<compile_context>
chip_gen: v7x
topology: tpu7x:2x2x1
jax: 0.10.0
libtpu: 0.0.40
codegen_flags: <defaults>
</compile_context>

<pallas_src>
import math
from functools import partial

import jax
import jax.numpy as jnp
from jax.experimental import pallas as pl
from jax.experimental.pallas import tpu as pltpu


def _round_up(x, m):
    return (x + m - 1) // m * m


# --------------------------------------------------------------------------
# Pallas kernels
# --------------------------------------------------------------------------
def _mm_bias_kernel(p_ref, w_ref, b_ref, o_ref, *, relu):
    # (TM, K) @ (K, C) on the MXU (bf16 inputs, f32 accumulate), + bias (+ReLU)
    acc = jnp.dot(p_ref[...], w_ref[...], preferred_element_type=jnp.float32)
    acc = acc + b_ref[...]
    if relu:
        acc = jnp.maximum(acc, 0.0)
    o_ref[...] = acc


def _mm_bias_res_kernel(p_ref, w_ref, b_ref, id_ref, o_ref):
    # fused residual epilogue: relu(P @ W + bias + identity)
    acc = jnp.dot(p_ref[...], w_ref[...], preferred_element_type=jnp.float32)
    o_ref[...] = jnp.maximum(acc + b_ref[...] + id_ref[...], 0.0)


def matmul_bias_act(patches, w, bias, relu, identity=None):
    """y[m,c] = act(sum_k patches[m,k]*w[k,c] + bias[c] (+ identity[m,c]))."""
    M, K = patches.shape
    C = w.shape[1]
    TM = 256 if M >= 256 else _round_up(M, 8)
    Mp = _round_up(M, TM)
    if Mp != M:
        patches = jnp.pad(patches, ((0, Mp - M), (0, 0)))
        if identity is not None:
            identity = jnp.pad(identity, ((0, Mp - M), (0, 0)))
    grid = (Mp // TM,)
    bias2 = bias.reshape(1, C)

    common_in_specs = [
        pl.BlockSpec((TM, K), lambda i: (i, 0)),
        pl.BlockSpec((K, C), lambda i: (0, 0)),
        pl.BlockSpec((1, C), lambda i: (0, 0)),
    ]
    cparams = pltpu.CompilerParams(dimension_semantics=("parallel",))

    if identity is None:
        out = pl.pallas_call(
            partial(_mm_bias_kernel, relu=relu),
            out_shape=jax.ShapeDtypeStruct((Mp, C), jnp.float32),
            grid=grid,
            in_specs=common_in_specs,
            out_specs=pl.BlockSpec((TM, C), lambda i: (i, 0)),
            compiler_params=cparams,
        )(patches, w, bias2)
    else:
        out = pl.pallas_call(
            _mm_bias_res_kernel,
            out_shape=jax.ShapeDtypeStruct((Mp, C), jnp.float32),
            grid=grid,
            in_specs=common_in_specs
            + [pl.BlockSpec((TM, C), lambda i: (i, 0))],
            out_specs=pl.BlockSpec((TM, C), lambda i: (i, 0)),
            compiler_params=cparams,
        )(patches, w, bias2, identity)

    return out[:M] if Mp != M else out


def _sum_relu_kernel(*refs):
    o_ref = refs[-1]
    acc = refs[0][...]
    for r in refs[1:-1]:
        acc = acc + r[...]
    o_ref[...] = jnp.maximum(acc, 0.0)


def sum_relu(xs):
    """relu(sum of same-shape NHWC tensors), lane-dense & tiled."""
    shape = xs[0].shape
    T = 1
    for d in shape:
        T *= int(d)
    R = pl.cdiv(T, 128)
    TR = min(512, _round_up(R, 8))
    Rp = _round_up(R, TR)
    Tp = Rp * 128

    slabs = []
    for x in xs:
        xf = x.astype(jnp.float32).reshape(-1)
        if Tp != T:
            xf = jnp.pad(xf, (0, Tp - T))
        slabs.append(xf.reshape(Rp, 128))

    n = len(slabs)
    out = pl.pallas_call(
        _sum_relu_kernel,
        out_shape=jax.ShapeDtypeStruct((Rp, 128), jnp.float32),
        grid=(Rp // TR,),
        in_specs=[pl.BlockSpec((TR, 128), lambda i: (i, 0)) for _ in range(n)],
        out_specs=pl.BlockSpec((TR, 128), lambda i: (i, 0)),
        compiler_params=pltpu.CompilerParams(
            dimension_semantics=("parallel",)),
    )(*slabs)
    return out.reshape(-1)[:T].reshape(shape)


# --------------------------------------------------------------------------
# Conv (im2col glue, bf16) + fused Pallas matmul
# --------------------------------------------------------------------------
def _im2col(x, k, stride, padding):
    N, H, W, C = x.shape
    if padding:
        x = jnp.pad(x, ((0, 0), (padding, padding), (padding, padding), (0, 0)))
    Hp, Wp = x.shape[1], x.shape[2]
    Ho = (Hp - k) // stride + 1
    Wo = (Wp - k) // stride + 1
    cols = []
    for di in range(k):
        for dj in range(k):
            cols.append(x[:, di:di + stride * Ho:stride,
                          dj:dj + stride * Wo:stride, :])
    patches = jnp.concatenate(cols, axis=-1)          # (N, Ho, Wo, k*k*C)
    return patches.reshape(N * Ho * Wo, k * k * C), (N, Ho, Wo)


def conv_bn_act(x, p, stride, padding, relu, identity=None):
    k = p['k']
    xb = x.astype(jnp.bfloat16)
    if k == 1 and stride == 1 and padding == 0:
        N, H, W, C = x.shape
        patches = xb.reshape(N * H * W, C)
        N_out, Ho, Wo = N, H, W
    else:
        patches, (N_out, Ho, Wo) = _im2col(xb, k, stride, padding)
    cout = p['w'].shape[1]
    id_flat = None
    if identity is not None:
        id_flat = identity.astype(jnp.float32).reshape(-1, cout)
    y = matmul_bias_act(patches, p['w'], p['bias'], relu, id_flat)
    return y.reshape(N_out, Ho, Wo, cout)


# --------------------------------------------------------------------------
# Bilinear upsample, align_corners=False (static-index JAX glue)
# TODO(synk): factor is a Python constant, so this could be fused into the
# preceding 1x1 conv as two small static interpolation matmuls; kept as glue.
# --------------------------------------------------------------------------
def bilinear_upsample(x, factor):
    N, H, W, C = x.shape
    Ho, Wo = H * factor, W * factor

    def idx_w(out_size, in_size, scale):
        o = jnp.arange(out_size, dtype=jnp.float32)
        src = (o + 0.5) / scale - 0.5
        src = jnp.clip(src, 0.0, float(in_size - 1))
        i0 = jnp.floor(src).astype(jnp.int32)
        i1 = jnp.minimum(i0 + 1, in_size - 1)
        w1 = src - i0.astype(jnp.float32)
        return i0, i1, 1.0 - w1, w1

    r0, r1, wr0, wr1 = idx_w(Ho, H, factor)
    c0, c1, wc0, wc1 = idx_w(Wo, W, factor)
    xr = (x[:, r0, :, :] * wr0[None, :, None, None]
          + x[:, r1, :, :] * wr1[None, :, None, None])
    return (xr[:, :, c0, :] * wc0[None, None, :, None]
            + xr[:, :, c1, :] * wc1[None, None, :, None])


# --------------------------------------------------------------------------
# Deterministic parameter construction (mirrors HRNet.__init__)
# --------------------------------------------------------------------------
class ParamGen:
    def __init__(self, seed=0):
        self.key = jax.random.PRNGKey(seed)

    def _next(self):
        self.key, k = jax.random.split(self.key)
        return k

    def conv_bn(self, cin, cout, k):
        w = jax.random.normal(self._next(), (k, k, cin, cout), jnp.float32)
        w = w * (0.1 / math.sqrt(k * k * cin))
        gamma = 1.0 + 0.1 * jax.random.normal(self._next(), (cout,), jnp.float32)
        beta = 0.1 * jax.random.normal(self._next(), (cout,), jnp.float32)
        mean = 0.1 * jax.random.normal(self._next(), (cout,), jnp.float32)
        var = 1.0 + 0.1 * jnp.abs(jax.random.normal(self._next(), (cout,), jnp.float32))
        scale = gamma / jnp.sqrt(var + 1e-5)
        bias = beta - mean * scale
        # Fold BN scale into the weights (eval-mode BN), keep weights in bf16
        # for the MXU; bias stays f32 for the epilogue.
        w_folded = (w.reshape(k * k * cin, cout) * scale[None, :]).astype(jnp.bfloat16)
        return {'w': w_folded, 'bias': bias.astype(jnp.float32), 'k': k}


def make_basic_block(pg, cin, planes, stride=1):
    blk = {'type': 'basic', 'stride': stride,
           'conv1': pg.conv_bn(cin, planes, 3),
           'conv2': pg.conv_bn(planes, planes, 3)}
    if stride != 1 or cin != planes:
        blk['ds'] = pg.conv_bn(cin, planes, 1)
    return blk


def make_bottleneck(pg, cin, planes, stride=1):
    blk = {'type': 'bottleneck', 'stride': stride,
           'conv1': pg.conv_bn(cin, planes, 1),
           'conv2': pg.conv_bn(planes, planes, 3),
           'conv3': pg.conv_bn(planes, planes * 4, 1)}
    if stride != 1 or cin != planes * 4:
        blk['ds'] = pg.conv_bn(cin, planes * 4, 1)
    return blk


def run_block(x, blk):
    if 'ds' in blk:
        identity = conv_bn_act(x, blk['ds'], blk['stride'], 0, False)
    else:
        identity = x
    if blk['type'] == 'basic':
        out = conv_bn_act(x, blk['conv1'], blk['stride'], 1, True)
        # residual add + ReLU fused into conv2's matmul epilogue
        out = conv_bn_act(out, blk['conv2'], 1, 1, False, identity=identity)
    else:
        out = conv_bn_act(x, blk['conv1'], 1, 0, True)
        out = conv_bn_act(out, blk['conv2'], blk['stride'], 1, True)
        out = conv_bn_act(out, blk['conv3'], 1, 0, False, identity=identity)
    return out


def make_hr_module(pg, num_branches, block_type, num_blocks,
                   in_channels, num_channels, multiscale_output):
    exp = 4 if block_type == 'BOTTLENECK' else 1
    maker = make_bottleneck if block_type == 'BOTTLENECK' else make_basic_block
    in_ch = list(in_channels)
    branches = []
    for i in range(num_branches):
        layers = [maker(pg, in_ch[i], num_channels[i], 1)]
        in_ch[i] = num_channels[i] * exp
        for _ in range(1, num_blocks[i]):
            layers.append(maker(pg, in_ch[i], num_channels[i], 1))
        branches.append(layers)

    num_out = num_branches if multiscale_output else 1
    fuse_up = {}     # per source branch j: one batched 1x1 conv for all i<j
    fuse_down = {}   # per (target i, source j<i): chain of stride-2 convs
    if num_branches > 1:
        for j in range(1, num_branches):
            targets = [i for i in range(num_out) if i < j]
            if targets:
                couts = [in_ch[i] for i in targets]
                fuse_up[j] = {
                    'conv': pg.conv_bn(in_ch[j], sum(couts), 1),
                    'targets': [(i, in_ch[i], 2 ** (j - i)) for i in targets],
                }
        for i in range(num_out):
            for j in range(i):
                downs = []
                for k in range(i - j):
                    if k == i - j - 1:
                        downs.append({'conv': pg.conv_bn(in_ch[j], in_ch[i], 3),
                                      'relu': False})
                    else:
                        downs.append({'conv': pg.conv_bn(in_ch[j], in_ch[j], 3),
                                      'relu': True})
                fuse_down[(i, j)] = downs

    mod = {'num_branches': num_branches, 'num_out': num_out,
           'branches': branches, 'fuse_up': fuse_up, 'fuse_down': fuse_down}
    return mod, in_ch


def run_hr_module(xs, mod):
    nb = mod['num_branches']
    outs = []
    for i in range(nb):
        x = xs[i]
        for blk in mod['branches'][i]:
            x = run_block(x, blk)
        outs.append(x)
    if nb == 1:
        return [outs[0]]

    num_out = mod['num_out']
    # Batched 1x1 fuse convs: one wide matmul per source branch, then split
    # per target and upsample each chunk.
    up_contrib = {}
    for j, spec in mod['fuse_up'].items():
        y = conv_bn_act(outs[j], spec['conv'], 1, 0, False)
        off = 0
        for (i, ci, factor) in spec['targets']:
            yi = y[..., off:off + ci]
            off += ci
            up_contrib[(i, j)] = bilinear_upsample(yi, factor)

    fused = []
    for i in range(num_out):
        contribs = []
        for j in range(nb):
            if j == i:
                contribs.append(outs[j])
            elif j > i:
                contribs.append(up_contrib[(i, j)])
            else:
                y = outs[j]
                for layer in mod['fuse_down'][(i, j)]:
                    y = conv_bn_act(y, layer['conv'], 2, 1, layer['relu'])
                contribs.append(y)
        fused.append(sum_relu(contribs))
    return fused


def make_transition(pg, pre, cur):
    trans = []
    nb_pre = len(pre)
    for i, c in enumerate(cur):
        if i < nb_pre:
            if c != pre[i]:
                trans.append({'kind': 'conv', 'conv': pg.conv_bn(pre[i], c, 3)})
            else:
                trans.append(None)
        else:
            downs = []
            for j in range(i + 1 - nb_pre):
                cin = pre[-1]
                cout = c if j == i - nb_pre else cin
                downs.append(pg.conv_bn(cin, cout, 3))
            trans.append({'kind': 'down', 'layers': downs})
    return trans


def run_transition(t, x):
    if t['kind'] == 'conv':
        return conv_bn_act(x, t['conv'], 1, 1, True)
    y = x
    for conv in t['layers']:
        y = conv_bn_act(y, conv, 2, 1, True)
    return y


def make_hrnet(pg, extra, in_channels=3):
    net = {'extra': extra,
           'conv1': pg.conv_bn(in_channels, 64, 3),
           'conv2': pg.conv_bn(64, 64, 3)}
    s1 = extra['stage1']
    exp = 4 if s1['block'] == 'BOTTLENECK' else 1
    maker = make_bottleneck if s1['block'] == 'BOTTLENECK' else make_basic_block
    nch, nblk = s1['num_channels'][0], s1['num_blocks'][0]
    layer1 = [maker(pg, 64, nch, 1)]
    for _ in range(1, nblk):
        layer1.append(maker(pg, nch * exp, nch, 1))
    net['layer1'] = layer1
    pre = [nch * exp]
    for sname in ('stage2', 'stage3', 'stage4'):
        cfg = extra[sname]
        exp = 4 if cfg['block'] == 'BOTTLENECK' else 1
        cur = [c * exp for c in cfg['num_channels']]
        net['trans_' + sname] = make_transition(pg, pre, cur)
        modules = []
        in_ch = list(cur)
        for _ in range(cfg['num_modules']):
            mod, in_ch = make_hr_module(pg, cfg['num_branches'], cfg['block'],
                                        cfg['num_blocks'], in_ch,
                                        cfg['num_channels'], True)
            modules.append(mod)
        net['mods_' + sname] = modules
        pre = in_ch
    return net


def hrnet_forward(net, x):
    x = conv_bn_act(x, net['conv1'], 2, 1, True)
    x = conv_bn_act(x, net['conv2'], 2, 1, True)
    for blk in net['layer1']:
        x = run_block(x, blk)
    y_list = [x]
    for sname in ('stage2', 'stage3', 'stage4'):
        cfg = net['extra'][sname]
        trans = net['trans_' + sname]
        x_list = []
        for i in range(cfg['num_branches']):
            if trans[i] is not None:
                x_list.append(run_transition(trans[i], y_list[-1]))
            else:
                x_list.append(y_list[i])
        for mod in net['mods_' + sname]:
            x_list = run_hr_module(x_list, mod)
        y_list = x_list
    return y_list


# --------------------------------------------------------------------------
if __name__ == "__main__":
    extra = dict(
        stage1=dict(num_modules=1, num_branches=1, block='BOTTLENECK',
                    num_blocks=(1,), num_channels=(8,)),
        stage2=dict(num_modules=1, num_branches=2, block='BASIC',
                    num_blocks=(1, 1), num_channels=(8, 16)),
        stage3=dict(num_modules=1, num_branches=3, block='BASIC',
                    num_blocks=(1, 1, 1), num_channels=(8, 16, 32)),
        stage4=dict(num_modules=1, num_branches=4, block='BASIC',
                    num_blocks=(1, 1, 1, 1), num_channels=(8, 16, 32, 64)),
    )

    key = jax.random.PRNGKey(0)
    # layout: NHWC input (equivalent to NCHW (2, 3, 32, 32) in the PyTorch model)
    x = jax.random.normal(key, (2, 32, 32, 3), jnp.float32)

    pg = ParamGen(seed=0)
    net = make_hrnet(pg, extra, in_channels=3)

    fwd = jax.jit(lambda inp: hrnet_forward(net, inp))
    outs = fwd(x)
    for o in outs:
        jax.block_until_ready(o)
    print("KERNEL_OK")
</pallas_src>

<mosaic_0001>
module attributes {stable_mosaic.version = 11 : i64} {
  func.func @_mm_bias_kernel(%arg0: i32, %arg1: memref<256x27xbf16, #tpu.memory_space<vmem>>, %arg2: memref<27x64xbf16, #tpu.memory_space<vmem>>, %arg3: memref<1x64xf32, #tpu.memory_space<vmem>>, %arg4: memref<256x64xf32, #tpu.memory_space<vmem>>) attributes {dimension_semantics = [#tpu.dimension_semantics<parallel>], iteration_bounds = array<i64: 2>, scalar_prefetch = 0 : i64, scratch_operands = 0 : i64, tpu.core_type = #tpu.core_type<tc>, window_params = [{transform_indices = @transform_0, window_bounds = array<i64: 256, 27>}, {pipeline_mode = #tpu.pipeline_mode<synchronous>, transform_indices = @transform_1, window_bounds = array<i64: 27, 64>}, {pipeline_mode = #tpu.pipeline_mode<synchronous>, transform_indices = @transform_2, window_bounds = array<i64: 1, 64>}, {transform_indices = @transform_3, window_bounds = array<i64: 256, 64>}]} {
    %c0 = arith.constant 0 : index
    %c0_0 = arith.constant 0 : index
    %0 = vector.load %arg1[%c0, %c0_0] : memref<256x27xbf16, #tpu.memory_space<vmem>>, vector<256x27xbf16>
    %c0_1 = arith.constant 0 : index
    %c0_2 = arith.constant 0 : index
    %1 = vector.load %arg2[%c0_1, %c0_2] : memref<27x64xbf16, #tpu.memory_space<vmem>>, vector<27x64xbf16>
    %cst = arith.constant dense<0.000000e+00> : vector<256x64xf32>
    %2 = tpu.matmul %0, %1, %cst {dimension_numbers = #tpu.dot_dimension_numbers<[1], [0], [0], [1], [0, 0, 1, 1], [], []>} : vector<256x27xbf16>, vector<27x64xbf16>, vector<256x64xf32> -> vector<256x64xf32>
    %c0_3 = arith.constant 0 : index
    %c0_4 = arith.constant 0 : index
    %3 = vector.load %arg3[%c0_3, %c0_4] : memref<1x64xf32, #tpu.memory_space<vmem>>, vector<1x64xf32>
    %4 = vector.broadcast %3 : vector<1x64xf32> to vector<256x64xf32>
    %5 = arith.addf %2, %4 : vector<256x64xf32>
    %cst_5 = arith.constant 0.000000e+00 : f32
    %6 = vector.broadcast %cst_5 : f32 to vector<256x64xf32>
    %7 = arith.maximumf %5, %6 : vector<256x64xf32>
    %c0_6 = arith.constant 0 : index
    %c0_7 = arith.constant 0 : index
    %8 = vector.load %arg4[%c0_6, %c0_7] : memref<256x64xf32, #tpu.memory_space<vmem>>, vector<256x64xf32>
    tpu.vector_store %arg4[%c0_6, %c0_7], %7 {strides = array<i32>} : memref<256x64xf32, #tpu.memory_space<vmem>>, vector<256x64xf32>,
    return
  }
  func.func @transform_0(%arg0: i32) -> (i32, i32) {
    %c0_i32 = arith.constant 0 : i32
    %c0_i32_0 = arith.constant 0 : i32
    return %arg0, %c0_i32 : i32, i32
  }
  func.func @transform_1(%arg0: i32) -> (i32, i32) {
    %c0_i32 = arith.constant 0 : i32
    %c0_i32_0 = arith.constant 0 : i32
    %c0_i32_1 = arith.constant 0 : i32
    return %c0_i32, %c0_i32_0 : i32, i32
  }
  func.func @transform_2(%arg0: i32) -> (i32, i32) {
    %c0_i32 = arith.constant 0 : i32
    %c0_i32_0 = arith.constant 0 : i32
    %c0_i32_1 = arith.constant 0 : i32
    return %c0_i32, %c0_i32_0 : i32, i32
  }
  func.func @transform_3(%arg0: i32) -> (i32, i32) {
    %c0_i32 = arith.constant 0 : i32
    %c0_i32_0 = arith.constant 0 : i32
    return %arg0, %c0_i32 : i32, i32
  }
}

module attributes {stable_mosaic.version = 11 : i64} {
  func.func @_mm_bias_kernel(%arg0: i32, %arg1: memref<128x576xbf16, #tpu.memory_space<vmem>>, %arg2: memref<576x64xbf16, #tpu.memory_space<vmem>>, %arg3: memref<1x64xf32, #tpu.memory_space<vmem>>, %arg4: memref<128x64xf32, #tpu.memory_space<vmem>>) attributes {dimension_semantics = [#tpu.dimension_semantics<parallel>], iteration_bounds = array<i64: 1>, scalar_prefetch = 0 : i64, scratch_operands = 0 : i64, tpu.core_type = #tpu.core_type<tc>, window_params = [{transform_indices = @transform_0, window_bounds = array<i64: 128, 576>}, {pipeline_mode = #tpu.pipeline_mode<synchronous>, transform_indices = @transform_1, window_bounds = array<i64: 576, 64>}, {pipeline_mode = #tpu.pipeline_mode<synchronous>, transform_indices = @transform_2, window_bounds = array<i64: 1, 64>}, {transform_indices = @transform_3, window_bounds = array<i64: 128, 64>}]} {
    %c0 = arith.constant 0 : index
    %c0_0 = arith.constant 0 : index
    %0 = vector.load %arg1[%c0, %c0_0] : memref<128x576xbf16, #tpu.memory_space<vmem>>, vector<128x576xbf16>
    %c0_1 = arith.constant 0 : index
    %c0_2 = arith.constant 0 : index
    %1 = vector.load %arg2[%c0_1, %c0_2] : memref<576x64xbf16, #tpu.memory_space<vmem>>, vector<576x64xbf16>
    %cst = arith.constant dense<0.000000e+00> : vector<128x64xf32>
    %2 = tpu.matmul %0, %1, %cst {dimension_numbers = #tpu.dot_dimension_numbers<[1], [0], [0], [1], [0, 0, 1, 1], [], []>} : vector<128x576xbf16>, vector<576x64xbf16>, vector<128x64xf32> -> vector<128x64xf32>
    %c0_3 = arith.constant 0 : index
    %c0_4 = arith.constant 0 : index
    %3 = vector.load %arg3[%c0_3, %c0_4] : memref<1x64xf32, #tpu.memory_space<vmem>>, vector<1x64xf32>
    %4 = vector.broadcast %3 : vector<1x64xf32> to vector<128x64xf32>
    %5 = arith.addf %2, %4 : vector<128x64xf32>
    %cst_5 = arith.constant 0.000000e+00 : f32
    %6 = vector.broadcast %cst_5 : f32 to vector<128x64xf32>
    %7 = arith.maximumf %5, %6 : vector<128x64xf32>
    %c0_6 = arith.constant 0 : index
    %c0_7 = arith.constant 0 : index
    %8 = vector.load %arg4[%c0_6, %c0_7] : memref<128x64xf32, #tpu.memory_space<vmem>>, vector<128x64xf32>
    tpu.vector_store %arg4[%c0_6, %c0_7], %7 {strides = array<i32>} : memref<128x64xf32, #tpu.memory_space<vmem>>, vector<128x64xf32>,
    return
  }
  func.func @transform_0(%arg0: i32) -> (i32, i32) {
    %c0_i32 = arith.constant 0 : i32
    %c0_i32_0 = arith.constant 0 : i32
    return %arg0, %c0_i32 : i32, i32
  }
  func.func @transform_1(%arg0: i32) -> (i32, i32) {
    %c0_i32 = arith.constant 0 : i32
    %c0_i32_0 = arith.constant 0 : i32
    %c0_i32_1 = arith.constant 0 : i32
    return %c0_i32, %c0_i32_0 : i32, i32
  }
  func.func @transform_2(%arg0: i32) -> (i32, i32) {
    %c0_i32 = arith.constant 0 : i32
    %c0_i32_0 = arith.constant 0 : i32
    %c0_i32_1 = arith.constant 0 : i32
    return %c0_i32, %c0_i32_0 : i32, i32
  }
  func.func @transform_3(%arg0: i32) -> (i32, i32) {
    %c0_i32 = arith.constant 0 : i32
    %c0_i32_0 = arith.constant 0 : i32
    return %arg0, %c0_i32 : i32, i32
  }
}

module attributes {stable_mosaic.version = 11 : i64} {
  func.func @_mm_bias_kernel(%arg0: i32, %arg1: memref<128x64xbf16, #tpu.memory_space<vmem>>, %arg2: memref<64x8xbf16, #tpu.memory_space<vmem>>, %arg3: memref<1x8xf32, #tpu.memory_space<vmem>>, %arg4: memref<128x8xf32, #tpu.memory_space<vmem>>) attributes {dimension_semantics = [#tpu.dimension_semantics<parallel>], iteration_bounds = array<i64: 1>, scalar_prefetch = 0 : i64, scratch_operands = 0 : i64, tpu.core_type = #tpu.core_type<tc>, window_params = [{transform_indices = @transform_0, window_bounds = array<i64: 128, 64>}, {pipeline_mode = #tpu.pipeline_mode<synchronous>, transform_indices = @transform_1, window_bounds = array<i64: 64, 8>}, {pipeline_mode = #tpu.pipeline_mode<synchronous>, transform_indices = @transform_2, window_bounds = array<i64: 1, 8>}, {transform_indices = @transform_3, window_bounds = array<i64: 128, 8>}]} {
    %c0 = arith.constant 0 : index
    %c0_0 = arith.constant 0 : index
    %0 = vector.load %arg1[%c0, %c0_0] : memref<128x64xbf16, #tpu.memory_space<vmem>>, vector<128x64xbf16>
    %c0_1 = arith.constant 0 : index
    %c0_2 = arith.constant 0 : index
    %1 = vector.load %arg2[%c0_1, %c0_2] : memref<64x8xbf16, #tpu.memory_space<vmem>>, vector<64x8xbf16>
    %cst = arith.constant dense<0.000000e+00> : vector<128x8xf32>
    %2 = tpu.matmul %0, %1, %cst {dimension_numbers = #tpu.dot_dimension_numbers<[1], [0], [0], [1], [0, 0, 1, 1], [], []>} : vector<128x64xbf16>, vector<64x8xbf16>, vector<128x8xf32> -> vector<128x8xf32>
    %c0_3 = arith.constant 0 : index
    %c0_4 = arith.constant 0 : index
    %3 = vector.load %arg3[%c0_3, %c0_4] : memref<1x8xf32, #tpu.memory_space<vmem>>, vector<1x8xf32>
    %4 = vector.broadcast %3 : vector<1x8xf32> to vector<128x8xf32>
    %5 = arith.addf %2, %4 : vector<128x8xf32>
    %cst_5 = arith.constant 0.000000e+00 : f32
    %6 = vector.broadcast %cst_5 : f32 to vector<128x8xf32>
    %7 = arith.maximumf %5, %6 : vector<128x8xf32>
    %c0_6 = arith.constant 0 : index
    %c0_7 = arith.constant 0 : index
    %8 = vector.load %arg4[%c0_6, %c0_7] : memref<128x8xf32, #tpu.memory_space<vmem>>, vector<128x8xf32>
    tpu.vector_store %arg4[%c0_6, %c0_7], %7 {strides = array<i32>} : memref<128x8xf32, #tpu.memory_space<vmem>>, vector<128x8xf32>,
    return
  }
  func.func @transform_0(%arg0: i32) -> (i32, i32) {
    %c0_i32 = arith.constant 0 : i32
    %c0_i32_0 = arith.constant 0 : i32
    return %arg0, %c0_i32 : i32, i32
  }
  func.func @transform_1(%arg0: i32) -> (i32, i32) {
    %c0_i32 = arith.constant 0 : i32
    %c0_i32_0 = arith.constant 0 : i32
    %c0_i32_1 = arith.constant 0 : i32
    return %c0_i32, %c0_i32_0 : i32, i32
  }
  func.func @transform_2(%arg0: i32) -> (i32, i32) {
    %c0_i32 = arith.constant 0 : i32
    %c0_i32_0 = arith.constant 0 : i32
    %c0_i32_1 = arith.constant 0 : i32
    return %c0_i32, %c0_i32_0 : i32, i32
  }
  func.func @transform_3(%arg0: i32) -> (i32, i32) {
    %c0_i32 = arith.constant 0 : i32
    %c0_i32_0 = arith.constant 0 : i32
    return %arg0, %c0_i32 : i32, i32
  }
}

module attributes {stable_mosaic.version = 11 : i64} {
  func.func @_mm_bias_kernel(%arg0: i32, %arg1: memref<128x64xbf16, #tpu.memory_space<vmem>>, %arg2: memref<64x32xbf16, #tpu.memory_space<vmem>>, %arg3: memref<1x32xf32, #tpu.memory_space<vmem>>, %arg4: memref<128x32xf32, #tpu.memory_space<vmem>>) attributes {dimension_semantics = [#tpu.dimension_semantics<parallel>], iteration_bounds = array<i64: 1>, scalar_prefetch = 0 : i64, scratch_operands = 0 : i64, tpu.core_type = #tpu.core_type<tc>, window_params = [{transform_indices = @transform_0, window_bounds = array<i64: 128, 64>}, {pipeline_mode = #tpu.pipeline_mode<synchronous>, transform_indices = @transform_1, window_bounds = array<i64: 64, 32>}, {pipeline_mode = #tpu.pipeline_mode<synchronous>, transform_indices = @transform_2, window_bounds = array<i64: 1, 32>}, {transform_indices = @transform_3, window_bounds = array<i64: 128, 32>}]} {
    %c0 = arith.constant 0 : index
    %c0_0 = arith.constant 0 : index
    %0 = vector.load %arg1[%c0, %c0_0] : memref<128x64xbf16, #tpu.memory_space<vmem>>, vector<128x64xbf16>
    %c0_1 = arith.constant 0 : index
    %c0_2 = arith.constant 0 : index
    %1 = vector.load %arg2[%c0_1, %c0_2] : memref<64x32xbf16, #tpu.memory_space<vmem>>, vector<64x32xbf16>
    %cst = arith.constant dense<0.000000e+00> : vector<128x32xf32>
    %2 = tpu.matmul %0, %1, %cst {dimension_numbers = #tpu.dot_dimension_numbers<[1], [0], [0], [1], [0, 0, 1, 1], [], []>} : vector<128x64xbf16>, vector<64x32xbf16>, vector<128x32xf32> -> vector<128x32xf32>
    %c0_3 = arith.constant 0 : index
    %c0_4 = arith.constant 0 : index
    %3 = vector.load %arg3[%c0_3, %c0_4] : memref<1x32xf32, #tpu.memory_space<vmem>>, vector<1x32xf32>
    %4 = vector.broadcast %3 : vector<1x32xf32> to vector<128x32xf32>
    %5 = arith.addf %2, %4 : vector<128x32xf32>
    %c0_5 = arith.constant 0 : index
    %c0_6 = arith.constant 0 : index
    %6 = vector.load %arg4[%c0_5, %c0_6] : memref<128x32xf32, #tpu.memory_space<vmem>>, vector<128x32xf32>
    tpu.vector_store %arg4[%c0_5, %c0_6], %5 {strides = array<i32>} : memref<128x32xf32, #tpu.memory_space<vmem>>, vector<128x32xf32>,
    return
  }
  func.func @transform_0(%arg0: i32) -> (i32, i32) {
    %c0_i32 = arith.constant 0 : i32
    %c0_i32_0 = arith.constant 0 : i32
    return %arg0, %c0_i32 : i32, i32
  }
  func.func @transform_1(%arg0: i32) -> (i32, i32) {
    %c0_i32 = arith.constant 0 : i32
    %c0_i32_0 = arith.constant 0 : i32
    %c0_i32_1 = arith.constant 0 : i32
    return %c0_i32, %c0_i32_0 : i32, i32
  }
  func.func @transform_2(%arg0: i32) -> (i32, i32) {
    %c0_i32 = arith.constant 0 : i32
    %c0_i32_0 = arith.constant 0 : i32
    %c0_i32_1 = arith.constant 0 : i32
    return %c0_i32, %c0_i32_0 : i32, i32
  }
  func.func @transform_3(%arg0: i32) -> (i32, i32) {
    %c0_i32 = arith.constant 0 : i32
    %c0_i32_0 = arith.constant 0 : i32
    return %arg0, %c0_i32 : i32, i32
  }
}

module attributes {stable_mosaic.version = 11 : i64} {
  func.func @_mm_bias_kernel(%arg0: i32, %arg1: memref<128x72xbf16, #tpu.memory_space<vmem>>, %arg2: memref<72x8xbf16, #tpu.memory_space<vmem>>, %arg3: memref<1x8xf32, #tpu.memory_space<vmem>>, %arg4: memref<128x8xf32, #tpu.memory_space<vmem>>) attributes {dimension_semantics = [#tpu.dimension_semantics<parallel>], iteration_bounds = array<i64: 1>, scalar_prefetch = 0 : i64, scratch_operands = 0 : i64, tpu.core_type = #tpu.core_type<tc>, window_params = [{transform_indices = @transform_0, window_bounds = array<i64: 128, 72>}, {pipeline_mode = #tpu.pipeline_mode<synchronous>, transform_indices = @transform_1, window_bounds = array<i64: 72, 8>}, {pipeline_mode = #tpu.pipeline_mode<synchronous>, transform_indices = @transform_2, window_bounds = array<i64: 1, 8>}, {transform_indices = @transform_3, window_bounds = array<i64: 128, 8>}]} {
    %c0 = arith.constant 0 : index
    %c0_0 = arith.constant 0 : index
    %0 = vector.load %arg1[%c0, %c0_0] : memref<128x72xbf16, #tpu.memory_space<vmem>>, vector<128x72xbf16>
    %c0_1 = arith.constant 0 : index
    %c0_2 = arith.constant 0 : index
    %1 = vector.load %arg2[%c0_1, %c0_2] : memref<72x8xbf16, #tpu.memory_space<vmem>>, vector<72x8xbf16>
    %cst = arith.constant dense<0.000000e+00> : vector<128x8xf32>
    %2 = tpu.matmul %0, %1, %cst {dimension_numbers = #tpu.dot_dimension_numbers<[1], [0], [0], [1], [0, 0, 1, 1], [], []>} : vector<128x72xbf16>, vector<72x8xbf16>, vector<128x8xf32> -> vector<128x8xf32>
    %c0_3 = arith.constant 0 : index
    %c0_4 = arith.constant 0 : index
    %3 = vector.load %arg3[%c0_3, %c0_4] : memref<1x8xf32, #tpu.memory_space<vmem>>, vector<1x8xf32>
    %4 = vector.broadcast %3 : vector<1x8xf32> to vector<128x8xf32>
    %5 = arith.addf %2, %4 : vector<128x8xf32>
    %cst_5 = arith.constant 0.000000e+00 : f32
    %6 = vector.broadcast %cst_5 : f32 to vector<128x8xf32>
    %7 = arith.maximumf %5, %6 : vector<128x8xf32>
    %c0_6 = arith.constant 0 : index
    %c0_7 = arith.constant 0 : index
    %8 = vector.load %arg4[%c0_6, %c0_7] : memref<128x8xf32, #tpu.memory_space<vmem>>, vector<128x8xf32>
    tpu.vector_store %arg4[%c0_6, %c0_7], %7 {strides = array<i32>} : memref<128x8xf32, #tpu.memory_space<vmem>>, vector<128x8xf32>,
    return
  }
  func.func @transform_0(%arg0: i32) -> (i32, i32) {
    %c0_i32 = arith.constant 0 : i32
    %c0_i32_0 = arith.constant 0 : i32
    return %arg0, %c0_i32 : i32, i32
  }
  func.func @transform_1(%arg0: i32) -> (i32, i32) {
    %c0_i32 = arith.constant 0 : i32
    %c0_i32_0 = arith.constant 0 : i32
    %c0_i32_1 = arith.constant 0 : i32
    return %c0_i32, %c0_i32_0 : i32, i32
  }
  func.func @transform_2(%arg0: i32) -> (i32, i32) {
    %c0_i32 = arith.constant 0 : i32
    %c0_i32_0 = arith.constant 0 : i32
    %c0_i32_1 = arith.constant 0 : i32
    return %c0_i32, %c0_i32_0 : i32, i32
  }
  func.func @transform_3(%arg0: i32) -> (i32, i32) {
    %c0_i32 = arith.constant 0 : i32
    %c0_i32_0 = arith.constant 0 : i32
    return %arg0, %c0_i32 : i32, i32
  }
}

module attributes {stable_mosaic.version = 11 : i64} {
  func.func @_mm_bias_res_kernel(%arg0: i32, %arg1: memref<128x8xbf16, #tpu.memory_space<vmem>>, %arg2: memref<8x32xbf16, #tpu.memory_space<vmem>>, %arg3: memref<1x32xf32, #tpu.memory_space<vmem>>, %arg4: memref<128x32xf32, #tpu.memory_space<vmem>>, %arg5: memref<128x32xf32, #tpu.memory_space<vmem>>) attributes {dimension_semantics = [#tpu.dimension_semantics<parallel>], iteration_bounds = array<i64: 1>, scalar_prefetch = 0 : i64, scratch_operands = 0 : i64, tpu.core_type = #tpu.core_type<tc>, window_params = [{transform_indices = @transform_0, window_bounds = array<i64: 128, 8>}, {pipeline_mode = #tpu.pipeline_mode<synchronous>, transform_indices = @transform_1, window_bounds = array<i64: 8, 32>}, {pipeline_mode = #tpu.pipeline_mode<synchronous>, transform_indices = @transform_2, window_bounds = array<i64: 1, 32>}, {transform_indices = @transform_3, window_bounds = array<i64: 128, 32>}, {transform_indices = @transform_4, window_bounds = array<i64: 128, 32>}]} {
    %c0 = arith.constant 0 : index
    %c0_0 = arith.constant 0 : index
    %0 = vector.load %arg1[%c0, %c0_0] : memref<128x8xbf16, #tpu.memory_space<vmem>>, vector<128x8xbf16>
    %c0_1 = arith.constant 0 : index
    %c0_2 = arith.constant 0 : index
    %1 = vector.load %arg2[%c0_1, %c0_2] : memref<8x32xbf16, #tpu.memory_space<vmem>>, vector<8x32xbf16>
    %cst = arith.constant dense<0.000000e+00> : vector<128x32xf32>
    %2 = tpu.matmul %0, %1, %cst {dimension_numbers = #tpu.dot_dimension_numbers<[1], [0], [0], [1], [0, 0, 1, 1], [], []>} : vector<128x8xbf16>, vector<8x32xbf16>, vector<128x32xf32> -> vector<128x32xf32>
    %c0_3 = arith.constant 0 : index
    %c0_4 = arith.constant 0 : index
    %3 = vector.load %arg3[%c0_3, %c0_4] : memref<1x32xf32, #tpu.memory_space<vmem>>, vector<1x32xf32>
    %4 = vector.broadcast %3 : vector<1x32xf32> to vector<128x32xf32>
    %5 = arith.addf %2, %4 : vector<128x32xf32>
    %c0_5 = arith.constant 0 : index
    %c0_6 = arith.constant 0 : index
    %6 = vector.load %arg4[%c0_5, %c0_6] : memref<128x32xf32, #tpu.memory_space<vmem>>, vector<128x32xf32>
    %7 = arith.addf %5, %6 : vector<128x32xf32>
    %cst_7 = arith.constant 0.000000e+00 : f32
    %8 = vector.broadcast %cst_7 : f32 to vector<128x32xf32>
    %9 = arith.maximumf %7, %8 : vector<128x32xf32>
    %c0_8 = arith.constant 0 : index
    %c0_9 = arith.constant 0 : index
    %10 = vector.load %arg5[%c0_8, %c0_9] : memref<128x32xf32, #tpu.memory_space<vmem>>, vector<128x32xf32>
    tpu.vector_store %arg5[%c0_8, %c0_9], %9 {strides = array<i32>} : memref<128x32xf32, #tpu.memory_space<vmem>>, vector<128x32xf32>,
    return
  }
  func.func @transform_0(%arg0: i32) -> (i32, i32) {
    %c0_i32 = arith.constant 0 : i32
    %c0_i32_0 = arith.constant 0 : i32
    return %arg0, %c0_i32 : i32, i32
  }
  func.func @transform_1(%arg0: i32) -> (i32, i32) {
    %c0_i32 = arith.constant 0 : i32
    %c0_i32_0 = arith.constant 0 : i32
    %c0_i32_1 = arith.constant 0 : i32
    return %c0_i32, %c0_i32_0 : i32, i32
  }
  func.func @transform_2(%arg0: i32) -> (i32, i32) {
    %c0_i32 = arith.constant 0 : i32
    %c0_i32_0 = arith.constant 0 : i32
    %c0_i32_1 = arith.constant 0 : i32
    return %c0_i32, %c0_i32_0 : i32, i32
  }
  func.func @transform_3(%arg0: i32) -> (i32, i32) {
    %c0_i32 = arith.constant 0 : i32
    %c0_i32_0 = arith.constant 0 : i32
    return %arg0, %c0_i32 : i32, i32
  }
  func.func @transform_4(%arg0: i32) -> (i32, i32) {
    %c0_i32 = arith.constant 0 : i32
    %c0_i32_0 = arith.constant 0 : i32
    return %arg0, %c0_i32 : i32, i32
  }
}

module attributes {stable_mosaic.version = 11 : i64} {
  func.func @_mm_bias_kernel(%arg0: i32, %arg1: memref<128x288xbf16, #tpu.memory_space<vmem>>, %arg2: memref<288x8xbf16, #tpu.memory_space<vmem>>, %arg3: memref<1x8xf32, #tpu.memory_space<vmem>>, %arg4: memref<128x8xf32, #tpu.memory_space<vmem>>) attributes {dimension_semantics = [#tpu.dimension_semantics<parallel>], iteration_bounds = array<i64: 1>, scalar_prefetch = 0 : i64, scratch_operands = 0 : i64, tpu.core_type = #tpu.core_type<tc>, window_params = [{transform_indices = @transform_0, window_bounds = array<i64: 128, 288>}, {pipeline_mode = #tpu.pipeline_mode<synchronous>, transform_indices = @transform_1, window_bounds = array<i64: 288, 8>}, {pipeline_mode = #tpu.pipeline_mode<synchronous>, transform_indices = @transform_2, window_bounds = array<i64: 1, 8>}, {transform_indices = @transform_3, window_bounds = array<i64: 128, 8>}]} {
    %c0 = arith.constant 0 : index
    %c0_0 = arith.constant 0 : index
    %0 = vector.load %arg1[%c0, %c0_0] : memref<128x288xbf16, #tpu.memory_space<vmem>>, vector<128x288xbf16>
    %c0_1 = arith.constant 0 : index
    %c0_2 = arith.constant 0 : index
    %1 = vector.load %arg2[%c0_1, %c0_2] : memref<288x8xbf16, #tpu.memory_space<vmem>>, vector<288x8xbf16>
    %cst = arith.constant dense<0.000000e+00> : vector<128x8xf32>
    %2 = tpu.matmul %0, %1, %cst {dimension_numbers = #tpu.dot_dimension_numbers<[1], [0], [0], [1], [0, 0, 1, 1], [], []>} : vector<128x288xbf16>, vector<288x8xbf16>, vector<128x8xf32> -> vector<128x8xf32>
    %c0_3 = arith.constant 0 : index
    %c0_4 = arith.constant 0 : index
    %3 = vector.load %arg3[%c0_3, %c0_4] : memref<1x8xf32, #tpu.memory_space<vmem>>, vector<1x8xf32>
    %4 = vector.broadcast %3 : vector<1x8xf32> to vector<128x8xf32>
    %5 = arith.addf %2, %4 : vector<128x8xf32>
    %cst_5 = arith.constant 0.000000e+00 : f32
    %6 = vector.broadcast %cst_5 : f32 to vector<128x8xf32>
    %7 = arith.maximumf %5, %6 : vector<128x8xf32>
    %c0_6 = arith.constant 0 : index
    %c0_7 = arith.constant 0 : index
    %8 = vector.load %arg4[%c0_6, %c0_7] : memref<128x8xf32, #tpu.memory_space<vmem>>, vector<128x8xf32>
    tpu.vector_store %arg4[%c0_6, %c0_7], %7 {strides = array<i32>} : memref<128x8xf32, #tpu.memory_space<vmem>>, vector<128x8xf32>,
    return
  }
  func.func @transform_0(%arg0: i32) -> (i32, i32) {
    %c0_i32 = arith.constant 0 : i32
    %c0_i32_0 = arith.constant 0 : i32
    return %arg0, %c0_i32 : i32, i32
  }
  func.func @transform_1(%arg0: i32) -> (i32, i32) {
    %c0_i32 = arith.constant 0 : i32
    %c0_i32_0 = arith.constant 0 : i32
    %c0_i32_1 = arith.constant 0 : i32
    return %c0_i32, %c0_i32_0 : i32, i32
  }
  func.func @transform_2(%arg0: i32) -> (i32, i32) {
    %c0_i32 = arith.constant 0 : i32
    %c0_i32_0 = arith.constant 0 : i32
    %c0_i32_1 = arith.constant 0 : i32
    return %c0_i32, %c0_i32_0 : i32, i32
  }
  func.func @transform_3(%arg0: i32) -> (i32, i32) {
    %c0_i32 = arith.constant 0 : i32
    %c0_i32_0 = arith.constant 0 : i32
    return %arg0, %c0_i32 : i32, i32
  }
}

module attributes {stable_mosaic.version = 11 : i64} {
  func.func @_mm_bias_res_kernel(%arg0: i32, %arg1: memref<128x72xbf16, #tpu.memory_space<vmem>>, %arg2: memref<72x8xbf16, #tpu.memory_space<vmem>>, %arg3: memref<1x8xf32, #tpu.memory_space<vmem>>, %arg4: memref<128x8xf32, #tpu.memory_space<vmem>>, %arg5: memref<128x8xf32, #tpu.memory_space<vmem>>) attributes {dimension_semantics = [#tpu.dimension_semantics<parallel>], iteration_bounds = array<i64: 1>, scalar_prefetch = 0 : i64, scratch_operands = 0 : i64, tpu.core_type = #tpu.core_type<tc>, window_params = [{transform_indices = @transform_0, window_bounds = array<i64: 128, 72>}, {pipeline_mode = #tpu.pipeline_mode<synchronous>, transform_indices = @transform_1, window_bounds = array<i64: 72, 8>}, {pipeline_mode = #tpu.pipeline_mode<synchronous>, transform_indices = @transform_2, window_bounds = array<i64: 1, 8>}, {transform_indices = @transform_3, window_bounds = array<i64: 128, 8>}, {transform_indices = @transform_4, window_bounds = array<i64: 128, 8>}]} {
    %c0 = arith.constant 0 : index
    %c0_0 = arith.constant 0 : index
    %0 = vector.load %arg1[%c0, %c0_0] : memref<128x72xbf16, #tpu.memory_space<vmem>>, vector<128x72xbf16>
    %c0_1 = arith.constant 0 : index
    %c0_2 = arith.constant 0 : index
    %1 = vector.load %arg2[%c0_1, %c0_2] : memref<72x8xbf16, #tpu.memory_space<vmem>>, vector<72x8xbf16>
    %cst = arith.constant dense<0.000000e+00> : vector<128x8xf32>
    %2 = tpu.matmul %0, %1, %cst {dimension_numbers = #tpu.dot_dimension_numbers<[1], [0], [0], [1], [0, 0, 1, 1], [], []>} : vector<128x72xbf16>, vector<72x8xbf16>, vector<128x8xf32> -> vector<128x8xf32>
    %c0_3 = arith.constant 0 : index
    %c0_4 = arith.constant 0 : index
    %3 = vector.load %arg3[%c0_3, %c0_4] : memref<1x8xf32, #tpu.memory_space<vmem>>, vector<1x8xf32>
    %4 = vector.broadcast %3 : vector<1x8xf32> to vector<128x8xf32>
    %5 = arith.addf %2, %4 : vector<128x8xf32>
    %c0_5 = arith.constant 0 : index
    %c0_6 = arith.constant 0 : index
    %6 = vector.load %arg4[%c0_5, %c0_6] : memref<128x8xf32, #tpu.memory_space<vmem>>, vector<128x8xf32>
    %7 = arith.addf %5, %6 : vector<128x8xf32>
    %cst_7 = arith.constant 0.000000e+00 : f32
    %8 = vector.broadcast %cst_7 : f32 to vector<128x8xf32>
    %9 = arith.maximumf %7, %8 : vector<128x8xf32>
    %c0_8 = arith.constant 0 : index
    %c0_9 = arith.constant 0 : index
    %10 = vector.load %arg5[%c0_8, %c0_9] : memref<128x8xf32, #tpu.memory_space<vmem>>, vector<128x8xf32>
    tpu.vector_store %arg5[%c0_8, %c0_9], %9 {strides = array<i32>} : memref<128x8xf32, #tpu.memory_space<vmem>>, vector<128x8xf32>,
    return
  }
  func.func @transform_0(%arg0: i32) -> (i32, i32) {
    %c0_i32 = arith.constant 0 : i32
    %c0_i32_0 = arith.constant 0 : i32
    return %arg0, %c0_i32 : i32, i32
  }
  func.func @transform_1(%arg0: i32) -> (i32, i32) {
    %c0_i32 = arith.constant 0 : i32
    %c0_i32_0 = arith.constant 0 : i32
    %c0_i32_1 = arith.constant 0 : i32
    return %c0_i32, %c0_i32_0 : i32, i32
  }
  func.func @transform_2(%arg0: i32) -> (i32, i32) {
    %c0_i32 = arith.constant 0 : i32
    %c0_i32_0 = arith.constant 0 : i32
    %c0_i32_1 = arith.constant 0 : i32
    return %c0_i32, %c0_i32_0 : i32, i32
  }
  func.func @transform_3(%arg0: i32) -> (i32, i32) {
    %c0_i32 = arith.constant 0 : i32
    %c0_i32_0 = arith.constant 0 : i32
    return %arg0, %c0_i32 : i32, i32
  }
  func.func @transform_4(%arg0: i32) -> (i32, i32) {
    %c0_i32 = arith.constant 0 : i32
    %c0_i32_0 = arith.constant 0 : i32
    return %arg0, %c0_i32 : i32, i32
  }
}

module attributes {stable_mosaic.version = 11 : i64} {
  func.func @_mm_bias_kernel(%arg0: i32, %arg1: memref<32x72xbf16, #tpu.memory_space<vmem>>, %arg2: memref<72x16xbf16, #tpu.memory_space<vmem>>, %arg3: memref<1x16xf32, #tpu.memory_space<vmem>>, %arg4: memref<32x16xf32, #tpu.memory_space<vmem>>) attributes {dimension_semantics = [#tpu.dimension_semantics<parallel>], iteration_bounds = array<i64: 1>, scalar_prefetch = 0 : i64, scratch_operands = 0 : i64, tpu.core_type = #tpu.core_type<tc>, window_params = [{transform_indices = @transform_0, window_bounds = array<i64: 32, 72>}, {pipeline_mode = #tpu.pipeline_mode<synchronous>, transform_indices = @transform_1, window_bounds = array<i64: 72, 16>}, {pipeline_mode = #tpu.pipeline_mode<synchronous>, transform_indices = @transform_2, window_bounds = array<i64: 1, 16>}, {transform_indices = @transform_3, window_bounds = array<i64: 32, 16>}]} {
    %c0 = arith.constant 0 : index
    %c0_0 = arith.constant 0 : index
    %0 = vector.load %arg1[%c0, %c0_0] : memref<32x72xbf16, #tpu.memory_space<vmem>>, vector<32x72xbf16>
    %c0_1 = arith.constant 0 : index
    %c0_2 = arith.constant 0 : index
    %1 = vector.load %arg2[%c0_1, %c0_2] : memref<72x16xbf16, #tpu.memory_space<vmem>>, vector<72x16xbf16>
    %cst = arith.constant dense<0.000000e+00> : vector<32x16xf32>
    %2 = tpu.matmul %0, %1, %cst {dimension_numbers = #tpu.dot_dimension_numbers<[1], [0], [0], [1], [0, 0, 1, 1], [], []>} : vector<32x72xbf16>, vector<72x16xbf16>, vector<32x16xf32> -> vector<32x16xf32>
    %c0_3 = arith.constant 0 : index
    %c0_4 = arith.constant 0 : index
    %3 = vector.load %arg3[%c0_3, %c0_4] : memref<1x16xf32, #tpu.memory_space<vmem>>, vector<1x16xf32>
    %4 = vector.broadcast %3 : vector<1x16xf32> to vector<32x16xf32>
    %5 = arith.addf %2, %4 : vector<32x16xf32>
    %c0_5 = arith.constant 0 : index
    %c0_6 = arith.constant 0 : index
    %6 = vector.load %arg4[%c0_5, %c0_6] : memref<32x16xf32, #tpu.memory_space<vmem>>, vector<32x16xf32>
    tpu.vector_store %arg4[%c0_5, %c0_6], %5 {strides = array<i32>} : memref<32x16xf32, #tpu.memory_space<vmem>>, vector<32x16xf32>,
    return
  }
  func.func @transform_0(%arg0: i32) -> (i32, i32) {
    %c0_i32 = arith.constant 0 : i32
    %c0_i32_0 = arith.constant 0 : i32
    return %arg0, %c0_i32 : i32, i32
  }
  func.func @transform_1(%arg0: i32) -> (i32, i32) {
    %c0_i32 = arith.constant 0 : i32
    %c0_i32_0 = arith.constant 0 : i32
    %c0_i32_1 = arith.constant 0 : i32
    return %c0_i32, %c0_i32_0 : i32, i32
  }
  func.func @transform_2(%arg0: i32) -> (i32, i32) {
    %c0_i32 = arith.constant 0 : i32
    %c0_i32_0 = arith.constant 0 : i32
    %c0_i32_1 = arith.constant 0 : i32
    return %c0_i32, %c0_i32_0 : i32, i32
  }
  func.func @transform_3(%arg0: i32) -> (i32, i32) {
    %c0_i32 = arith.constant 0 : i32
    %c0_i32_0 = arith.constant 0 : i32
    return %arg0, %c0_i32 : i32, i32
  }
}

module attributes {stable_mosaic.version = 11 : i64} {
  func.func @_mm_bias_kernel(%arg0: i32, %arg1: memref<32x288xbf16, #tpu.memory_space<vmem>>, %arg2: memref<288x16xbf16, #tpu.memory_space<vmem>>, %arg3: memref<1x16xf32, #tpu.memory_space<vmem>>, %arg4: memref<32x16xf32, #tpu.memory_space<vmem>>) attributes {dimension_semantics = [#tpu.dimension_semantics<parallel>], iteration_bounds = array<i64: 1>, scalar_prefetch = 0 : i64, scratch_operands = 0 : i64, tpu.core_type = #tpu.core_type<tc>, window_params = [{transform_indices = @transform_0, window_bounds = array<i64: 32, 288>}, {pipeline_mode = #tpu.pipeline_mode<synchronous>, transform_indices = @transform_1, window_bounds = array<i64: 288, 16>}, {pipeline_mode = #tpu.pipeline_mode<synchronous>, transform_indices = @transform_2, window_bounds = array<i64: 1, 16>}, {transform_indices = @transform_3, window_bounds = array<i64: 32, 16>}]} {
    %c0 = arith.constant 0 : index
    %c0_0 = arith.constant 0 : index
    %0 = vector.load %arg1[%c0, %c0_0] : memref<32x288xbf16, #tpu.memory_space<vmem>>, vector<32x288xbf16>
    %c0_1 = arith.constant 0 : index
    %c0_2 = arith.constant 0 : index
    %1 = vector.load %arg2[%c0_1, %c0_2] : memref<288x16xbf16, #tpu.memory_space<vmem>>, vector<288x16xbf16>
    %cst = arith.constant dense<0.000000e+00> : vector<32x16xf32>
    %2 = tpu.matmul %0, %1, %cst {dimension_numbers = #tpu.dot_dimension_numbers<[1], [0], [0], [1], [0, 0, 1, 1], [], []>} : vector<32x288xbf16>, vector<288x16xbf16>, vector<32x16xf32> -> vector<32x16xf32>
    %c0_3 = arith.constant 0 : index
    %c0_4 = arith.constant 0 : index
    %3 = vector.load %arg3[%c0_3, %c0_4] : memref<1x16xf32, #tpu.memory_space<vmem>>, vector<1x16xf32>
    %4 = vector.broadcast %3 : vector<1x16xf32> to vector<32x16xf32>
    %5 = arith.addf %2, %4 : vector<32x16xf32>
    %cst_5 = arith.constant 0.000000e+00 : f32
    %6 = vector.broadcast %cst_5 : f32 to vector<32x16xf32>
    %7 = arith.maximumf %5, %6 : vector<32x16xf32>
    %c0_6 = arith.constant 0 : index
    %c0_7 = arith.constant 0 : index
    %8 = vector.load %arg4[%c0_6, %c0_7] : memref<32x16xf32, #tpu.memory_space<vmem>>, vector<32x16xf32>
    tpu.vector_store %arg4[%c0_6, %c0_7], %7 {strides = array<i32>} : memref<32x16xf32, #tpu.memory_space<vmem>>, vector<32x16xf32>,
    return
  }
  func.func @transform_0(%arg0: i32) -> (i32, i32) {
    %c0_i32 = arith.constant 0 : i32
    %c0_i32_0 = arith.constant 0 : i32
    return %arg0, %c0_i32 : i32, i32
  }
  func.func @transform_1(%arg0: i32) -> (i32, i32) {
    %c0_i32 = arith.constant 0 : i32
    %c0_i32_0 = arith.constant 0 : i32
    %c0_i32_1 = arith.constant 0 : i32
    return %c0_i32, %c0_i32_0 : i32, i32
  }
  func.func @transform_2(%arg0: i32) -> (i32, i32) {
    %c0_i32 = arith.constant 0 : i32
    %c0_i32_0 = arith.constant 0 : i32
    %c0_i32_1 = arith.constant 0 : i32
    return %c0_i32, %c0_i32_0 : i32, i32
  }
  func.func @transform_3(%arg0: i32) -> (i32, i32) {
    %c0_i32 = arith.constant 0 : i32
    %c0_i32_0 = arith.constant 0 : i32
    return %arg0, %c0_i32 : i32, i32
  }
}

module attributes {stable_mosaic.version = 11 : i64} {
  func.func @_mm_bias_kernel(%arg0: i32, %arg1: memref<32x144xbf16, #tpu.memory_space<vmem>>, %arg2: memref<144x16xbf16, #tpu.memory_space<vmem>>, %arg3: memref<1x16xf32, #tpu.memory_space<vmem>>, %arg4: memref<32x16xf32, #tpu.memory_space<vmem>>) attributes {dimension_semantics = [#tpu.dimension_semantics<parallel>], iteration_bounds = array<i64: 1>, scalar_prefetch = 0 : i64, scratch_operands = 0 : i64, tpu.core_type = #tpu.core_type<tc>, window_params = [{transform_indices = @transform_0, window_bounds = array<i64: 32, 144>}, {pipeline_mode = #tpu.pipeline_mode<synchronous>, transform_indices = @transform_1, window_bounds = array<i64: 144, 16>}, {pipeline_mode = #tpu.pipeline_mode<synchronous>, transform_indices = @transform_2, window_bounds = array<i64: 1, 16>}, {transform_indices = @transform_3, window_bounds = array<i64: 32, 16>}]} {
    %c0 = arith.constant 0 : index
    %c0_0 = arith.constant 0 : index
    %0 = vector.load %arg1[%c0, %c0_0] : memref<32x144xbf16, #tpu.memory_space<vmem>>, vector<32x144xbf16>
    %c0_1 = arith.constant 0 : index
    %c0_2 = arith.constant 0 : index
    %1 = vector.load %arg2[%c0_1, %c0_2] : memref<144x16xbf16, #tpu.memory_space<vmem>>, vector<144x16xbf16>
    %cst = arith.constant dense<0.000000e+00> : vector<32x16xf32>
    %2 = tpu.matmul %0, %1, %cst {dimension_numbers = #tpu.dot_dimension_numbers<[1], [0], [0], [1], [0, 0, 1, 1], [], []>} : vector<32x144xbf16>, vector<144x16xbf16>, vector<32x16xf32> -> vector<32x16xf32>
    %c0_3 = arith.constant 0 : index
    %c0_4 = arith.constant 0 : index
    %3 = vector.load %arg3[%c0_3, %c0_4] : memref<1x16xf32, #tpu.memory_space<vmem>>, vector<1x16xf32>
    %4 = vector.broadcast %3 : vector<1x16xf32> to vector<32x16xf32>
    %5 = arith.addf %2, %4 : vector<32x16xf32>
    %cst_5 = arith.constant 0.000000e+00 : f32
    %6 = vector.broadcast %cst_5 : f32 to vector<32x16xf32>
    %7 = arith.maximumf %5, %6 : vector<32x16xf32>
    %c0_6 = arith.constant 0 : index
    %c0_7 = arith.constant 0 : index
    %8 = vector.load %arg4[%c0_6, %c0_7] : memref<32x16xf32, #tpu.memory_space<vmem>>, vector<32x16xf32>
    tpu.vector_store %arg4[%c0_6, %c0_7], %7 {strides = array<i32>} : memref<32x16xf32, #tpu.memory_space<vmem>>, vector<32x16xf32>,
    return
  }
  func.func @transform_0(%arg0: i32) -> (i32, i32) {
    %c0_i32 = arith.constant 0 : i32
    %c0_i32_0 = arith.constant 0 : i32
    return %arg0, %c0_i32 : i32, i32
  }
  func.func @transform_1(%arg0: i32) -> (i32, i32) {
    %c0_i32 = arith.constant 0 : i32
    %c0_i32_0 = arith.constant 0 : i32
    %c0_i32_1 = arith.constant 0 : i32
    return %c0_i32, %c0_i32_0 : i32, i32
  }
  func.func @transform_2(%arg0: i32) -> (i32, i32) {
    %c0_i32 = arith.constant 0 : i32
    %c0_i32_0 = arith.constant 0 : i32
    %c0_i32_1 = arith.constant 0 : i32
    return %c0_i32, %c0_i32_0 : i32, i32
  }
  func.func @transform_3(%arg0: i32) -> (i32, i32) {
    %c0_i32 = arith.constant 0 : i32
    %c0_i32_0 = arith.constant 0 : i32
    return %arg0, %c0_i32 : i32, i32
  }
}

module attributes {stable_mosaic.version = 11 : i64} {
  func.func @_mm_bias_res_kernel(%arg0: i32, %arg1: memref<32x144xbf16, #tpu.memory_space<vmem>>, %arg2: memref<144x16xbf16, #tpu.memory_space<vmem>>, %arg3: memref<1x16xf32, #tpu.memory_space<vmem>>, %arg4: memref<32x16xf32, #tpu.memory_space<vmem>>, %arg5: memref<32x16xf32, #tpu.memory_space<vmem>>) attributes {dimension_semantics = [#tpu.dimension_semantics<parallel>], iteration_bounds = array<i64: 1>, scalar_prefetch = 0 : i64, scratch_operands = 0 : i64, tpu.core_type = #tpu.core_type<tc>, window_params = [{transform_indices = @transform_0, window_bounds = array<i64: 32, 144>}, {pipeline_mode = #tpu.pipeline_mode<synchronous>, transform_indices = @transform_1, window_bounds = array<i64: 144, 16>}, {pipeline_mode = #tpu.pipeline_mode<synchronous>, transform_indices = @transform_2, window_bounds = array<i64: 1, 16>}, {transform_indices = @transform_3, window_bounds = array<i64: 32, 16>}, {transform_indices = @transform_4, window_bounds = array<i64: 32, 16>}]} {
    %c0 = arith.constant 0 : index
    %c0_0 = arith.constant 0 : index
    %0 = vector.load %arg1[%c0, %c0_0] : memref<32x144xbf16, #tpu.memory_space<vmem>>, vector<32x144xbf16>
    %c0_1 = arith.constant 0 : index
    %c0_2 = arith.constant 0 : index
    %1 = vector.load %arg2[%c0_1, %c0_2] : memref<144x16xbf16, #tpu.memory_space<vmem>>, vector<144x16xbf16>
    %cst = arith.constant dense<0.000000e+00> : vector<32x16xf32>
    %2 = tpu.matmul %0, %1, %cst {dimension_numbers = #tpu.dot_dimension_numbers<[1], [0], [0], [1], [0, 0, 1, 1], [], []>} : vector<32x144xbf16>, vector<144x16xbf16>, vector<32x16xf32> -> vector<32x16xf32>
    %c0_3 = arith.constant 0 : index
    %c0_4 = arith.constant 0 : index
    %3 = vector.load %arg3[%c0_3, %c0_4] : memref<1x16xf32, #tpu.memory_space<vmem>>, vector<1x16xf32>
    %4 = vector.broadcast %3 : vector<1x16xf32> to vector<32x16xf32>
    %5 = arith.addf %2, %4 : vector<32x16xf32>
    %c0_5 = arith.constant 0 : index
    %c0_6 = arith.constant 0 : index
    %6 = vector.load %arg4[%c0_5, %c0_6] : memref<32x16xf32, #tpu.memory_space<vmem>>, vector<32x16xf32>
    %7 = arith.addf %5, %6 : vector<32x16xf32>
    %cst_7 = arith.constant 0.000000e+00 : f32
    %8 = vector.broadcast %cst_7 : f32 to vector<32x16xf32>
    %9 = arith.maximumf %7, %8 : vector<32x16xf32>
    %c0_8 = arith.constant 0 : index
    %c0_9 = arith.constant 0 : index
    %10 = vector.load %arg5[%c0_8, %c0_9] : memref<32x16xf32, #tpu.memory_space<vmem>>, vector<32x16xf32>
    tpu.vector_store %arg5[%c0_8, %c0_9], %9 {strides = array<i32>} : memref<32x16xf32, #tpu.memory_space<vmem>>, vector<32x16xf32>,
    return
  }
  func.func @transform_0(%arg0: i32) -> (i32, i32) {
    %c0_i32 = arith.constant 0 : i32
    %c0_i32_0 = arith.constant 0 : i32
    return %arg0, %c0_i32 : i32, i32
  }
  func.func @transform_1(%arg0: i32) -> (i32, i32) {
    %c0_i32 = arith.constant 0 : i32
    %c0_i32_0 = arith.constant 0 : i32
    %c0_i32_1 = arith.constant 0 : i32
    return %c0_i32, %c0_i32_0 : i32, i32
  }
  func.func @transform_2(%arg0: i32) -> (i32, i32) {
    %c0_i32 = arith.constant 0 : i32
    %c0_i32_0 = arith.constant 0 : i32
    %c0_i32_1 = arith.constant 0 : i32
    return %c0_i32, %c0_i32_0 : i32, i32
  }
  func.func @transform_3(%arg0: i32) -> (i32, i32) {
    %c0_i32 = arith.constant 0 : i32
    %c0_i32_0 = arith.constant 0 : i32
    return %arg0, %c0_i32 : i32, i32
  }
  func.func @transform_4(%arg0: i32) -> (i32, i32) {
    %c0_i32 = arith.constant 0 : i32
    %c0_i32_0 = arith.constant 0 : i32
    return %arg0, %c0_i32 : i32, i32
  }
}

module attributes {stable_mosaic.version = 11 : i64} {
  func.func @_sum_relu_kernel(%arg0: i32, %arg1: memref<8x128xf32, #tpu.memory_space<vmem>>, %arg2: memref<8x128xf32, #tpu.memory_space<vmem>>, %arg3: memref<8x128xf32, #tpu.memory_space<vmem>>) attributes {dimension_semantics = [#tpu.dimension_semantics<parallel>], iteration_bounds = array<i64: 1>, scalar_prefetch = 0 : i64, scratch_operands = 0 : i64, tpu.core_type = #tpu.core_type<tc>, window_params = [{transform_indices = @transform_0, window_bounds = array<i64: 8, 128>}, {transform_indices = @transform_1, window_bounds = array<i64: 8, 128>}, {transform_indices = @transform_2, window_bounds = array<i64: 8, 128>}]} {
    %c0 = arith.constant 0 : index
    %c0_0 = arith.constant 0 : index
    %0 = vector.load %arg1[%c0, %c0_0] : memref<8x128xf32, #tpu.memory_space<vmem>>, vector<8x128xf32>
    %c0_1 = arith.constant 0 : index
    %c0_2 = arith.constant 0 : index
    %1 = vector.load %arg2[%c0_1, %c0_2] : memref<8x128xf32, #tpu.memory_space<vmem>>, vector<8x128xf32>
    %2 = arith.addf %0, %1 : vector<8x128xf32>
    %cst = arith.constant 0.000000e+00 : f32
    %3 = vector.broadcast %cst : f32 to vector<8x128xf32>
    %4 = arith.maximumf %2, %3 : vector<8x128xf32>
    %c0_3 = arith.constant 0 : index
    %c0_4 = arith.constant 0 : index
    %5 = vector.load %arg3[%c0_3, %c0_4] : memref<8x128xf32, #tpu.memory_space<vmem>>, vector<8x128xf32>
    tpu.vector_store %arg3[%c0_3, %c0_4], %4 {strides = array<i32>} : memref<8x128xf32, #tpu.memory_space<vmem>>, vector<8x128xf32>,
    return
  }
  func.func @transform_0(%arg0: i32) -> (i32, i32) {
    %c0_i32 = arith.constant 0 : i32
    %c0_i32_0 = arith.constant 0 : i32
    return %arg0, %c0_i32 : i32, i32
  }
  func.func @transform_1(%arg0: i32) -> (i32, i32) {
    %c0_i32 = arith.constant 0 : i32
    %c0_i32_0 = arith.constant 0 : i32
    return %arg0, %c0_i32 : i32, i32
  }
  func.func @transform_2(%arg0: i32) -> (i32, i32) {
    %c0_i32 = arith.constant 0 : i32
    %c0_i32_0 = arith.constant 0 : i32
    return %arg0, %c0_i32 : i32, i32
  }
}

module attributes {stable_mosaic.version = 11 : i64} {
  func.func @_mm_bias_kernel(%arg0: i32, %arg1: memref<8x144xbf16, #tpu.memory_space<vmem>>, %arg2: memref<144x32xbf16, #tpu.memory_space<vmem>>, %arg3: memref<1x32xf32, #tpu.memory_space<vmem>>, %arg4: memref<8x32xf32, #tpu.memory_space<vmem>>) attributes {dimension_semantics = [#tpu.dimension_semantics<parallel>], iteration_bounds = array<i64: 1>, scalar_prefetch = 0 : i64, scratch_operands = 0 : i64, tpu.core_type = #tpu.core_type<tc>, window_params = [{transform_indices = @transform_0, window_bounds = array<i64: 8, 144>}, {pipeline_mode = #tpu.pipeline_mode<synchronous>, transform_indices = @transform_1, window_bounds = array<i64: 144, 32>}, {pipeline_mode = #tpu.pipeline_mode<synchronous>, transform_indices = @transform_2, window_bounds = array<i64: 1, 32>}, {transform_indices = @transform_3, window_bounds = array<i64: 8, 32>}]} {
    %c0 = arith.constant 0 : index
    %c0_0 = arith.constant 0 : index
    %0 = vector.load %arg1[%c0, %c0_0] : memref<8x144xbf16, #tpu.memory_space<vmem>>, vector<8x144xbf16>
    %c0_1 = arith.constant 0 : index
    %c0_2 = arith.constant 0 : index
    %1 = vector.load %arg2[%c0_1, %c0_2] : memref<144x32xbf16, #tpu.memory_space<vmem>>, vector<144x32xbf16>
    %cst = arith.constant dense<0.000000e+00> : vector<8x32xf32>
    %2 = tpu.matmul %0, %1, %cst {dimension_numbers = #tpu.dot_dimension_numbers<[1], [0], [0], [1], [0, 0, 1, 1], [], []>} : vector<8x144xbf16>, vector<144x32xbf16>, vector<8x32xf32> -> vector<8x32xf32>
    %c0_3 = arith.constant 0 : index
    %c0_4 = arith.constant 0 : index
    %3 = vector.load %arg3[%c0_3, %c0_4] : memref<1x32xf32, #tpu.memory_space<vmem>>, vector<1x32xf32>
    %4 = vector.broadcast %3 : vector<1x32xf32> to vector<8x32xf32>
    %5 = arith.addf %2, %4 : vector<8x32xf32>
    %cst_5 = arith.constant 0.000000e+00 : f32
    %6 = vector.broadcast %cst_5 : f32 to vector<8x32xf32>
    %7 = arith.maximumf %5, %6 : vector<8x32xf32>
    %c0_6 = arith.constant 0 : index
    %c0_7 = arith.constant 0 : index
    %8 = vector.load %arg4[%c0_6, %c0_7] : memref<8x32xf32, #tpu.memory_space<vmem>>, vector<8x32xf32>
    tpu.vector_store %arg4[%c0_6, %c0_7], %7 {strides = array<i32>} : memref<8x32xf32, #tpu.memory_space<vmem>>, vector<8x32xf32>,
    return
  }
  func.func @transform_0(%arg0: i32) -> (i32, i32) {
    %c0_i32 = arith.constant 0 : i32
    %c0_i32_0 = arith.constant 0 : i32
    return %arg0, %c0_i32 : i32, i32
  }
  func.func @transform_1(%arg0: i32) -> (i32, i32) {
    %c0_i32 = arith.constant 0 : i32
    %c0_i32_0 = arith.constant 0 : i32
    %c0_i32_1 = arith.constant 0 : i32
    return %c0_i32, %c0_i32_0 : i32, i32
  }
  func.func @transform_2(%arg0: i32) -> (i32, i32) {
    %c0_i32 = arith.constant 0 : i32
    %c0_i32_0 = arith.constant 0 : i32
    %c0_i32_1 = arith.constant 0 : i32
    return %c0_i32, %c0_i32_0 : i32, i32
  }
  func.func @transform_3(%arg0: i32) -> (i32, i32) {
    %c0_i32 = arith.constant 0 : i32
    %c0_i32_0 = arith.constant 0 : i32
    return %arg0, %c0_i32 : i32, i32
  }
}

module attributes {stable_mosaic.version = 11 : i64} {
  func.func @_mm_bias_kernel(%arg0: i32, %arg1: memref<8x288xbf16, #tpu.memory_space<vmem>>, %arg2: memref<288x32xbf16, #tpu.memory_space<vmem>>, %arg3: memref<1x32xf32, #tpu.memory_space<vmem>>, %arg4: memref<8x32xf32, #tpu.memory_space<vmem>>) attributes {dimension_semantics = [#tpu.dimension_semantics<parallel>], iteration_bounds = array<i64: 1>, scalar_prefetch = 0 : i64, scratch_operands = 0 : i64, tpu.core_type = #tpu.core_type<tc>, window_params = [{transform_indices = @transform_0, window_bounds = array<i64: 8, 288>}, {pipeline_mode = #tpu.pipeline_mode<synchronous>, transform_indices = @transform_1, window_bounds = array<i64: 288, 32>}, {pipeline_mode = #tpu.pipeline_mode<synchronous>, transform_indices = @transform_2, window_bounds = array<i64: 1, 32>}, {transform_indices = @transform_3, window_bounds = array<i64: 8, 32>}]} {
    %c0 = arith.constant 0 : index
    %c0_0 = arith.constant 0 : index
    %0 = vector.load %arg1[%c0, %c0_0] : memref<8x288xbf16, #tpu.memory_space<vmem>>, vector<8x288xbf16>
    %c0_1 = arith.constant 0 : index
    %c0_2 = arith.constant 0 : index
    %1 = vector.load %arg2[%c0_1, %c0_2] : memref<288x32xbf16, #tpu.memory_space<vmem>>, vector<288x32xbf16>
    %cst = arith.constant dense<0.000000e+00> : vector<8x32xf32>
    %2 = tpu.matmul %0, %1, %cst {dimension_numbers = #tpu.dot_dimension_numbers<[1], [0], [0], [1], [0, 0, 1, 1], [], []>} : vector<8x288xbf16>, vector<288x32xbf16>, vector<8x32xf32> -> vector<8x32xf32>
    %c0_3 = arith.constant 0 : index
    %c0_4 = arith.constant 0 : index
    %3 = vector.load %arg3[%c0_3, %c0_4] : memref<1x32xf32, #tpu.memory_space<vmem>>, vector<1x32xf32>
    %4 = vector.broadcast %3 : vector<1x32xf32> to vector<8x32xf32>
    %5 = arith.addf %2, %4 : vector<8x32xf32>
    %cst_5 = arith.constant 0.000000e+00 : f32
    %6 = vector.broadcast %cst_5 : f32 to vector<8x32xf32>
    %7 = arith.maximumf %5, %6 : vector<8x32xf32>
    %c0_6 = arith.constant 0 : index
    %c0_7 = arith.constant 0 : index
    %8 = vector.load %arg4[%c0_6, %c0_7] : memref<8x32xf32, #tpu.memory_space<vmem>>, vector<8x32xf32>
    tpu.vector_store %arg4[%c0_6, %c0_7], %7 {strides = array<i32>} : memref<8x32xf32, #tpu.memory_space<vmem>>, vector<8x32xf32>,
    return
  }
  func.func @transform_0(%arg0: i32) -> (i32, i32) {
    %c0_i32 = arith.constant 0 : i32
    %c0_i32_0 = arith.constant 0 : i32
    return %arg0, %c0_i32 : i32, i32
  }
  func.func @transform_1(%arg0: i32) -> (i32, i32) {
    %c0_i32 = arith.constant 0 : i32
    %c0_i32_0 = arith.constant 0 : i32
    %c0_i32_1 = arith.constant 0 : i32
    return %c0_i32, %c0_i32_0 : i32, i32
  }
  func.func @transform_2(%arg0: i32) -> (i32, i32) {
    %c0_i32 = arith.constant 0 : i32
    %c0_i32_0 = arith.constant 0 : i32
    %c0_i32_1 = arith.constant 0 : i32
    return %c0_i32, %c0_i32_0 : i32, i32
  }
  func.func @transform_3(%arg0: i32) -> (i32, i32) {
    %c0_i32 = arith.constant 0 : i32
    %c0_i32_0 = arith.constant 0 : i32
    return %arg0, %c0_i32 : i32, i32
  }
}

module attributes {stable_mosaic.version = 11 : i64} {
  func.func @_mm_bias_res_kernel(%arg0: i32, %arg1: memref<8x288xbf16, #tpu.memory_space<vmem>>, %arg2: memref<288x32xbf16, #tpu.memory_space<vmem>>, %arg3: memref<1x32xf32, #tpu.memory_space<vmem>>, %arg4: memref<8x32xf32, #tpu.memory_space<vmem>>, %arg5: memref<8x32xf32, #tpu.memory_space<vmem>>) attributes {dimension_semantics = [#tpu.dimension_semantics<parallel>], iteration_bounds = array<i64: 1>, scalar_prefetch = 0 : i64, scratch_operands = 0 : i64, tpu.core_type = #tpu.core_type<tc>, window_params = [{transform_indices = @transform_0, window_bounds = array<i64: 8, 288>}, {pipeline_mode = #tpu.pipeline_mode<synchronous>, transform_indices = @transform_1, window_bounds = array<i64: 288, 32>}, {pipeline_mode = #tpu.pipeline_mode<synchronous>, transform_indices = @transform_2, window_bounds = array<i64: 1, 32>}, {transform_indices = @transform_3, window_bounds = array<i64: 8, 32>}, {transform_indices = @transform_4, window_bounds = array<i64: 8, 32>}]} {
    %c0 = arith.constant 0 : index
    %c0_0 = arith.constant 0 : index
    %0 = vector.load %arg1[%c0, %c0_0] : memref<8x288xbf16, #tpu.memory_space<vmem>>, vector<8x288xbf16>
    %c0_1 = arith.constant 0 : index
    %c0_2 = arith.constant 0 : index
    %1 = vector.load %arg2[%c0_1, %c0_2] : memref<288x32xbf16, #tpu.memory_space<vmem>>, vector<288x32xbf16>
    %cst = arith.constant dense<0.000000e+00> : vector<8x32xf32>
    %2 = tpu.matmul %0, %1, %cst {dimension_numbers = #tpu.dot_dimension_numbers<[1], [0], [0], [1], [0, 0, 1, 1], [], []>} : vector<8x288xbf16>, vector<288x32xbf16>, vector<8x32xf32> -> vector<8x32xf32>
    %c0_3 = arith.constant 0 : index
    %c0_4 = arith.constant 0 : index
    %3 = vector.load %arg3[%c0_3, %c0_4] : memref<1x32xf32, #tpu.memory_space<vmem>>, vector<1x32xf32>
    %4 = vector.broadcast %3 : vector<1x32xf32> to vector<8x32xf32>
    %5 = arith.addf %2, %4 : vector<8x32xf32>
    %c0_5 = arith.constant 0 : index
    %c0_6 = arith.constant 0 : index
    %6 = vector.load %arg4[%c0_5, %c0_6] : memref<8x32xf32, #tpu.memory_space<vmem>>, vector<8x32xf32>
    %7 = arith.addf %5, %6 : vector<8x32xf32>
    %cst_7 = arith.constant 0.000000e+00 : f32
    %8 = vector.broadcast %cst_7 : f32 to vector<8x32xf32>
    %9 = arith.maximumf %7, %8 : vector<8x32xf32>
    %c0_8 = arith.constant 0 : index
    %c0_9 = arith.constant 0 : index
    %10 = vector.load %arg5[%c0_8, %c0_9] : memref<8x32xf32, #tpu.memory_space<vmem>>, vector<8x32xf32>
    tpu.vector_store %arg5[%c0_8, %c0_9], %9 {strides = array<i32>} : memref<8x32xf32, #tpu.memory_space<vmem>>, vector<8x32xf32>,
    return
  }
  func.func @transform_0(%arg0: i32) -> (i32, i32) {
    %c0_i32 = arith.constant 0 : i32
    %c0_i32_0 = arith.constant 0 : i32
    return %arg0, %c0_i32 : i32, i32
  }
  func.func @transform_1(%arg0: i32) -> (i32, i32) {
    %c0_i32 = arith.constant 0 : i32
    %c0_i32_0 = arith.constant 0 : i32
    %c0_i32_1 = arith.constant 0 : i32
    return %c0_i32, %c0_i32_0 : i32, i32
  }
  func.func @transform_2(%arg0: i32) -> (i32, i32) {
    %c0_i32 = arith.constant 0 : i32
    %c0_i32_0 = arith.constant 0 : i32
    %c0_i32_1 = arith.constant 0 : i32
    return %c0_i32, %c0_i32_0 : i32, i32
  }
  func.func @transform_3(%arg0: i32) -> (i32, i32) {
    %c0_i32 = arith.constant 0 : i32
    %c0_i32_0 = arith.constant 0 : i32
    return %arg0, %c0_i32 : i32, i32
  }
  func.func @transform_4(%arg0: i32) -> (i32, i32) {
    %c0_i32 = arith.constant 0 : i32
    %c0_i32_0 = arith.constant 0 : i32
    return %arg0, %c0_i32 : i32, i32
  }
}

module attributes {stable_mosaic.version = 11 : i64} {
  func.func @_mm_bias_kernel(%arg0: i32, %arg1: memref<8x144xbf16, #tpu.memory_space<vmem>>, %arg2: memref<144x32xbf16, #tpu.memory_space<vmem>>, %arg3: memref<1x32xf32, #tpu.memory_space<vmem>>, %arg4: memref<8x32xf32, #tpu.memory_space<vmem>>) attributes {dimension_semantics = [#tpu.dimension_semantics<parallel>], iteration_bounds = array<i64: 1>, scalar_prefetch = 0 : i64, scratch_operands = 0 : i64, tpu.core_type = #tpu.core_type<tc>, window_params = [{transform_indices = @transform_0, window_bounds = array<i64: 8, 144>}, {pipeline_mode = #tpu.pipeline_mode<synchronous>, transform_indices = @transform_1, window_bounds = array<i64: 144, 32>}, {pipeline_mode = #tpu.pipeline_mode<synchronous>, transform_indices = @transform_2, window_bounds = array<i64: 1, 32>}, {transform_indices = @transform_3, window_bounds = array<i64: 8, 32>}]} {
    %c0 = arith.constant 0 : index
    %c0_0 = arith.constant 0 : index
    %0 = vector.load %arg1[%c0, %c0_0] : memref<8x144xbf16, #tpu.memory_space<vmem>>, vector<8x144xbf16>
    %c0_1 = arith.constant 0 : index
    %c0_2 = arith.constant 0 : index
    %1 = vector.load %arg2[%c0_1, %c0_2] : memref<144x32xbf16, #tpu.memory_space<vmem>>, vector<144x32xbf16>
    %cst = arith.constant dense<0.000000e+00> : vector<8x32xf32>
    %2 = tpu.matmul %0, %1, %cst {dimension_numbers = #tpu.dot_dimension_numbers<[1], [0], [0], [1], [0, 0, 1, 1], [], []>} : vector<8x144xbf16>, vector<144x32xbf16>, vector<8x32xf32> -> vector<8x32xf32>
    %c0_3 = arith.constant 0 : index
    %c0_4 = arith.constant 0 : index
    %3 = vector.load %arg3[%c0_3, %c0_4] : memref<1x32xf32, #tpu.memory_space<vmem>>, vector<1x32xf32>
    %4 = vector.broadcast %3 : vector<1x32xf32> to vector<8x32xf32>
    %5 = arith.addf %2, %4 : vector<8x32xf32>
    %c0_5 = arith.constant 0 : index
    %c0_6 = arith.constant 0 : index
    %6 = vector.load %arg4[%c0_5, %c0_6] : memref<8x32xf32, #tpu.memory_space<vmem>>, vector<8x32xf32>
    tpu.vector_store %arg4[%c0_5, %c0_6], %5 {strides = array<i32>} : memref<8x32xf32, #tpu.memory_space<vmem>>, vector<8x32xf32>,
    return
  }
  func.func @transform_0(%arg0: i32) -> (i32, i32) {
    %c0_i32 = arith.constant 0 : i32
    %c0_i32_0 = arith.constant 0 : i32
    return %arg0, %c0_i32 : i32, i32
  }
  func.func @transform_1(%arg0: i32) -> (i32, i32) {
    %c0_i32 = arith.constant 0 : i32
    %c0_i32_0 = arith.constant 0 : i32
    %c0_i32_1 = arith.constant 0 : i32
    return %c0_i32, %c0_i32_0 : i32, i32
  }
  func.func @transform_2(%arg0: i32) -> (i32, i32) {
    %c0_i32 = arith.constant 0 : i32
    %c0_i32_0 = arith.constant 0 : i32
    %c0_i32_1 = arith.constant 0 : i32
    return %c0_i32, %c0_i32_0 : i32, i32
  }
  func.func @transform_3(%arg0: i32) -> (i32, i32) {
    %c0_i32 = arith.constant 0 : i32
    %c0_i32_0 = arith.constant 0 : i32
    return %arg0, %c0_i32 : i32, i32
  }
}

module attributes {stable_mosaic.version = 11 : i64} {
  func.func @_mm_bias_kernel(%arg0: i32, %arg1: memref<32x16xbf16, #tpu.memory_space<vmem>>, %arg2: memref<16x8xbf16, #tpu.memory_space<vmem>>, %arg3: memref<1x8xf32, #tpu.memory_space<vmem>>, %arg4: memref<32x8xf32, #tpu.memory_space<vmem>>) attributes {dimension_semantics = [#tpu.dimension_semantics<parallel>], iteration_bounds = array<i64: 1>, scalar_prefetch = 0 : i64, scratch_operands = 0 : i64, tpu.core_type = #tpu.core_type<tc>, window_params = [{transform_indices = @transform_0, window_bounds = array<i64: 32, 16>}, {pipeline_mode = #tpu.pipeline_mode<synchronous>, transform_indices = @transform_1, window_bounds = array<i64: 16, 8>}, {pipeline_mode = #tpu.pipeline_mode<synchronous>, transform_indices = @transform_2, window_bounds = array<i64: 1, 8>}, {transform_indices = @transform_3, window_bounds = array<i64: 32, 8>}]} {
    %c0 = arith.constant 0 : index
    %c0_0 = arith.constant 0 : index
    %0 = vector.load %arg1[%c0, %c0_0] : memref<32x16xbf16, #tpu.memory_space<vmem>>, vector<32x16xbf16>
    %c0_1 = arith.constant 0 : index
    %c0_2 = arith.constant 0 : index
    %1 = vector.load %arg2[%c0_1, %c0_2] : memref<16x8xbf16, #tpu.memory_space<vmem>>, vector<16x8xbf16>
    %cst = arith.constant dense<0.000000e+00> : vector<32x8xf32>
    %2 = tpu.matmul %0, %1, %cst {dimension_numbers = #tpu.dot_dimension_numbers<[1], [0], [0], [1], [0, 0, 1, 1], [], []>} : vector<32x16xbf16>, vector<16x8xbf16>, vector<32x8xf32> -> vector<32x8xf32>
    %c0_3 = arith.constant 0 : index
    %c0_4 = arith.constant 0 : index
    %3 = vector.load %arg3[%c0_3, %c0_4] : memref<1x8xf32, #tpu.memory_space<vmem>>, vector<1x8xf32>
    %4 = vector.broadcast %3 : vector<1x8xf32> to vector<32x8xf32>
    %5 = arith.addf %2, %4 : vector<32x8xf32>
    %c0_5 = arith.constant 0 : index
    %c0_6 = arith.constant 0 : index
    %6 = vector.load %arg4[%c0_5, %c0_6] : memref<32x8xf32, #tpu.memory_space<vmem>>, vector<32x8xf32>
    tpu.vector_store %arg4[%c0_5, %c0_6], %5 {strides = array<i32>} : memref<32x8xf32, #tpu.memory_space<vmem>>, vector<32x8xf32>,
    return
  }
  func.func @transform_0(%arg0: i32) -> (i32, i32) {
    %c0_i32 = arith.constant 0 : i32
    %c0_i32_0 = arith.constant 0 : i32
    return %arg0, %c0_i32 : i32, i32
  }
  func.func @transform_1(%arg0: i32) -> (i32, i32) {
    %c0_i32 = arith.constant 0 : i32
    %c0_i32_0 = arith.constant 0 : i32
    %c0_i32_1 = arith.constant 0 : i32
    return %c0_i32, %c0_i32_0 : i32, i32
  }
  func.func @transform_2(%arg0: i32) -> (i32, i32) {
    %c0_i32 = arith.constant 0 : i32
    %c0_i32_0 = arith.constant 0 : i32
    %c0_i32_1 = arith.constant 0 : i32
    return %c0_i32, %c0_i32_0 : i32, i32
  }
  func.func @transform_3(%arg0: i32) -> (i32, i32) {
    %c0_i32 = arith.constant 0 : i32
    %c0_i32_0 = arith.constant 0 : i32
    return %arg0, %c0_i32 : i32, i32
  }
}

module attributes {stable_mosaic.version = 11 : i64} {
  func.func @_mm_bias_kernel(%arg0: i32, %arg1: memref<32x72xbf16, #tpu.memory_space<vmem>>, %arg2: memref<72x8xbf16, #tpu.memory_space<vmem>>, %arg3: memref<1x8xf32, #tpu.memory_space<vmem>>, %arg4: memref<32x8xf32, #tpu.memory_space<vmem>>) attributes {dimension_semantics = [#tpu.dimension_semantics<parallel>], iteration_bounds = array<i64: 1>, scalar_prefetch = 0 : i64, scratch_operands = 0 : i64, tpu.core_type = #tpu.core_type<tc>, window_params = [{transform_indices = @transform_0, window_bounds = array<i64: 32, 72>}, {pipeline_mode = #tpu.pipeline_mode<synchronous>, transform_indices = @transform_1, window_bounds = array<i64: 72, 8>}, {pipeline_mode = #tpu.pipeline_mode<synchronous>, transform_indices = @transform_2, window_bounds = array<i64: 1, 8>}, {transform_indices = @transform_3, window_bounds = array<i64: 32, 8>}]} {
    %c0 = arith.constant 0 : index
    %c0_0 = arith.constant 0 : index
    %0 = vector.load %arg1[%c0, %c0_0] : memref<32x72xbf16, #tpu.memory_space<vmem>>, vector<32x72xbf16>
    %c0_1 = arith.constant 0 : index
    %c0_2 = arith.constant 0 : index
    %1 = vector.load %arg2[%c0_1, %c0_2] : memref<72x8xbf16, #tpu.memory_space<vmem>>, vector<72x8xbf16>
    %cst = arith.constant dense<0.000000e+00> : vector<32x8xf32>
    %2 = tpu.matmul %0, %1, %cst {dimension_numbers = #tpu.dot_dimension_numbers<[1], [0], [0], [1], [0, 0, 1, 1], [], []>} : vector<32x72xbf16>, vector<72x8xbf16>, vector<32x8xf32> -> vector<32x8xf32>
    %c0_3 = arith.constant 0 : index
    %c0_4 = arith.constant 0 : index
    %3 = vector.load %arg3[%c0_3, %c0_4] : memref<1x8xf32, #tpu.memory_space<vmem>>, vector<1x8xf32>
    %4 = vector.broadcast %3 : vector<1x8xf32> to vector<32x8xf32>
    %5 = arith.addf %2, %4 : vector<32x8xf32>
    %cst_5 = arith.constant 0.000000e+00 : f32
    %6 = vector.broadcast %cst_5 : f32 to vector<32x8xf32>
    %7 = arith.maximumf %5, %6 : vector<32x8xf32>
    %c0_6 = arith.constant 0 : index
    %c0_7 = arith.constant 0 : index
    %8 = vector.load %arg4[%c0_6, %c0_7] : memref<32x8xf32, #tpu.memory_space<vmem>>, vector<32x8xf32>
    tpu.vector_store %arg4[%c0_6, %c0_7], %7 {strides = array<i32>} : memref<32x8xf32, #tpu.memory_space<vmem>>, vector<32x8xf32>,
    return
  }
  func.func @transform_0(%arg0: i32) -> (i32, i32) {
    %c0_i32 = arith.constant 0 : i32
    %c0_i32_0 = arith.constant 0 : i32
    return %arg0, %c0_i32 : i32, i32
  }
  func.func @transform_1(%arg0: i32) -> (i32, i32) {
    %c0_i32 = arith.constant 0 : i32
    %c0_i32_0 = arith.constant 0 : i32
    %c0_i32_1 = arith.constant 0 : i32
    return %c0_i32, %c0_i32_0 : i32, i32
  }
  func.func @transform_2(%arg0: i32) -> (i32, i32) {
    %c0_i32 = arith.constant 0 : i32
    %c0_i32_0 = arith.constant 0 : i32
    %c0_i32_1 = arith.constant 0 : i32
    return %c0_i32, %c0_i32_0 : i32, i32
  }
  func.func @transform_3(%arg0: i32) -> (i32, i32) {
    %c0_i32 = arith.constant 0 : i32
    %c0_i32_0 = arith.constant 0 : i32
    return %arg0, %c0_i32 : i32, i32
  }
}

module attributes {stable_mosaic.version = 11 : i64} {
  func.func @_sum_relu_kernel(%arg0: i32, %arg1: memref<8x128xf32, #tpu.memory_space<vmem>>, %arg2: memref<8x128xf32, #tpu.memory_space<vmem>>, %arg3: memref<8x128xf32, #tpu.memory_space<vmem>>, %arg4: memref<8x128xf32, #tpu.memory_space<vmem>>) attributes {dimension_semantics = [#tpu.dimension_semantics<parallel>], iteration_bounds = array<i64: 1>, scalar_prefetch = 0 : i64, scratch_operands = 0 : i64, tpu.core_type = #tpu.core_type<tc>, window_params = [{transform_indices = @transform_0, window_bounds = array<i64: 8, 128>}, {transform_indices = @transform_1, window_bounds = array<i64: 8, 128>}, {transform_indices = @transform_2, window_bounds = array<i64: 8, 128>}, {transform_indices = @transform_3, window_bounds = array<i64: 8, 128>}]} {
    %c0 = arith.constant 0 : index
    %c0_0 = arith.constant 0 : index
    %0 = vector.load %arg1[%c0, %c0_0] : memref<8x128xf32, #tpu.memory_space<vmem>>, vector<8x128xf32>
    %c0_1 = arith.constant 0 : index
    %c0_2 = arith.constant 0 : index
    %1 = vector.load %arg2[%c0_1, %c0_2] : memref<8x128xf32, #tpu.memory_space<vmem>>, vector<8x128xf32>
    %2 = arith.addf %0, %1 : vector<8x128xf32>
    %c0_3 = arith.constant 0 : index
    %c0_4 = arith.constant 0 : index
    %3 = vector.load %arg3[%c0_3, %c0_4] : memref<8x128xf32, #tpu.memory_space<vmem>>, vector<8x128xf32>
    %4 = arith.addf %2, %3 : vector<8x128xf32>
    %cst = arith.constant 0.000000e+00 : f32
    %5 = vector.broadcast %cst : f32 to vector<8x128xf32>
    %6 = arith.maximumf %4, %5 : vector<8x128xf32>
    %c0_5 = arith.constant 0 : index
    %c0_6 = arith.constant 0 : index
    %7 = vector.load %arg4[%c0_5, %c0_6] : memref<8x128xf32, #tpu.memory_space<vmem>>, vector<8x128xf32>
    tpu.vector_store %arg4[%c0_5, %c0_6], %6 {strides = array<i32>} : memref<8x128xf32, #tpu.memory_space<vmem>>, vector<8x128xf32>,
    return
  }
  func.func @transform_0(%arg0: i32) -> (i32, i32) {
    %c0_i32 = arith.constant 0 : i32
    %c0_i32_0 = arith.constant 0 : i32
    return %arg0, %c0_i32 : i32, i32
  }
  func.func @transform_1(%arg0: i32) -> (i32, i32) {
    %c0_i32 = arith.constant 0 : i32
    %c0_i32_0 = arith.constant 0 : i32
    return %arg0, %c0_i32 : i32, i32
  }
  func.func @transform_2(%arg0: i32) -> (i32, i32) {
    %c0_i32 = arith.constant 0 : i32
    %c0_i32_0 = arith.constant 0 : i32
    return %arg0, %c0_i32 : i32, i32
  }
  func.func @transform_3(%arg0: i32) -> (i32, i32) {
    %c0_i32 = arith.constant 0 : i32
    %c0_i32_0 = arith.constant 0 : i32
    return %arg0, %c0_i32 : i32, i32
  }
}

module attributes {stable_mosaic.version = 11 : i64} {
  func.func @_mm_bias_kernel(%arg0: i32, %arg1: memref<8x72xbf16, #tpu.memory_space<vmem>>, %arg2: memref<72x32xbf16, #tpu.memory_space<vmem>>, %arg3: memref<1x32xf32, #tpu.memory_space<vmem>>, %arg4: memref<8x32xf32, #tpu.memory_space<vmem>>) attributes {dimension_semantics = [#tpu.dimension_semantics<parallel>], iteration_bounds = array<i64: 1>, scalar_prefetch = 0 : i64, scratch_operands = 0 : i64, tpu.core_type = #tpu.core_type<tc>, window_params = [{transform_indices = @transform_0, window_bounds = array<i64: 8, 72>}, {pipeline_mode = #tpu.pipeline_mode<synchronous>, transform_indices = @transform_1, window_bounds = array<i64: 72, 32>}, {pipeline_mode = #tpu.pipeline_mode<synchronous>, transform_indices = @transform_2, window_bounds = array<i64: 1, 32>}, {transform_indices = @transform_3, window_bounds = array<i64: 8, 32>}]} {
    %c0 = arith.constant 0 : index
    %c0_0 = arith.constant 0 : index
    %0 = vector.load %arg1[%c0, %c0_0] : memref<8x72xbf16, #tpu.memory_space<vmem>>, vector<8x72xbf16>
    %c0_1 = arith.constant 0 : index
    %c0_2 = arith.constant 0 : index
    %1 = vector.load %arg2[%c0_1, %c0_2] : memref<72x32xbf16, #tpu.memory_space<vmem>>, vector<72x32xbf16>
    %cst = arith.constant dense<0.000000e+00> : vector<8x32xf32>
    %2 = tpu.matmul %0, %1, %cst {dimension_numbers = #tpu.dot_dimension_numbers<[1], [0], [0], [1], [0, 0, 1, 1], [], []>} : vector<8x72xbf16>, vector<72x32xbf16>, vector<8x32xf32> -> vector<8x32xf32>
    %c0_3 = arith.constant 0 : index
    %c0_4 = arith.constant 0 : index
    %3 = vector.load %arg3[%c0_3, %c0_4] : memref<1x32xf32, #tpu.memory_space<vmem>>, vector<1x32xf32>
    %4 = vector.broadcast %3 : vector<1x32xf32> to vector<8x32xf32>
    %5 = arith.addf %2, %4 : vector<8x32xf32>
    %c0_5 = arith.constant 0 : index
    %c0_6 = arith.constant 0 : index
    %6 = vector.load %arg4[%c0_5, %c0_6] : memref<8x32xf32, #tpu.memory_space<vmem>>, vector<8x32xf32>
    tpu.vector_store %arg4[%c0_5, %c0_6], %5 {strides = array<i32>} : memref<8x32xf32, #tpu.memory_space<vmem>>, vector<8x32xf32>,
    return
  }
  func.func @transform_0(%arg0: i32) -> (i32, i32) {
    %c0_i32 = arith.constant 0 : i32
    %c0_i32_0 = arith.constant 0 : i32
    return %arg0, %c0_i32 : i32, i32
  }
  func.func @transform_1(%arg0: i32) -> (i32, i32) {
    %c0_i32 = arith.constant 0 : i32
    %c0_i32_0 = arith.constant 0 : i32
    %c0_i32_1 = arith.constant 0 : i32
    return %c0_i32, %c0_i32_0 : i32, i32
  }
  func.func @transform_2(%arg0: i32) -> (i32, i32) {
    %c0_i32 = arith.constant 0 : i32
    %c0_i32_0 = arith.constant 0 : i32
    %c0_i32_1 = arith.constant 0 : i32
    return %c0_i32, %c0_i32_0 : i32, i32
  }
  func.func @transform_3(%arg0: i32) -> (i32, i32) {
    %c0_i32 = arith.constant 0 : i32
    %c0_i32_0 = arith.constant 0 : i32
    return %arg0, %c0_i32 : i32, i32
  }
}

module attributes {stable_mosaic.version = 11 : i64} {
  func.func @_mm_bias_kernel(%arg0: i32, %arg1: memref<8x288xbf16, #tpu.memory_space<vmem>>, %arg2: memref<288x64xbf16, #tpu.memory_space<vmem>>, %arg3: memref<1x64xf32, #tpu.memory_space<vmem>>, %arg4: memref<8x64xf32, #tpu.memory_space<vmem>>) attributes {dimension_semantics = [#tpu.dimension_semantics<parallel>], iteration_bounds = array<i64: 1>, scalar_prefetch = 0 : i64, scratch_operands = 0 : i64, tpu.core_type = #tpu.core_type<tc>, window_params = [{transform_indices = @transform_0, window_bounds = array<i64: 8, 288>}, {pipeline_mode = #tpu.pipeline_mode<synchronous>, transform_indices = @transform_1, window_bounds = array<i64: 288, 64>}, {pipeline_mode = #tpu.pipeline_mode<synchronous>, transform_indices = @transform_2, window_bounds = array<i64: 1, 64>}, {transform_indices = @transform_3, window_bounds = array<i64: 8, 64>}]} {
    %c0 = arith.constant 0 : index
    %c0_0 = arith.constant 0 : index
    %0 = vector.load %arg1[%c0, %c0_0] : memref<8x288xbf16, #tpu.memory_space<vmem>>, vector<8x288xbf16>
    %c0_1 = arith.constant 0 : index
    %c0_2 = arith.constant 0 : index
    %1 = vector.load %arg2[%c0_1, %c0_2] : memref<288x64xbf16, #tpu.memory_space<vmem>>, vector<288x64xbf16>
    %cst = arith.constant dense<0.000000e+00> : vector<8x64xf32>
    %2 = tpu.matmul %0, %1, %cst {dimension_numbers = #tpu.dot_dimension_numbers<[1], [0], [0], [1], [0, 0, 1, 1], [], []>} : vector<8x288xbf16>, vector<288x64xbf16>, vector<8x64xf32> -> vector<8x64xf32>
    %c0_3 = arith.constant 0 : index
    %c0_4 = arith.constant 0 : index
    %3 = vector.load %arg3[%c0_3, %c0_4] : memref<1x64xf32, #tpu.memory_space<vmem>>, vector<1x64xf32>
    %4 = vector.broadcast %3 : vector<1x64xf32> to vector<8x64xf32>
    %5 = arith.addf %2, %4 : vector<8x64xf32>
    %c0_5 = arith.constant 0 : index
    %c0_6 = arith.constant 0 : index
    %6 = vector.load %arg4[%c0_5, %c0_6] : memref<8x64xf32, #tpu.memory_space<vmem>>, vector<8x64xf32>
    tpu.vector_store %arg4[%c0_5, %c0_6], %5 {strides = array<i32>} : memref<8x64xf32, #tpu.memory_space<vmem>>, vector<8x64xf32>,
    return
  }
  func.func @transform_0(%arg0: i32) -> (i32, i32) {
    %c0_i32 = arith.constant 0 : i32
    %c0_i32_0 = arith.constant 0 : i32
    return %arg0, %c0_i32 : i32, i32
  }
  func.func @transform_1(%arg0: i32) -> (i32, i32) {
    %c0_i32 = arith.constant 0 : i32
    %c0_i32_0 = arith.constant 0 : i32
    %c0_i32_1 = arith.constant 0 : i32
    return %c0_i32, %c0_i32_0 : i32, i32
  }
  func.func @transform_2(%arg0: i32) -> (i32, i32) {
    %c0_i32 = arith.constant 0 : i32
    %c0_i32_0 = arith.constant 0 : i32
    %c0_i32_1 = arith.constant 0 : i32
    return %c0_i32, %c0_i32_0 : i32, i32
  }
  func.func @transform_3(%arg0: i32) -> (i32, i32) {
    %c0_i32 = arith.constant 0 : i32
    %c0_i32_0 = arith.constant 0 : i32
    return %arg0, %c0_i32 : i32, i32
  }
}

module attributes {stable_mosaic.version = 11 : i64} {
  func.func @_mm_bias_kernel(%arg0: i32, %arg1: memref<8x32xbf16, #tpu.memory_space<vmem>>, %arg2: memref<32x24xbf16, #tpu.memory_space<vmem>>, %arg3: memref<1x24xf32, #tpu.memory_space<vmem>>, %arg4: memref<8x24xf32, #tpu.memory_space<vmem>>) attributes {dimension_semantics = [#tpu.dimension_semantics<parallel>], iteration_bounds = array<i64: 1>, scalar_prefetch = 0 : i64, scratch_operands = 0 : i64, tpu.core_type = #tpu.core_type<tc>, window_params = [{transform_indices = @transform_0, window_bounds = array<i64: 8, 32>}, {pipeline_mode = #tpu.pipeline_mode<synchronous>, transform_indices = @transform_1, window_bounds = array<i64: 32, 24>}, {pipeline_mode = #tpu.pipeline_mode<synchronous>, transform_indices = @transform_2, window_bounds = array<i64: 1, 24>}, {transform_indices = @transform_3, window_bounds = array<i64: 8, 24>}]} {
    %c0 = arith.constant 0 : index
    %c0_0 = arith.constant 0 : index
    %0 = vector.load %arg1[%c0, %c0_0] : memref<8x32xbf16, #tpu.memory_space<vmem>>, vector<8x32xbf16>
    %c0_1 = arith.constant 0 : index
    %c0_2 = arith.constant 0 : index
    %1 = vector.load %arg2[%c0_1, %c0_2] : memref<32x24xbf16, #tpu.memory_space<vmem>>, vector<32x24xbf16>
    %cst = arith.constant dense<0.000000e+00> : vector<8x24xf32>
    %2 = tpu.matmul %0, %1, %cst {dimension_numbers = #tpu.dot_dimension_numbers<[1], [0], [0], [1], [0, 0, 1, 1], [], []>} : vector<8x32xbf16>, vector<32x24xbf16>, vector<8x24xf32> -> vector<8x24xf32>
    %c0_3 = arith.constant 0 : index
    %c0_4 = arith.constant 0 : index
    %3 = vector.load %arg3[%c0_3, %c0_4] : memref<1x24xf32, #tpu.memory_space<vmem>>, vector<1x24xf32>
    %4 = vector.broadcast %3 : vector<1x24xf32> to vector<8x24xf32>
    %5 = arith.addf %2, %4 : vector<8x24xf32>
    %c0_5 = arith.constant 0 : index
    %c0_6 = arith.constant 0 : index
    %6 = vector.load %arg4[%c0_5, %c0_6] : memref<8x24xf32, #tpu.memory_space<vmem>>, vector<8x24xf32>
    tpu.vector_store %arg4[%c0_5, %c0_6], %5 {strides = array<i32>} : memref<8x24xf32, #tpu.memory_space<vmem>>, vector<8x24xf32>,
    return
  }
  func.func @transform_0(%arg0: i32) -> (i32, i32) {
    %c0_i32 = arith.constant 0 : i32
    %c0_i32_0 = arith.constant 0 : i32
    return %arg0, %c0_i32 : i32, i32
  }
  func.func @transform_1(%arg0: i32) -> (i32, i32) {
    %c0_i32 = arith.constant 0 : i32
    %c0_i32_0 = arith.constant 0 : i32
    %c0_i32_1 = arith.constant 0 : i32
    return %c0_i32, %c0_i32_0 : i32, i32
  }
  func.func @transform_2(%arg0: i32) -> (i32, i32) {
    %c0_i32 = arith.constant 0 : i32
    %c0_i32_0 = arith.constant 0 : i32
    %c0_i32_1 = arith.constant 0 : i32
    return %c0_i32, %c0_i32_0 : i32, i32
  }
  func.func @transform_3(%arg0: i32) -> (i32, i32) {
    %c0_i32 = arith.constant 0 : i32
    %c0_i32_0 = arith.constant 0 : i32
    return %arg0, %c0_i32 : i32, i32
  }
}

module attributes {stable_mosaic.version = 11 : i64} {
  func.func @_mm_bias_kernel(%arg0: i32, %arg1: memref<8x144xbf16, #tpu.memory_space<vmem>>, %arg2: memref<144x16xbf16, #tpu.memory_space<vmem>>, %arg3: memref<1x16xf32, #tpu.memory_space<vmem>>, %arg4: memref<8x16xf32, #tpu.memory_space<vmem>>) attributes {dimension_semantics = [#tpu.dimension_semantics<parallel>], iteration_bounds = array<i64: 1>, scalar_prefetch = 0 : i64, scratch_operands = 0 : i64, tpu.core_type = #tpu.core_type<tc>, window_params = [{transform_indices = @transform_0, window_bounds = array<i64: 8, 144>}, {pipeline_mode = #tpu.pipeline_mode<synchronous>, transform_indices = @transform_1, window_bounds = array<i64: 144, 16>}, {pipeline_mode = #tpu.pipeline_mode<synchronous>, transform_indices = @transform_2, window_bounds = array<i64: 1, 16>}, {transform_indices = @transform_3, window_bounds = array<i64: 8, 16>}]} {
    %c0 = arith.constant 0 : index
    %c0_0 = arith.constant 0 : index
    %0 = vector.load %arg1[%c0, %c0_0] : memref<8x144xbf16, #tpu.memory_space<vmem>>, vector<8x144xbf16>
    %c0_1 = arith.constant 0 : index
    %c0_2 = arith.constant 0 : index
    %1 = vector.load %arg2[%c0_1, %c0_2] : memref<144x16xbf16, #tpu.memory_space<vmem>>, vector<144x16xbf16>
    %cst = arith.constant dense<0.000000e+00> : vector<8x16xf32>
    %2 = tpu.matmul %0, %1, %cst {dimension_numbers = #tpu.dot_dimension_numbers<[1], [0], [0], [1], [0, 0, 1, 1], [], []>} : vector<8x144xbf16>, vector<144x16xbf16>, vector<8x16xf32> -> vector<8x16xf32>
    %c0_3 = arith.constant 0 : index
    %c0_4 = arith.constant 0 : index
    %3 = vector.load %arg3[%c0_3, %c0_4] : memref<1x16xf32, #tpu.memory_space<vmem>>, vector<1x16xf32>
    %4 = vector.broadcast %3 : vector<1x16xf32> to vector<8x16xf32>
    %5 = arith.addf %2, %4 : vector<8x16xf32>
    %cst_5 = arith.constant 0.000000e+00 : f32
    %6 = vector.broadcast %cst_5 : f32 to vector<8x16xf32>
    %7 = arith.maximumf %5, %6 : vector<8x16xf32>
    %c0_6 = arith.constant 0 : index
    %c0_7 = arith.constant 0 : index
    %8 = vector.load %arg4[%c0_6, %c0_7] : memref<8x16xf32, #tpu.memory_space<vmem>>, vector<8x16xf32>
    tpu.vector_store %arg4[%c0_6, %c0_7], %7 {strides = array<i32>} : memref<8x16xf32, #tpu.memory_space<vmem>>, vector<8x16xf32>,
    return
  }
  func.func @transform_0(%arg0: i32) -> (i32, i32) {
    %c0_i32 = arith.constant 0 : i32
    %c0_i32_0 = arith.constant 0 : i32
    return %arg0, %c0_i32 : i32, i32
  }
  func.func @transform_1(%arg0: i32) -> (i32, i32) {
    %c0_i32 = arith.constant 0 : i32
    %c0_i32_0 = arith.constant 0 : i32
    %c0_i32_1 = arith.constant 0 : i32
    return %c0_i32, %c0_i32_0 : i32, i32
  }
  func.func @transform_2(%arg0: i32) -> (i32, i32) {
    %c0_i32 = arith.constant 0 : i32
    %c0_i32_0 = arith.constant 0 : i32
    %c0_i32_1 = arith.constant 0 : i32
    return %c0_i32, %c0_i32_0 : i32, i32
  }
  func.func @transform_3(%arg0: i32) -> (i32, i32) {
    %c0_i32 = arith.constant 0 : i32
    %c0_i32_0 = arith.constant 0 : i32
    return %arg0, %c0_i32 : i32, i32
  }
}

module attributes {stable_mosaic.version = 11 : i64} {
  func.func @_mm_bias_kernel(%arg0: i32, %arg1: memref<8x144xbf16, #tpu.memory_space<vmem>>, %arg2: memref<144x64xbf16, #tpu.memory_space<vmem>>, %arg3: memref<1x64xf32, #tpu.memory_space<vmem>>, %arg4: memref<8x64xf32, #tpu.memory_space<vmem>>) attributes {dimension_semantics = [#tpu.dimension_semantics<parallel>], iteration_bounds = array<i64: 1>, scalar_prefetch = 0 : i64, scratch_operands = 0 : i64, tpu.core_type = #tpu.core_type<tc>, window_params = [{transform_indices = @transform_0, window_bounds = array<i64: 8, 144>}, {pipeline_mode = #tpu.pipeline_mode<synchronous>, transform_indices = @transform_1, window_bounds = array<i64: 144, 64>}, {pipeline_mode = #tpu.pipeline_mode<synchronous>, transform_indices = @transform_2, window_bounds = array<i64: 1, 64>}, {transform_indices = @transform_3, window_bounds = array<i64: 8, 64>}]} {
    %c0 = arith.constant 0 : index
    %c0_0 = arith.constant 0 : index
    %0 = vector.load %arg1[%c0, %c0_0] : memref<8x144xbf16, #tpu.memory_space<vmem>>, vector<8x144xbf16>
    %c0_1 = arith.constant 0 : index
    %c0_2 = arith.constant 0 : index
    %1 = vector.load %arg2[%c0_1, %c0_2] : memref<144x64xbf16, #tpu.memory_space<vmem>>, vector<144x64xbf16>
    %cst = arith.constant dense<0.000000e+00> : vector<8x64xf32>
    %2 = tpu.matmul %0, %1, %cst {dimension_numbers = #tpu.dot_dimension_numbers<[1], [0], [0], [1], [0, 0, 1, 1], [], []>} : vector<8x144xbf16>, vector<144x64xbf16>, vector<8x64xf32> -> vector<8x64xf32>
    %c0_3 = arith.constant 0 : index
    %c0_4 = arith.constant 0 : index
    %3 = vector.load %arg3[%c0_3, %c0_4] : memref<1x64xf32, #tpu.memory_space<vmem>>, vector<1x64xf32>
    %4 = vector.broadcast %3 : vector<1x64xf32> to vector<8x64xf32>
    %5 = arith.addf %2, %4 : vector<8x64xf32>
    %c0_5 = arith.constant 0 : index
    %c0_6 = arith.constant 0 : index
    %6 = vector.load %arg4[%c0_5, %c0_6] : memref<8x64xf32, #tpu.memory_space<vmem>>, vector<8x64xf32>
    tpu.vector_store %arg4[%c0_5, %c0_6], %5 {strides = array<i32>} : memref<8x64xf32, #tpu.memory_space<vmem>>, vector<8x64xf32>,
    return
  }
  func.func @transform_0(%arg0: i32) -> (i32, i32) {
    %c0_i32 = arith.constant 0 : i32
    %c0_i32_0 = arith.constant 0 : i32
    return %arg0, %c0_i32 : i32, i32
  }
  func.func @transform_1(%arg0: i32) -> (i32, i32) {
    %c0_i32 = arith.constant 0 : i32
    %c0_i32_0 = arith.constant 0 : i32
    %c0_i32_1 = arith.constant 0 : i32
    return %c0_i32, %c0_i32_0 : i32, i32
  }
  func.func @transform_2(%arg0: i32) -> (i32, i32) {
    %c0_i32 = arith.constant 0 : i32
    %c0_i32_0 = arith.constant 0 : i32
    %c0_i32_1 = arith.constant 0 : i32
    return %c0_i32, %c0_i32_0 : i32, i32
  }
  func.func @transform_3(%arg0: i32) -> (i32, i32) {
    %c0_i32 = arith.constant 0 : i32
    %c0_i32_0 = arith.constant 0 : i32
    return %arg0, %c0_i32 : i32, i32
  }
}

module attributes {stable_mosaic.version = 11 : i64} {
  func.func @_mm_bias_kernel(%arg0: i32, %arg1: memref<8x72xbf16, #tpu.memory_space<vmem>>, %arg2: memref<72x8xbf16, #tpu.memory_space<vmem>>, %arg3: memref<1x8xf32, #tpu.memory_space<vmem>>, %arg4: memref<8x8xf32, #tpu.memory_space<vmem>>) attributes {dimension_semantics = [#tpu.dimension_semantics<parallel>], iteration_bounds = array<i64: 1>, scalar_prefetch = 0 : i64, scratch_operands = 0 : i64, tpu.core_type = #tpu.core_type<tc>, window_params = [{transform_indices = @transform_0, window_bounds = array<i64: 8, 72>}, {pipeline_mode = #tpu.pipeline_mode<synchronous>, transform_indices = @transform_1, window_bounds = array<i64: 72, 8>}, {pipeline_mode = #tpu.pipeline_mode<synchronous>, transform_indices = @transform_2, window_bounds = array<i64: 1, 8>}, {transform_indices = @transform_3, window_bounds = array<i64: 8, 8>}]} {
    %c0 = arith.constant 0 : index
    %c0_0 = arith.constant 0 : index
    %0 = vector.load %arg1[%c0, %c0_0] : memref<8x72xbf16, #tpu.memory_space<vmem>>, vector<8x72xbf16>
    %c0_1 = arith.constant 0 : index
    %c0_2 = arith.constant 0 : index
    %1 = vector.load %arg2[%c0_1, %c0_2] : memref<72x8xbf16, #tpu.memory_space<vmem>>, vector<72x8xbf16>
    %cst = arith.constant dense<0.000000e+00> : vector<8x8xf32>
    %2 = tpu.matmul %0, %1, %cst {dimension_numbers = #tpu.dot_dimension_numbers<[1], [0], [0], [1], [0, 0, 1, 1], [], []>} : vector<8x72xbf16>, vector<72x8xbf16>, vector<8x8xf32> -> vector<8x8xf32>
    %c0_3 = arith.constant 0 : index
    %c0_4 = arith.constant 0 : index
    %3 = vector.load %arg3[%c0_3, %c0_4] : memref<1x8xf32, #tpu.memory_space<vmem>>, vector<1x8xf32>
    %4 = vector.broadcast %3 : vector<1x8xf32> to vector<8x8xf32>
    %5 = arith.addf %2, %4 : vector<8x8xf32>
    %cst_5 = arith.constant 0.000000e+00 : f32
    %6 = vector.broadcast %cst_5 : f32 to vector<8x8xf32>
    %7 = arith.maximumf %5, %6 : vector<8x8xf32>
    %c0_6 = arith.constant 0 : index
    %c0_7 = arith.constant 0 : index
    %8 = vector.load %arg4[%c0_6, %c0_7] : memref<8x8xf32, #tpu.memory_space<vmem>>, vector<8x8xf32>
    tpu.vector_store %arg4[%c0_6, %c0_7], %7 {strides = array<i32>} : memref<8x8xf32, #tpu.memory_space<vmem>>, vector<8x8xf32>,
    return
  }
  func.func @transform_0(%arg0: i32) -> (i32, i32) {
    %c0_i32 = arith.constant 0 : i32
    %c0_i32_0 = arith.constant 0 : i32
    return %arg0, %c0_i32 : i32, i32
  }
  func.func @transform_1(%arg0: i32) -> (i32, i32) {
    %c0_i32 = arith.constant 0 : i32
    %c0_i32_0 = arith.constant 0 : i32
    %c0_i32_1 = arith.constant 0 : i32
    return %c0_i32, %c0_i32_0 : i32, i32
  }
  func.func @transform_2(%arg0: i32) -> (i32, i32) {
    %c0_i32 = arith.constant 0 : i32
    %c0_i32_0 = arith.constant 0 : i32
    %c0_i32_1 = arith.constant 0 : i32
    return %c0_i32, %c0_i32_0 : i32, i32
  }
  func.func @transform_3(%arg0: i32) -> (i32, i32) {
    %c0_i32 = arith.constant 0 : i32
    %c0_i32_0 = arith.constant 0 : i32
    return %arg0, %c0_i32 : i32, i32
  }
}

module attributes {stable_mosaic.version = 11 : i64} {
  func.func @_mm_bias_kernel(%arg0: i32, %arg1: memref<8x288xbf16, #tpu.memory_space<vmem>>, %arg2: memref<288x64xbf16, #tpu.memory_space<vmem>>, %arg3: memref<1x64xf32, #tpu.memory_space<vmem>>, %arg4: memref<8x64xf32, #tpu.memory_space<vmem>>) attributes {dimension_semantics = [#tpu.dimension_semantics<parallel>], iteration_bounds = array<i64: 1>, scalar_prefetch = 0 : i64, scratch_operands = 0 : i64, tpu.core_type = #tpu.core_type<tc>, window_params = [{transform_indices = @transform_0, window_bounds = array<i64: 8, 288>}, {pipeline_mode = #tpu.pipeline_mode<synchronous>, transform_indices = @transform_1, window_bounds = array<i64: 288, 64>}, {pipeline_mode = #tpu.pipeline_mode<synchronous>, transform_indices = @transform_2, window_bounds = array<i64: 1, 64>}, {transform_indices = @transform_3, window_bounds = array<i64: 8, 64>}]} {
    %c0 = arith.constant 0 : index
    %c0_0 = arith.constant 0 : index
    %0 = vector.load %arg1[%c0, %c0_0] : memref<8x288xbf16, #tpu.memory_space<vmem>>, vector<8x288xbf16>
    %c0_1 = arith.constant 0 : index
    %c0_2 = arith.constant 0 : index
    %1 = vector.load %arg2[%c0_1, %c0_2] : memref<288x64xbf16, #tpu.memory_space<vmem>>, vector<288x64xbf16>
    %cst = arith.constant dense<0.000000e+00> : vector<8x64xf32>
    %2 = tpu.matmul %0, %1, %cst {dimension_numbers = #tpu.dot_dimension_numbers<[1], [0], [0], [1], [0, 0, 1, 1], [], []>} : vector<8x288xbf16>, vector<288x64xbf16>, vector<8x64xf32> -> vector<8x64xf32>
    %c0_3 = arith.constant 0 : index
    %c0_4 = arith.constant 0 : index
    %3 = vector.load %arg3[%c0_3, %c0_4] : memref<1x64xf32, #tpu.memory_space<vmem>>, vector<1x64xf32>
    %4 = vector.broadcast %3 : vector<1x64xf32> to vector<8x64xf32>
    %5 = arith.addf %2, %4 : vector<8x64xf32>
    %cst_5 = arith.constant 0.000000e+00 : f32
    %6 = vector.broadcast %cst_5 : f32 to vector<8x64xf32>
    %7 = arith.maximumf %5, %6 : vector<8x64xf32>
    %c0_6 = arith.constant 0 : index
    %c0_7 = arith.constant 0 : index
    %8 = vector.load %arg4[%c0_6, %c0_7] : memref<8x64xf32, #tpu.memory_space<vmem>>, vector<8x64xf32>
    tpu.vector_store %arg4[%c0_6, %c0_7], %7 {strides = array<i32>} : memref<8x64xf32, #tpu.memory_space<vmem>>, vector<8x64xf32>,
    return
  }
  func.func @transform_0(%arg0: i32) -> (i32, i32) {
    %c0_i32 = arith.constant 0 : i32
    %c0_i32_0 = arith.constant 0 : i32
    return %arg0, %c0_i32 : i32, i32
  }
  func.func @transform_1(%arg0: i32) -> (i32, i32) {
    %c0_i32 = arith.constant 0 : i32
    %c0_i32_0 = arith.constant 0 : i32
    %c0_i32_1 = arith.constant 0 : i32
    return %c0_i32, %c0_i32_0 : i32, i32
  }
  func.func @transform_2(%arg0: i32) -> (i32, i32) {
    %c0_i32 = arith.constant 0 : i32
    %c0_i32_0 = arith.constant 0 : i32
    %c0_i32_1 = arith.constant 0 : i32
    return %c0_i32, %c0_i32_0 : i32, i32
  }
  func.func @transform_3(%arg0: i32) -> (i32, i32) {
    %c0_i32 = arith.constant 0 : i32
    %c0_i32_0 = arith.constant 0 : i32
    return %arg0, %c0_i32 : i32, i32
  }
}

module attributes {stable_mosaic.version = 11 : i64} {
  func.func @_mm_bias_kernel(%arg0: i32, %arg1: memref<8x72xbf16, #tpu.memory_space<vmem>>, %arg2: memref<72x64xbf16, #tpu.memory_space<vmem>>, %arg3: memref<1x64xf32, #tpu.memory_space<vmem>>, %arg4: memref<8x64xf32, #tpu.memory_space<vmem>>) attributes {dimension_semantics = [#tpu.dimension_semantics<parallel>], iteration_bounds = array<i64: 1>, scalar_prefetch = 0 : i64, scratch_operands = 0 : i64, tpu.core_type = #tpu.core_type<tc>, window_params = [{transform_indices = @transform_0, window_bounds = array<i64: 8, 72>}, {pipeline_mode = #tpu.pipeline_mode<synchronous>, transform_indices = @transform_1, window_bounds = array<i64: 72, 64>}, {pipeline_mode = #tpu.pipeline_mode<synchronous>, transform_indices = @transform_2, window_bounds = array<i64: 1, 64>}, {transform_indices = @transform_3, window_bounds = array<i64: 8, 64>}]} {
    %c0 = arith.constant 0 : index
    %c0_0 = arith.constant 0 : index
    %0 = vector.load %arg1[%c0, %c0_0] : memref<8x72xbf16, #tpu.memory_space<vmem>>, vector<8x72xbf16>
    %c0_1 = arith.constant 0 : index
    %c0_2 = arith.constant 0 : index
    %1 = vector.load %arg2[%c0_1, %c0_2] : memref<72x64xbf16, #tpu.memory_space<vmem>>, vector<72x64xbf16>
    %cst = arith.constant dense<0.000000e+00> : vector<8x64xf32>
    %2 = tpu.matmul %0, %1, %cst {dimension_numbers = #tpu.dot_dimension_numbers<[1], [0], [0], [1], [0, 0, 1, 1], [], []>} : vector<8x72xbf16>, vector<72x64xbf16>, vector<8x64xf32> -> vector<8x64xf32>
    %c0_3 = arith.constant 0 : index
    %c0_4 = arith.constant 0 : index
    %3 = vector.load %arg3[%c0_3, %c0_4] : memref<1x64xf32, #tpu.memory_space<vmem>>, vector<1x64xf32>
    %4 = vector.broadcast %3 : vector<1x64xf32> to vector<8x64xf32>
    %5 = arith.addf %2, %4 : vector<8x64xf32>
    %c0_5 = arith.constant 0 : index
    %c0_6 = arith.constant 0 : index
    %6 = vector.load %arg4[%c0_5, %c0_6] : memref<8x64xf32, #tpu.memory_space<vmem>>, vector<8x64xf32>
    tpu.vector_store %arg4[%c0_5, %c0_6], %5 {strides = array<i32>} : memref<8x64xf32, #tpu.memory_space<vmem>>, vector<8x64xf32>,
    return
  }
  func.func @transform_0(%arg0: i32) -> (i32, i32) {
    %c0_i32 = arith.constant 0 : i32
    %c0_i32_0 = arith.constant 0 : i32
    return %arg0, %c0_i32 : i32, i32
  }
  func.func @transform_1(%arg0: i32) -> (i32, i32) {
    %c0_i32 = arith.constant 0 : i32
    %c0_i32_0 = arith.constant 0 : i32
    %c0_i32_1 = arith.constant 0 : i32
    return %c0_i32, %c0_i32_0 : i32, i32
  }
  func.func @transform_2(%arg0: i32) -> (i32, i32) {
    %c0_i32 = arith.constant 0 : i32
    %c0_i32_0 = arith.constant 0 : i32
    %c0_i32_1 = arith.constant 0 : i32
    return %c0_i32, %c0_i32_0 : i32, i32
  }
  func.func @transform_3(%arg0: i32) -> (i32, i32) {
    %c0_i32 = arith.constant 0 : i32
    %c0_i32_0 = arith.constant 0 : i32
    return %arg0, %c0_i32 : i32, i32
  }
}

module attributes {stable_mosaic.version = 11 : i64} {
  func.func @_mm_bias_kernel(%arg0: i32, %arg1: memref<8x576xbf16, #tpu.memory_space<vmem>>, %arg2: memref<576x64xbf16, #tpu.memory_space<vmem>>, %arg3: memref<1x64xf32, #tpu.memory_space<vmem>>, %arg4: memref<8x64xf32, #tpu.memory_space<vmem>>) attributes {dimension_semantics = [#tpu.dimension_semantics<parallel>], iteration_bounds = array<i64: 1>, scalar_prefetch = 0 : i64, scratch_operands = 0 : i64, tpu.core_type = #tpu.core_type<tc>, window_params = [{transform_indices = @transform_0, window_bounds = array<i64: 8, 576>}, {pipeline_mode = #tpu.pipeline_mode<synchronous>, transform_indices = @transform_1, window_bounds = array<i64: 576, 64>}, {pipeline_mode = #tpu.pipeline_mode<synchronous>, transform_indices = @transform_2, window_bounds = array<i64: 1, 64>}, {transform_indices = @transform_3, window_bounds = array<i64: 8, 64>}]} {
    %c0 = arith.constant 0 : index
    %c0_0 = arith.constant 0 : index
    %0 = vector.load %arg1[%c0, %c0_0] : memref<8x576xbf16, #tpu.memory_space<vmem>>, vector<8x576xbf16>
    %c0_1 = arith.constant 0 : index
    %c0_2 = arith.constant 0 : index
    %1 = vector.load %arg2[%c0_1, %c0_2] : memref<576x64xbf16, #tpu.memory_space<vmem>>, vector<576x64xbf16>
    %cst = arith.constant dense<0.000000e+00> : vector<8x64xf32>
    %2 = tpu.matmul %0, %1, %cst {dimension_numbers = #tpu.dot_dimension_numbers<[1], [0], [0], [1], [0, 0, 1, 1], [], []>} : vector<8x576xbf16>, vector<576x64xbf16>, vector<8x64xf32> -> vector<8x64xf32>
    %c0_3 = arith.constant 0 : index
    %c0_4 = arith.constant 0 : index
    %3 = vector.load %arg3[%c0_3, %c0_4] : memref<1x64xf32, #tpu.memory_space<vmem>>, vector<1x64xf32>
    %4 = vector.broadcast %3 : vector<1x64xf32> to vector<8x64xf32>
    %5 = arith.addf %2, %4 : vector<8x64xf32>
    %cst_5 = arith.constant 0.000000e+00 : f32
    %6 = vector.broadcast %cst_5 : f32 to vector<8x64xf32>
    %7 = arith.maximumf %5, %6 : vector<8x64xf32>
    %c0_6 = arith.constant 0 : index
    %c0_7 = arith.constant 0 : index
    %8 = vector.load %arg4[%c0_6, %c0_7] : memref<8x64xf32, #tpu.memory_space<vmem>>, vector<8x64xf32>
    tpu.vector_store %arg4[%c0_6, %c0_7], %7 {strides = array<i32>} : memref<8x64xf32, #tpu.memory_space<vmem>>, vector<8x64xf32>,
    return
  }
  func.func @transform_0(%arg0: i32) -> (i32, i32) {
    %c0_i32 = arith.constant 0 : i32
    %c0_i32_0 = arith.constant 0 : i32
    return %arg0, %c0_i32 : i32, i32
  }
  func.func @transform_1(%arg0: i32) -> (i32, i32) {
    %c0_i32 = arith.constant 0 : i32
    %c0_i32_0 = arith.constant 0 : i32
    %c0_i32_1 = arith.constant 0 : i32
    return %c0_i32, %c0_i32_0 : i32, i32
  }
  func.func @transform_2(%arg0: i32) -> (i32, i32) {
    %c0_i32 = arith.constant 0 : i32
    %c0_i32_0 = arith.constant 0 : i32
    %c0_i32_1 = arith.constant 0 : i32
    return %c0_i32, %c0_i32_0 : i32, i32
  }
  func.func @transform_3(%arg0: i32) -> (i32, i32) {
    %c0_i32 = arith.constant 0 : i32
    %c0_i32_0 = arith.constant 0 : i32
    return %arg0, %c0_i32 : i32, i32
  }
}

module attributes {stable_mosaic.version = 11 : i64} {
  func.func @_mm_bias_res_kernel(%arg0: i32, %arg1: memref<8x576xbf16, #tpu.memory_space<vmem>>, %arg2: memref<576x64xbf16, #tpu.memory_space<vmem>>, %arg3: memref<1x64xf32, #tpu.memory_space<vmem>>, %arg4: memref<8x64xf32, #tpu.memory_space<vmem>>, %arg5: memref<8x64xf32, #tpu.memory_space<vmem>>) attributes {dimension_semantics = [#tpu.dimension_semantics<parallel>], iteration_bounds = array<i64: 1>, scalar_prefetch = 0 : i64, scratch_operands = 0 : i64, tpu.core_type = #tpu.core_type<tc>, window_params = [{transform_indices = @transform_0, window_bounds = array<i64: 8, 576>}, {pipeline_mode = #tpu.pipeline_mode<synchronous>, transform_indices = @transform_1, window_bounds = array<i64: 576, 64>}, {pipeline_mode = #tpu.pipeline_mode<synchronous>, transform_indices = @transform_2, window_bounds = array<i64: 1, 64>}, {transform_indices = @transform_3, window_bounds = array<i64: 8, 64>}, {transform_indices = @transform_4, window_bounds = array<i64: 8, 64>}]} {
    %c0 = arith.constant 0 : index
    %c0_0 = arith.constant 0 : index
    %0 = vector.load %arg1[%c0, %c0_0] : memref<8x576xbf16, #tpu.memory_space<vmem>>, vector<8x576xbf16>
    %c0_1 = arith.constant 0 : index
    %c0_2 = arith.constant 0 : index
    %1 = vector.load %arg2[%c0_1, %c0_2] : memref<576x64xbf16, #tpu.memory_space<vmem>>, vector<576x64xbf16>
    %cst = arith.constant dense<0.000000e+00> : vector<8x64xf32>
    %2 = tpu.matmul %0, %1, %cst {dimension_numbers = #tpu.dot_dimension_numbers<[1], [0], [0], [1], [0, 0, 1, 1], [], []>} : vector<8x576xbf16>, vector<576x64xbf16>, vector<8x64xf32> -> vector<8x64xf32>
    %c0_3 = arith.constant 0 : index
    %c0_4 = arith.constant 0 : index
    %3 = vector.load %arg3[%c0_3, %c0_4] : memref<1x64xf32, #tpu.memory_space<vmem>>, vector<1x64xf32>
    %4 = vector.broadcast %3 : vector<1x64xf32> to vector<8x64xf32>
    %5 = arith.addf %2, %4 : vector<8x64xf32>
    %c0_5 = arith.constant 0 : index
    %c0_6 = arith.constant 0 : index
    %6 = vector.load %arg4[%c0_5, %c0_6] : memref<8x64xf32, #tpu.memory_space<vmem>>, vector<8x64xf32>
    %7 = arith.addf %5, %6 : vector<8x64xf32>
    %cst_7 = arith.constant 0.000000e+00 : f32
    %8 = vector.broadcast %cst_7 : f32 to vector<8x64xf32>
    %9 = arith.maximumf %7, %8 : vector<8x64xf32>
    %c0_8 = arith.constant 0 : index
    %c0_9 = arith.constant 0 : index
    %10 = vector.load %arg5[%c0_8, %c0_9] : memref<8x64xf32, #tpu.memory_space<vmem>>, vector<8x64xf32>
    tpu.vector_store %arg5[%c0_8, %c0_9], %9 {strides = array<i32>} : memref<8x64xf32, #tpu.memory_space<vmem>>, vector<8x64xf32>,
    return
  }
  func.func @transform_0(%arg0: i32) -> (i32, i32) {
    %c0_i32 = arith.constant 0 : i32
    %c0_i32_0 = arith.constant 0 : i32
    return %arg0, %c0_i32 : i32, i32
  }
  func.func @transform_1(%arg0: i32) -> (i32, i32) {
    %c0_i32 = arith.constant 0 : i32
    %c0_i32_0 = arith.constant 0 : i32
    %c0_i32_1 = arith.constant 0 : i32
    return %c0_i32, %c0_i32_0 : i32, i32
  }
  func.func @transform_2(%arg0: i32) -> (i32, i32) {
    %c0_i32 = arith.constant 0 : i32
    %c0_i32_0 = arith.constant 0 : i32
    %c0_i32_1 = arith.constant 0 : i32
    return %c0_i32, %c0_i32_0 : i32, i32
  }
  func.func @transform_3(%arg0: i32) -> (i32, i32) {
    %c0_i32 = arith.constant 0 : i32
    %c0_i32_0 = arith.constant 0 : i32
    return %arg0, %c0_i32 : i32, i32
  }
  func.func @transform_4(%arg0: i32) -> (i32, i32) {
    %c0_i32 = arith.constant 0 : i32
    %c0_i32_0 = arith.constant 0 : i32
    return %arg0, %c0_i32 : i32, i32
  }
}

module attributes {stable_mosaic.version = 11 : i64} {
  func.func @_sum_relu_kernel(%arg0: i32, %arg1: memref<8x128xf32, #tpu.memory_space<vmem>>, %arg2: memref<8x128xf32, #tpu.memory_space<vmem>>, %arg3: memref<8x128xf32, #tpu.memory_space<vmem>>, %arg4: memref<8x128xf32, #tpu.memory_space<vmem>>, %arg5: memref<8x128xf32, #tpu.memory_space<vmem>>) attributes {dimension_semantics = [#tpu.dimension_semantics<parallel>], iteration_bounds = array<i64: 1>, scalar_prefetch = 0 : i64, scratch_operands = 0 : i64, tpu.core_type = #tpu.core_type<tc>, window_params = [{transform_indices = @transform_0, window_bounds = array<i64: 8, 128>}, {transform_indices = @transform_1, window_bounds = array<i64: 8, 128>}, {transform_indices = @transform_2, window_bounds = array<i64: 8, 128>}, {transform_indices = @transform_3, window_bounds = array<i64: 8, 128>}, {transform_indices = @transform_4, window_bounds = array<i64: 8, 128>}]} {
    %c0 = arith.constant 0 : index
    %c0_0 = arith.constant 0 : index
    %0 = vector.load %arg1[%c0, %c0_0] : memref<8x128xf32, #tpu.memory_space<vmem>>, vector<8x128xf32>
    %c0_1 = arith.constant 0 : index
    %c0_2 = arith.constant 0 : index
    %1 = vector.load %arg2[%c0_1, %c0_2] : memref<8x128xf32, #tpu.memory_space<vmem>>, vector<8x128xf32>
    %2 = arith.addf %0, %1 : vector<8x128xf32>
    %c0_3 = arith.constant 0 : index
    %c0_4 = arith.constant 0 : index
    %3 = vector.load %arg3[%c0_3, %c0_4] : memref<8x128xf32, #tpu.memory_space<vmem>>, vector<8x128xf32>
    %4 = arith.addf %2, %3 : vector<8x128xf32>
    %c0_5 = arith.constant 0 : index
    %c0_6 = arith.constant 0 : index
    %5 = vector.load %arg4[%c0_5, %c0_6] : memref<8x128xf32, #tpu.memory_space<vmem>>, vector<8x128xf32>
    %6 = arith.addf %4, %5 : vector<8x128xf32>
    %cst = arith.constant 0.000000e+00 : f32
    %7 = vector.broadcast %cst : f32 to vector<8x128xf32>
    %8 = arith.maximumf %6, %7 : vector<8x128xf32>
    %c0_7 = arith.constant 0 : index
    %c0_8 = arith.constant 0 : index
    %9 = vector.load %arg5[%c0_7, %c0_8] : memref<8x128xf32, #tpu.memory_space<vmem>>, vector<8x128xf32>
    tpu.vector_store %arg5[%c0_7, %c0_8], %8 {strides = array<i32>} : memref<8x128xf32, #tpu.memory_space<vmem>>, vector<8x128xf32>,
    return
  }
  func.func @transform_0(%arg0: i32) -> (i32, i32) {
    %c0_i32 = arith.constant 0 : i32
    %c0_i32_0 = arith.constant 0 : i32
    return %arg0, %c0_i32 : i32, i32
  }
  func.func @transform_1(%arg0: i32) -> (i32, i32) {
    %c0_i32 = arith.constant 0 : i32
    %c0_i32_0 = arith.constant 0 : i32
    return %arg0, %c0_i32 : i32, i32
  }
  func.func @transform_2(%arg0: i32) -> (i32, i32) {
    %c0_i32 = arith.constant 0 : i32
    %c0_i32_0 = arith.constant 0 : i32
    return %arg0, %c0_i32 : i32, i32
  }
  func.func @transform_3(%arg0: i32) -> (i32, i32) {
    %c0_i32 = arith.constant 0 : i32
    %c0_i32_0 = arith.constant 0 : i32
    return %arg0, %c0_i32 : i32, i32
  }
  func.func @transform_4(%arg0: i32) -> (i32, i32) {
    %c0_i32 = arith.constant 0 : i32
    %c0_i32_0 = arith.constant 0 : i32
    return %arg0, %c0_i32 : i32, i32
  }
}

module attributes {stable_mosaic.version = 11 : i64} {
  func.func @_mm_bias_kernel(%arg0: i32, %arg1: memref<8x64xbf16, #tpu.memory_space<vmem>>, %arg2: memref<64x56xbf16, #tpu.memory_space<vmem>>, %arg3: memref<1x56xf32, #tpu.memory_space<vmem>>, %arg4: memref<8x56xf32, #tpu.memory_space<vmem>>) attributes {dimension_semantics = [#tpu.dimension_semantics<parallel>], iteration_bounds = array<i64: 1>, scalar_prefetch = 0 : i64, scratch_operands = 0 : i64, tpu.core_type = #tpu.core_type<tc>, window_params = [{transform_indices = @transform_0, window_bounds = array<i64: 8, 64>}, {pipeline_mode = #tpu.pipeline_mode<synchronous>, transform_indices = @transform_1, window_bounds = array<i64: 64, 56>}, {pipeline_mode = #tpu.pipeline_mode<synchronous>, transform_indices = @transform_2, window_bounds = array<i64: 1, 56>}, {transform_indices = @transform_3, window_bounds = array<i64: 8, 56>}]} {
    %c0 = arith.constant 0 : index
    %c0_0 = arith.constant 0 : index
    %0 = vector.load %arg1[%c0, %c0_0] : memref<8x64xbf16, #tpu.memory_space<vmem>>, vector<8x64xbf16>
    %c0_1 = arith.constant 0 : index
    %c0_2 = arith.constant 0 : index
    %1 = vector.load %arg2[%c0_1, %c0_2] : memref<64x56xbf16, #tpu.memory_space<vmem>>, vector<64x56xbf16>
    %cst = arith.constant dense<0.000000e+00> : vector<8x56xf32>
    %2 = tpu.matmul %0, %1, %cst {dimension_numbers = #tpu.dot_dimension_numbers<[1], [0], [0], [1], [0, 0, 1, 1], [], []>} : vector<8x64xbf16>, vector<64x56xbf16>, vector<8x56xf32> -> vector<8x56xf32>
    %c0_3 = arith.constant 0 : index
    %c0_4 = arith.constant 0 : index
    %3 = vector.load %arg3[%c0_3, %c0_4] : memref<1x56xf32, #tpu.memory_space<vmem>>, vector<1x56xf32>
    %4 = vector.broadcast %3 : vector<1x56xf32> to vector<8x56xf32>
    %5 = arith.addf %2, %4 : vector<8x56xf32>
    %c0_5 = arith.constant 0 : index
    %c0_6 = arith.constant 0 : index
    %6 = vector.load %arg4[%c0_5, %c0_6] : memref<8x56xf32, #tpu.memory_space<vmem>>, vector<8x56xf32>
    tpu.vector_store %arg4[%c0_5, %c0_6], %5 {strides = array<i32>} : memref<8x56xf32, #tpu.memory_space<vmem>>, vector<8x56xf32>,
    return
  }
  func.func @transform_0(%arg0: i32) -> (i32, i32) {
    %c0_i32 = arith.constant 0 : i32
    %c0_i32_0 = arith.constant 0 : i32
    return %arg0, %c0_i32 : i32, i32
  }
  func.func @transform_1(%arg0: i32) -> (i32, i32) {
    %c0_i32 = arith.constant 0 : i32
    %c0_i32_0 = arith.constant 0 : i32
    %c0_i32_1 = arith.constant 0 : i32
    return %c0_i32, %c0_i32_0 : i32, i32
  }
  func.func @transform_2(%arg0: i32) -> (i32, i32) {
    %c0_i32 = arith.constant 0 : i32
    %c0_i32_0 = arith.constant 0 : i32
    %c0_i32_1 = arith.constant 0 : i32
    return %c0_i32, %c0_i32_0 : i32, i32
  }
  func.func @transform_3(%arg0: i32) -> (i32, i32) {
    %c0_i32 = arith.constant 0 : i32
    %c0_i32_0 = arith.constant 0 : i32
    return %arg0, %c0_i32 : i32, i32
  }
}

</mosaic_0001>

<bundles_post_ra>
// kernel: _lambda_.58
= control target key start
LH: loop header
LB: loop body
LE: loop exit
PB: predicated region body
PF: predicated region fallthrough
CT: control target
= control target key end

     0   :  { %s807_s12 = smov 0   ;;  %s971_s0 = inlined_call_operand.vmem [shape: bf16[512,27], index: 0, kind: input, shape index: {}]   ;;  %s972_s1 = inlined_call_operand.vmem [shape: bf16[27,64], index: 1, kind: input, shape index: {}]   ;;  %s973_s2 = inlined_call_operand.vmem [shape: f32[1,64], index: 2, kind: input, shape index: {}]   ;;  %s974_s3 = inlined_call_operand.vmem [shape: f32[512,64], index: 3, kind: output, shape index: {}]  }
   0x1 LB: > { %s647_s13 = sadd.s32 4294967295, %s784_s12   ;;  %p651_p0 = scmp.ge.s32.totalorder %s784_s12, 1  ;;  %s784_s12 = sphi %s807_s12, %s13_s12  }
   0x2   : > { %p138_p1 = scmp.lt.s32.totalorder %s784_s12, 3 }
   0x4   : > { %p139_p2 = pnand %p651_p0, %p138_p1 }
   0x5   : > { %v760_v0 = vld [vmem:[%s972_s1] sm:$0xff] (!%p139_p2)   ;;  %vm358_vm0 = vcmask (!%p139_p2), 1044480   ;;  %v761_v1 = vld [vmem:[%s972_s1 + $0x8] sm:$0x3f] (!%p139_p2)   ;;  %vm359_vm1 = vcmask (!%p139_p2), 1045504   ;;  %s652_s18 = sshll.u32 (!%p139_p2), %s647_s13, 5 }
   0x6   : > { %142 = sbr.rel (%p139_p2) target bundleno = 263 (0x107), region = 32  ;;  %711 = vmatprep.subr.bf16.mxu0 (!%p139_p2), %v760_v0  ;;  %747 = vmatprep.subr.bf16.mxu1 (!%p139_p2), %v760_v0  ;;  %v786_v2 = vmov (!%p139_p2), 65535   ;;  %p163_p3 = scmp.lt.s32.totalorder (!%p139_p2), %s652_s18, 63  ;;  %vm309_vm2 = vcmask (!%p139_p2), 220160   ;;  %v864_v22 = vld [vmem:[%s973_s2] ss:$0 sm:$0xff] (!%p139_p2) }
   0x7   : > { %712 = vmatpush3.bf16.msra.mxu0 (!%p139_p2), %v760_v0  ;;  %749 = vmatpush3.bf16.msra.mxu1 (!%p139_p2), %v760_v0  ;;  %v360_v3 = vsel (!%p139_p2), %vm358_vm0, 4294967295, %v786_v2  ;;  %vm558_vm3 = vcmask (!%p139_p2), 523264  }
   0x8   : > { %v361_v4 = vsel (!%p139_p2), %vm359_vm1, %v360_v3, 0 }
   0x9   : > { %v363_v5 = vand.u32 (!%p139_p2), %v761_v1, %v361_v4 }
   0xb   : > { %713 = vmatprep.subr.bf16.mxu0 (!%p139_p2), %v363_v5  ;;  %748 = vmatprep.subr.bf16.mxu1 (!%p139_p2), %v363_v5 }
   0xc   : > { %714 = vmatpush3.bf16.msra.mxu0 (!%p139_p2), %v363_v5  ;;  %750 = vmatpush3.bf16.msra.mxu1 (!%p139_p2), %v363_v5 }
   0xd   : > { %s976_s18 = smov (!%p163_p3, %s652_s18), 63 }
   0xe   : > { %s653_s19 = sshll.u32 %s976_s18, 2  ;;  %s655_s25 = sshll.u32 %s976_s18, 3 }
   0xf   : > { %s827_s22 = scalar_lea.vmem %s971_s0, %s653_s19  ;;  %s871_s28 = scalar_lea.vmem %s974_s3, %s655_s25 }
  0x10   : > { %v762_v6 = vld [vmem:[%s827_s22] sm:$0xff]   ;;  %v764_v8 = vld [vmem:[%s827_s22 + $0x8] sm:$0xff]   ;;  %v766_v10 = vld [vmem:[%s827_s22 + $0x10] sm:$0xff]  }
  0x11   : > { %v763_v7 = vld [vmem:[%s827_s22 + $0x40] sm:$0xff]   ;;  %715 = vmatprep.mubr.msk.bf16.mxu0 %vm309_vm2, %v762_v6  ;;  %v765_v9 = vld [vmem:[%s827_s22 + $0x48] sm:$0xff]   ;;  %v767_v11 = vld [vmem:[%s827_s22 + $0x50] sm:$0xff]  }
  0x12   : > { %731 = vmatprep.mubr.msk.bf16.mxu1 %vm309_vm2, %v763_v7  ;;  %716 = vmatmul.mubr.msk.bf16.vlgmr.msra.gmra.mrb[0].mxu0 %vm309_vm2, %v764_v8  ;;  %v768_v12 = vld [vmem:[%s827_s22 + $0x18] sm:$0xff]   ;;  %v770_v14 = vld [vmem:[%s827_s22 + $0x20] sm:$0xff]   ;;  %v772_v16 = vld [vmem:[%s827_s22 + $0x28] sm:$0xff]  }
  0x13   : > { %732 = vmatmul.mubr.msk.bf16.vlgmr.msra.gmra.mrb[0].mxu1 %vm309_vm2, %v765_v9  ;;  %719 = vmatprep.mubr.msk.bf16.mxu0 %vm309_vm2, %v766_v10  ;;  %v769_v13 = vld [vmem:[%s827_s22 + $0x58] sm:$0xff]   ;;  %v771_v15 = vld [vmem:[%s827_s22 + $0x60] sm:$0xff]   ;;  %v773_v17 = vld [vmem:[%s827_s22 + $0x68] sm:$0xff]  }
  0x14   : > { %735 = vmatprep.mubr.msk.bf16.mxu1 %vm309_vm2, %v767_v11  ;;  %v774_v18 = vld [vmem:[%s827_s22 + $0x30] sm:$0xff]   ;;  %v776_v20 = vld [vmem:[%s827_s22 + $0x38] sm:$0xff]  }
  0x15   : > { %v775_v19 = vld [vmem:[%s827_s22 + $0x70] sm:$0xff]   ;;  %v777_v21 = vld [vmem:[%s827_s22 + $0x78] sm:$0xff]  }
  0x1a   : > { %720 = vmatmul.mubr.msk.bf16.gmra.mrb[4].mxu0 %vm309_vm2, %v768_v12 }
  0x1b   : > { %736 = vmatmul.mubr.msk.bf16.gmra.mrb[4].mxu1 %vm309_vm2, %v769_v13  ;;  %723 = vmatprep.mubr.msk.bf16.mxu0 %vm309_vm2, %v770_v14 }
  0x1c   : > { %739 = vmatprep.mubr.msk.bf16.mxu1 %vm309_vm2, %v771_v15 }
  0x22   : > { %724 = vmatmul.mubr.msk.bf16.gmra.mrb[8].mxu0 %vm309_vm2, %v772_v16 }
  0x23   : > { %740 = vmatmul.mubr.msk.bf16.gmra.mrb[8].mxu1 %vm309_vm2, %v773_v17  ;;  %727 = vmatprep.mubr.msk.bf16.mxu0 %vm309_vm2, %v774_v18 }
  0x24   : > { %743 = vmatprep.mubr.msk.bf16.mxu1 %vm309_vm2, %v775_v19 }
  0x2a   : > { %728 = vmatmul.mubr.msk.bf16.gmra.mrb[12].mxu0 %vm309_vm2, %v776_v20 }
  0x2b   : > { %744 = vmatmul.mubr.msk.bf16.gmra.mrb[12].mxu1 %vm309_vm2, %v777_v21 }
  0xe5   : > { %v717_v23 = vpop.f32.mrb[0].mxu0 }
  0xe6   : > { %v408_v24 = vadd.f32 %v717_v23, %v864_v22  ;;  %v733_v25 = vpop.f32.mrb[0].mxu1  ;;  %v399_v26 = vpop.f32.mrb[1].mxu0 }
  0xe7   : > { %v472_v27 = vadd.f32 %v733_v25, %v864_v22  ;;  %v400_v28 = vadd.f32 %v864_v22, %v399_v26  ;;  %v463_v29 = vpop.f32.mrb[1].mxu1  ;;  %v718_v30 = vpop.f32.mrb[2].mxu0 }
  0xe8   : > { %v528_v31 = vmax.f32 %v408_v24, 0.0  ;;  %v464_v32 = vadd.f32 %v864_v22, %v463_v29  ;;  %v411_v33 = vadd.f32 %v718_v30, %v864_v22  ;;  %v734_v34 = vpop.f32.mrb[2].mxu1  ;;  %v402_v35 = vpop.f32.mrb[3].mxu0 }
  0xe9   : > { %v544_v36 = vmax.f32 %v472_v27, 0.0  ;;  %v526_v37 = vmax.f32 %v400_v28, 0.0  ;;  %v475_v38 = vadd.f32 %v734_v34, %v864_v22  ;;  %v403_v39 = vadd.f32 %v864_v22, %v402_v35  ;;  %v466_v40 = vpop.f32.mrb[3].mxu1 }
  0xea   : > { %561 = vst.msk [vmem:[%s871_s28 + $0x10] sm:$0xff] %vm558_vm3, %v528_v31  ;;  %v542_v41 = vmax.f32 %v464_v32, 0.0  ;;  %v529_v42 = vmax.f32 %v411_v33, 0.0  ;;  %v467_v43 = vadd.f32 %v864_v22, %v466_v40 }
  0xeb   : > { %577 = vst.msk [vmem:[%s871_s28 + $0x90] sm:$0xff] %vm558_vm3, %v544_v36  ;;  %559 = vst.msk [vmem:[%s871_s28] sm:$0xff] %vm558_vm3, %v526_v37  ;;  %v545_v44 = vmax.f32 %v475_v38, 0.0  ;;  %v527_v45 = vmax.f32 %v403_v39, 0.0 }
  0xec   : > { %575 = vst.msk [vmem:[%s871_s28 + $0x80] sm:$0xff] %vm558_vm3, %v542_v41  ;;  %562 = vst.msk [vmem:[%s871_s28 + $0x18] sm:$0xff] %vm558_vm3, %v529_v42  ;;  %v543_v46 = vmax.f32 %v467_v43, 0.0 }
  0xed   : > { %578 = vst.msk [vmem:[%s871_s28 + $0x98] sm:$0xff] %vm558_vm3, %v545_v44  ;;  %560 = vst.msk [vmem:[%s871_s28 + $0x8] sm:$0xff] %vm558_vm3, %v527_v45  ;;  %v721_v47 = vpop.f32.mrb[4].mxu0 }
  0xee   : > { %576 = vst.msk [vmem:[%s871_s28 + $0x88] sm:$0xff] %vm558_vm3, %v543_v46  ;;  %v424_v48 = vadd.f32 %v721_v47, %v864_v22  ;;  %v737_v49 = vpop.f32.mrb[4].mxu1  ;;  %v415_v50 = vpop.f32.mrb[5].mxu0 }
  0xef   : > { %v488_v51 = vadd.f32 %v737_v49, %v864_v22  ;;  %v416_v52 = vadd.f32 %v864_v22, %v415_v50  ;;  %v479_v53 = vpop.f32.mrb[5].mxu1  ;;  %v722_v54 = vpop.f32.mrb[6].mxu0 }
  0xf0   : > { %v532_v55 = vmax.f32 %v424_v48, 0.0  ;;  %v480_v56 = vadd.f32 %v864_v22, %v479_v53  ;;  %v427_v57 = vadd.f32 %v722_v54, %v864_v22  ;;  %v738_v58 = vpop.f32.mrb[6].mxu1  ;;  %v418_v59 = vpop.f32.mrb[7].mxu0 }
  0xf1   : > { %v548_v60 = vmax.f32 %v488_v51, 0.0  ;;  %v530_v61 = vmax.f32 %v416_v52, 0.0  ;;  %v491_v62 = vadd.f32 %v738_v58, %v864_v22  ;;  %v419_v63 = vadd.f32 %v864_v22, %v418_v59  ;;  %v482_v0 = vpop.f32.mrb[7].mxu1 }
  0xf2   : > { %565 = vst.msk [vmem:[%s871_s28 + $0x30] sm:$0xff] %vm558_vm3, %v532_v55  ;;  %v546_v1 = vmax.f32 %v480_v56, 0.0  ;;  %v533_v2 = vmax.f32 %v427_v57, 0.0  ;;  %v483_v3 = vadd.f32 %v864_v22, %v482_v0 }
  0xf3   : > { %581 = vst.msk [vmem:[%s871_s28 + $0xb0] sm:$0xff] %vm558_vm3, %v548_v60  ;;  %563 = vst.msk [vmem:[%s871_s28 + $0x20] sm:$0xff] %vm558_vm3, %v530_v61  ;;  %v549_v4 = vmax.f32 %v491_v62, 0.0  ;;  %v531_v5 = vmax.f32 %v419_v63, 0.0 }
  0xf4   : > { %579 = vst.msk [vmem:[%s871_s28 + $0xa0] sm:$0xff] %vm558_vm3, %v546_v1  ;;  %566 = vst.msk [vmem:[%s871_s28 + $0x38] sm:$0xff] %vm558_vm3, %v533_v2  ;;  %v547_v6 = vmax.f32 %v483_v3, 0.0 }
  0xf5   : > { %582 = vst.msk [vmem:[%s871_s28 + $0xb8] sm:$0xff] %vm558_vm3, %v549_v4  ;;  %564 = vst.msk [vmem:[%s871_s28 + $0x28] sm:$0xff] %vm558_vm3, %v531_v5  ;;  %v725_v7 = vpop.f32.mrb[8].mxu0 }
  0xf6   : > { %580 = vst.msk [vmem:[%s871_s28 + $0xa8] sm:$0xff] %vm558_vm3, %v547_v6  ;;  %v440_v8 = vadd.f32 %v725_v7, %v864_v22  ;;  %v741_v9 = vpop.f32.mrb[8].mxu1  ;;  %v431_v10 = vpop.f32.mrb[9].mxu0 }
  0xf7   : > { %v504_v11 = vadd.f32 %v741_v9, %v864_v22  ;;  %v432_v12 = vadd.f32 %v864_v22, %v431_v10  ;;  %v495_v13 = vpop.f32.mrb[9].mxu1  ;;  %v726_v14 = vpop.f32.mrb[10].mxu0 }
  0xf8   : > { %v536_v15 = vmax.f32 %v440_v8, 0.0  ;;  %v496_v16 = vadd.f32 %v864_v22, %v495_v13  ;;  %v443_v17 = vadd.f32 %v726_v14, %v864_v22  ;;  %v742_v18 = vpop.f32.mrb[10].mxu1  ;;  %v434_v19 = vpop.f32.mrb[11].mxu0 }
  0xf9   : > { %v552_v20 = vmax.f32 %v504_v11, 0.0  ;;  %v534_v21 = vmax.f32 %v432_v12, 0.0  ;;  %v507_v23 = vadd.f32 %v742_v18, %v864_v22  ;;  %v435_v24 = vadd.f32 %v864_v22, %v434_v19  ;;  %v498_v25 = vpop.f32.mrb[11].mxu1 }
  0xfa   : > { %569 = vst.msk [vmem:[%s871_s28 + $0x50] sm:$0xff] %vm558_vm3, %v536_v15  ;;  %v550_v26 = vmax.f32 %v496_v16, 0.0  ;;  %v537_v27 = vmax.f32 %v443_v17, 0.0  ;;  %v499_v28 = vadd.f32 %v864_v22, %v498_v25 }
  0xfb   : > { %585 = vst.msk [vmem:[%s871_s28 + $0xd0] sm:$0xff] %vm558_vm3, %v552_v20  ;;  %567 = vst.msk [vmem:[%s871_s28 + $0x40] sm:$0xff] %vm558_vm3, %v534_v21  ;;  %v553_v29 = vmax.f32 %v507_v23, 0.0  ;;  %v535_v30 = vmax.f32 %v435_v24, 0.0 }
  0xfc   : > { %583 = vst.msk [vmem:[%s871_s28 + $0xc0] sm:$0xff] %vm558_vm3, %v550_v26  ;;  %570 = vst.msk [vmem:[%s871_s28 + $0x58] sm:$0xff] %vm558_vm3, %v537_v27  ;;  %v551_v31 = vmax.f32 %v499_v28, 0.0 }
  0xfd   : > { %586 = vst.msk [vmem:[%s871_s28 + $0xd8] sm:$0xff] %vm558_vm3, %v553_v29  ;;  %568 = vst.msk [vmem:[%s871_s28 + $0x48] sm:$0xff] %vm558_vm3, %v535_v30  ;;  %v729_v32 = vpop.f32.mrb[12].mxu0 }
  0xfe   : > { %584 = vst.msk [vmem:[%s871_s28 + $0xc8] sm:$0xff] %vm558_vm3, %v551_v31  ;;  %v456_v33 = vadd.f32 %v729_v32, %v864_v22  ;;  %v745_v34 = vpop.f32.mrb[12].mxu1  ;;  %v447_v35 = vpop.f32.mrb[13].mxu0 }
  0xff   : > { %v520_v36 = vadd.f32 %v745_v34, %v864_v22  ;;  %v448_v37 = vadd.f32 %v864_v22, %v447_v35  ;;  %v511_v38 = vpop.f32.mrb[13].mxu1  ;;  %v730_v39 = vpop.f32.mrb[14].mxu0 }
 0x100   : > { %v540_v40 = vmax.f32 %v456_v33, 0.0  ;;  %v512_v41 = vadd.f32 %v864_v22, %v511_v38  ;;  %v459_v42 = vadd.f32 %v730_v39, %v864_v22  ;;  %v746_v43 = vpop.f32.mrb[14].mxu1  ;;  %v450_v44 = vpop.f32.mrb[15].mxu0 }
 0x101   : > { %v556_v45 = vmax.f32 %v520_v36, 0.0  ;;  %v538_v46 = vmax.f32 %v448_v37, 0.0  ;;  %v523_v47 = vadd.f32 %v746_v43, %v864_v22  ;;  %v451_v48 = vadd.f32 %v864_v22, %v450_v44  ;;  %v514_v49 = vpop.f32.mrb[15].mxu1 }
 0x102   : > { %573 = vst.msk [vmem:[%s871_s28 + $0x70] sm:$0xff] %vm558_vm3, %v540_v40  ;;  %v554_v50 = vmax.f32 %v512_v41, 0.0  ;;  %v541_v51 = vmax.f32 %v459_v42, 0.0  ;;  %v515_v52 = vadd.f32 %v864_v22, %v514_v49 }
 0x103   : > { %589 = vst.msk [vmem:[%s871_s28 + $0xf0] sm:$0xff] %vm558_vm3, %v556_v45  ;;  %571 = vst.msk [vmem:[%s871_s28 + $0x60] sm:$0xff] %vm558_vm3, %v538_v46  ;;  %v557_v53 = vmax.f32 %v523_v47, 0.0  ;;  %v539_v54 = vmax.f32 %v451_v48, 0.0 }
 0x104   : > { %587 = vst.msk [vmem:[%s871_s28 + $0xe0] sm:$0xff] %vm558_vm3, %v554_v50  ;;  %574 = vst.msk [vmem:[%s871_s28 + $0x78] sm:$0xff] %vm558_vm3, %v541_v51  ;;  %v555_v55 = vmax.f32 %v515_v52, 0.0 }
 0x105   : > { %590 = vst.msk [vmem:[%s871_s28 + $0xf8] sm:$0xff] %vm558_vm3, %v557_v53  ;;  %572 = vst.msk [vmem:[%s871_s28 + $0x68] sm:$0xff] %vm558_vm3, %v539_v54 }
 0x106   : > { %588 = vst.msk [vmem:[%s871_s28 + $0xe8] sm:$0xff] %vm558_vm3, %v555_v55 }
 0x107 PF: > { %s13_s12 = sadd.s32 1, %s784_s12  }
 0x108   : > { %p10_p4 = scmp.ge.s32.totalorder %s13_s12, 4  }
 0x10a   :  { %12 = sbr.rel (!%p10_p4) target bundleno = 1 (0x1), region = 62 }

// kernel: _lambda_.61
= control target key start
LH: loop header
LB: loop body
LE: loop exit
PB: predicated region body
PF: predicated region fallthrough
CT: control target
= control target key end

     0   :  { %vm110_vm0 = vcmask 523264   ;;  %vm248_vm1 = vcmask 64512   ;;  %s477_s1 = inlined_call_operand.vmem [shape: bf16[64,8], index: 1, kind: input, shape index: {}]   ;;  %s478_s0 = inlined_call_operand.vmem [shape: bf16[128,64], index: 0, kind: input, shape index: {}]   ;;  %s479_s2 = inlined_call_operand.vmem [shape: f32[1,8], index: 2, kind: input, shape index: {}]   ;;  %s480_s3 = inlined_call_operand.vmem [shape: f32[128,8], index: 3, kind: output, shape index: {}]  }
   0x1   :  { %v334_v0 = vld [vmem:[%s477_s1] sm:$0xff]   ;;  %v335_v1 = vld [vmem:[%s477_s1 + $0x8] sm:$0xff]   ;;  %v336_v2 = vld [vmem:[%s477_s1 + $0x10] sm:$0xff]  }
   0x2   :  { %302 = vmatprep.subr.bf16.mxu0 %v334_v0  ;;  %326 = vmatprep.subr.bf16.mxu1 %v334_v0  ;;  %v338_v3 = vld [vmem:[%s478_s0] sm:$0xff]   ;;  %v337_v5 = vld [vmem:[%s477_s1 + $0x18] sm:$0xff]   ;;  %v340_v6 = vld [vmem:[%s478_s0 + $0x8] sm:$0xff]  }
   0x3   :  { %303 = vmatpush3.bf16.msra.mxu0 %v334_v0  ;;  %330 = vmatpush3.bf16.msra.mxu1 %v334_v0  ;;  %v339_v4 = vld [vmem:[%s478_s0 + $0x20] sm:$0xff]   ;;  %v341_v7 = vld [vmem:[%s478_s0 + $0x28] sm:$0xff]   ;;  %v342_v8 = vld [vmem:[%s478_s0 + $0x10] sm:$0xff]  }
   0x4   :  { %304 = vmatprep.subr.bf16.mxu0 %v335_v1  ;;  %327 = vmatprep.subr.bf16.mxu1 %v335_v1  ;;  %v343_v9 = vld [vmem:[%s478_s0 + $0x30] sm:$0xff]   ;;  %v344_v10 = vld [vmem:[%s478_s0 + $0x18] sm:$0xff]   ;;  %v269_v12 = vld [vmem:[%s479_s2] ss:$0 sm:$0xff] }
   0x5   :  { %310 = vmatprep.mubr.msk.bf16.mxu0 %vm110_vm0, %v338_v3  ;;  %318 = vmatprep.mubr.msk.bf16.mxu1 %vm110_vm0, %v339_v4  ;;  %v345_v11 = vld [vmem:[%s478_s0 + $0x38] sm:$0xff]  }
   0x7   :  { %305 = vmatpush3.bf16.msra.mxu0 %v335_v1  ;;  %331 = vmatpush3.bf16.msra.mxu1 %v335_v1 }
   0x8   :  { %306 = vmatprep.subr.bf16.mxu0 %v336_v2  ;;  %328 = vmatprep.subr.bf16.mxu1 %v336_v2 }
   0xb   :  { %307 = vmatpush3.bf16.msra.mxu0 %v336_v2  ;;  %332 = vmatpush3.bf16.msra.mxu1 %v336_v2 }
   0xc   :  { %308 = vmatprep.subr.bf16.mxu0 %v337_v5  ;;  %329 = vmatprep.subr.bf16.mxu1 %v337_v5 }
   0xf   :  { %309 = vmatpush3.bf16.msra.mxu0 %v337_v5  ;;  %333 = vmatpush3.bf16.msra.mxu1 %v337_v5 }
  0x12   :  { %311 = vmatmul.mubr.msk.bf16.vlgmr.msra.gmra.mrb[0].mxu0 %vm110_vm0, %v340_v6  ;;  %319 = vmatmul.mubr.msk.bf16.vlgmr.msra.gmra.mrb[0].mxu1 %vm110_vm0, %v341_v7 }
  0x13   :  { %314 = vmatprep.mubr.msk.bf16.mxu0 %vm110_vm0, %v342_v8  ;;  %322 = vmatprep.mubr.msk.bf16.mxu1 %vm110_vm0, %v343_v9 }
  0x1a   :  { %315 = vmatmul.mubr.msk.bf16.gmra.mrb[4].mxu0 %vm110_vm0, %v344_v10  ;;  %323 = vmatmul.mubr.msk.bf16.gmra.mrb[4].mxu1 %vm110_vm0, %v345_v11 }
  0xe5   :  { %v312_v13 = vpop.f32.mrb[0].mxu0  ;;  %v320_v14 = vpop.f32.mrb[0].mxu1 }
  0xe6   :  { %v178_v15 = vadd.f32 %v312_v13, %v269_v12  ;;  %v210_v16 = vadd.f32 %v320_v14, %v269_v12  ;;  %v169_v17 = vpop.f32.mrb[1].mxu0  ;;  %v201_v18 = vpop.f32.mrb[1].mxu1 }
  0xe7   :  { %v170_v19 = vadd.f32 %v269_v12, %v169_v17  ;;  %v202_v20 = vadd.f32 %v269_v12, %v201_v18  ;;  %v313_v21 = vpop.f32.mrb[2].mxu0  ;;  %v321_v22 = vpop.f32.mrb[2].mxu1 }
  0xe8   :  { %v234_v23 = vmax.f32 %v178_v15, 0.0  ;;  %v242_v24 = vmax.f32 %v210_v16, 0.0  ;;  %v181_v25 = vadd.f32 %v313_v21, %v269_v12  ;;  %v213_v26 = vadd.f32 %v321_v22, %v269_v12  ;;  %v172_v27 = vpop.f32.mrb[3].mxu0  ;;  %v204_v28 = vpop.f32.mrb[3].mxu1 }
  0xe9   :  { %v232_v29 = vmax.f32 %v170_v19, 0.0  ;;  %v240_v30 = vmax.f32 %v202_v20, 0.0  ;;  %v173_v31 = vadd.f32 %v269_v12, %v172_v27  ;;  %v205_v32 = vadd.f32 %v269_v12, %v204_v28 }
  0xea   :  { %251 = vst.msk [vmem:[%s480_s3 + $0x10] sm:$0xff] %vm248_vm1, %v234_v23  ;;  %259 = vst.msk [vmem:[%s480_s3 + $0x50] sm:$0xff] %vm248_vm1, %v242_v24  ;;  %v235_v33 = vmax.f32 %v181_v25, 0.0  ;;  %v243_v34 = vmax.f32 %v213_v26, 0.0 }
  0xeb   :  { %249 = vst.msk [vmem:[%s480_s3] sm:$0xff] %vm248_vm1, %v232_v29  ;;  %257 = vst.msk [vmem:[%s480_s3 + $0x40] sm:$0xff] %vm248_vm1, %v240_v30  ;;  %v233_v35 = vmax.f32 %v173_v31, 0.0  ;;  %v241_v36 = vmax.f32 %v205_v32, 0.0 }
  0xec   :  { %252 = vst.msk [vmem:[%s480_s3 + $0x18] sm:$0xff] %vm248_vm1, %v235_v33  ;;  %260 = vst.msk [vmem:[%s480_s3 + $0x58] sm:$0xff] %vm248_vm1, %v243_v34 }
  0xed   :  { %250 = vst.msk [vmem:[%s480_s3 + $0x8] sm:$0xff] %vm248_vm1, %v233_v35  ;;  %258 = vst.msk [vmem:[%s480_s3 + $0x48] sm:$0xff] %vm248_vm1, %v241_v36  ;;  %v316_v37 = vpop.f32.mrb[4].mxu0  ;;  %v324_v38 = vpop.f32.mrb[4].mxu1 }
  0xee   :  { %v194_v39 = vadd.f32 %v316_v37, %v269_v12  ;;  %v226_v40 = vadd.f32 %v324_v38, %v269_v12  ;;  %v185_v41 = vpop.f32.mrb[5].mxu0  ;;  %v217_v42 = vpop.f32.mrb[5].mxu1 }
  0xef   :  { %v186_v43 = vadd.f32 %v269_v12, %v185_v41  ;;  %v218_v44 = vadd.f32 %v269_v12, %v217_v42  ;;  %v317_v45 = vpop.f32.mrb[6].mxu0  ;;  %v325_v46 = vpop.f32.mrb[6].mxu1 }
  0xf0   :  { %v238_v47 = vmax.f32 %v194_v39, 0.0  ;;  %v246_v48 = vmax.f32 %v226_v40, 0.0  ;;  %v197_v49 = vadd.f32 %v317_v45, %v269_v12  ;;  %v229_v50 = vadd.f32 %v325_v46, %v269_v12  ;;  %v188_v51 = vpop.f32.mrb[7].mxu0  ;;  %v220_v52 = vpop.f32.mrb[7].mxu1 }
  0xf1   :  { %v236_v53 = vmax.f32 %v186_v43, 0.0  ;;  %v244_v54 = vmax.f32 %v218_v44, 0.0  ;;  %v189_v55 = vadd.f32 %v269_v12, %v188_v51  ;;  %v221_v56 = vadd.f32 %v269_v12, %v220_v52 }
  0xf2   :  { %255 = vst.msk [vmem:[%s480_s3 + $0x30] sm:$0xff] %vm248_vm1, %v238_v47  ;;  %263 = vst.msk [vmem:[%s480_s3 + $0x70] sm:$0xff] %vm248_vm1, %v246_v48  ;;  %v239_v57 = vmax.f32 %v197_v49, 0.0  ;;  %v247_v58 = vmax.f32 %v229_v50, 0.0 }
  0xf3   :  { %253 = vst.msk [vmem:[%s480_s3 + $0x20] sm:$0xff] %vm248_vm1, %v236_v53  ;;  %261 = vst.msk [vmem:[%s480_s3 + $0x60] sm:$0xff] %vm248_vm1, %v244_v54  ;;  %v237_v59 = vmax.f32 %v189_v55, 0.0  ;;  %v245_v60 = vmax.f32 %v221_v56, 0.0 }
  0xf4   :  { %256 = vst.msk [vmem:[%s480_s3 + $0x38] sm:$0xff] %vm248_vm1, %v239_v57  ;;  %264 = vst.msk [vmem:[%s480_s3 + $0x78] sm:$0xff] %vm248_vm1, %v247_v58 }
  0xf5   :  { %254 = vst.msk [vmem:[%s480_s3 + $0x28] sm:$0xff] %vm248_vm1, %v237_v59  ;;  %262 = vst.msk [vmem:[%s480_s3 + $0x68] sm:$0xff] %vm248_vm1, %v245_v60 }

// kernel: _lambda_.59
= control target key start
LH: loop header
LB: loop body
LE: loop exit
PB: predicated region body
PF: predicated region fallthrough
CT: control target
= control target key end

     0   :  { %vm558_vm0 = vcmask 523264   ;;  %s1630_s1 = inlined_call_operand.vmem [shape: bf16[576,64], index: 1, kind: input, shape index: {}]   ;;  %s1631_s0 = inlined_call_operand.vmem [shape: bf16[128,576], index: 0, kind: input, shape index: {}]   ;;  %s1632_s2 = inlined_call_operand.vmem [shape: f32[1,64], index: 2, kind: input, shape index: {}]   ;;  %s1633_s3 = inlined_call_operand.vmem [shape: f32[128,64], index: 3, kind: output, shape index: {}]  }
   0x1   :  { %v1167_v0 = vld [vmem:[%s1630_s1 + $0x40] sm:$0xff]   ;;  %v1171_v4 = vld [vmem:[%s1630_s1 + $0x48] sm:$0xff]   ;;  %v1175_v8 = vld [vmem:[%s1630_s1 + $0x50] sm:$0xff]  }
   0x2   :  { %v1168_v1 = vld [vmem:[%s1630_s1 + $0xc0] sm:$0xff]   ;;  %995 = vmatprep.subr.bf16.mxu0 %v1167_v0  ;;  %v1172_v5 = vld [vmem:[%s1630_s1 + $0xc8] sm:$0xff]   ;;  %v1176_v9 = vld [vmem:[%s1630_s1 + $0xd0] sm:$0xff]  }
   0x3   :  { %v1169_v2 = vld [vmem:[%s1630_s1] sm:$0xff]   ;;  %1059 = vmatprep.subr.bf16.mxu1 %v1168_v1  ;;  %v1173_v6 = vld [vmem:[%s1630_s1 + $0x8] sm:$0xff]   ;;  %v1177_v10 = vld [vmem:[%s1630_s1 + $0x10] sm:$0xff]  }
   0x4   :  { %v1170_v3 = vld [vmem:[%s1630_s1 + $0x80] sm:$0xff]   ;;  %996 = vmatpush3.bf16.msra.mxu0 %v1169_v2  ;;  %v1174_v7 = vld [vmem:[%s1630_s1 + $0x88] sm:$0xff]   ;;  %v1178_v11 = vld [vmem:[%s1630_s1 + $0x90] sm:$0xff]  }
   0x5   :  { %1060 = vmatpush3.bf16.msra.mxu1 %v1170_v3  ;;  %997 = vmatprep.subr.bf16.mxu0 %v1171_v4  ;;  %v1179_v12 = vld [vmem:[%s1630_s1 + $0x58] sm:$0xff]   ;;  %v1183_v16 = vld [vmem:[%s1630_s1 + $0x60] sm:$0xff]   ;;  %v1187_v20 = vld [vmem:[%s1630_s1 + $0x68] sm:$0xff]  }
   0x6   :  { %1061 = vmatprep.subr.bf16.mxu1 %v1172_v5  ;;  %v1180_v13 = vld [vmem:[%s1630_s1 + $0xd8] sm:$0xff]   ;;  %v1184_v17 = vld [vmem:[%s1630_s1 + $0xe0] sm:$0xff]   ;;  %v1188_v21 = vld [vmem:[%s1630_s1 + $0xe8] sm:$0xff]  }
   0x7   :  { %v1181_v14 = vld [vmem:[%s1630_s1 + $0x18] sm:$0xff]   ;;  %v1185_v18 = vld [vmem:[%s1630_s1 + $0x20] sm:$0xff]   ;;  %v1189_v22 = vld [vmem:[%s1630_s1 + $0x28] sm:$0xff]  }
   0x8   :  { %998 = vmatpush3.bf16.msra.mxu0 %v1173_v6  ;;  %v1182_v15 = vld [vmem:[%s1630_s1 + $0x98] sm:$0xff]   ;;  %v1186_v19 = vld [vmem:[%s1630_s1 + $0xa0] sm:$0xff]   ;;  %v1190_v23 = vld [vmem:[%s1630_s1 + $0xa8] sm:$0xff]  }
   0x9   :  { %1062 = vmatpush3.bf16.msra.mxu1 %v1174_v7  ;;  %999 = vmatprep.subr.bf16.mxu0 %v1175_v8  ;;  %v1191_v24 = vld [vmem:[%s1630_s1 + $0x70] sm:$0xff]   ;;  %v1195_v28 = vld [vmem:[%s1630_s1 + $0x78] sm:$0xff]   ;;  %v1204_v35 = vld [vmem:[%s1631_s0 + $0xc] ss:$20 sps:$4 sm:$0xff]  }
   0xa   :  { %1063 = vmatprep.subr.bf16.mxu1 %v1176_v9  ;;  %v1192_v25 = vld [vmem:[%s1630_s1 + $0xf0] sm:$0xff]   ;;  %v1196_v29 = vld [vmem:[%s1630_s1 + $0xf8] sm:$0xff]   ;;  %v1205_v36 = vld [vmem:[%s1630_s1 + $0x100] sm:$0xff]   ;;  %712 = vmatprep.mubr.bf16.mxu1 %v1204_v35 }
   0xb   :  { %v1193_v26 = vld [vmem:[%s1630_s1 + $0x30] sm:$0xff]   ;;  %v1197_v30 = vld [vmem:[%s1630_s1 + $0x38] sm:$0xff]   ;;  %v1206_v37 = vld [vmem:[%s1631_s0 + $0x2c] ss:$20 sps:$4 sm:$0xff]  }
   0xc   :  { %1000 = vmatpush3.bf16.msra.mxu0 %v1177_v10  ;;  %v1194_v27 = vld [vmem:[%s1630_s1 + $0xb0] sm:$0xff]   ;;  %v1198_v31 = vld [vmem:[%s1630_s1 + $0xb8] sm:$0xff]   ;;  %v1218_v42 = vld [vmem:[%s1630_s1 + $0x108] sm:$0xff]  }
   0xd   :  { %1064 = vmatpush3.bf16.msra.mxu1 %v1178_v11  ;;  %1001 = vmatprep.subr.bf16.mxu0 %v1179_v12  ;;  %v1199_v32 = vld [vmem:[%s1631_s0] ss:$20 sps:$4 sm:$0xff]   ;;  %v1201_v33 = vld [vmem:[%s1631_s0 + $0x4] ss:$20 sps:$4 sm:$0xff]   ;;  %v1202_v34 = vld [vmem:[%s1631_s0 + $0x8] ss:$20 sps:$4 sm:$0xff]  }
   0xe   :  { %1065 = vmatprep.subr.bf16.mxu1 %v1180_v13  ;;  %615 = vmatprep.mubr.bf16.mxu0 %v1201_v33  ;;  %v1208_v38 = vld [vmem:[%s1631_s0 + $0x34] ss:$20 sps:$4 sm:$0xff]   ;;  %v1211_v40 = vld [vmem:[%s1631_s0 + $0x30] ss:$20 sps:$4 sm:$0xff]   ;;  %v1217_v45 = vld [vmem:[%s1631_s0 + $0x58] ss:$20 sps:$4 sm:$0xff]  }
   0xf   :  { %v1210_v39 = vld [vmem:[%s1631_s0 + $0x28] ss:$20 sps:$4 sm:$0xff]   ;;  %v1216_v44 = vld [vmem:[%s1631_s0 + $0x50] ss:$20 sps:$4 sm:$0xff]   ;;  %v1223_v50 = vld [vmem:[%s1631_s0 + $0x78] ss:$20 sps:$4 sm:$0xff]  }
  0x10   :  { %1002 = vmatpush3.bf16.msra.mxu0 %v1181_v14  ;;  %v1212_v41 = vld [vmem:[%s1631_s0 + $0x54] ss:$20 sps:$4 sm:$0xff]   ;;  %v1214_v43 = vld [vmem:[%s1631_s0 + $0x5c] ss:$20 sps:$4 sm:$0xff]   ;;  %v1221_v48 = vld [vmem:[%s1631_s0 + $0x84] ss:$20 sps:$4 sm:$0xff]  }
  0x11   :  { %1066 = vmatpush3.bf16.msra.mxu1 %v1182_v15  ;;  %1003 = vmatprep.subr.bf16.mxu0 %v1183_v16  ;;  %v1231_v46 = vld [vmem:[%s1630_s1 + $0x110] sm:$0xff]   ;;  %v1244_v49 = vld [vmem:[%s1630_s1 + $0x118] sm:$0xff]   ;;  %v1227_v53 = vld [vmem:[%s1631_s0 + $0xac] ss:$20 sps:$4 sm:$0xff]  }
  0x12   :  { %1067 = vmatprep.subr.bf16.mxu1 %v1184_v17  ;;  %v1219_v47 = vld [vmem:[%s1631_s0 + $0x7c] ss:$20 sps:$4 sm:$0xff]   ;;  %v1224_v51 = vld [vmem:[%s1631_s0 + $0x80] ss:$20 sps:$4 sm:$0xff]   ;;  %v1225_v52 = vld [vmem:[%s1631_s0 + $0xa4] ss:$20 sps:$4 sm:$0xff]  }
  0x13   :  { %v1229_v54 = vld [vmem:[%s1631_s0 + $0xa0] ss:$20 sps:$4 sm:$0xff]   ;;  %v1230_v55 = vld [vmem:[%s1631_s0 + $0xa8] ss:$20 sps:$4 sm:$0xff]   ;;  %v1237_v59 = vld [vmem:[%s1631_s0 + $0xd0] ss:$20 sps:$4 sm:$0xff]  }
  0x14   :  { %1004 = vmatpush3.bf16.msra.mxu0 %v1185_v18  ;;  %v1232_v56 = vld [vmem:[%s1631_s0 + $0xcc] ss:$20 sps:$4 sm:$0xff]   ;;  %v1234_v57 = vld [vmem:[%s1631_s0 + $0xd4] ss:$20 sps:$4 sm:$0xff]   ;;  %v1240_v61 = vld [vmem:[%s1631_s0 + $0xfc] ss:$20 sps:$4 sm:$0xff]  }
  0x15   :  { %1068 = vmatpush3.bf16.msra.mxu1 %v1186_v19  ;;  %1005 = vmatprep.subr.bf16.mxu0 %v1187_v20  ;;  %v1236_v58 = vld [vmem:[%s1631_s0 + $0xc8] ss:$20 sps:$4 sm:$0xff]   ;;  %v1242_v62 = vld [vmem:[%s1631_s0 + $0xf0] ss:$20 sps:$4 sm:$0xff]   ;;  %v1243_v63 = vld [vmem:[%s1631_s0 + $0xf8] ss:$20 sps:$4 sm:$0xff]  }
  0x16   :  { %1069 = vmatprep.subr.bf16.mxu1 %v1188_v21  ;;  %v1238_v60 = vld [vmem:[%s1631_s0 + $0xf4] ss:$20 sps:$4 sm:$0xff]   ;;  %v1245_v0 = vld [vmem:[%s1631_s0 + $0x11c] ss:$20 sps:$4 sm:$0xff]   ;;  %v1247_v1 = vld [vmem:[%s1631_s0 + $0x124] ss:$20 sps:$4 sm:$0xff]  }
  0x17   :  { %v1249_v2 = vld [vmem:[%s1631_s0 + $0x118] ss:$20 sps:$4 sm:$0xff]   ;;  %v1250_v3 = vld [vmem:[%s1631_s0 + $0x120] ss:$20 sps:$4 sm:$0xff]   ;;  %v1251_v4 = vld [vmem:[%s1631_s0 + $0x10] ss:$20 sps:$4 sm:$0xff]  }
  0x18   :  { %1006 = vmatpush3.bf16.msra.mxu0 %v1189_v22  ;;  %v1252_v5 = vld [vmem:[%s1631_s0 + $0xb0] ss:$20 sps:$4 sm:$0xff]   ;;  %v1253_v6 = vld [vmem:[%s1631_s0 + $0x38] ss:$20 sps:$4 sm:$0xff]   ;;  %v1255_v8 = vld [vmem:[%s1631_s0 + $0x60] ss:$20 sps:$4 sm:$0xff]  }
  0x19   :  { %1070 = vmatpush3.bf16.msra.mxu1 %v1190_v23  ;;  %1007 = vmatprep.subr.bf16.mxu0 %v1191_v24  ;;  %v1254_v7 = vld [vmem:[%s1631_s0 + $0xd8] ss:$20 sps:$4 sm:$0xff]   ;;  %v1256_v9 = vld [vmem:[%s1631_s0 + $0x100] ss:$20 sps:$4 sm:$0xff]   ;;  %v1257_v10 = vld [vmem:[%s1631_s0 + $0x88] ss:$20 sps:$4 sm:$0xff]  }
  0x1a   :  { %1071 = vmatprep.subr.bf16.mxu1 %v1192_v25  ;;  %v1258_v11 = vld [vmem:[%s1631_s0 + $0x128] ss:$20 sps:$4 sm:$0xff]   ;;  %v1518_v14 = vld [vmem:[%s1632_s2] ss:$0 sm:$0xff] }
  0x1c   :  { %1008 = vmatpush3.bf16.msra.mxu0 %v1193_v26 }
  0x1d   :  { %1072 = vmatpush3.bf16.msra.mxu1 %v1194_v27  ;;  %1009 = vmatprep.subr.bf16.mxu0 %v1195_v28 }
  0x1e   :  { %1073 = vmatprep.subr.bf16.mxu1 %v1196_v29 }
  0x20   :  { %1010 = vmatpush3.bf16.msra.mxu0 %v1197_v30 }
  0x21   :  { %1074 = vmatpush3.bf16.msra.mxu1 %v1198_v31  ;;  %1135 = vmatprep.subr.bf16.mxu0 %v1205_v36 }
  0x22   :  { %1159 = vmatprep.subr.bf16.mxu1 %v1205_v36 }
  0x23   :  { %616 = vmatmul.mubr.bf16.vlgmr.msra.gmra.mrb[0].mxu0 %v1199_v32 }
  0x24   :  { %713 = vmatmul.mubr.bf16.vlgmr.msra.gmra.mrb[0].mxu1 %v1202_v34  ;;  %1136 = vmatpush3.bf16.msra.mxu0 %v1205_v36 }
  0x25   :  { %1163 = vmatpush3.bf16.msra.mxu1 %v1205_v36  ;;  %623 = vmatprep.mubr.bf16.mxu0 %v1206_v37 }
  0x26   :  { %720 = vmatprep.mubr.bf16.mxu1 %v1208_v38  ;;  %1137 = vmatprep.subr.bf16.mxu0 %v1218_v42 }
  0x27   :  { %1160 = vmatprep.subr.bf16.mxu1 %v1218_v42 }
  0x28   :  { %1138 = vmatpush3.bf16.msra.mxu0 %v1218_v42 }
  0x29   :  { %1164 = vmatpush3.bf16.msra.mxu1 %v1218_v42  ;;  %1139 = vmatprep.subr.bf16.mxu0 %v1231_v46 }
  0x2a   :  { %1161 = vmatprep.subr.bf16.mxu1 %v1231_v46 }
  0x2b   :  { %624 = vmatmul.mubr.bf16.gmra.mrb[4].mxu0 %v1210_v39 }
  0x2c   :  { %721 = vmatmul.mubr.bf16.gmra.mrb[4].mxu1 %v1211_v40  ;;  %631 = vmatprep.mubr.bf16.mxu0 %v1212_v41 }
  0x2d   :  { %728 = vmatprep.mubr.bf16.mxu1 %v1214_v43  ;;  %1140 = vmatpush3.bf16.msra.mxu0 %v1231_v46 }
  0x2e   :  { %1165 = vmatpush3.bf16.msra.mxu1 %v1231_v46  ;;  %1141 = vmatprep.subr.bf16.mxu0 %v1244_v49 }
  0x2f   :  { %1162 = vmatprep.subr.bf16.mxu1 %v1244_v49 }
  0x31   :  { %1142 = vmatpush3.bf16.msra.mxu0 %v1244_v49 }
  0x32   :  { %1166 = vmatpush3.bf16.msra.mxu1 %v1244_v49 }
  0x33   :  { %632 = vmatmul.mubr.bf16.gmra.mrb[8].mxu0 %v1216_v44 }
  0x34   :  { %729 = vmatmul.mubr.bf16.gmra.mrb[8].mxu1 %v1217_v45  ;;  %639 = vmatprep.mubr.bf16.mxu0 %v1219_v47 }
  0x35   :  { %736 = vmatprep.mubr.bf16.mxu1 %v1221_v48 }
  0x3b   :  { %640 = vmatmul.mubr.bf16.gmra.mrb[12].mxu0 %v1223_v50 }
  0x3c   :  { %737 = vmatmul.mubr.bf16.gmra.mrb[12].mxu1 %v1224_v51  ;;  %647 = vmatprep.mubr.bf16.mxu0 %v1225_v52 }
  0x3d   :  { %744 = vmatprep.mubr.bf16.mxu1 %v1227_v53 }
  0x43   :  { %648 = vmatmul.mubr.bf16.gmra.mrb[16].mxu0 %v1229_v54 }
  0x44   :  { %745 = vmatmul.mubr.bf16.gmra.mrb[16].mxu1 %v1230_v55  ;;  %655 = vmatprep.mubr.bf16.mxu0 %v1232_v56 }
  0x45   :  { %752 = vmatprep.mubr.bf16.mxu1 %v1234_v57 }
  0x4b   :  { %656 = vmatmul.mubr.bf16.gmra.mrb[20].mxu0 %v1236_v58 }
  0x4c   :  { %753 = vmatmul.mubr.bf16.gmra.mrb[20].mxu1 %v1237_v59  ;;  %663 = vmatprep.mubr.bf16.mxu0 %v1238_v60 }
  0x4d   :  { %760 = vmatprep.mubr.bf16.mxu1 %v1240_v61 }
  0x53   :  { %664 = vmatmul.mubr.bf16.gmra.mrb[24].mxu0 %v1242_v62 }
  0x54   :  { %761 = vmatmul.mubr.bf16.gmra.mrb[24].mxu1 %v1243_v63  ;;  %671 = vmatprep.mubr.bf16.mxu0 %v1245_v0 }
  0x55   :  { %768 = vmatprep.mubr.bf16.mxu1 %v1247_v1 }
  0x5b   :  { %672 = vmatmul.mubr.bf16.gmra.mrb[28].mxu0 %v1249_v2 }
  0x5c   :  { %769 = vmatmul.mubr.bf16.gmra.mrb[28].mxu1 %v1250_v3  ;;  %1143 = vmatprep.mubr.msk.bf16.mxu0 %vm558_vm0, %v1251_v4 }
  0x5d   :  { %1151 = vmatprep.mubr.msk.bf16.mxu1 %vm558_vm0, %v1252_v5 }
  0x63   :  { %1144 = vmatmul.mubr.msk.bf16.vlgmr.msra.gmra.mrb[32].mxu0 %vm558_vm0, %v1253_v6 }
  0x64   :  { %1152 = vmatmul.mubr.msk.bf16.vlgmr.msra.gmra.mrb[32].mxu1 %vm558_vm0, %v1254_v7  ;;  %1147 = vmatprep.mubr.msk.bf16.mxu0 %vm558_vm0, %v1255_v8 }
  0x65   :  { %1155 = vmatprep.mubr.msk.bf16.mxu1 %vm558_vm0, %v1256_v9 }
  0x6b   :  { %1148 = vmatmul.mubr.msk.bf16.gmra.mrb[36].mxu0 %vm558_vm0, %v1257_v10 }
  0x6c   :  { %1156 = vmatmul.mubr.msk.bf16.gmra.mrb[36].mxu1 %vm558_vm0, %v1258_v11 }
  0xf6   :  { %v1011_v12 = vpop.f32.mrb[0].mxu0 }
  0xf7   :  { %v1075_v13 = vpop.f32.mrb[0].mxu1  ;;  %v1012_v15 = vpop.f32.mrb[1].mxu0 }
  0xf8   :  { %v1013_v16 = vadd.f32 %v1012_v15, %v1011_v12  ;;  %v1076_v17 = vpop.f32.mrb[1].mxu1  ;;  %v1014_v18 = vpop.f32.mrb[2].mxu0 }
  0xf9   :  { %v1077_v19 = vadd.f32 %v1076_v17, %v1075_v13  ;;  %v1078_v20 = vpop.f32.mrb[2].mxu1  ;;  %v1015_v21 = vpop.f32.mrb[3].mxu0 }
  0xfa   :  { %v618_v22 = vadd.f32 %v1013_v16, %v1518_v14  ;;  %v1016_v23 = vadd.f32 %v1015_v21, %v1014_v18  ;;  %v1079_v24 = vpop.f32.mrb[3].mxu1 }
  0xfb   :  { %v1080_v25 = vadd.f32 %v1079_v24, %v1078_v20 }
  0xfc   :  { %v621_v26 = vadd.f32 %v1016_v23, %v1518_v14  ;;  %v1522_v27 = vadd.f32 %v1077_v19, %v618_v22 }
  0xfe   :  { %v1017_v28 = vpop.f32.mrb[4].mxu0  ;;  %v1524_v29 = vadd.f32 %v1080_v25, %v621_v26 }
  0xff   :  { %v1081_v30 = vpop.f32.mrb[4].mxu1  ;;  %v1018_v31 = vpop.f32.mrb[5].mxu0 }
 0x100   :  { %v1019_v32 = vadd.f32 %v1018_v31, %v1017_v28  ;;  %v1082_v33 = vpop.f32.mrb[5].mxu1  ;;  %v1020_v34 = vpop.f32.mrb[6].mxu0 }
 0x101   :  { %v1083_v35 = vadd.f32 %v1082_v33, %v1081_v30  ;;  %v1084_v36 = vpop.f32.mrb[6].mxu1  ;;  %v1021_v37 = vpop.f32.mrb[7].mxu0 }
 0x102   :  { %v626_v38 = vadd.f32 %v1019_v32, %v1518_v14  ;;  %v1022_v39 = vadd.f32 %v1021_v37, %v1020_v34  ;;  %v1085_v40 = vpop.f32.mrb[7].mxu1 }
 0x103   :  { %v1086_v41 = vadd.f32 %v1085_v40, %v1084_v36 }
 0x104   :  { %v629_v42 = vadd.f32 %v1022_v39, %v1518_v14  ;;  %v1528_v43 = vadd.f32 %v1083_v35, %v626_v38 }
 0x106   :  { %v1023_v44 = vpop.f32.mrb[8].mxu0  ;;  %v1530_v45 = vadd.f32 %v1086_v41, %v629_v42 }
 0x107   :  { %v1087_v46 = vpop.f32.mrb[8].mxu1  ;;  %v1024_v47 = vpop.f32.mrb[9].mxu0 }
 0x108   :  { %v1025_v48 = vadd.f32 %v1024_v47, %v1023_v44  ;;  %v1088_v49 = vpop.f32.mrb[9].mxu1  ;;  %v1026_v50 = vpop.f32.mrb[10].mxu0 }
 0x109   :  { %v1089_v51 = vadd.f32 %v1088_v49, %v1087_v46  ;;  %v1090_v52 = vpop.f32.mrb[10].mxu1  ;;  %v1027_v53 = vpop.f32.mrb[11].mxu0 }
 0x10a   :  { %v634_v54 = vadd.f32 %v1025_v48, %v1518_v14  ;;  %v1028_v55 = vadd.f32 %v1027_v53, %v1026_v50  ;;  %v1091_v56 = vpop.f32.mrb[11].mxu1 }
 0x10b   :  { %v1092_v57 = vadd.f32 %v1091_v56, %v1090_v52 }
 0x10c   :  { %v637_v58 = vadd.f32 %v1028_v55, %v1518_v14  ;;  %v1534_v59 = vadd.f32 %v1089_v51, %v634_v54 }
 0x10e   :  { %v1029_v60 = vpop.f32.mrb[12].mxu0  ;;  %v1536_v61 = vadd.f32 %v1092_v57, %v637_v58 }
 0x10f   :  { %v1093_v62 = vpop.f32.mrb[12].mxu1  ;;  %v1030_v63 = vpop.f32.mrb[13].mxu0 }
 0x110   :  { %v1031_v0 = vadd.f32 %v1030_v63, %v1029_v60  ;;  %v1094_v1 = vpop.f32.mrb[13].mxu1  ;;  %v1032_v2 = vpop.f32.mrb[14].mxu0 }
 0x111   :  { %v1095_v3 = vadd.f32 %v1094_v1, %v1093_v62  ;;  %v1096_v4 = vpop.f32.mrb[14].mxu1  ;;  %v1033_v5 = vpop.f32.mrb[15].mxu0 }
 0x112   :  { %v642_v6 = vadd.f32 %v1031_v0, %v1518_v14  ;;  %v1034_v7 = vadd.f32 %v1033_v5, %v1032_v2  ;;  %v1097_v8 = vpop.f32.mrb[15].mxu1 }
 0x113   :  { %v1098_v9 = vadd.f32 %v1097_v8, %v1096_v4 }
 0x114   :  { %v645_v10 = vadd.f32 %v1034_v7, %v1518_v14  ;;  %v1540_v11 = vadd.f32 %v1095_v3, %v642_v6 }
 0x116   :  { %v1035_v12 = vpop.f32.mrb[16].mxu0  ;;  %v1542_v13 = vadd.f32 %v1098_v9, %v645_v10 }
 0x117   :  { %v1099_v15 = vpop.f32.mrb[16].mxu1  ;;  %v1036_v16 = vpop.f32.mrb[17].mxu0 }
 0x118   :  { %v1037_v17 = vadd.f32 %v1036_v16, %v1035_v12  ;;  %v1100_v18 = vpop.f32.mrb[17].mxu1  ;;  %v1038_v19 = vpop.f32.mrb[18].mxu0 }
 0x119   :  { %v1101_v20 = vadd.f32 %v1100_v18, %v1099_v15  ;;  %v1102_v21 = vpop.f32.mrb[18].mxu1  ;;  %v1039_v22 = vpop.f32.mrb[19].mxu0 }
 0x11a   :  { %v650_v23 = vadd.f32 %v1037_v17, %v1518_v14  ;;  %v1040_v24 = vadd.f32 %v1039_v22, %v1038_v19  ;;  %v1103_v25 = vpop.f32.mrb[19].mxu1 }
 0x11b   :  { %v1104_v26 = vadd.f32 %v1103_v25, %v1102_v21 }
 0x11c   :  { %v653_v28 = vadd.f32 %v1040_v24, %v1518_v14  ;;  %v747_v30 = vadd.f32 %v1101_v20, %v650_v23 }
 0x11e   :  { %v1041_v31 = vpop.f32.mrb[20].mxu0  ;;  %v1546_v32 = vadd.f32 %v1104_v26, %v653_v28 }
 0x11f   :  { %v1105_v33 = vpop.f32.mrb[20].mxu1  ;;  %v1042_v34 = vpop.f32.mrb[21].mxu0 }
 0x120   :  { %v1043_v35 = vadd.f32 %v1042_v34, %v1041_v31  ;;  %v1106_v36 = vpop.f32.mrb[21].mxu1  ;;  %v1044_v37 = vpop.f32.mrb[22].mxu0 }
 0x121   :  { %v1107_v38 = vadd.f32 %v1106_v36, %v1105_v33  ;;  %v1108_v39 = vpop.f32.mrb[22].mxu1  ;;  %v1045_v40 = vpop.f32.mrb[23].mxu0 }
 0x122   :  { %v658_v41 = vadd.f32 %v1043_v35, %v1518_v14  ;;  %v1046_v42 = vadd.f32 %v1045_v40, %v1044_v37  ;;  %v1109_v44 = vpop.f32.mrb[23].mxu1 }
 0x123   :  { %v1110_v46 = vadd.f32 %v1109_v44, %v1108_v39 }
 0x124   :  { %v661_v47 = vadd.f32 %v1046_v42, %v1518_v14  ;;  %v755_v48 = vadd.f32 %v1107_v38, %v658_v41 }
 0x126   :  { %v1047_v49 = vpop.f32.mrb[24].mxu0  ;;  %v758_v50 = vadd.f32 %v1110_v46, %v661_v47 }
 0x127   :  { %v1111_v51 = vpop.f32.mrb[24].mxu1  ;;  %v1048_v52 = vpop.f32.mrb[25].mxu0 }
 0x128   :  { %v1049_v53 = vadd.f32 %v1048_v52, %v1047_v49  ;;  %v1112_v54 = vpop.f32.mrb[25].mxu1  ;;  %v1050_v55 = vpop.f32.mrb[26].mxu0 }
 0x129   :  { %v1113_v56 = vadd.f32 %v1112_v54, %v1111_v51  ;;  %v1114_v57 = vpop.f32.mrb[26].mxu1  ;;  %v1051_v58 = vpop.f32.mrb[27].mxu0 }
 0x12a   :  { %v666_v60 = vadd.f32 %v1049_v53, %v1518_v14  ;;  %v1052_v62 = vadd.f32 %v1051_v58, %v1050_v55  ;;  %v1115_v63 = vpop.f32.mrb[27].mxu1 }
 0x12b   :  { %v1116_v0 = vadd.f32 %v1115_v63, %v1114_v57 }
 0x12c   :  { %v669_v1 = vadd.f32 %v1052_v62, %v1518_v14  ;;  %v763_v2 = vadd.f32 %v1113_v56, %v666_v60 }
 0x12e   :  { %v1053_v3 = vpop.f32.mrb[28].mxu0  ;;  %v1552_v4 = vadd.f32 %v1116_v0, %v669_v1 }
 0x12f   :  { %v1117_v5 = vpop.f32.mrb[28].mxu1  ;;  %v1054_v6 = vpop.f32.mrb[29].mxu0 }
 0x130   :  { %v1055_v7 = vadd.f32 %v1054_v6, %v1053_v3  ;;  %v1118_v8 = vpop.f32.mrb[29].mxu1  ;;  %v1056_v9 = vpop.f32.mrb[30].mxu0 }
 0x131   :  { %v1119_v10 = vadd.f32 %v1118_v8, %v1117_v5  ;;  %v1120_v12 = vpop.f32.mrb[30].mxu1  ;;  %v1057_v15 = vpop.f32.mrb[31].mxu0 }
 0x132   :  { %v674_v16 = vadd.f32 %v1055_v7, %v1518_v14  ;;  %v1058_v17 = vadd.f32 %v1057_v15, %v1056_v9  ;;  %v1121_v18 = vpop.f32.mrb[31].mxu1 }
 0x133   :  { %v1122_v19 = vadd.f32 %v1121_v18, %v1120_v12 }
 0x134   :  { %v677_v20 = vadd.f32 %v1058_v17, %v1518_v14  ;;  %v771_v21 = vadd.f32 %v1119_v10, %v674_v16 }
 0x136   :  { %v1145_v22 = vpop.f32.mrb[32].mxu0  ;;  %v774_v23 = vadd.f32 %v1122_v19, %v677_v20 }
 0x137   :  { %v820_v24 = vadd.f32 %v1145_v22, %v1528_v43  ;;  %v1153_v25 = vpop.f32.mrb[32].mxu1  ;;  %v811_v26 = vpop.f32.mrb[33].mxu0 }
 0x138   :  { %v852_v28 = vadd.f32 %v1153_v25, %v755_v48  ;;  %v812_v31 = vadd.f32 %v811_v26, %v1522_v27  ;;  %v843_v33 = vpop.f32.mrb[33].mxu1  ;;  %v1146_v34 = vpop.f32.mrb[34].mxu0 }
 0x139   :  { %v876_v35 = vmax.f32 %v820_v24, 0.0  ;;  %v844_v36 = vadd.f32 %v843_v33, %v747_v30  ;;  %v823_v37 = vadd.f32 %v1146_v34, %v1530_v45  ;;  %v1154_v38 = vpop.f32.mrb[34].mxu1  ;;  %v814_v39 = vpop.f32.mrb[35].mxu0 }
 0x13a   :  { %v884_v40 = vmax.f32 %v852_v28, 0.0  ;;  %v874_v14 = vmax.f32 %v812_v31, 0.0  ;;  %v855_v41 = vadd.f32 %v1154_v38, %v758_v50  ;;  %v815_v42 = vadd.f32 %v814_v39, %v1524_v29  ;;  %v846_v44 = vpop.f32.mrb[35].mxu1 }
 0x13b   :  { %892 = vst.msk [vmem:[%s1633_s3 + $0x10] sm:$0xff] %vm558_vm0, %v876_v35  ;;  %v882_v27 = vmax.f32 %v844_v36, 0.0  ;;  %v877_v43 = vmax.f32 %v823_v37, 0.0  ;;  %v847_v46 = vadd.f32 %v846_v44, %v1546_v32 }
 0x13c   :  { %900 = vst.msk [vmem:[%s1633_s3 + $0x50] sm:$0xff] %vm558_vm0, %v884_v40  ;;  %890 = vst.msk [vmem:[%s1633_s3] sm:$0xff] %vm558_vm0, %v874_v14  ;;  %v885_v29 = vmax.f32 %v855_v41, 0.0  ;;  %v875_v45 = vmax.f32 %v815_v42, 0.0 }
 0x13d   :  { %898 = vst.msk [vmem:[%s1633_s3 + $0x40] sm:$0xff] %vm558_vm0, %v882_v27  ;;  %893 = vst.msk [vmem:[%s1633_s3 + $0x18] sm:$0xff] %vm558_vm0, %v877_v43  ;;  %v883_v30 = vmax.f32 %v847_v46, 0.0 }
 0x13e   :  { %901 = vst.msk [vmem:[%s1633_s3 + $0x58] sm:$0xff] %vm558_vm0, %v885_v29  ;;  %891 = vst.msk [vmem:[%s1633_s3 + $0x8] sm:$0xff] %vm558_vm0, %v875_v45  ;;  %v1149_v32 = vpop.f32.mrb[36].mxu0 }
 0x13f   :  { %899 = vst.msk [vmem:[%s1633_s3 + $0x48] sm:$0xff] %vm558_vm0, %v883_v30  ;;  %v836_v47 = vadd.f32 %v1149_v32, %v1540_v11  ;;  %v1157_v48 = vpop.f32.mrb[36].mxu1  ;;  %v827_v49 = vpop.f32.mrb[37].mxu0 }
 0x140   :  { %v868_v50 = vadd.f32 %v1157_v48, %v771_v21  ;;  %v828_v51 = vadd.f32 %v827_v49, %v1534_v59  ;;  %v859_v52 = vpop.f32.mrb[37].mxu1  ;;  %v1150_v53 = vpop.f32.mrb[38].mxu0 }
 0x141   :  { %v880_v54 = vmax.f32 %v836_v47, 0.0  ;;  %v860_v55 = vadd.f32 %v859_v52, %v763_v2  ;;  %v839_v56 = vadd.f32 %v1150_v53, %v1542_v13  ;;  %v1158_v57 = vpop.f32.mrb[38].mxu1  ;;  %v830_v58 = vpop.f32.mrb[39].mxu0 }
 0x142   :  { %v888_v60 = vmax.f32 %v868_v50, 0.0  ;;  %v878_v62 = vmax.f32 %v828_v51, 0.0  ;;  %v871_v63 = vadd.f32 %v1158_v57, %v774_v23  ;;  %v831_v0 = vadd.f32 %v830_v58, %v1536_v61  ;;  %v862_v1 = vpop.f32.mrb[39].mxu1 }
 0x143   :  { %896 = vst.msk [vmem:[%s1633_s3 + $0x30] sm:$0xff] %vm558_vm0, %v880_v54  ;;  %v886_v59 = vmax.f32 %v860_v55, 0.0  ;;  %v881_v11 = vmax.f32 %v839_v56, 0.0  ;;  %v863_v3 = vadd.f32 %v862_v1, %v1552_v4 }
 0x144   :  { %904 = vst.msk [vmem:[%s1633_s3 + $0x70] sm:$0xff] %vm558_vm0, %v888_v60  ;;  %894 = vst.msk [vmem:[%s1633_s3 + $0x20] sm:$0xff] %vm558_vm0, %v878_v62  ;;  %v889_v61 = vmax.f32 %v871_v63, 0.0  ;;  %v879_v13 = vmax.f32 %v831_v0, 0.0 }
 0x145   :  { %902 = vst.msk [vmem:[%s1633_s3 + $0x60] sm:$0xff] %vm558_vm0, %v886_v59  ;;  %897 = vst.msk [vmem:[%s1633_s3 + $0x38] sm:$0xff] %vm558_vm0, %v881_v11  ;;  %v887_v2 = vmax.f32 %v863_v3, 0.0 }
 0x146   :  { %905 = vst.msk [vmem:[%s1633_s3 + $0x78] sm:$0xff] %vm558_vm0, %v889_v61  ;;  %895 = vst.msk [vmem:[%s1633_s3 + $0x28] sm:$0xff] %vm558_vm0, %v879_v13 }
 0x147   :  { %903 = vst.msk [vmem:[%s1633_s3 + $0x68] sm:$0xff] %vm558_vm0, %v887_v2 }

// kernel: _lambda_.60
= control target key start
LH: loop header
LB: loop body
LE: loop exit
PB: predicated region body
PF: predicated region fallthrough
CT: control target
= control target key end

     0   :  { %vm110_vm0 = vcmask 523264   ;;  %vm232_vm1 = vcmask 261120   ;;  %s461_s1 = inlined_call_operand.vmem [shape: bf16[64,32], index: 1, kind: input, shape index: {}]   ;;  %s462_s0 = inlined_call_operand.vmem [shape: bf16[128,64], index: 0, kind: input, shape index: {}]   ;;  %s463_s2 = inlined_call_operand.vmem [shape: f32[1,32], index: 2, kind: input, shape index: {}]   ;;  %s464_s3 = inlined_call_operand.vmem [shape: f32[128,32], index: 3, kind: output, shape index: {}]  }
   0x1   :  { %v318_v0 = vld [vmem:[%s461_s1] sm:$0xff]   ;;  %v319_v1 = vld [vmem:[%s461_s1 + $0x8] sm:$0xff]   ;;  %v320_v2 = vld [vmem:[%s461_s1 + $0x10] sm:$0xff]  }
   0x2   :  { %286 = vmatprep.subr.bf16.mxu0 %v318_v0  ;;  %310 = vmatprep.subr.bf16.mxu1 %v318_v0  ;;  %v322_v3 = vld [vmem:[%s462_s0] sm:$0xff]   ;;  %v321_v5 = vld [vmem:[%s461_s1 + $0x18] sm:$0xff]   ;;  %v324_v6 = vld [vmem:[%s462_s0 + $0x8] sm:$0xff]  }
   0x3   :  { %287 = vmatpush3.bf16.msra.mxu0 %v318_v0  ;;  %314 = vmatpush3.bf16.msra.mxu1 %v318_v0  ;;  %v323_v4 = vld [vmem:[%s462_s0 + $0x20] sm:$0xff]   ;;  %v325_v7 = vld [vmem:[%s462_s0 + $0x28] sm:$0xff]   ;;  %v326_v8 = vld [vmem:[%s462_s0 + $0x10] sm:$0xff]  }
   0x4   :  { %288 = vmatprep.subr.bf16.mxu0 %v319_v1  ;;  %311 = vmatprep.subr.bf16.mxu1 %v319_v1  ;;  %v327_v9 = vld [vmem:[%s462_s0 + $0x30] sm:$0xff]   ;;  %v328_v10 = vld [vmem:[%s462_s0 + $0x18] sm:$0xff]   ;;  %v253_v12 = vld [vmem:[%s463_s2] ss:$0 sm:$0xff] }
   0x5   :  { %294 = vmatprep.mubr.msk.bf16.mxu0 %vm110_vm0, %v322_v3  ;;  %302 = vmatprep.mubr.msk.bf16.mxu1 %vm110_vm0, %v323_v4  ;;  %v329_v11 = vld [vmem:[%s462_s0 + $0x38] sm:$0xff]  }
   0x7   :  { %289 = vmatpush3.bf16.msra.mxu0 %v319_v1  ;;  %315 = vmatpush3.bf16.msra.mxu1 %v319_v1 }
   0x8   :  { %290 = vmatprep.subr.bf16.mxu0 %v320_v2  ;;  %312 = vmatprep.subr.bf16.mxu1 %v320_v2 }
   0xb   :  { %291 = vmatpush3.bf16.msra.mxu0 %v320_v2  ;;  %316 = vmatpush3.bf16.msra.mxu1 %v320_v2 }
   0xc   :  { %292 = vmatprep.subr.bf16.mxu0 %v321_v5  ;;  %313 = vmatprep.subr.bf16.mxu1 %v321_v5 }
   0xf   :  { %293 = vmatpush3.bf16.msra.mxu0 %v321_v5  ;;  %317 = vmatpush3.bf16.msra.mxu1 %v321_v5 }
  0x12   :  { %295 = vmatmul.mubr.msk.bf16.vlgmr.msra.gmra.mrb[0].mxu0 %vm110_vm0, %v324_v6  ;;  %303 = vmatmul.mubr.msk.bf16.vlgmr.msra.gmra.mrb[0].mxu1 %vm110_vm0, %v325_v7 }
  0x13   :  { %298 = vmatprep.mubr.msk.bf16.mxu0 %vm110_vm0, %v326_v8  ;;  %306 = vmatprep.mubr.msk.bf16.mxu1 %vm110_vm0, %v327_v9 }
  0x1a   :  { %299 = vmatmul.mubr.msk.bf16.gmra.mrb[4].mxu0 %vm110_vm0, %v328_v10  ;;  %307 = vmatmul.mubr.msk.bf16.gmra.mrb[4].mxu1 %vm110_vm0, %v329_v11 }
  0xe5   :  { %v296_v13 = vpop.f32.mrb[0].mxu0  ;;  %v304_v14 = vpop.f32.mrb[0].mxu1 }
  0xe6   :  { %v178_v15 = vadd.f32 %v296_v13, %v253_v12  ;;  %v210_v16 = vadd.f32 %v304_v14, %v253_v12  ;;  %v169_v17 = vpop.f32.mrb[1].mxu0  ;;  %v201_v18 = vpop.f32.mrb[1].mxu1 }
  0xe7   :  { %v170_v19 = vadd.f32 %v253_v12, %v169_v17  ;;  %v202_v20 = vadd.f32 %v253_v12, %v201_v18  ;;  %v297_v21 = vpop.f32.mrb[2].mxu0  ;;  %v305_v22 = vpop.f32.mrb[2].mxu1 }
  0xe8   :  { %235 = vst.msk [vmem:[%s464_s3 + $0x10] sm:$0xff] %vm232_vm1, %v178_v15  ;;  %243 = vst.msk [vmem:[%s464_s3 + $0x50] sm:$0xff] %vm232_vm1, %v210_v16  ;;  %v181_v23 = vadd.f32 %v297_v21, %v253_v12  ;;  %v213_v24 = vadd.f32 %v305_v22, %v253_v12  ;;  %v172_v25 = vpop.f32.mrb[3].mxu0  ;;  %v204_v26 = vpop.f32.mrb[3].mxu1 }
  0xe9   :  { %233 = vst.msk [vmem:[%s464_s3] sm:$0xff] %vm232_vm1, %v170_v19  ;;  %241 = vst.msk [vmem:[%s464_s3 + $0x40] sm:$0xff] %vm232_vm1, %v202_v20  ;;  %v173_v27 = vadd.f32 %v253_v12, %v172_v25  ;;  %v205_v28 = vadd.f32 %v253_v12, %v204_v26 }
  0xea   :  { %236 = vst.msk [vmem:[%s464_s3 + $0x18] sm:$0xff] %vm232_vm1, %v181_v23  ;;  %244 = vst.msk [vmem:[%s464_s3 + $0x58] sm:$0xff] %vm232_vm1, %v213_v24 }
  0xeb   :  { %234 = vst.msk [vmem:[%s464_s3 + $0x8] sm:$0xff] %vm232_vm1, %v173_v27  ;;  %242 = vst.msk [vmem:[%s464_s3 + $0x48] sm:$0xff] %vm232_vm1, %v205_v28 }
  0xed   :  { %v300_v29 = vpop.f32.mrb[4].mxu0  ;;  %v308_v30 = vpop.f32.mrb[4].mxu1 }
  0xee   :  { %v194_v31 = vadd.f32 %v300_v29, %v253_v12  ;;  %v226_v32 = vadd.f32 %v308_v30, %v253_v12  ;;  %v185_v33 = vpop.f32.mrb[5].mxu0  ;;  %v217_v34 = vpop.f32.mrb[5].mxu1 }
  0xef   :  { %v186_v35 = vadd.f32 %v253_v12, %v185_v33  ;;  %v218_v36 = vadd.f32 %v253_v12, %v217_v34  ;;  %v301_v37 = vpop.f32.mrb[6].mxu0  ;;  %v309_v38 = vpop.f32.mrb[6].mxu1 }
  0xf0   :  { %239 = vst.msk [vmem:[%s464_s3 + $0x30] sm:$0xff] %vm232_vm1, %v194_v31  ;;  %247 = vst.msk [vmem:[%s464_s3 + $0x70] sm:$0xff] %vm232_vm1, %v226_v32  ;;  %v197_v39 = vadd.f32 %v301_v37, %v253_v12  ;;  %v229_v40 = vadd.f32 %v309_v38, %v253_v12  ;;  %v188_v41 = vpop.f32.mrb[7].mxu0  ;;  %v220_v42 = vpop.f32.mrb[7].mxu1 }
  0xf1   :  { %237 = vst.msk [vmem:[%s464_s3 + $0x20] sm:$0xff] %vm232_vm1, %v186_v35  ;;  %245 = vst.msk [vmem:[%s464_s3 + $0x60] sm:$0xff] %vm232_vm1, %v218_v36  ;;  %v189_v43 = vadd.f32 %v253_v12, %v188_v41  ;;  %v221_v44 = vadd.f32 %v253_v12, %v220_v42 }
  0xf2   :  { %240 = vst.msk [vmem:[%s464_s3 + $0x38] sm:$0xff] %vm232_vm1, %v197_v39  ;;  %248 = vst.msk [vmem:[%s464_s3 + $0x78] sm:$0xff] %vm232_vm1, %v229_v40 }
  0xf3   :  { %238 = vst.msk [vmem:[%s464_s3 + $0x28] sm:$0xff] %vm232_vm1, %v189_v43  ;;  %246 = vst.msk [vmem:[%s464_s3 + $0x68] sm:$0xff] %vm232_vm1, %v221_v44 }

// kernel: _lambda_.62
= control target key start
LH: loop header
LB: loop body
LE: loop exit
PB: predicated region body
PF: predicated region fallthrough
CT: control target
= control target key end

     0   :  { %vm114_vm0 = vcmask 588800   ;;  %vm139_vm1 = vcmask 1043456   ;;  %vm256_vm2 = vcmask 64512   ;;  %s497_s1 = inlined_call_operand.vmem [shape: bf16[72,8], index: 1, kind: input, shape index: {}]   ;;  %s498_s0 = inlined_call_operand.vmem [shape: bf16[128,72], index: 0, kind: input, shape index: {}]   ;;  %s499_s2 = inlined_call_operand.vmem [shape: f32[1,8], index: 2, kind: input, shape index: {}]   ;;  %s500_s3 = inlined_call_operand.vmem [shape: f32[128,8], index: 3, kind: output, shape index: {}]  }
   0x1   :  { %v350_v0 = vld [vmem:[%s497_s1] sm:$0xff]   ;;  %v351_v1 = vld [vmem:[%s497_s1 + $0x8] sm:$0xff]   ;;  %v352_v2 = vld [vmem:[%s497_s1 + $0x10] sm:$0xff]  }
   0x2   :  { %312 = vmatprep.subr.bf16.mxu0 %v350_v0  ;;  %338 = vmatprep.subr.bf16.mxu1 %v350_v0  ;;  %v355_v3 = vld [vmem:[%s498_s0] sm:$0xff]   ;;  %v353_v5 = vld [vmem:[%s497_s1 + $0x18] sm:$0xff]   ;;  %v357_v8 = vld [vmem:[%s498_s0 + $0x8] sm:$0xff]  }
   0x3   :  { %313 = vmatpush3.bf16.msra.mxu0 %v350_v0  ;;  %343 = vmatpush3.bf16.msra.mxu1 %v350_v0  ;;  %v356_v4 = vld [vmem:[%s498_s0 + $0x20] sm:$0xff]   ;;  %v358_v9 = vld [vmem:[%s498_s0 + $0x28] sm:$0xff]   ;;  %v359_v10 = vld [vmem:[%s498_s0 + $0x10] sm:$0xff]  }
   0x4   :  { %314 = vmatprep.subr.bf16.mxu0 %v351_v1  ;;  %339 = vmatprep.subr.bf16.mxu1 %v351_v1  ;;  %v354_v6 = vld [vmem:[%s497_s1 + $0x20] ss:$0 sps:$4 sm:$0xff]   ;;  %v360_v11 = vld [vmem:[%s498_s0 + $0x30] sm:$0xff]   ;;  %v361_v12 = vld [vmem:[%s498_s0 + $0x18] sm:$0xff]  }
   0x5   :  { %322 = vmatprep.mubr.msk.bf16.mxu0 %vm114_vm0, %v355_v3  ;;  %330 = vmatprep.mubr.msk.bf16.mxu1 %vm114_vm0, %v356_v4  ;;  %v141_v7 = vsel %vm139_vm1, %v354_v6, 0  ;;  %v362_v13 = vld [vmem:[%s498_s0 + $0x38] sm:$0xff]   ;;  %v277_v14 = vld [vmem:[%s499_s2] ss:$0 sm:$0xff] }
   0x7   :  { %315 = vmatpush3.bf16.msra.mxu0 %v351_v1  ;;  %344 = vmatpush3.bf16.msra.mxu1 %v351_v1 }
   0x8   :  { %316 = vmatprep.subr.bf16.mxu0 %v352_v2  ;;  %340 = vmatprep.subr.bf16.mxu1 %v352_v2 }
   0xb   :  { %317 = vmatpush3.bf16.msra.mxu0 %v352_v2  ;;  %345 = vmatpush3.bf16.msra.mxu1 %v352_v2 }
   0xc   :  { %318 = vmatprep.subr.bf16.mxu0 %v353_v5  ;;  %341 = vmatprep.subr.bf16.mxu1 %v353_v5 }
   0xf   :  { %319 = vmatpush3.bf16.msra.mxu0 %v353_v5  ;;  %346 = vmatpush3.bf16.msra.mxu1 %v353_v5 }
  0x10   :  { %348 = vmatprep.subr.msk.bf16.mxu0 %vm139_vm1, %v354_v6  ;;  %349 = vmatprep.subr.msk.bf16.mxu1 %vm139_vm1, %v354_v6 }
  0x13   :  { %321 = vmatpush3.bf16.msra.mxu0 %v141_v7  ;;  %347 = vmatpush3.bf16.msra.mxu1 %v141_v7 }
  0x16   :  { %323 = vmatmul.mubr.msk.bf16.vlgmr.msra.gmra.mrb[0].mxu0 %vm114_vm0, %v357_v8  ;;  %331 = vmatmul.mubr.msk.bf16.vlgmr.msra.gmra.mrb[0].mxu1 %vm114_vm0, %v358_v9 }
  0x17   :  { %326 = vmatprep.mubr.msk.bf16.mxu0 %vm114_vm0, %v359_v10  ;;  %334 = vmatprep.mubr.msk.bf16.mxu1 %vm114_vm0, %v360_v11 }
  0x1e   :  { %327 = vmatmul.mubr.msk.bf16.gmra.mrb[4].mxu0 %vm114_vm0, %v361_v12  ;;  %335 = vmatmul.mubr.msk.bf16.gmra.mrb[4].mxu1 %vm114_vm0, %v362_v13 }
  0xe9   :  { %v324_v15 = vpop.f32.mrb[0].mxu0  ;;  %v332_v16 = vpop.f32.mrb[0].mxu1 }
  0xea   :  { %v186_v17 = vadd.f32 %v324_v15, %v277_v14  ;;  %v218_v18 = vadd.f32 %v332_v16, %v277_v14  ;;  %v177_v19 = vpop.f32.mrb[1].mxu0  ;;  %v209_v20 = vpop.f32.mrb[1].mxu1 }
  0xeb   :  { %v178_v21 = vadd.f32 %v277_v14, %v177_v19  ;;  %v210_v22 = vadd.f32 %v277_v14, %v209_v20  ;;  %v325_v23 = vpop.f32.mrb[2].mxu0  ;;  %v333_v24 = vpop.f32.mrb[2].mxu1 }
  0xec   :  { %v242_v25 = vmax.f32 %v186_v17, 0.0  ;;  %v250_v26 = vmax.f32 %v218_v18, 0.0  ;;  %v189_v27 = vadd.f32 %v325_v23, %v277_v14  ;;  %v221_v28 = vadd.f32 %v333_v24, %v277_v14  ;;  %v180_v29 = vpop.f32.mrb[3].mxu0  ;;  %v212_v30 = vpop.f32.mrb[3].mxu1 }
  0xed   :  { %v240_v31 = vmax.f32 %v178_v21, 0.0  ;;  %v248_v32 = vmax.f32 %v210_v22, 0.0  ;;  %v181_v33 = vadd.f32 %v277_v14, %v180_v29  ;;  %v213_v34 = vadd.f32 %v277_v14, %v212_v30 }
  0xee   :  { %259 = vst.msk [vmem:[%s500_s3 + $0x10] sm:$0xff] %vm256_vm2, %v242_v25  ;;  %267 = vst.msk [vmem:[%s500_s3 + $0x50] sm:$0xff] %vm256_vm2, %v250_v26  ;;  %v243_v35 = vmax.f32 %v189_v27, 0.0  ;;  %v251_v36 = vmax.f32 %v221_v28, 0.0 }
  0xef   :  { %257 = vst.msk [vmem:[%s500_s3] sm:$0xff] %vm256_vm2, %v240_v31  ;;  %265 = vst.msk [vmem:[%s500_s3 + $0x40] sm:$0xff] %vm256_vm2, %v248_v32  ;;  %v241_v37 = vmax.f32 %v181_v33, 0.0  ;;  %v249_v38 = vmax.f32 %v213_v34, 0.0 }
  0xf0   :  { %260 = vst.msk [vmem:[%s500_s3 + $0x18] sm:$0xff] %vm256_vm2, %v243_v35  ;;  %268 = vst.msk [vmem:[%s500_s3 + $0x58] sm:$0xff] %vm256_vm2, %v251_v36 }
  0xf1   :  { %258 = vst.msk [vmem:[%s500_s3 + $0x8] sm:$0xff] %vm256_vm2, %v241_v37  ;;  %266 = vst.msk [vmem:[%s500_s3 + $0x48] sm:$0xff] %vm256_vm2, %v249_v38  ;;  %v328_v39 = vpop.f32.mrb[4].mxu0  ;;  %v336_v40 = vpop.f32.mrb[4].mxu1 }
  0xf2   :  { %v202_v41 = vadd.f32 %v328_v39, %v277_v14  ;;  %v234_v42 = vadd.f32 %v336_v40, %v277_v14  ;;  %v193_v43 = vpop.f32.mrb[5].mxu0  ;;  %v225_v44 = vpop.f32.mrb[5].mxu1 }
  0xf3   :  { %v194_v45 = vadd.f32 %v277_v14, %v193_v43  ;;  %v226_v46 = vadd.f32 %v277_v14, %v225_v44  ;;  %v329_v47 = vpop.f32.mrb[6].mxu0  ;;  %v337_v48 = vpop.f32.mrb[6].mxu1 }
  0xf4   :  { %v246_v49 = vmax.f32 %v202_v41, 0.0  ;;  %v254_v50 = vmax.f32 %v234_v42, 0.0  ;;  %v205_v51 = vadd.f32 %v329_v47, %v277_v14  ;;  %v237_v52 = vadd.f32 %v337_v48, %v277_v14  ;;  %v196_v53 = vpop.f32.mrb[7].mxu0  ;;  %v228_v54 = vpop.f32.mrb[7].mxu1 }
  0xf5   :  { %v244_v55 = vmax.f32 %v194_v45, 0.0  ;;  %v252_v56 = vmax.f32 %v226_v46, 0.0  ;;  %v197_v57 = vadd.f32 %v277_v14, %v196_v53  ;;  %v229_v58 = vadd.f32 %v277_v14, %v228_v54 }
  0xf6   :  { %263 = vst.msk [vmem:[%s500_s3 + $0x30] sm:$0xff] %vm256_vm2, %v246_v49  ;;  %271 = vst.msk [vmem:[%s500_s3 + $0x70] sm:$0xff] %vm256_vm2, %v254_v50  ;;  %v247_v59 = vmax.f32 %v205_v51, 0.0  ;;  %v255_v60 = vmax.f32 %v237_v52, 0.0 }
  0xf7   :  { %261 = vst.msk [vmem:[%s500_s3 + $0x20] sm:$0xff] %vm256_vm2, %v244_v55  ;;  %269 = vst.msk [vmem:[%s500_s3 + $0x60] sm:$0xff] %vm256_vm2, %v252_v56  ;;  %v245_v61 = vmax.f32 %v197_v57, 0.0  ;;  %v253_v62 = vmax.f32 %v229_v58, 0.0 }
  0xf8   :  { %264 = vst.msk [vmem:[%s500_s3 + $0x38] sm:$0xff] %vm256_vm2, %v247_v59  ;;  %272 = vst.msk [vmem:[%s500_s3 + $0x78] sm:$0xff] %vm256_vm2, %v255_v60 }
  0xf9   :  { %262 = vst.msk [vmem:[%s500_s3 + $0x28] sm:$0xff] %vm256_vm2, %v245_v61  ;;  %270 = vst.msk [vmem:[%s500_s3 + $0x68] sm:$0xff] %vm256_vm2, %v253_v62 }

// kernel: _lambda_.63
= control target key start
LH: loop header
LB: loop body
LE: loop exit
PB: predicated region body
PF: predicated region fallthrough
CT: control target
= control target key end

     0   :  { %vm107_vm0 = vcmask 1043456   ;;  %vm82_vm1 = vcmask 64512   ;;  %vm256_vm2 = vcmask 261120   ;;  %s526_s1 = inlined_call_operand.vmem [shape: bf16[8,32], index: 1, kind: input, shape index: {}]   ;;  %s527_s0 = inlined_call_operand.vmem [shape: bf16[128,8], index: 0, kind: input, shape index: {}]   ;;  %s528_s2 = inlined_call_operand.vmem [shape: f32[1,32], index: 2, kind: input, shape index: {}]   ;;  %s529_s3 = inlined_call_operand.vmem [shape: f32[128,32], index: 3, kind: input, shape index: {}]   ;;  %s530_s4 = inlined_call_operand.vmem [shape: f32[128,32], index: 4, kind: output, shape index: {}]  }
   0x1   :  { %v34_v0 = vld [vmem:[%s526_s1] sm:$0xf]  ;;  %v327_v4 = vld [vmem:[%s527_s0 + $0x8] sm:$0xff]   ;;  %v329_v6 = vld [vmem:[%s527_s0 + $0x10] sm:$0xff]  }
   0x2   :  { %323 = vmatprep.subr.msk.bf16.mxu0 %vm107_vm0, %v34_v0  ;;  %324 = vmatprep.subr.msk.bf16.mxu1 %vm107_vm0, %v34_v0  ;;  %v109_v1 = vsel %vm107_vm0, %v34_v0, 0  ;;  %v325_v2 = vld [vmem:[%s527_s0] sm:$0xff]   ;;  %v328_v5 = vld [vmem:[%s527_s0 + $0x28] sm:$0xff]   ;;  %v330_v7 = vld [vmem:[%s527_s0 + $0x30] sm:$0xff]  }
   0x3   :  { %304 = vmatpush3.bf16.msra.mxu0 %v109_v1  ;;  %322 = vmatpush3.bf16.msra.mxu1 %v109_v1  ;;  %v326_v3 = vld [vmem:[%s527_s0 + $0x20] sm:$0xff]   ;;  %v331_v8 = vld [vmem:[%s527_s0 + $0x18] sm:$0xff]   ;;  %v210_v12 = vld [vmem:[%s529_s3 + $0x10] sm:$0xff] }
   0x4   :  { %305 = vmatprep.mubr.msk.bf16.mxu0 %vm82_vm1, %v325_v2  ;;  %313 = vmatprep.mubr.msk.bf16.mxu1 %vm82_vm1, %v326_v3  ;;  %v332_v9 = vld [vmem:[%s527_s0 + $0x38] sm:$0xff]   ;;  %v396_v10 = vld [vmem:[%s528_s2] ss:$0 sm:$0xff]  ;;  %v218_v15 = vld [vmem:[%s529_s3 + $0x50] sm:$0xff] }
   0x5   :  { %v208_v17 = vld [vmem:[%s529_s3] sm:$0xff]  ;;  %v211_v23 = vld [vmem:[%s529_s3 + $0x18] sm:$0xff]  ;;  %v209_v30 = vld [vmem:[%s529_s3 + $0x8] sm:$0xff] }
   0x6   :  { %306 = vmatmul.mubr.msk.bf16.vlgmr.msra.gmra.mrb[0].mxu0 %vm82_vm1, %v327_v4  ;;  %314 = vmatmul.mubr.msk.bf16.vlgmr.msra.gmra.mrb[0].mxu1 %vm82_vm1, %v328_v5  ;;  %v216_v21 = vld [vmem:[%s529_s3 + $0x40] sm:$0xff]  ;;  %v219_v28 = vld [vmem:[%s529_s3 + $0x58] sm:$0xff]  ;;  %v217_v36 = vld [vmem:[%s529_s3 + $0x48] sm:$0xff] }
   0x7   :  { %309 = vmatprep.mubr.msk.bf16.mxu0 %vm82_vm1, %v329_v6  ;;  %317 = vmatprep.mubr.msk.bf16.mxu1 %vm82_vm1, %v330_v7  ;;  %v214_v51 = vld [vmem:[%s529_s3 + $0x30] sm:$0xff]  ;;  %v212_v57 = vld [vmem:[%s529_s3 + $0x20] sm:$0xff]  ;;  %v215_v63 = vld [vmem:[%s529_s3 + $0x38] sm:$0xff] }
   0x8   :  { %v222_v55 = vld [vmem:[%s529_s3 + $0x70] sm:$0xff]  ;;  %v220_v61 = vld [vmem:[%s529_s3 + $0x60] sm:$0xff]  ;;  %v223_v4 = vld [vmem:[%s529_s3 + $0x78] sm:$0xff] }
   0x9   :  { %v213_v6 = vld [vmem:[%s529_s3 + $0x28] sm:$0xff] }
   0xe   :  { %310 = vmatmul.mubr.msk.bf16.gmra.mrb[4].mxu0 %vm82_vm1, %v331_v8  ;;  %318 = vmatmul.mubr.msk.bf16.gmra.mrb[4].mxu1 %vm82_vm1, %v332_v9 }
  0xd9   :  { %v307_v11 = vpop.f32.mrb[0].mxu0  ;;  %v315_v14 = vpop.f32.mrb[0].mxu1 }
  0xda   :  { %v154_v13 = vadd.f32 %v307_v11, %v396_v10  ;;  %v145_v16 = vpop.f32.mrb[1].mxu0  ;;  %v186_v18 = vadd.f32 %v315_v14, %v396_v10  ;;  %v177_v20 = vpop.f32.mrb[1].mxu1 }
  0xdb   :  { %v146_v19 = vadd.f32 %v396_v10, %v145_v16  ;;  %v308_v22 = vpop.f32.mrb[2].mxu0  ;;  %v178_v25 = vadd.f32 %v396_v10, %v177_v20  ;;  %v316_v27 = vpop.f32.mrb[2].mxu1 }
  0xdc   :  { %v226_v24 = vadd.f32 %v210_v12, %v154_v13  ;;  %v157_v26 = vadd.f32 %v308_v22, %v396_v10  ;;  %v148_v29 = vpop.f32.mrb[3].mxu0  ;;  %v234_v31 = vadd.f32 %v218_v15, %v186_v18  ;;  %v189_v33 = vadd.f32 %v316_v27, %v396_v10  ;;  %v180_v35 = vpop.f32.mrb[3].mxu1  ;;  %v221_v13 = vld [vmem:[%s529_s3 + $0x68] sm:$0xff] }
  0xdd   :  { %v224_v32 = vadd.f32 %v208_v17, %v146_v19  ;;  %v149_v34 = vadd.f32 %v396_v10, %v148_v29  ;;  %v232_v38 = vadd.f32 %v216_v21, %v178_v25  ;;  %v181_v40 = vadd.f32 %v396_v10, %v180_v35 }
  0xde   :  { %v242_v37 = vmax.f32 %v226_v24, 0.0  ;;  %v227_v39 = vadd.f32 %v211_v23, %v157_v26  ;;  %v250_v41 = vmax.f32 %v234_v31, 0.0  ;;  %v235_v43 = vadd.f32 %v219_v28, %v189_v33 }
  0xdf   :  { %v240_v42 = vmax.f32 %v224_v32, 0.0  ;;  %v225_v44 = vadd.f32 %v209_v30, %v149_v34  ;;  %v248_v45 = vmax.f32 %v232_v38, 0.0  ;;  %v233_v47 = vadd.f32 %v217_v36, %v181_v40 }
  0xe0   :  { %259 = vst.msk [vmem:[%s530_s4 + $0x10] sm:$0xff] %vm256_vm2, %v242_v37  ;;  %v243_v46 = vmax.f32 %v227_v39, 0.0  ;;  %267 = vst.msk [vmem:[%s530_s4 + $0x50] sm:$0xff] %vm256_vm2, %v250_v41  ;;  %v251_v48 = vmax.f32 %v235_v43, 0.0 }
  0xe1   :  { %257 = vst.msk [vmem:[%s530_s4] sm:$0xff] %vm256_vm2, %v240_v42  ;;  %v241_v49 = vmax.f32 %v225_v44, 0.0  ;;  %v311_v50 = vpop.f32.mrb[4].mxu0  ;;  %265 = vst.msk [vmem:[%s530_s4 + $0x40] sm:$0xff] %vm256_vm2, %v248_v45  ;;  %v249_v52 = vmax.f32 %v233_v47, 0.0  ;;  %v319_v54 = vpop.f32.mrb[4].mxu1 }
  0xe2   :  { %260 = vst.msk [vmem:[%s530_s4 + $0x18] sm:$0xff] %vm256_vm2, %v243_v46  ;;  %v170_v53 = vadd.f32 %v311_v50, %v396_v10  ;;  %v161_v56 = vpop.f32.mrb[5].mxu0  ;;  %268 = vst.msk [vmem:[%s530_s4 + $0x58] sm:$0xff] %vm256_vm2, %v251_v48  ;;  %v202_v58 = vadd.f32 %v319_v54, %v396_v10  ;;  %v193_v60 = vpop.f32.mrb[5].mxu1 }
  0xe3   :  { %258 = vst.msk [vmem:[%s530_s4 + $0x8] sm:$0xff] %vm256_vm2, %v241_v49  ;;  %v162_v59 = vadd.f32 %v396_v10, %v161_v56  ;;  %v312_v62 = vpop.f32.mrb[6].mxu0  ;;  %266 = vst.msk [vmem:[%s530_s4 + $0x48] sm:$0xff] %vm256_vm2, %v249_v52  ;;  %v194_v1 = vadd.f32 %v396_v10, %v193_v60  ;;  %v320_v3 = vpop.f32.mrb[6].mxu1 }
  0xe4   :  { %v230_v0 = vadd.f32 %v214_v51, %v170_v53  ;;  %v173_v2 = vadd.f32 %v312_v62, %v396_v10  ;;  %v164_v5 = vpop.f32.mrb[7].mxu0  ;;  %v238_v7 = vadd.f32 %v222_v55, %v202_v58  ;;  %v205_v9 = vadd.f32 %v320_v3, %v396_v10  ;;  %v196_v12 = vpop.f32.mrb[7].mxu1 }
  0xe5   :  { %v228_v8 = vadd.f32 %v212_v57, %v162_v59  ;;  %v165_v11 = vadd.f32 %v396_v10, %v164_v5  ;;  %v236_v15 = vadd.f32 %v220_v61, %v194_v1  ;;  %v197_v17 = vadd.f32 %v396_v10, %v196_v12 }
  0xe6   :  { %v246_v14 = vmax.f32 %v230_v0, 0.0  ;;  %v231_v16 = vadd.f32 %v215_v63, %v173_v2  ;;  %v254_v18 = vmax.f32 %v238_v7, 0.0  ;;  %v239_v20 = vadd.f32 %v223_v4, %v205_v9 }
  0xe7   :  { %v244_v19 = vmax.f32 %v228_v8, 0.0  ;;  %v229_v21 = vadd.f32 %v213_v6, %v165_v11  ;;  %v252_v22 = vmax.f32 %v236_v15, 0.0  ;;  %v237_v24 = vadd.f32 %v221_v13, %v197_v17 }
  0xe8   :  { %263 = vst.msk [vmem:[%s530_s4 + $0x30] sm:$0xff] %vm256_vm2, %v246_v14  ;;  %v247_v23 = vmax.f32 %v231_v16, 0.0  ;;  %271 = vst.msk [vmem:[%s530_s4 + $0x70] sm:$0xff] %vm256_vm2, %v254_v18  ;;  %v255_v10 = vmax.f32 %v239_v20, 0.0 }
  0xe9   :  { %261 = vst.msk [vmem:[%s530_s4 + $0x20] sm:$0xff] %vm256_vm2, %v244_v19  ;;  %v245_v25 = vmax.f32 %v229_v21, 0.0  ;;  %269 = vst.msk [vmem:[%s530_s4 + $0x60] sm:$0xff] %vm256_vm2, %v252_v22  ;;  %v253_v26 = vmax.f32 %v237_v24, 0.0 }
  0xea   :  { %264 = vst.msk [vmem:[%s530_s4 + $0x38] sm:$0xff] %vm256_vm2, %v247_v23  ;;  %272 = vst.msk [vmem:[%s530_s4 + $0x78] sm:$0xff] %vm256_vm2, %v255_v10 }
  0xeb   :  { %262 = vst.msk [vmem:[%s530_s4 + $0x28] sm:$0xff] %vm256_vm2, %v245_v25  ;;  %270 = vst.msk [vmem:[%s530_s4 + $0x68] sm:$0xff] %vm256_vm2, %v253_v26 }

// kernel: _lambda_.67
= control target key start
LH: loop header
LB: loop body
LE: loop exit
PB: predicated region body
PF: predicated region fallthrough
CT: control target
= control target key end

     0   :  { %vm117_vm0 = vcmask 588800   ;;  %vm142_vm1 = vcmask 1043456   ;;  %vm291_vm2 = vcmask 64512   ;;  %s603_s1 = inlined_call_operand.vmem [shape: bf16[72,8], index: 1, kind: input, shape index: {}]   ;;  %s604_s0 = inlined_call_operand.vmem [shape: bf16[128,72], index: 0, kind: input, shape index: {}]   ;;  %s605_s2 = inlined_call_operand.vmem [shape: f32[1,8], index: 2, kind: input, shape index: {}]   ;;  %s606_s3 = inlined_call_operand.vmem [shape: f32[128,8], index: 3, kind: input, shape index: {}]   ;;  %s607_s4 = inlined_call_operand.vmem [shape: f32[128,8], index: 4, kind: output, shape index: {}]  }
   0x1   :  { %v385_v0 = vld [vmem:[%s603_s1] sm:$0xff]   ;;  %v386_v1 = vld [vmem:[%s603_s1 + $0x8] sm:$0xff]   ;;  %v387_v2 = vld [vmem:[%s603_s1 + $0x10] sm:$0xff]  }
   0x2   :  { %347 = vmatprep.subr.bf16.mxu0 %v385_v0  ;;  %373 = vmatprep.subr.bf16.mxu1 %v385_v0  ;;  %v390_v3 = vld [vmem:[%s604_s0] sm:$0xff]   ;;  %v388_v5 = vld [vmem:[%s603_s1 + $0x18] sm:$0xff]   ;;  %v392_v8 = vld [vmem:[%s604_s0 + $0x8] sm:$0xff]  }
   0x3   :  { %348 = vmatpush3.bf16.msra.mxu0 %v385_v0  ;;  %378 = vmatpush3.bf16.msra.mxu1 %v385_v0  ;;  %v391_v4 = vld [vmem:[%s604_s0 + $0x20] sm:$0xff]   ;;  %v393_v9 = vld [vmem:[%s604_s0 + $0x28] sm:$0xff]   ;;  %v394_v10 = vld [vmem:[%s604_s0 + $0x10] sm:$0xff]  }
   0x4   :  { %349 = vmatprep.subr.bf16.mxu0 %v386_v1  ;;  %374 = vmatprep.subr.bf16.mxu1 %v386_v1  ;;  %v389_v6 = vld [vmem:[%s603_s1 + $0x20] ss:$0 sps:$4 sm:$0xff]   ;;  %v395_v11 = vld [vmem:[%s604_s0 + $0x30] sm:$0xff]   ;;  %v396_v12 = vld [vmem:[%s604_s0 + $0x18] sm:$0xff]  }
   0x5   :  { %357 = vmatprep.mubr.msk.bf16.mxu0 %vm117_vm0, %v390_v3  ;;  %365 = vmatprep.mubr.msk.bf16.mxu1 %vm117_vm0, %v391_v4  ;;  %v144_v7 = vsel %vm142_vm1, %v389_v6, 0  ;;  %v397_v13 = vld [vmem:[%s604_s0 + $0x38] sm:$0xff]   ;;  %v473_v14 = vld [vmem:[%s605_s2] ss:$0 sm:$0xff]  ;;  %v245_v16 = vld [vmem:[%s606_s3 + $0x10] sm:$0xff] }
   0x6   :  { %v253_v18 = vld [vmem:[%s606_s3 + $0x50] sm:$0xff]  ;;  %v243_v22 = vld [vmem:[%s606_s3] sm:$0xff]  ;;  %v246_v28 = vld [vmem:[%s606_s3 + $0x18] sm:$0xff] }
   0x7   :  { %350 = vmatpush3.bf16.msra.mxu0 %v386_v1  ;;  %379 = vmatpush3.bf16.msra.mxu1 %v386_v1  ;;  %v251_v24 = vld [vmem:[%s606_s3 + $0x40] sm:$0xff]  ;;  %v254_v30 = vld [vmem:[%s606_s3 + $0x58] sm:$0xff]  ;;  %v244_v36 = vld [vmem:[%s606_s3 + $0x8] sm:$0xff] }
   0x8   :  { %351 = vmatprep.subr.bf16.mxu0 %v387_v2  ;;  %375 = vmatprep.subr.bf16.mxu1 %v387_v2  ;;  %v252_v38 = vld [vmem:[%s606_s3 + $0x48] sm:$0xff]  ;;  %v249_v56 = vld [vmem:[%s606_s3 + $0x30] sm:$0xff]  ;;  %v247_v62 = vld [vmem:[%s606_s3 + $0x20] sm:$0xff] }
   0x9   :  { %v257_v58 = vld [vmem:[%s606_s3 + $0x70] sm:$0xff]  ;;  %v255_v0 = vld [vmem:[%s606_s3 + $0x60] sm:$0xff]  ;;  %v250_v4 = vld [vmem:[%s606_s3 + $0x38] sm:$0xff] }
   0xb   :  { %352 = vmatpush3.bf16.msra.mxu0 %v387_v2  ;;  %380 = vmatpush3.bf16.msra.mxu1 %v387_v2 }
   0xc   :  { %353 = vmatprep.subr.bf16.mxu0 %v388_v5  ;;  %376 = vmatprep.subr.bf16.mxu1 %v388_v5 }
   0xf   :  { %354 = vmatpush3.bf16.msra.mxu0 %v388_v5  ;;  %381 = vmatpush3.bf16.msra.mxu1 %v388_v5 }
  0x10   :  { %383 = vmatprep.subr.msk.bf16.mxu0 %vm142_vm1, %v389_v6  ;;  %384 = vmatprep.subr.msk.bf16.mxu1 %vm142_vm1, %v389_v6  ;;  %v258_v6 = vld [vmem:[%s606_s3 + $0x78] sm:$0xff] }
  0x13   :  { %356 = vmatpush3.bf16.msra.mxu0 %v144_v7  ;;  %382 = vmatpush3.bf16.msra.mxu1 %v144_v7 }
  0x16   :  { %358 = vmatmul.mubr.msk.bf16.vlgmr.msra.gmra.mrb[0].mxu0 %vm117_vm0, %v392_v8  ;;  %366 = vmatmul.mubr.msk.bf16.vlgmr.msra.gmra.mrb[0].mxu1 %vm117_vm0, %v393_v9 }
  0x17   :  { %361 = vmatprep.mubr.msk.bf16.mxu0 %vm117_vm0, %v394_v10  ;;  %369 = vmatprep.mubr.msk.bf16.mxu1 %vm117_vm0, %v395_v11 }
  0x1e   :  { %362 = vmatmul.mubr.msk.bf16.gmra.mrb[4].mxu0 %vm117_vm0, %v396_v12  ;;  %370 = vmatmul.mubr.msk.bf16.gmra.mrb[4].mxu1 %vm117_vm0, %v397_v13  ;;  %v248_v12 = vld [vmem:[%s606_s3 + $0x28] sm:$0xff] }
  0xe9   :  { %v359_v15 = vpop.f32.mrb[0].mxu0  ;;  %v367_v17 = vpop.f32.mrb[0].mxu1 }
  0xea   :  { %v189_v19 = vadd.f32 %v359_v15, %v473_v14  ;;  %v221_v20 = vadd.f32 %v367_v17, %v473_v14  ;;  %v180_v21 = vpop.f32.mrb[1].mxu0  ;;  %v212_v23 = vpop.f32.mrb[1].mxu1  ;;  %v256_v15 = vld [vmem:[%s606_s3 + $0x68] sm:$0xff] }
  0xeb   :  { %v181_v25 = vadd.f32 %v473_v14, %v180_v21  ;;  %v213_v26 = vadd.f32 %v473_v14, %v212_v23  ;;  %v360_v27 = vpop.f32.mrb[2].mxu0  ;;  %v368_v29 = vpop.f32.mrb[2].mxu1 }
  0xec   :  { %v261_v31 = vadd.f32 %v245_v16, %v189_v19  ;;  %v269_v32 = vadd.f32 %v253_v18, %v221_v20  ;;  %v192_v33 = vadd.f32 %v360_v27, %v473_v14  ;;  %v224_v34 = vadd.f32 %v368_v29, %v473_v14  ;;  %v183_v35 = vpop.f32.mrb[3].mxu0  ;;  %v215_v37 = vpop.f32.mrb[3].mxu1 }
  0xed   :  { %v259_v39 = vadd.f32 %v243_v22, %v181_v25  ;;  %v267_v40 = vadd.f32 %v251_v24, %v213_v26  ;;  %v184_v41 = vadd.f32 %v473_v14, %v183_v35  ;;  %v216_v42 = vadd.f32 %v473_v14, %v215_v37 }
  0xee   :  { %v277_v43 = vmax.f32 %v261_v31, 0.0  ;;  %v285_v44 = vmax.f32 %v269_v32, 0.0  ;;  %v262_v45 = vadd.f32 %v246_v28, %v192_v33  ;;  %v270_v46 = vadd.f32 %v254_v30, %v224_v34 }
  0xef   :  { %v275_v47 = vmax.f32 %v259_v39, 0.0  ;;  %v283_v48 = vmax.f32 %v267_v40, 0.0  ;;  %v260_v49 = vadd.f32 %v244_v36, %v184_v41  ;;  %v268_v50 = vadd.f32 %v252_v38, %v216_v42 }
  0xf0   :  { %294 = vst.msk [vmem:[%s607_s4 + $0x10] sm:$0xff] %vm291_vm2, %v277_v43  ;;  %302 = vst.msk [vmem:[%s607_s4 + $0x50] sm:$0xff] %vm291_vm2, %v285_v44  ;;  %v278_v51 = vmax.f32 %v262_v45, 0.0  ;;  %v286_v52 = vmax.f32 %v270_v46, 0.0 }
  0xf1   :  { %292 = vst.msk [vmem:[%s607_s4] sm:$0xff] %vm291_vm2, %v275_v47  ;;  %300 = vst.msk [vmem:[%s607_s4 + $0x40] sm:$0xff] %vm291_vm2, %v283_v48  ;;  %v276_v53 = vmax.f32 %v260_v49, 0.0  ;;  %v284_v54 = vmax.f32 %v268_v50, 0.0  ;;  %v363_v55 = vpop.f32.mrb[4].mxu0  ;;  %v371_v57 = vpop.f32.mrb[4].mxu1 }
  0xf2   :  { %295 = vst.msk [vmem:[%s607_s4 + $0x18] sm:$0xff] %vm291_vm2, %v278_v51  ;;  %303 = vst.msk [vmem:[%s607_s4 + $0x58] sm:$0xff] %vm291_vm2, %v286_v52  ;;  %v205_v59 = vadd.f32 %v363_v55, %v473_v14  ;;  %v237_v60 = vadd.f32 %v371_v57, %v473_v14  ;;  %v196_v61 = vpop.f32.mrb[5].mxu0  ;;  %v228_v63 = vpop.f32.mrb[5].mxu1 }
  0xf3   :  { %293 = vst.msk [vmem:[%s607_s4 + $0x8] sm:$0xff] %vm291_vm2, %v276_v53  ;;  %301 = vst.msk [vmem:[%s607_s4 + $0x48] sm:$0xff] %vm291_vm2, %v284_v54  ;;  %v197_v1 = vadd.f32 %v473_v14, %v196_v61  ;;  %v229_v2 = vadd.f32 %v473_v14, %v228_v63  ;;  %v364_v3 = vpop.f32.mrb[6].mxu0  ;;  %v372_v5 = vpop.f32.mrb[6].mxu1 }
  0xf4   :  { %v265_v7 = vadd.f32 %v249_v56, %v205_v59  ;;  %v273_v8 = vadd.f32 %v257_v58, %v237_v60  ;;  %v208_v9 = vadd.f32 %v364_v3, %v473_v14  ;;  %v240_v10 = vadd.f32 %v372_v5, %v473_v14  ;;  %v199_v11 = vpop.f32.mrb[7].mxu0  ;;  %v231_v13 = vpop.f32.mrb[7].mxu1 }
  0xf5   :  { %v263_v16 = vadd.f32 %v247_v62, %v197_v1  ;;  %v271_v17 = vadd.f32 %v255_v0, %v229_v2  ;;  %v200_v18 = vadd.f32 %v473_v14, %v199_v11  ;;  %v232_v19 = vadd.f32 %v473_v14, %v231_v13 }
  0xf6   :  { %v281_v20 = vmax.f32 %v265_v7, 0.0  ;;  %v289_v21 = vmax.f32 %v273_v8, 0.0  ;;  %v266_v22 = vadd.f32 %v250_v4, %v208_v9  ;;  %v274_v23 = vadd.f32 %v258_v6, %v240_v10 }
  0xf7   :  { %v279_v24 = vmax.f32 %v263_v16, 0.0  ;;  %v287_v25 = vmax.f32 %v271_v17, 0.0  ;;  %v264_v26 = vadd.f32 %v248_v12, %v200_v18  ;;  %v272_v27 = vadd.f32 %v256_v15, %v232_v19 }
  0xf8   :  { %298 = vst.msk [vmem:[%s607_s4 + $0x30] sm:$0xff] %vm291_vm2, %v281_v20  ;;  %306 = vst.msk [vmem:[%s607_s4 + $0x70] sm:$0xff] %vm291_vm2, %v289_v21  ;;  %v282_v28 = vmax.f32 %v266_v22, 0.0  ;;  %v290_v14 = vmax.f32 %v274_v23, 0.0 }
  0xf9   :  { %296 = vst.msk [vmem:[%s607_s4 + $0x20] sm:$0xff] %vm291_vm2, %v279_v24  ;;  %304 = vst.msk [vmem:[%s607_s4 + $0x60] sm:$0xff] %vm291_vm2, %v287_v25  ;;  %v280_v29 = vmax.f32 %v264_v26, 0.0  ;;  %v288_v30 = vmax.f32 %v272_v27, 0.0 }
  0xfa   :  { %299 = vst.msk [vmem:[%s607_s4 + $0x38] sm:$0xff] %vm291_vm2, %v282_v28  ;;  %307 = vst.msk [vmem:[%s607_s4 + $0x78] sm:$0xff] %vm291_vm2, %v290_v14 }
  0xfb   :  { %297 = vst.msk [vmem:[%s607_s4 + $0x28] sm:$0xff] %vm291_vm2, %v280_v29  ;;  %305 = vst.msk [vmem:[%s607_s4 + $0x68] sm:$0xff] %vm291_vm2, %v288_v30 }

// kernel: _lambda_.64
= control target key start
LH: loop header
LB: loop body
LE: loop exit
PB: predicated region body
PF: predicated region fallthrough
CT: control target
= control target key end

     0   :  { %vm318_vm0 = vcmask 261120   ;;  %vm553_vm1 = vcmask 64512   ;;  %s1036_s1 = inlined_call_operand.vmem [shape: bf16[288,8], index: 1, kind: input, shape index: {}]   ;;  %s1037_s0 = inlined_call_operand.vmem [shape: bf16[128,288], index: 0, kind: input, shape index: {}]   ;;  %s1038_s2 = inlined_call_operand.vmem [shape: f32[1,8], index: 2, kind: input, shape index: {}]   ;;  %s1039_s3 = inlined_call_operand.vmem [shape: f32[128,8], index: 3, kind: output, shape index: {}]  }
   0x1   :  { %v735_v0 = vld [vmem:[%s1036_s1 + $0x40] sm:$0xff]   ;;  %v737_v2 = vld [vmem:[%s1036_s1 + $0x48] sm:$0xff]   ;;  %v739_v4 = vld [vmem:[%s1036_s1 + $0x50] sm:$0xff]  }
   0x2   :  { %v736_v1 = vld [vmem:[%s1036_s1] sm:$0xff]   ;;  %625 = vmatprep.subr.bf16.mxu0 %v735_v0  ;;  %719 = vmatprep.subr.bf16.mxu1 %v735_v0  ;;  %v738_v3 = vld [vmem:[%s1036_s1 + $0x8] sm:$0xff]   ;;  %v740_v5 = vld [vmem:[%s1036_s1 + $0x10] sm:$0xff]  }
   0x3   :  { %626 = vmatpush3.bf16.msra.mxu0 %v736_v1  ;;  %727 = vmatpush3.bf16.msra.mxu1 %v736_v1  ;;  %v741_v6 = vld [vmem:[%s1036_s1 + $0x58] sm:$0xff]   ;;  %v743_v8 = vld [vmem:[%s1036_s1 + $0x60] sm:$0xff]   ;;  %v745_v10 = vld [vmem:[%s1036_s1 + $0x68] sm:$0xff]  }
   0x4   :  { %627 = vmatprep.subr.bf16.mxu0 %v737_v2  ;;  %720 = vmatprep.subr.bf16.mxu1 %v737_v2  ;;  %v742_v7 = vld [vmem:[%s1036_s1 + $0x18] sm:$0xff]   ;;  %v744_v9 = vld [vmem:[%s1036_s1 + $0x20] sm:$0xff]   ;;  %v746_v13 = vld [vmem:[%s1036_s1 + $0x28] sm:$0xff]  }
   0x5   :  { %v753_v11 = vld [vmem:[%s1037_s0 + $0x4] ss:$12 sps:$4 sm:$0xff]   ;;  %v756_v12 = vld [vmem:[%s1037_s0 + $0x94] ss:$12 sps:$4 sm:$0xff]   ;;  %v749_v16 = vld [vmem:[%s1036_s1 + $0x78] sm:$0xff]  }
   0x6   :  { %v747_v14 = vld [vmem:[%s1036_s1 + $0x70] sm:$0xff]   ;;  %375 = vmatprep.mubr.bf16.mxu0 %v753_v11  ;;  %423 = vmatprep.mubr.bf16.mxu1 %v756_v12  ;;  %v750_v17 = vld [vmem:[%s1036_s1 + $0x38] sm:$0xff]   ;;  %v751_v18 = vld [vmem:[%s1037_s0] ss:$12 sps:$4 sm:$0xff]  }
   0x7   :  { %628 = vmatpush3.bf16.msra.mxu0 %v738_v3  ;;  %728 = vmatpush3.bf16.msra.mxu1 %v738_v3  ;;  %v748_v15 = vld [vmem:[%s1036_s1 + $0x30] sm:$0xff]   ;;  %v757_v19 = vld [vmem:[%s1036_s1 + $0x80] sm:$0xff]   ;;  %v758_v21 = vld [vmem:[%s1037_s0 + $0x1c] ss:$12 sps:$4 sm:$0xff]  }
   0x8   :  { %629 = vmatprep.subr.bf16.mxu0 %v739_v4  ;;  %721 = vmatprep.subr.bf16.mxu1 %v739_v4  ;;  %v754_v20 = vld [vmem:[%s1037_s0 + $0x90] ss:$12 sps:$4 sm:$0xff]   ;;  %v760_v22 = vld [vmem:[%s1037_s0 + $0xac] ss:$12 sps:$4 sm:$0xff]   ;;  %v763_v25 = vld [vmem:[%s1037_s0 + $0xa8] ss:$12 sps:$4 sm:$0xff]  }
   0x9   :  { %v764_v23 = vld [vmem:[%s1036_s1 + $0x88] sm:$0xff]   ;;  %v762_v24 = vld [vmem:[%s1037_s0 + $0x18] ss:$12 sps:$4 sm:$0xff]   ;;  %v765_v26 = vld [vmem:[%s1037_s0 + $0x34] ss:$12 sps:$4 sm:$0xff]  }
   0xa   :  { %v767_v27 = vld [vmem:[%s1037_s0 + $0x8] ss:$12 sps:$4 sm:$0xff]   ;;  %v768_v28 = vld [vmem:[%s1037_s0 + $0x30] ss:$12 sps:$4 sm:$0xff]   ;;  %v769_v29 = vld [vmem:[%s1037_s0 + $0x20] ss:$12 sps:$4 sm:$0xff]  }
   0xb   :  { %630 = vmatpush3.bf16.msra.mxu0 %v740_v5  ;;  %729 = vmatpush3.bf16.msra.mxu1 %v740_v5  ;;  %v770_v30 = vld [vmem:[%s1037_s0 + $0x4c] ss:$12 sps:$4 sm:$0xff]   ;;  %v773_v32 = vld [vmem:[%s1037_s0 + $0x48] ss:$12 sps:$4 sm:$0xff]   ;;  %v774_v33 = vld [vmem:[%s1037_s0 + $0x50] ss:$12 sps:$4 sm:$0xff]  }
   0xc   :  { %631 = vmatprep.subr.bf16.mxu0 %v741_v6  ;;  %722 = vmatprep.subr.bf16.mxu1 %v741_v6  ;;  %v772_v31 = vld [vmem:[%s1037_s0 + $0x38] ss:$12 sps:$4 sm:$0xff]   ;;  %v777_v35 = vld [vmem:[%s1037_s0 + $0x68] ss:$12 sps:$4 sm:$0xff]   ;;  %v778_v36 = vld [vmem:[%s1037_s0 + $0x60] ss:$12 sps:$4 sm:$0xff]  }
   0xd   :  { %v775_v34 = vld [vmem:[%s1037_s0 + $0x64] ss:$12 sps:$4 sm:$0xff]   ;;  %v779_v37 = vld [vmem:[%s1037_s0 + $0x80] ss:$12 sps:$4 sm:$0xff]   ;;  %v780_v38 = vld [vmem:[%s1037_s0 + $0x7c] ss:$12 sps:$4 sm:$0xff]  }
   0xe   :  { %v782_v39 = vld [vmem:[%s1037_s0 + $0x98] ss:$12 sps:$4 sm:$0xff]   ;;  %v784_v41 = vld [vmem:[%s1037_s0 + $0xb0] ss:$12 sps:$4 sm:$0xff]   ;;  %v950_v2 = vld [vmem:[%s1038_s2] ss:$0 sm:$0xff] }
   0xf   :  { %632 = vmatpush3.bf16.msra.mxu0 %v742_v7  ;;  %730 = vmatpush3.bf16.msra.mxu1 %v742_v7  ;;  %v783_v40 = vld [vmem:[%s1037_s0 + $0x78] ss:$12 sps:$4 sm:$0xff]  }
  0x10   :  { %633 = vmatprep.subr.bf16.mxu0 %v743_v8  ;;  %723 = vmatprep.subr.bf16.mxu1 %v743_v8 }
  0x13   :  { %634 = vmatpush3.bf16.msra.mxu0 %v744_v9  ;;  %731 = vmatpush3.bf16.msra.mxu1 %v744_v9 }
  0x14   :  { %635 = vmatprep.subr.bf16.mxu0 %v745_v10  ;;  %724 = vmatprep.subr.bf16.mxu1 %v745_v10 }
  0x17   :  { %636 = vmatpush3.bf16.msra.mxu0 %v746_v13  ;;  %732 = vmatpush3.bf16.msra.mxu1 %v746_v13 }
  0x18   :  { %637 = vmatprep.subr.bf16.mxu0 %v747_v14  ;;  %725 = vmatprep.subr.bf16.mxu1 %v747_v14 }
  0x1b   :  { %638 = vmatpush3.bf16.msra.mxu0 %v748_v15  ;;  %733 = vmatpush3.bf16.msra.mxu1 %v748_v15 }
  0x1c   :  { %639 = vmatprep.subr.bf16.mxu0 %v749_v16  ;;  %726 = vmatprep.subr.bf16.mxu1 %v749_v16 }
  0x1f   :  { %640 = vmatpush3.bf16.msra.mxu0 %v750_v17  ;;  %734 = vmatpush3.bf16.msra.mxu1 %v750_v17 }
  0x20   :  { %699 = vmatprep.subr.bf16.mxu1 %v757_v19 }
  0x22   :  { %376 = vmatmul.mubr.bf16.vlgmr.msra.gmra.mrb[0].mxu0 %v751_v18  ;;  %424 = vmatmul.mubr.bf16.vlgmr.msra.gmra.mrb[0].mxu1 %v754_v20 }
  0x23   :  { %700 = vmatpush3.bf16.msra.mxu1 %v757_v19  ;;  %383 = vmatprep.mubr.bf16.mxu0 %v758_v21 }
  0x24   :  { %431 = vmatprep.mubr.bf16.mxu1 %v760_v22  ;;  %701 = vmatprep.subr.bf16.mxu1 %v764_v23 }
  0x27   :  { %702 = vmatpush3.bf16.msra.mxu1 %v764_v23 }
  0x2a   :  { %384 = vmatmul.mubr.bf16.gmra.mrb[4].mxu0 %v762_v24  ;;  %432 = vmatmul.mubr.bf16.gmra.mrb[4].mxu1 %v763_v25 }
  0x2b   :  { %391 = vmatprep.mubr.bf16.mxu0 %v765_v26  ;;  %703 = vmatprep.mubr.msk.bf16.mxu1 %vm318_vm0, %v767_v27 }
  0x32   :  { %392 = vmatmul.mubr.bf16.gmra.mrb[8].mxu0 %v768_v28  ;;  %704 = vmatmul.mubr.msk.bf16.vlgmr.msra.gmra.mrb[8].mxu1 %vm318_vm0, %v769_v29 }
  0x33   :  { %399 = vmatprep.mubr.bf16.mxu0 %v770_v30  ;;  %707 = vmatprep.mubr.msk.bf16.mxu1 %vm318_vm0, %v772_v31 }
  0x3a   :  { %400 = vmatmul.mubr.bf16.gmra.mrb[12].mxu0 %v773_v32  ;;  %708 = vmatmul.mubr.msk.bf16.gmra.mrb[12].mxu1 %vm318_vm0, %v774_v33 }
  0x3b   :  { %407 = vmatprep.mubr.bf16.mxu0 %v775_v34  ;;  %711 = vmatprep.mubr.msk.bf16.mxu1 %vm318_vm0, %v777_v35 }
  0x42   :  { %408 = vmatmul.mubr.bf16.gmra.mrb[16].mxu0 %v778_v36  ;;  %712 = vmatmul.mubr.msk.bf16.gmra.mrb[16].mxu1 %vm318_vm0, %v779_v37 }
  0x43   :  { %415 = vmatprep.mubr.bf16.mxu0 %v780_v38  ;;  %715 = vmatprep.mubr.msk.bf16.mxu1 %vm318_vm0, %v782_v39 }
  0x4a   :  { %416 = vmatmul.mubr.bf16.gmra.mrb[20].mxu0 %v783_v40  ;;  %716 = vmatmul.mubr.msk.bf16.gmra.mrb[20].mxu1 %vm318_vm0, %v784_v41 }
  0xf5   :  { %v641_v42 = vpop.f32.mrb[0].mxu0  ;;  %v677_v43 = vpop.f32.mrb[0].mxu1 }
  0xf6   :  { %v642_v44 = vpop.f32.mrb[1].mxu0  ;;  %v678_v45 = vpop.f32.mrb[1].mxu1 }
  0xf7   :  { %v643_v46 = vadd.f32 %v642_v44, %v641_v42  ;;  %v644_v47 = vpop.f32.mrb[2].mxu0  ;;  %v939_v48 = vadd.f32 %v678_v45, %v677_v43  ;;  %v680_v49 = vpop.f32.mrb[2].mxu1 }
  0xf8   :  { %v645_v50 = vpop.f32.mrb[3].mxu0  ;;  %v681_v51 = vpop.f32.mrb[3].mxu1 }
  0xf9   :  { %v646_v52 = vadd.f32 %v645_v50, %v644_v47  ;;  %v941_v53 = vadd.f32 %v681_v51, %v680_v49  ;;  %v378_v6 = vadd.f32 %v643_v46, %v950_v2 }
  0xfb   :  { %v381_v15 = vadd.f32 %v646_v52, %v950_v2 }
  0xfd   :  { %v647_v54 = vpop.f32.mrb[4].mxu0  ;;  %v683_v55 = vpop.f32.mrb[4].mxu1 }
  0xfe   :  { %v648_v56 = vpop.f32.mrb[5].mxu0  ;;  %v684_v57 = vpop.f32.mrb[5].mxu1 }
  0xff   :  { %v649_v58 = vadd.f32 %v648_v56, %v647_v54  ;;  %v650_v59 = vpop.f32.mrb[6].mxu0  ;;  %v943_v60 = vadd.f32 %v684_v57, %v683_v55  ;;  %v686_v61 = vpop.f32.mrb[6].mxu1 }
 0x100   :  { %v651_v62 = vpop.f32.mrb[7].mxu0  ;;  %v687_v63 = vpop.f32.mrb[7].mxu1 }
 0x101   :  { %v652_v0 = vadd.f32 %v651_v62, %v650_v59  ;;  %v945_v1 = vadd.f32 %v687_v63, %v686_v61  ;;  %v386_v3 = vadd.f32 %v649_v58, %v950_v2  ;;  %v434_v63 = vadd.f32 %v943_v60, %v950_v2 }
 0x103   :  { %v389_v10 = vadd.f32 %v652_v0, %v950_v2 }
 0x105   :  { %v653_v4 = vpop.f32.mrb[8].mxu0  ;;  %v705_v5 = vpop.f32.mrb[8].mxu1 }
 0x106   :  { %v483_v7 = vadd.f32 %v705_v5, %v386_v3  ;;  %v654_v8 = vpop.f32.mrb[9].mxu0  ;;  %v474_v9 = vpop.f32.mrb[9].mxu1 }
 0x107   :  { %v655_v11 = vadd.f32 %v654_v8, %v653_v4  ;;  %v475_v12 = vadd.f32 %v474_v9, %v378_v6  ;;  %v656_v13 = vpop.f32.mrb[10].mxu0  ;;  %v706_v14 = vpop.f32.mrb[10].mxu1  ;;  %v426_v6 = vadd.f32 %v939_v48, %v950_v2 }
 0x108   :  { %v539_v16 = vmax.f32 %v483_v7, 0.0  ;;  %v486_v17 = vadd.f32 %v706_v14, %v389_v10  ;;  %v657_v18 = vpop.f32.mrb[11].mxu0  ;;  %v477_v19 = vpop.f32.mrb[11].mxu1  ;;  %v437_v10 = vadd.f32 %v945_v1, %v950_v2 }
 0x109   :  { %v537_v20 = vmax.f32 %v475_v12, 0.0  ;;  %v658_v21 = vadd.f32 %v657_v18, %v656_v13  ;;  %v478_v22 = vadd.f32 %v477_v19, %v381_v15  ;;  %v394_v27 = vadd.f32 %v655_v11, %v950_v2 }
 0x10a   :  { %556 = vst.msk [vmem:[%s1039_s3 + $0x10] sm:$0xff] %vm553_vm1, %v539_v16  ;;  %v540_v23 = vmax.f32 %v486_v17, 0.0  ;;  %v429_v15 = vadd.f32 %v941_v53, %v950_v2 }
 0x10b   :  { %554 = vst.msk [vmem:[%s1039_s3] sm:$0xff] %vm553_vm1, %v537_v20  ;;  %v538_v24 = vmax.f32 %v478_v22, 0.0  ;;  %v397_v34 = vadd.f32 %v658_v21, %v950_v2 }
 0x10c   :  { %557 = vst.msk [vmem:[%s1039_s3 + $0x18] sm:$0xff] %vm553_vm1, %v540_v23 }
 0x10d   :  { %555 = vst.msk [vmem:[%s1039_s3 + $0x8] sm:$0xff] %vm553_vm1, %v538_v24  ;;  %v659_v25 = vpop.f32.mrb[12].mxu0  ;;  %v709_v26 = vpop.f32.mrb[12].mxu1 }
 0x10e   :  { %v660_v28 = vpop.f32.mrb[13].mxu0  ;;  %v490_v29 = vpop.f32.mrb[13].mxu1 }
 0x10f   :  { %v661_v30 = vadd.f32 %v660_v28, %v659_v25  ;;  %v491_v31 = vadd.f32 %v490_v29, %v394_v27  ;;  %v662_v32 = vpop.f32.mrb[14].mxu0  ;;  %v710_v33 = vpop.f32.mrb[14].mxu1 }
 0x110   :  { %v663_v35 = vpop.f32.mrb[15].mxu0  ;;  %v493_v36 = vpop.f32.mrb[15].mxu1 }
 0x111   :  { %v402_v37 = vadd.f32 %v661_v30, %v950_v2  ;;  %v541_v38 = vmax.f32 %v491_v31, 0.0  ;;  %v664_v39 = vadd.f32 %v663_v35, %v662_v32  ;;  %v494_v40 = vadd.f32 %v493_v36, %v397_v34 }
 0x113   :  { %v499_v41 = vadd.f32 %v709_v26, %v402_v37  ;;  %558 = vst.msk [vmem:[%s1039_s3 + $0x20] sm:$0xff] %vm553_vm1, %v541_v38  ;;  %v405_v42 = vadd.f32 %v664_v39, %v950_v2  ;;  %v542_v43 = vmax.f32 %v494_v40, 0.0 }
 0x115   :  { %v543_v44 = vmax.f32 %v499_v41, 0.0  ;;  %v502_v45 = vadd.f32 %v710_v33, %v405_v42  ;;  %559 = vst.msk [vmem:[%s1039_s3 + $0x28] sm:$0xff] %vm553_vm1, %v542_v43  ;;  %v665_v46 = vpop.f32.mrb[16].mxu0  ;;  %v713_v47 = vpop.f32.mrb[16].mxu1 }
 0x116   :  { %v666_v49 = vpop.f32.mrb[17].mxu0  ;;  %v506_v50 = vpop.f32.mrb[17].mxu1 }
 0x117   :  { %560 = vst.msk [vmem:[%s1039_s3 + $0x30] sm:$0xff] %vm553_vm1, %v543_v44  ;;  %v544_v51 = vmax.f32 %v502_v45, 0.0  ;;  %v667_v52 = vadd.f32 %v666_v49, %v665_v46  ;;  %v668_v54 = vpop.f32.mrb[18].mxu0  ;;  %v714_v55 = vpop.f32.mrb[18].mxu1 }
 0x118   :  { %v669_v56 = vpop.f32.mrb[19].mxu0  ;;  %v509_v57 = vpop.f32.mrb[19].mxu1 }
 0x119   :  { %561 = vst.msk [vmem:[%s1039_s3 + $0x38] sm:$0xff] %vm553_vm1, %v544_v51  ;;  %v410_v58 = vadd.f32 %v667_v52, %v950_v2  ;;  %v670_v59 = vadd.f32 %v669_v56, %v668_v54 }
 0x11b   :  { %v507_v61 = vadd.f32 %v506_v50, %v410_v58  ;;  %v413_v62 = vadd.f32 %v670_v59, %v950_v2 }
 0x11d   :  { %v545_v0 = vmax.f32 %v507_v61, 0.0  ;;  %v510_v3 = vadd.f32 %v509_v57, %v413_v62  ;;  %v671_v4 = vpop.f32.mrb[20].mxu0  ;;  %v717_v5 = vpop.f32.mrb[20].mxu1 }
 0x11e   :  { %v531_v7 = vadd.f32 %v717_v5, %v434_v63  ;;  %v672_v8 = vpop.f32.mrb[21].mxu0  ;;  %v522_v9 = vpop.f32.mrb[21].mxu1 }
 0x11f   :  { %562 = vst.msk [vmem:[%s1039_s3 + $0x40] sm:$0xff] %vm553_vm1, %v545_v0  ;;  %v546_v11 = vmax.f32 %v510_v3, 0.0  ;;  %v673_v60 = vadd.f32 %v672_v8, %v671_v4  ;;  %v523_v12 = vadd.f32 %v522_v9, %v426_v6  ;;  %v674_v13 = vpop.f32.mrb[22].mxu0  ;;  %v718_v14 = vpop.f32.mrb[22].mxu1 }
 0x120   :  { %v551_v48 = vmax.f32 %v531_v7, 0.0  ;;  %v534_v16 = vadd.f32 %v718_v14, %v437_v10  ;;  %v675_v17 = vpop.f32.mrb[23].mxu0  ;;  %v525_v18 = vpop.f32.mrb[23].mxu1 }
 0x121   :  { %563 = vst.msk [vmem:[%s1039_s3 + $0x48] sm:$0xff] %vm553_vm1, %v546_v11  ;;  %v418_v1 = vadd.f32 %v673_v60, %v950_v2  ;;  %v549_v19 = vmax.f32 %v523_v12, 0.0  ;;  %v676_v20 = vadd.f32 %v675_v17, %v674_v13  ;;  %v526_v21 = vadd.f32 %v525_v18, %v429_v15 }
 0x122   :  { %568 = vst.msk [vmem:[%s1039_s3 + $0x70] sm:$0xff] %vm553_vm1, %v551_v48  ;;  %v552_v53 = vmax.f32 %v534_v16, 0.0 }
 0x123   :  { %v515_v22 = vadd.f32 %v713_v47, %v418_v1  ;;  %566 = vst.msk [vmem:[%s1039_s3 + $0x60] sm:$0xff] %vm553_vm1, %v549_v19  ;;  %v421_v23 = vadd.f32 %v676_v20, %v950_v2  ;;  %v550_v24 = vmax.f32 %v526_v21, 0.0 }
 0x124   :  { %569 = vst.msk [vmem:[%s1039_s3 + $0x78] sm:$0xff] %vm553_vm1, %v552_v53 }
 0x125   :  { %v547_v25 = vmax.f32 %v515_v22, 0.0  ;;  %v518_v26 = vadd.f32 %v714_v55, %v421_v23  ;;  %567 = vst.msk [vmem:[%s1039_s3 + $0x68] sm:$0xff] %vm553_vm1, %v550_v24 }
 0x127   :  { %564 = vst.msk [vmem:[%s1039_s3 + $0x50] sm:$0xff] %vm553_vm1, %v547_v25  ;;  %v548_v27 = vmax.f32 %v518_v26, 0.0 }
 0x129   :  { %565 = vst.msk [vmem:[%s1039_s3 + $0x58] sm:$0xff] %vm553_vm1, %v548_v27 }

// kernel: _lambda_.72
= control target key start
LH: loop header
LB: loop body
LE: loop exit
PB: predicated region body
PF: predicated region fallthrough
CT: control target
= control target key end

     0   :  { %vm72_vm0 = vcmask 588800   ;;  %vm79_vm1 = vcmask 1043456   ;;  %vm132_vm2 = vcmask 130048   ;;  %s236_s1 = inlined_call_operand.vmem [shape: bf16[72,16], index: 1, kind: input, shape index: {}]   ;;  %s237_s0 = inlined_call_operand.vmem [shape: bf16[32,72], index: 0, kind: input, shape index: {}]   ;;  %s238_s2 = inlined_call_operand.vmem [shape: f32[1,16], index: 2, kind: input, shape index: {}]   ;;  %s239_s3 = inlined_call_operand.vmem [shape: f32[32,16], index: 3, kind: output, shape index: {}]  }
   0x1   :  { %v173_v0 = vld [vmem:[%s236_s1] sm:$0xff]   ;;  %v174_v1 = vld [vmem:[%s236_s1 + $0x8] sm:$0xff]   ;;  %v175_v2 = vld [vmem:[%s236_s1 + $0x10] sm:$0xff]  }
   0x2   :  { %158 = vmatprep.subr.bf16.mxu0 %v173_v0  ;;  %v178_v3 = vld [vmem:[%s237_s0] sm:$0xff]   ;;  %v176_v4 = vld [vmem:[%s236_s1 + $0x18] sm:$0xff]   ;;  %v179_v7 = vld [vmem:[%s237_s0 + $0x8] sm:$0xff]  }
   0x3   :  { %159 = vmatpush3.bf16.msra.mxu0 %v173_v0  ;;  %168 = vmatprep.mubr.msk.bf16.mxu0 %vm72_vm0, %v178_v3  ;;  %v177_v5 = vld [vmem:[%s236_s1 + $0x20] ss:$0 sps:$4 sm:$0xff]  }
   0x4   :  { %160 = vmatprep.subr.bf16.mxu0 %v174_v1  ;;  %v81_v6 = vsel %vm79_vm1, %v177_v5, 0  ;;  %v141_v8 = vld [vmem:[%s238_s2] ss:$0 sm:$0xff] }
   0x7   :  { %161 = vmatpush3.bf16.msra.mxu0 %v174_v1 }
   0x8   :  { %162 = vmatprep.subr.bf16.mxu0 %v175_v2 }
   0xb   :  { %163 = vmatpush3.bf16.msra.mxu0 %v175_v2 }
   0xc   :  { %164 = vmatprep.subr.bf16.mxu0 %v176_v4 }
   0xf   :  { %165 = vmatpush3.bf16.msra.mxu0 %v176_v4 }
  0x10   :  { %172 = vmatprep.subr.msk.bf16.mxu0 %vm79_vm1, %v177_v5 }
  0x13   :  { %167 = vmatpush3.bf16.msra.mxu0 %v81_v6 }
  0x16   :  { %169 = vmatmul.mubr.msk.bf16.vlgmr.msra.gmra.mrb[0].mxu0 %vm72_vm0, %v179_v7 }
  0xe9   :  { %v170_v9 = vpop.f32.mrb[0].mxu0 }
  0xea   :  { %v126_v10 = vadd.f32 %v170_v9, %v141_v8  ;;  %v117_v11 = vpop.f32.mrb[1].mxu0 }
  0xeb   :  { %v118_v12 = vadd.f32 %v141_v8, %v117_v11  ;;  %v171_v13 = vpop.f32.mrb[2].mxu0 }
  0xec   :  { %135 = vst.msk [vmem:[%s239_s3 + $0x10] sm:$0xff] %vm132_vm2, %v126_v10  ;;  %v129_v14 = vadd.f32 %v171_v13, %v141_v8  ;;  %v120_v15 = vpop.f32.mrb[3].mxu0 }
  0xed   :  { %133 = vst.msk [vmem:[%s239_s3] sm:$0xff] %vm132_vm2, %v118_v12  ;;  %v121_v16 = vadd.f32 %v141_v8, %v120_v15 }
  0xee   :  { %136 = vst.msk [vmem:[%s239_s3 + $0x18] sm:$0xff] %vm132_vm2, %v129_v14 }
  0xef   :  { %134 = vst.msk [vmem:[%s239_s3 + $0x8] sm:$0xff] %vm132_vm2, %v121_v16 }

// kernel: _lambda_.65
= control target key start
LH: loop header
LB: loop body
LE: loop exit
PB: predicated region body
PF: predicated region fallthrough
CT: control target
= control target key end

     0   :  { %vm204_vm0 = vcmask 261120   ;;  %vm313_vm1 = vcmask 130048   ;;  %s526_s1 = inlined_call_operand.vmem [shape: bf16[288,16], index: 1, kind: input, shape index: {}]   ;;  %s527_s0 = inlined_call_operand.vmem [shape: bf16[32,288], index: 0, kind: input, shape index: {}]   ;;  %s528_s2 = inlined_call_operand.vmem [shape: f32[1,16], index: 2, kind: input, shape index: {}]   ;;  %s529_s3 = inlined_call_operand.vmem [shape: f32[32,16], index: 3, kind: output, shape index: {}]  }
   0x1   :  { %v389_v0 = vld [vmem:[%s526_s1 + $0x40] sm:$0xff]   ;;  %v391_v2 = vld [vmem:[%s526_s1 + $0x48] sm:$0xff]   ;;  %v393_v4 = vld [vmem:[%s526_s1 + $0x50] sm:$0xff]  }
   0x2   :  { %v390_v1 = vld [vmem:[%s526_s1] sm:$0xff]   ;;  %349 = vmatprep.subr.bf16.mxu0 %v389_v0  ;;  %v392_v3 = vld [vmem:[%s526_s1 + $0x8] sm:$0xff]   ;;  %v394_v5 = vld [vmem:[%s526_s1 + $0x10] sm:$0xff]  }
   0x3   :  { %350 = vmatpush3.bf16.msra.mxu0 %v390_v1  ;;  %v395_v6 = vld [vmem:[%s526_s1 + $0x58] sm:$0xff]   ;;  %v397_v8 = vld [vmem:[%s526_s1 + $0x60] sm:$0xff]   ;;  %v399_v11 = vld [vmem:[%s526_s1 + $0x68] sm:$0xff]  }
   0x4   :  { %351 = vmatprep.subr.bf16.mxu0 %v391_v2  ;;  %v396_v7 = vld [vmem:[%s526_s1 + $0x18] sm:$0xff]   ;;  %v398_v9 = vld [vmem:[%s526_s1 + $0x20] sm:$0xff]   ;;  %v400_v12 = vld [vmem:[%s526_s1 + $0x28] sm:$0xff]  }
   0x5   :  { %v404_v10 = vld [vmem:[%s526_s1 + $0x80] sm:$0xff]   ;;  %v401_v13 = vld [vmem:[%s526_s1 + $0x70] sm:$0xff]   ;;  %v409_v15 = vld [vmem:[%s526_s1 + $0x88] sm:$0xff]  }
   0x6   :  { %381 = vmatprep.subr.bf16.mxu1 %v404_v10  ;;  %v408_v14 = vld [vmem:[%s527_s0 + $0x4] ss:$12 sps:$4 sm:$0xff]   ;;  %v410_v16 = vld [vmem:[%s527_s0 + $0x8] ss:$12 sps:$4 sm:$0xff]   ;;  %v411_v17 = vld [vmem:[%s527_s0 + $0x20] ss:$12 sps:$4 sm:$0xff]  }
   0x7   :  { %352 = vmatpush3.bf16.msra.mxu0 %v392_v3  ;;  %382 = vmatpush3.bf16.msra.mxu1 %v404_v10  ;;  %v402_v18 = vld [vmem:[%s526_s1 + $0x30] sm:$0xff]   ;;  %v403_v19 = vld [vmem:[%s526_s1 + $0x78] sm:$0xff]   ;;  %v406_v21 = vld [vmem:[%s527_s0] ss:$12 sps:$4 sm:$0xff]  }
   0x8   :  { %353 = vmatprep.subr.bf16.mxu0 %v393_v4  ;;  %243 = vmatprep.mubr.bf16.mxu0 %v408_v14  ;;  %v405_v20 = vld [vmem:[%s526_s1 + $0x38] sm:$0xff]   ;;  %v322_v30 = vld [vmem:[%s528_s2] ss:$0 sm:$0xff] }
   0x9   :  { %383 = vmatprep.subr.bf16.mxu1 %v409_v15  ;;  %385 = vmatprep.mubr.msk.bf16.mxu1 %vm204_vm0, %v410_v16  ;;  %v412_v22 = vld [vmem:[%s527_s0 + $0x1c] ss:$12 sps:$4 sm:$0xff]   ;;  %v414_v23 = vld [vmem:[%s527_s0 + $0x18] ss:$12 sps:$4 sm:$0xff]  }
   0xb   :  { %354 = vmatpush3.bf16.msra.mxu0 %v394_v5  ;;  %384 = vmatpush3.bf16.msra.mxu1 %v409_v15 }
   0xc   :  { %355 = vmatprep.subr.bf16.mxu0 %v395_v6 }
   0xe   :  { %386 = vmatmul.mubr.msk.bf16.vlgmr.msra.gmra.mrb[0].mxu1 %vm204_vm0, %v411_v17 }
   0xf   :  { %356 = vmatpush3.bf16.msra.mxu0 %v396_v7 }
  0x10   :  { %357 = vmatprep.subr.bf16.mxu0 %v397_v8 }
  0x13   :  { %358 = vmatpush3.bf16.msra.mxu0 %v398_v9 }
  0x14   :  { %359 = vmatprep.subr.bf16.mxu0 %v399_v11 }
  0x17   :  { %360 = vmatpush3.bf16.msra.mxu0 %v400_v12 }
  0x18   :  { %361 = vmatprep.subr.bf16.mxu0 %v401_v13 }
  0x1b   :  { %362 = vmatpush3.bf16.msra.mxu0 %v402_v18 }
  0x1c   :  { %363 = vmatprep.subr.bf16.mxu0 %v403_v19 }
  0x1f   :  { %364 = vmatpush3.bf16.msra.mxu0 %v405_v20 }
  0x22   :  { %244 = vmatmul.mubr.bf16.vlgmr.msra.gmra.mrb[0].mxu0 %v406_v21 }
  0x23   :  { %251 = vmatprep.mubr.bf16.mxu0 %v412_v22 }
  0x2a   :  { %252 = vmatmul.mubr.bf16.gmra.mrb[4].mxu0 %v414_v23 }
  0xe1   :  { %v387_v24 = vpop.f32.mrb[0].mxu1 }
  0xe2   :  { %v294_v25 = vpop.f32.mrb[1].mxu1 }
  0xe3   :  { %v388_v26 = vpop.f32.mrb[2].mxu1 }
  0xe4   :  { %v297_v27 = vpop.f32.mrb[3].mxu1 }
  0xf5   :  { %v365_v28 = vpop.f32.mrb[0].mxu0 }
  0xf6   :  { %v366_v29 = vpop.f32.mrb[1].mxu0 }
  0xf7   :  { %v367_v31 = vadd.f32 %v366_v29, %v365_v28  ;;  %v368_v32 = vpop.f32.mrb[2].mxu0 }
  0xf8   :  { %v369_v33 = vpop.f32.mrb[3].mxu0 }
  0xf9   :  { %v370_v34 = vadd.f32 %v369_v33, %v368_v32  ;;  %v246_v35 = vadd.f32 %v367_v31, %v322_v30 }
  0xfb   :  { %v295_v36 = vadd.f32 %v294_v25, %v246_v35  ;;  %v249_v37 = vadd.f32 %v370_v34, %v322_v30 }
  0xfd   :  { %v309_v38 = vmax.f32 %v295_v36, 0.0  ;;  %v298_v39 = vadd.f32 %v297_v27, %v249_v37  ;;  %v371_v40 = vpop.f32.mrb[4].mxu0 }
  0xfe   :  { %v372_v41 = vpop.f32.mrb[5].mxu0 }
  0xff   :  { %314 = vst.msk [vmem:[%s529_s3] sm:$0xff] %vm313_vm1, %v309_v38  ;;  %v310_v42 = vmax.f32 %v298_v39, 0.0  ;;  %v373_v43 = vadd.f32 %v372_v41, %v371_v40  ;;  %v374_v44 = vpop.f32.mrb[6].mxu0 }
 0x100   :  { %v375_v45 = vpop.f32.mrb[7].mxu0 }
 0x101   :  { %315 = vst.msk [vmem:[%s529_s3 + $0x8] sm:$0xff] %vm313_vm1, %v310_v42  ;;  %v254_v46 = vadd.f32 %v373_v43, %v322_v30  ;;  %v376_v47 = vadd.f32 %v375_v45, %v374_v44 }
 0x103   :  { %v303_v48 = vadd.f32 %v387_v24, %v254_v46  ;;  %v257_v49 = vadd.f32 %v376_v47, %v322_v30 }
 0x105   :  { %v311_v50 = vmax.f32 %v303_v48, 0.0  ;;  %v306_v51 = vadd.f32 %v388_v26, %v257_v49 }
 0x107   :  { %316 = vst.msk [vmem:[%s529_s3 + $0x10] sm:$0xff] %vm313_vm1, %v311_v50  ;;  %v312_v52 = vmax.f32 %v306_v51, 0.0 }
 0x109   :  { %317 = vst.msk [vmem:[%s529_s3 + $0x18] sm:$0xff] %vm313_vm1, %v312_v52 }

// kernel: _lambda_.68
= control target key start
LH: loop header
LB: loop body
LE: loop exit
PB: predicated region body
PF: predicated region fallthrough
CT: control target
= control target key end

     0   :  { %v234_v0 = vmov 0   ;;  %vm116_vm0 = vcmask 130048   ;;  %s315_s1 = inlined_call_operand.vmem [shape: bf16[144,16], index: 1, kind: input, shape index: {}]   ;;  %s316_s0 = inlined_call_operand.vmem [shape: bf16[32,144], index: 0, kind: input, shape index: {}]   ;;  %s317_s2 = inlined_call_operand.vmem [shape: f32[1,16], index: 2, kind: input, shape index: {}]   ;;  %s318_s3 = inlined_call_operand.vmem [shape: f32[32,16], index: 3, kind: output, shape index: {}]  }
   0x1   :  { %123 = vmatprep.subr.bf16.mxu0 %v234_v0  ;;  %200 = vmatprep.subr.bf16.mxu1 %v234_v0  ;;  %v219_v1 = vld [vmem:[%s315_s1] sm:$0xff]   ;;  %v220_v2 = vld [vmem:[%s315_s1 + $0x8] sm:$0xff]   ;;  %v221_v3 = vld [vmem:[%s315_s1 + $0x10] sm:$0xff]  }
   0x2   :  { %124 = vmatpush1.bf16.msra.mxu0 %v219_v1  ;;  %209 = vmatpush1.bf16.msra.mxu1 %v219_v1  ;;  %v222_v4 = vld [vmem:[%s315_s1 + $0x18] sm:$0xff]   ;;  %v230_v5 = vld [vmem:[%s316_s0 + $0x4] ss:$8 sps:$4 sm:$0xff]   ;;  %v225_v9 = vld [vmem:[%s315_s1 + $0x30] sm:$0xff]  }
   0x3   :  { %125 = vmatprep.subr.bf16.mxu0 %v234_v0  ;;  %201 = vmatprep.subr.bf16.mxu1 %v234_v0  ;;  %v233_v6 = vld [vmem:[%s316_s0 + $0x14] ss:$8 sps:$4 sm:$0xff]   ;;  %v223_v7 = vld [vmem:[%s315_s1 + $0x20] sm:$0xff]   ;;  %v224_v8 = vld [vmem:[%s315_s1 + $0x28] sm:$0xff]  }
   0x4   :  { %198 = vmatprep.mubr.msk.bf16.mxu0 %vm116_vm0, %v230_v5  ;;  %199 = vmatprep.mubr.msk.bf16.mxu1 %vm116_vm0, %v233_v6  ;;  %v226_v10 = vld [vmem:[%s315_s1 + $0x38] sm:$0xff]   ;;  %v227_v11 = vld [vmem:[%s315_s1 + $0x40] sm:$0xff]  }
   0x5   :  { %v228_v12 = vld [vmem:[%s316_s0] ss:$8 sps:$4 sm:$0xff]   ;;  %v231_v13 = vld [vmem:[%s316_s0 + $0x10] ss:$8 sps:$4 sm:$0xff]  }
   0x6   :  { %126 = vmatpush1.bf16.msra.mxu0 %v220_v2  ;;  %210 = vmatpush1.bf16.msra.mxu1 %v220_v2  ;;  %v184_v14 = vld [vmem:[%s317_s2] ss:$0 sm:$0xff] }
   0x7   :  { %127 = vmatprep.subr.bf16.mxu0 %v234_v0  ;;  %202 = vmatprep.subr.bf16.mxu1 %v234_v0 }
   0xa   :  { %128 = vmatpush1.bf16.msra.mxu0 %v221_v3  ;;  %211 = vmatpush1.bf16.msra.mxu1 %v221_v3 }
   0xb   :  { %129 = vmatprep.subr.bf16.mxu0 %v234_v0  ;;  %203 = vmatprep.subr.bf16.mxu1 %v234_v0 }
   0xe   :  { %130 = vmatpush1.bf16.msra.mxu0 %v222_v4  ;;  %212 = vmatpush1.bf16.msra.mxu1 %v222_v4 }
   0xf   :  { %131 = vmatprep.subr.bf16.mxu0 %v234_v0  ;;  %204 = vmatprep.subr.bf16.mxu1 %v234_v0 }
  0x12   :  { %132 = vmatpush1.bf16.msra.mxu0 %v223_v7  ;;  %213 = vmatpush1.bf16.msra.mxu1 %v223_v7 }
  0x13   :  { %133 = vmatprep.subr.bf16.mxu0 %v234_v0  ;;  %205 = vmatprep.subr.bf16.mxu1 %v234_v0 }
  0x16   :  { %134 = vmatpush1.bf16.msra.mxu0 %v224_v8  ;;  %214 = vmatpush1.bf16.msra.mxu1 %v224_v8 }
  0x17   :  { %135 = vmatprep.subr.bf16.mxu0 %v234_v0  ;;  %206 = vmatprep.subr.bf16.mxu1 %v234_v0 }
  0x1a   :  { %136 = vmatpush1.bf16.msra.mxu0 %v225_v9  ;;  %215 = vmatpush1.bf16.msra.mxu1 %v225_v9 }
  0x1b   :  { %137 = vmatprep.subr.bf16.mxu0 %v234_v0  ;;  %207 = vmatprep.subr.bf16.mxu1 %v234_v0 }
  0x1e   :  { %138 = vmatpush1.bf16.msra.mxu0 %v226_v10  ;;  %216 = vmatpush1.bf16.msra.mxu1 %v226_v10 }
  0x1f   :  { %139 = vmatprep.subr.bf16.mxu0 %v234_v0  ;;  %208 = vmatprep.subr.bf16.mxu1 %v234_v0 }
  0x22   :  { %140 = vmatpush1.bf16.msra.mxu0 %v227_v11  ;;  %217 = vmatpush1.bf16.msra.mxu1 %v227_v11 }
  0x25   :  { %156 = vmatmul.mubr.bf16.vlgmr.msra.gmra.mrb[0].mxu0 %v228_v12  ;;  %164 = vmatmul.mubr.bf16.vlgmr.msra.gmra.mrb[0].mxu1 %v231_v13 }
  0xf8   :  { %v157_v15 = vpop.f32.mrb[0].mxu0  ;;  %v165_v16 = vpop.f32.mrb[0].mxu1 }
  0xf9   :  { %v158_v17 = vadd.f32 %v184_v14, %v157_v15  ;;  %v166_v18 = vadd.f32 %v184_v14, %v165_v16  ;;  %v159_v19 = vpop.f32.mrb[1].mxu0  ;;  %v167_v20 = vpop.f32.mrb[1].mxu1 }
  0xfa   :  { %v160_v21 = vpop.f32.mrb[2].mxu0  ;;  %v168_v22 = vpop.f32.mrb[2].mxu1 }
  0xfb   :  { %v172_v23 = vmax.f32 %v158_v17, 0.0  ;;  %v174_v24 = vmax.f32 %v166_v18, 0.0  ;;  %v161_v25 = vadd.f32 %v184_v14, %v160_v21  ;;  %v169_v26 = vadd.f32 %v184_v14, %v168_v22  ;;  %v162_v27 = vpop.f32.mrb[3].mxu0  ;;  %v170_v28 = vpop.f32.mrb[3].mxu1 }
  0xfd   :  { %176 = vst.msk [vmem:[%s318_s3] sm:$0xff] %vm116_vm0, %v172_v23  ;;  %178 = vst.msk [vmem:[%s318_s3 + $0x10] sm:$0xff] %vm116_vm0, %v174_v24  ;;  %v173_v29 = vmax.f32 %v161_v25, 0.0  ;;  %v175_v30 = vmax.f32 %v169_v26, 0.0 }
  0xff   :  { %177 = vst.msk [vmem:[%s318_s3 + $0x8] sm:$0xff] %vm116_vm0, %v173_v29  ;;  %179 = vst.msk [vmem:[%s318_s3 + $0x18] sm:$0xff] %vm116_vm0, %v175_v30 }

// kernel: _lambda_.69
= control target key start
LH: loop header
LB: loop body
LE: loop exit
PB: predicated region body
PF: predicated region fallthrough
CT: control target
= control target key end

     0   :  { %v245_v0 = vmov 0   ;;  %vm119_vm0 = vcmask 130048   ;;  %s343_s1 = inlined_call_operand.vmem [shape: bf16[144,16], index: 1, kind: input, shape index: {}]   ;;  %s344_s0 = inlined_call_operand.vmem [shape: bf16[32,144], index: 0, kind: input, shape index: {}]   ;;  %s345_s2 = inlined_call_operand.vmem [shape: f32[1,16], index: 2, kind: input, shape index: {}]   ;;  %s346_s3 = inlined_call_operand.vmem [shape: f32[32,16], index: 3, kind: input, shape index: {}]   ;;  %s347_s4 = inlined_call_operand.vmem [shape: f32[32,16], index: 4, kind: output, shape index: {}]  }
   0x1   :  { %126 = vmatprep.subr.bf16.mxu0 %v245_v0  ;;  %211 = vmatprep.subr.bf16.mxu1 %v245_v0  ;;  %v230_v1 = vld [vmem:[%s343_s1] sm:$0xff]   ;;  %v231_v2 = vld [vmem:[%s343_s1 + $0x8] sm:$0xff]   ;;  %v232_v3 = vld [vmem:[%s343_s1 + $0x10] sm:$0xff]  }
   0x2   :  { %127 = vmatpush1.bf16.msra.mxu0 %v230_v1  ;;  %220 = vmatpush1.bf16.msra.mxu1 %v230_v1  ;;  %v233_v4 = vld [vmem:[%s343_s1 + $0x18] sm:$0xff]   ;;  %v241_v5 = vld [vmem:[%s344_s0 + $0x4] ss:$8 sps:$4 sm:$0xff]   ;;  %v236_v9 = vld [vmem:[%s343_s1 + $0x30] sm:$0xff]  }
   0x3   :  { %128 = vmatprep.subr.bf16.mxu0 %v245_v0  ;;  %212 = vmatprep.subr.bf16.mxu1 %v245_v0  ;;  %v244_v6 = vld [vmem:[%s344_s0 + $0x14] ss:$8 sps:$4 sm:$0xff]   ;;  %v234_v7 = vld [vmem:[%s343_s1 + $0x20] sm:$0xff]   ;;  %v235_v8 = vld [vmem:[%s343_s1 + $0x28] sm:$0xff]  }
   0x4   :  { %209 = vmatprep.mubr.msk.bf16.mxu0 %vm119_vm0, %v241_v5  ;;  %210 = vmatprep.mubr.msk.bf16.mxu1 %vm119_vm0, %v244_v6  ;;  %v237_v10 = vld [vmem:[%s343_s1 + $0x38] sm:$0xff]   ;;  %v238_v11 = vld [vmem:[%s343_s1 + $0x40] sm:$0xff]   ;;  %v177_v18 = vld [vmem:[%s346_s3 + $0x10] sm:$0xff] }
   0x5   :  { %v239_v12 = vld [vmem:[%s344_s0] ss:$8 sps:$4 sm:$0xff]   ;;  %v242_v13 = vld [vmem:[%s344_s0 + $0x10] ss:$8 sps:$4 sm:$0xff]  }
   0x6   :  { %129 = vmatpush1.bf16.msra.mxu0 %v231_v2  ;;  %221 = vmatpush1.bf16.msra.mxu1 %v231_v2  ;;  %v195_v14 = vld [vmem:[%s345_s2] ss:$0 sm:$0xff]  ;;  %v176_v24 = vld [vmem:[%s346_s3 + $0x8] sm:$0xff]  ;;  %v178_v26 = vld [vmem:[%s346_s3 + $0x18] sm:$0xff] }
   0x7   :  { %130 = vmatprep.subr.bf16.mxu0 %v245_v0  ;;  %213 = vmatprep.subr.bf16.mxu1 %v245_v0  ;;  %v175_v16 = vld [vmem:[%s346_s3] sm:$0xff] }
   0xa   :  { %131 = vmatpush1.bf16.msra.mxu0 %v232_v3  ;;  %222 = vmatpush1.bf16.msra.mxu1 %v232_v3 }
   0xb   :  { %132 = vmatprep.subr.bf16.mxu0 %v245_v0  ;;  %214 = vmatprep.subr.bf16.mxu1 %v245_v0 }
   0xe   :  { %133 = vmatpush1.bf16.msra.mxu0 %v233_v4  ;;  %223 = vmatpush1.bf16.msra.mxu1 %v233_v4 }
   0xf   :  { %134 = vmatprep.subr.bf16.mxu0 %v245_v0  ;;  %215 = vmatprep.subr.bf16.mxu1 %v245_v0 }
  0x12   :  { %135 = vmatpush1.bf16.msra.mxu0 %v234_v7  ;;  %224 = vmatpush1.bf16.msra.mxu1 %v234_v7 }
  0x13   :  { %136 = vmatprep.subr.bf16.mxu0 %v245_v0  ;;  %216 = vmatprep.subr.bf16.mxu1 %v245_v0 }
  0x16   :  { %137 = vmatpush1.bf16.msra.mxu0 %v235_v8  ;;  %225 = vmatpush1.bf16.msra.mxu1 %v235_v8 }
  0x17   :  { %138 = vmatprep.subr.bf16.mxu0 %v245_v0  ;;  %217 = vmatprep.subr.bf16.mxu1 %v245_v0 }
  0x1a   :  { %139 = vmatpush1.bf16.msra.mxu0 %v236_v9  ;;  %226 = vmatpush1.bf16.msra.mxu1 %v236_v9 }
  0x1b   :  { %140 = vmatprep.subr.bf16.mxu0 %v245_v0  ;;  %218 = vmatprep.subr.bf16.mxu1 %v245_v0 }
  0x1e   :  { %141 = vmatpush1.bf16.msra.mxu0 %v237_v10  ;;  %227 = vmatpush1.bf16.msra.mxu1 %v237_v10 }
  0x1f   :  { %142 = vmatprep.subr.bf16.mxu0 %v245_v0  ;;  %219 = vmatprep.subr.bf16.mxu1 %v245_v0 }
  0x22   :  { %143 = vmatpush1.bf16.msra.mxu0 %v238_v11  ;;  %228 = vmatpush1.bf16.msra.mxu1 %v238_v11 }
  0x25   :  { %159 = vmatmul.mubr.bf16.vlgmr.msra.gmra.mrb[0].mxu0 %v239_v12  ;;  %167 = vmatmul.mubr.bf16.vlgmr.msra.gmra.mrb[0].mxu1 %v242_v13 }
  0xf8   :  { %v160_v15 = vpop.f32.mrb[0].mxu0  ;;  %v168_v17 = vpop.f32.mrb[0].mxu1 }
  0xf9   :  { %v161_v19 = vadd.f32 %v195_v14, %v160_v15  ;;  %v169_v20 = vadd.f32 %v195_v14, %v168_v17  ;;  %v162_v21 = vpop.f32.mrb[1].mxu0  ;;  %v170_v22 = vpop.f32.mrb[1].mxu1 }
  0xfa   :  { %v163_v23 = vpop.f32.mrb[2].mxu0  ;;  %v171_v25 = vpop.f32.mrb[2].mxu1 }
  0xfb   :  { %v179_v27 = vadd.f32 %v175_v16, %v161_v19  ;;  %v181_v28 = vadd.f32 %v177_v18, %v169_v20  ;;  %v164_v29 = vadd.f32 %v195_v14, %v163_v23  ;;  %v172_v30 = vadd.f32 %v195_v14, %v171_v25  ;;  %v165_v31 = vpop.f32.mrb[3].mxu0  ;;  %v173_v32 = vpop.f32.mrb[3].mxu1 }
  0xfd   :  { %v183_v33 = vmax.f32 %v179_v27, 0.0  ;;  %v185_v34 = vmax.f32 %v181_v28, 0.0  ;;  %v180_v35 = vadd.f32 %v176_v24, %v164_v29  ;;  %v182_v36 = vadd.f32 %v178_v26, %v172_v30 }
  0xff   :  { %187 = vst.msk [vmem:[%s347_s4] sm:$0xff] %vm119_vm0, %v183_v33  ;;  %189 = vst.msk [vmem:[%s347_s4 + $0x10] sm:$0xff] %vm119_vm0, %v185_v34  ;;  %v184_v37 = vmax.f32 %v180_v35, 0.0  ;;  %v186_v38 = vmax.f32 %v182_v36, 0.0 }
 0x101   :  { %188 = vst.msk [vmem:[%s347_s4 + $0x8] sm:$0xff] %vm119_vm0, %v184_v37  ;;  %190 = vst.msk [vmem:[%s347_s4 + $0x18] sm:$0xff] %vm119_vm0, %v186_v38 }

// kernel: _lambda_.73
= control target key start
LH: loop header
LB: loop body
LE: loop exit
PB: predicated region body
PF: predicated region fallthrough
CT: control target
= control target key end

     0   :  { %s44_s0 = inlined_call_operand.vmem [shape: f32[8,128], index: 0, kind: input, shape index: {}]   ;;  %s45_s1 = inlined_call_operand.vmem [shape: f32[8,128], index: 1, kind: input, shape index: {}]   ;;  %s46_s2 = inlined_call_operand.vmem [shape: f32[8,128], index: 2, kind: output, shape index: {}]  }
   0x1   :  { %v11_v0 = vld [vmem:[%s44_s0] sm:$0xff] }
   0x2   :  { %v12_v1 = vld [vmem:[%s45_s1] sm:$0xff] }
   0x3   :  { %v13_v2 = vadd.f32 %v12_v1, %v11_v0 }
   0x5   :  { %v14_v3 = vmax.f32 %v13_v2, 0.0 }
   0x7   :  { %15 = vst [vmem:[%s46_s2] sm:$0xff] %v14_v3 }

// kernel: _lambda_.74
= control target key start
LH: loop header
LB: loop body
LE: loop exit
PB: predicated region body
PF: predicated region fallthrough
CT: control target
= control target key end

     0   :  { %v177_v0 = vmov 0   ;;  %vm101_vm0 = vcmask 130048   ;;  %vm146_vm1 = vcmask 261120   ;;  %s234_s1 = inlined_call_operand.vmem [shape: bf16[144,32], index: 1, kind: input, shape index: {}]   ;;  %s235_s0 = inlined_call_operand.vmem [shape: bf16[8,144], index: 0, kind: input, shape index: {}]   ;;  %s236_s2 = inlined_call_operand.vmem [shape: f32[1,32], index: 2, kind: input, shape index: {}]   ;;  %s237_s3 = inlined_call_operand.vmem [shape: f32[8,32], index: 3, kind: output, shape index: {}]  }
   0x1   :  { %105 = vmatprep.subr.bf16.mxu0 %v177_v0  ;;  %v166_v1 = vld [vmem:[%s234_s1] sm:$0xff]   ;;  %v167_v2 = vld [vmem:[%s234_s1 + $0x8] sm:$0xff]   ;;  %v168_v3 = vld [vmem:[%s234_s1 + $0x10] sm:$0xff]  }
   0x2   :  { %106 = vmatpush1.bf16.msra.mxu0 %v166_v1  ;;  %v15_v4 = vld [vmem:[%s235_s0] sm:$0xff]  ;;  %v169_v5 = vld [vmem:[%s234_s1 + $0x18] sm:$0xff]   ;;  %v171_v8 = vld [vmem:[%s234_s1 + $0x28] sm:$0xff]  }
   0x3   :  { %107 = vmatprep.subr.bf16.mxu0 %v177_v0  ;;  %v154_v6 = vcombine.high %v15_v4, %v15_v4  ;;  %v170_v7 = vld [vmem:[%s234_s1 + $0x20] sm:$0xff]   ;;  %v172_v9 = vld [vmem:[%s234_s1 + $0x30] sm:$0xff]   ;;  %v173_v10 = vld [vmem:[%s234_s1 + $0x38] sm:$0xff]   ;;  %v153_v12 = vcombine.low %v15_v4, %v15_v4 }
   0x4   :  { %v174_v11 = vld [vmem:[%s234_s1 + $0x40] sm:$0xff]  }
   0x5   :  { %164 = vmatprep.mubr.msk.bf16.mxu0 %vm101_vm0, %v154_v6  ;;  %v152_v13 = vld [vmem:[%s236_s2] ss:$0 sm:$0xff] }
   0x6   :  { %108 = vmatpush1.bf16.msra.mxu0 %v167_v2 }
   0x7   :  { %109 = vmatprep.subr.bf16.mxu0 %v177_v0 }
   0xa   :  { %110 = vmatpush1.bf16.msra.mxu0 %v168_v3 }
   0xb   :  { %111 = vmatprep.subr.bf16.mxu0 %v177_v0 }
   0xe   :  { %112 = vmatpush1.bf16.msra.mxu0 %v169_v5 }
   0xf   :  { %113 = vmatprep.subr.bf16.mxu0 %v177_v0 }
  0x12   :  { %114 = vmatpush1.bf16.msra.mxu0 %v170_v7 }
  0x13   :  { %115 = vmatprep.subr.bf16.mxu0 %v177_v0 }
  0x16   :  { %116 = vmatpush1.bf16.msra.mxu0 %v171_v8 }
  0x17   :  { %117 = vmatprep.subr.bf16.mxu0 %v177_v0 }
  0x1a   :  { %118 = vmatpush1.bf16.msra.mxu0 %v172_v9 }
  0x1b   :  { %119 = vmatprep.subr.bf16.mxu0 %v177_v0 }
  0x1e   :  { %120 = vmatpush1.bf16.msra.mxu0 %v173_v10 }
  0x1f   :  { %121 = vmatprep.subr.bf16.mxu0 %v177_v0 }
  0x22   :  { %122 = vmatpush1.bf16.msra.mxu0 %v174_v11 }
  0x25   :  { %138 = vmatmul.mubr.bf16.vlgmr.msra.gmra.mrb[0].mxu0 %v153_v12 }
  0xf8   :  { %v139_v14 = vpop.f32.mrb[0].mxu0 }
  0xf9   :  { %v140_v15 = vadd.f32 %v152_v13, %v139_v14  ;;  %v141_v16 = vpop.f32.mrb[1].mxu0 }
  0xfa   :  { %v142_v17 = vpop.f32.mrb[2].mxu0 }
  0xfb   :  { %v145_v18 = vmax.f32 %v140_v15, 0.0  ;;  %v143_v19 = vpop.f32.mrb[3].mxu0 }
  0xfd   :  { %147 = vst.msk [vmem:[%s237_s3] sm:$0xff] %vm146_vm1, %v145_v18 }

// kernel: _lambda_.80
= control target key start
LH: loop header
LB: loop body
LE: loop exit
PB: predicated region body
PF: predicated region fallthrough
CT: control target
= control target key end

     0   :  { %v352_v1 = vmov 0.0   ;;  %vm353_vm0 = vmmov 0   ;;  %vm181_vm1 = vcmask 261120   ;;  %s450_s1 = inlined_call_operand.vmem [shape: bf16[288,32], index: 1, kind: input, shape index: {}]   ;;  %s451_s0 = inlined_call_operand.vmem [shape: bf16[8,288], index: 0, kind: input, shape index: {}]   ;;  %s452_s2 = inlined_call_operand.vmem [shape: f32[1,32], index: 2, kind: input, shape index: {}]   ;;  %s453_s3 = inlined_call_operand.vmem [shape: f32[8,32], index: 3, kind: input, shape index: {}]   ;;  %s454_s4 = inlined_call_operand.vmem [shape: f32[8,32], index: 4, kind: output, shape index: {}]  }
   0x1   :  { %v331_v0 = vld [vmem:[%s450_s1 + $0x40] sm:$0xff]   ;;  %321 = vmatprep.subr.bf16.mxu1 %v352_v1  ;;  %325 = vmatprep.mubr.msk.bf16.mxu1 %vm353_vm0, %v352_v1  ;;  %v333_v3 = vld [vmem:[%s450_s1 + $0x48] sm:$0xff]   ;;  %v335_v5 = vld [vmem:[%s450_s1 + $0x50] sm:$0xff]  }
   0x2   :  { %v332_v2 = vld [vmem:[%s450_s1] sm:$0xff]   ;;  %296 = vmatprep.subr.bf16.mxu0 %v331_v0  ;;  %v334_v4 = vld [vmem:[%s450_s1 + $0x8] sm:$0xff]   ;;  %v336_v6 = vld [vmem:[%s450_s1 + $0x10] sm:$0xff]  }
   0x3   :  { %297 = vmatpush3.bf16.msra.mxu0 %v332_v2  ;;  %v337_v7 = vld [vmem:[%s450_s1 + $0x58] sm:$0xff]   ;;  %v339_v9 = vld [vmem:[%s450_s1 + $0x60] sm:$0xff]   ;;  %v341_v12 = vld [vmem:[%s450_s1 + $0x68] sm:$0xff]  }
   0x4   :  { %298 = vmatprep.subr.bf16.mxu0 %v333_v3  ;;  %v338_v8 = vld [vmem:[%s450_s1 + $0x18] sm:$0xff]   ;;  %v345_v10 = vld [vmem:[%s450_s1 + $0x80] sm:$0xff]   ;;  %v351_v15 = vld [vmem:[%s450_s1 + $0x88] sm:$0xff]  }
   0x5   :  { %v340_v11 = vld [vmem:[%s450_s1 + $0x20] sm:$0xff]   ;;  %322 = vmatpush3.bf16.msra.mxu1 %v345_v10  ;;  %v342_v16 = vld [vmem:[%s450_s1 + $0x28] sm:$0xff]   ;;  %v343_v17 = vld [vmem:[%s450_s1 + $0x70] sm:$0xff]  }
   0x6   :  { %323 = vmatprep.subr.bf16.mxu1 %v352_v1  ;;  %v18_v13 = vld [vmem:[%s451_s0] sm:$0xff]  ;;  %v350_v18 = vld [vmem:[%s451_s0 + $0x8] ss:$0 sps:$4 sm:$0xff]   ;;  %v344_v19 = vld [vmem:[%s450_s1 + $0x30] sm:$0xff]  }
   0x7   :  { %299 = vmatpush3.bf16.msra.mxu0 %v334_v4  ;;  %v275_v14 = vcombine.high %v18_v13, %v18_v13  ;;  %v346_v20 = vld [vmem:[%s450_s1 + $0x78] sm:$0xff]   ;;  %v274_v22 = vcombine.low %v18_v13, %v18_v13  ;;  %v273_v29 = vld [vmem:[%s452_s2] ss:$0 sm:$0xff] }
   0x8   :  { %300 = vmatprep.subr.bf16.mxu0 %v335_v5  ;;  %v347_v21 = vld [vmem:[%s450_s1 + $0x38] sm:$0xff]   ;;  %v265_v34 = vld [vmem:[%s453_s3] sm:$0xff] }
   0x9   :  { %217 = vmatprep.mubr.bf16.mxu0 %v275_v14  ;;  %324 = vmatpush3.bf16.msra.mxu1 %v351_v15 }
   0xb   :  { %301 = vmatpush3.bf16.msra.mxu0 %v336_v6 }
   0xc   :  { %302 = vmatprep.subr.bf16.mxu0 %v337_v7  ;;  %326 = vmatmul.mubr.msk.bf16.vlgmr.msra.gmra.mrb[0].mxu1 %vm181_vm1, %v350_v18 }
   0xf   :  { %303 = vmatpush3.bf16.msra.mxu0 %v338_v8 }
  0x10   :  { %304 = vmatprep.subr.bf16.mxu0 %v339_v9 }
  0x13   :  { %305 = vmatpush3.bf16.msra.mxu0 %v340_v11 }
  0x14   :  { %306 = vmatprep.subr.bf16.mxu0 %v341_v12 }
  0x17   :  { %307 = vmatpush3.bf16.msra.mxu0 %v342_v16 }
  0x18   :  { %308 = vmatprep.subr.bf16.mxu0 %v343_v17 }
  0x1b   :  { %309 = vmatpush3.bf16.msra.mxu0 %v344_v19 }
  0x1c   :  { %310 = vmatprep.subr.bf16.mxu0 %v346_v20 }
  0x1f   :  { %311 = vmatpush3.bf16.msra.mxu0 %v347_v21 }
  0x22   :  { %218 = vmatmul.mubr.bf16.vlgmr.msra.gmra.mrb[0].mxu0 %v274_v22 }
  0xdf   :  { %v259_v23 = vpop.f32.mrb[0].mxu1 }
  0xe0   :  { %v327_v24 = vpop.f32.mrb[1].mxu1 }
  0xe1   :  { %v262_v25 = vpop.f32.mrb[2].mxu1 }
  0xe2   :  { %v328_v26 = vpop.f32.mrb[3].mxu1 }
  0xf5   :  { %v312_v27 = vpop.f32.mrb[0].mxu0 }
  0xf6   :  { %v313_v28 = vpop.f32.mrb[1].mxu0 }
  0xf7   :  { %v314_v30 = vadd.f32 %v313_v28, %v312_v27  ;;  %v315_v31 = vpop.f32.mrb[2].mxu0 }
  0xf8   :  { %v316_v32 = vpop.f32.mrb[3].mxu0 }
  0xf9   :  { %v220_v33 = vadd.f32 %v314_v30, %v273_v29 }
  0xfb   :  { %v260_v35 = vadd.f32 %v259_v23, %v220_v33 }
  0xfd   :  { %v266_v36 = vadd.f32 %v265_v34, %v260_v35 }
  0xff   :  { %v267_v37 = vmax.f32 %v266_v36, 0.0 }
 0x101   :  { %268 = vst.msk [vmem:[%s454_s4] sm:$0xff] %vm181_vm1, %v267_v37 }

// kernel: _lambda_.79
= control target key start
LH: loop header
LB: loop body
LE: loop exit
PB: predicated region body
PF: predicated region fallthrough
CT: control target
= control target key end

     0   :  { %v347_v1 = vmov 0.0   ;;  %vm348_vm0 = vmmov 0   ;;  %vm178_vm1 = vcmask 261120   ;;  %s437_s1 = inlined_call_operand.vmem [shape: bf16[288,32], index: 1, kind: input, shape index: {}]   ;;  %s438_s0 = inlined_call_operand.vmem [shape: bf16[8,288], index: 0, kind: input, shape index: {}]   ;;  %s439_s2 = inlined_call_operand.vmem [shape: f32[1,32], index: 2, kind: input, shape index: {}]   ;;  %s440_s3 = inlined_call_operand.vmem [shape: f32[8,32], index: 3, kind: output, shape index: {}]  }
   0x1   :  { %v326_v0 = vld [vmem:[%s437_s1 + $0x40] sm:$0xff]   ;;  %316 = vmatprep.subr.bf16.mxu1 %v347_v1  ;;  %320 = vmatprep.mubr.msk.bf16.mxu1 %vm348_vm0, %v347_v1  ;;  %v328_v3 = vld [vmem:[%s437_s1 + $0x48] sm:$0xff]   ;;  %v330_v5 = vld [vmem:[%s437_s1 + $0x50] sm:$0xff]  }
   0x2   :  { %v327_v2 = vld [vmem:[%s437_s1] sm:$0xff]   ;;  %291 = vmatprep.subr.bf16.mxu0 %v326_v0  ;;  %v329_v4 = vld [vmem:[%s437_s1 + $0x8] sm:$0xff]   ;;  %v331_v6 = vld [vmem:[%s437_s1 + $0x10] sm:$0xff]  }
   0x3   :  { %292 = vmatpush3.bf16.msra.mxu0 %v327_v2  ;;  %v332_v7 = vld [vmem:[%s437_s1 + $0x58] sm:$0xff]   ;;  %v334_v9 = vld [vmem:[%s437_s1 + $0x60] sm:$0xff]   ;;  %v336_v12 = vld [vmem:[%s437_s1 + $0x68] sm:$0xff]  }
   0x4   :  { %293 = vmatprep.subr.bf16.mxu0 %v328_v3  ;;  %v333_v8 = vld [vmem:[%s437_s1 + $0x18] sm:$0xff]   ;;  %v340_v10 = vld [vmem:[%s437_s1 + $0x80] sm:$0xff]   ;;  %v346_v15 = vld [vmem:[%s437_s1 + $0x88] sm:$0xff]  }
   0x5   :  { %v335_v11 = vld [vmem:[%s437_s1 + $0x20] sm:$0xff]   ;;  %317 = vmatpush3.bf16.msra.mxu1 %v340_v10  ;;  %v337_v16 = vld [vmem:[%s437_s1 + $0x28] sm:$0xff]   ;;  %v338_v17 = vld [vmem:[%s437_s1 + $0x70] sm:$0xff]  }
   0x6   :  { %318 = vmatprep.subr.bf16.mxu1 %v347_v1  ;;  %v15_v13 = vld [vmem:[%s438_s0] sm:$0xff]  ;;  %v345_v18 = vld [vmem:[%s438_s0 + $0x8] ss:$0 sps:$4 sm:$0xff]   ;;  %v339_v19 = vld [vmem:[%s437_s1 + $0x30] sm:$0xff]  }
   0x7   :  { %294 = vmatpush3.bf16.msra.mxu0 %v329_v4  ;;  %v270_v14 = vcombine.high %v15_v13, %v15_v13  ;;  %v341_v20 = vld [vmem:[%s437_s1 + $0x78] sm:$0xff]   ;;  %v269_v22 = vcombine.low %v15_v13, %v15_v13  ;;  %v268_v29 = vld [vmem:[%s439_s2] ss:$0 sm:$0xff] }
   0x8   :  { %295 = vmatprep.subr.bf16.mxu0 %v330_v5  ;;  %v342_v21 = vld [vmem:[%s437_s1 + $0x38] sm:$0xff]  }
   0x9   :  { %214 = vmatprep.mubr.bf16.mxu0 %v270_v14  ;;  %319 = vmatpush3.bf16.msra.mxu1 %v346_v15 }
   0xb   :  { %296 = vmatpush3.bf16.msra.mxu0 %v331_v6 }
   0xc   :  { %297 = vmatprep.subr.bf16.mxu0 %v332_v7  ;;  %321 = vmatmul.mubr.msk.bf16.vlgmr.msra.gmra.mrb[0].mxu1 %vm178_vm1, %v345_v18 }
   0xf   :  { %298 = vmatpush3.bf16.msra.mxu0 %v333_v8 }
  0x10   :  { %299 = vmatprep.subr.bf16.mxu0 %v334_v9 }
  0x13   :  { %300 = vmatpush3.bf16.msra.mxu0 %v335_v11 }
  0x14   :  { %301 = vmatprep.subr.bf16.mxu0 %v336_v12 }
  0x17   :  { %302 = vmatpush3.bf16.msra.mxu0 %v337_v16 }
  0x18   :  { %303 = vmatprep.subr.bf16.mxu0 %v338_v17 }
  0x1b   :  { %304 = vmatpush3.bf16.msra.mxu0 %v339_v19 }
  0x1c   :  { %305 = vmatprep.subr.bf16.mxu0 %v341_v20 }
  0x1f   :  { %306 = vmatpush3.bf16.msra.mxu0 %v342_v21 }
  0x22   :  { %215 = vmatmul.mubr.bf16.vlgmr.msra.gmra.mrb[0].mxu0 %v269_v22 }
  0xdf   :  { %v256_v23 = vpop.f32.mrb[0].mxu1 }
  0xe0   :  { %v322_v24 = vpop.f32.mrb[1].mxu1 }
  0xe1   :  { %v259_v25 = vpop.f32.mrb[2].mxu1 }
  0xe2   :  { %v323_v26 = vpop.f32.mrb[3].mxu1 }
  0xf5   :  { %v307_v27 = vpop.f32.mrb[0].mxu0 }
  0xf6   :  { %v308_v28 = vpop.f32.mrb[1].mxu0 }
  0xf7   :  { %v309_v30 = vadd.f32 %v308_v28, %v307_v27  ;;  %v310_v31 = vpop.f32.mrb[2].mxu0 }
  0xf8   :  { %v311_v32 = vpop.f32.mrb[3].mxu0 }
  0xf9   :  { %v217_v33 = vadd.f32 %v309_v30, %v268_v29 }
  0xfb   :  { %v257_v34 = vadd.f32 %v256_v23, %v217_v33 }
  0xfd   :  { %v262_v35 = vmax.f32 %v257_v34, 0.0 }
  0xff   :  { %263 = vst.msk [vmem:[%s440_s3] sm:$0xff] %vm178_vm1, %v262_v35 }

// kernel: _lambda_.88
= control target key start
LH: loop header
LB: loop body
LE: loop exit
PB: predicated region body
PF: predicated region fallthrough
CT: control target
= control target key end

     0   :  { %v176_v0 = vmov 0   ;;  %vm101_vm0 = vcmask 130048   ;;  %vm145_vm1 = vcmask 261120   ;;  %s233_s1 = inlined_call_operand.vmem [shape: bf16[144,32], index: 1, kind: input, shape index: {}]   ;;  %s234_s0 = inlined_call_operand.vmem [shape: bf16[8,144], index: 0, kind: input, shape index: {}]   ;;  %s235_s2 = inlined_call_operand.vmem [shape: f32[1,32], index: 2, kind: input, shape index: {}]   ;;  %s236_s3 = inlined_call_operand.vmem [shape: f32[8,32], index: 3, kind: output, shape index: {}]  }
   0x1   :  { %105 = vmatprep.subr.bf16.mxu0 %v176_v0  ;;  %v165_v1 = vld [vmem:[%s233_s1] sm:$0xff]   ;;  %v166_v2 = vld [vmem:[%s233_s1 + $0x8] sm:$0xff]   ;;  %v167_v3 = vld [vmem:[%s233_s1 + $0x10] sm:$0xff]  }
   0x2   :  { %106 = vmatpush1.bf16.msra.mxu0 %v165_v1  ;;  %v15_v4 = vld [vmem:[%s234_s0] sm:$0xff]  ;;  %v168_v5 = vld [vmem:[%s233_s1 + $0x18] sm:$0xff]   ;;  %v170_v8 = vld [vmem:[%s233_s1 + $0x28] sm:$0xff]  }
   0x3   :  { %107 = vmatprep.subr.bf16.mxu0 %v176_v0  ;;  %v153_v6 = vcombine.high %v15_v4, %v15_v4  ;;  %v169_v7 = vld [vmem:[%s233_s1 + $0x20] sm:$0xff]   ;;  %v171_v9 = vld [vmem:[%s233_s1 + $0x30] sm:$0xff]   ;;  %v172_v10 = vld [vmem:[%s233_s1 + $0x38] sm:$0xff]   ;;  %v152_v12 = vcombine.low %v15_v4, %v15_v4 }
   0x4   :  { %v173_v11 = vld [vmem:[%s233_s1 + $0x40] sm:$0xff]  }
   0x5   :  { %163 = vmatprep.mubr.msk.bf16.mxu0 %vm101_vm0, %v153_v6  ;;  %v151_v13 = vld [vmem:[%s235_s2] ss:$0 sm:$0xff] }
   0x6   :  { %108 = vmatpush1.bf16.msra.mxu0 %v166_v2 }
   0x7   :  { %109 = vmatprep.subr.bf16.mxu0 %v176_v0 }
   0xa   :  { %110 = vmatpush1.bf16.msra.mxu0 %v167_v3 }
   0xb   :  { %111 = vmatprep.subr.bf16.mxu0 %v176_v0 }
   0xe   :  { %112 = vmatpush1.bf16.msra.mxu0 %v168_v5 }
   0xf   :  { %113 = vmatprep.subr.bf16.mxu0 %v176_v0 }
  0x12   :  { %114 = vmatpush1.bf16.msra.mxu0 %v169_v7 }
  0x13   :  { %115 = vmatprep.subr.bf16.mxu0 %v176_v0 }
  0x16   :  { %116 = vmatpush1.bf16.msra.mxu0 %v170_v8 }
  0x17   :  { %117 = vmatprep.subr.bf16.mxu0 %v176_v0 }
  0x1a   :  { %118 = vmatpush1.bf16.msra.mxu0 %v171_v9 }
  0x1b   :  { %119 = vmatprep.subr.bf16.mxu0 %v176_v0 }
  0x1e   :  { %120 = vmatpush1.bf16.msra.mxu0 %v172_v10 }
  0x1f   :  { %121 = vmatprep.subr.bf16.mxu0 %v176_v0 }
  0x22   :  { %122 = vmatpush1.bf16.msra.mxu0 %v173_v11 }
  0x25   :  { %138 = vmatmul.mubr.bf16.vlgmr.msra.gmra.mrb[0].mxu0 %v152_v12 }
  0xf8   :  { %v139_v14 = vpop.f32.mrb[0].mxu0 }
  0xf9   :  { %v140_v15 = vadd.f32 %v151_v13, %v139_v14  ;;  %v141_v16 = vpop.f32.mrb[1].mxu0 }
  0xfa   :  { %v142_v17 = vpop.f32.mrb[2].mxu0 }
  0xfb   :  { %146 = vst.msk [vmem:[%s236_s3] sm:$0xff] %vm145_vm1, %v140_v15  ;;  %v143_v18 = vpop.f32.mrb[3].mxu0 }

// kernel: _lambda_.70
= control target key start
LH: loop header
LB: loop body
LE: loop exit
PB: predicated region body
PF: predicated region fallthrough
CT: control target
= control target key end

     0   :  { %vm44_vm0 = vcmask 130048   ;;  %vm100_vm1 = vcmask 64512   ;;  %s171_s1 = inlined_call_operand.vmem [shape: bf16[16,8], index: 1, kind: input, shape index: {}]   ;;  %s172_s0 = inlined_call_operand.vmem [shape: bf16[32,16], index: 0, kind: input, shape index: {}]   ;;  %s173_s2 = inlined_call_operand.vmem [shape: f32[1,8], index: 2, kind: input, shape index: {}]   ;;  %s174_s3 = inlined_call_operand.vmem [shape: f32[32,8], index: 3, kind: output, shape index: {}]  }
   0x1   :  { %v124_v0 = vld [vmem:[%s171_s1] sm:$0xff]   ;;  %v126_v2 = vld [vmem:[%s172_s0 + $0x8] sm:$0xff]  }
   0x2   :  { %v125_v1 = vld [vmem:[%s172_s0] sm:$0xff]   ;;  %118 = vmatprep.subr.bf16.mxu0 %v124_v0 }
   0x3   :  { %119 = vmatpush3.bf16.msra.mxu0 %v124_v0  ;;  %120 = vmatprep.mubr.msk.bf16.mxu0 %vm44_vm0, %v125_v1  ;;  %v109_v3 = vld [vmem:[%s173_s2] ss:$0 sm:$0xff] }
   0x6   :  { %121 = vmatmul.mubr.msk.bf16.vlgmr.msra.gmra.mrb[0].mxu0 %vm44_vm0, %v126_v2 }
  0xd9   :  { %v122_v4 = vpop.f32.mrb[0].mxu0 }
  0xda   :  { %v94_v5 = vadd.f32 %v122_v4, %v109_v3  ;;  %v85_v6 = vpop.f32.mrb[1].mxu0 }
  0xdb   :  { %v86_v7 = vadd.f32 %v109_v3, %v85_v6  ;;  %v123_v8 = vpop.f32.mrb[2].mxu0 }
  0xdc   :  { %103 = vst.msk [vmem:[%s174_s3 + $0x10] sm:$0xff] %vm100_vm1, %v94_v5  ;;  %v97_v9 = vadd.f32 %v123_v8, %v109_v3  ;;  %v88_v10 = vpop.f32.mrb[3].mxu0 }
  0xdd   :  { %101 = vst.msk [vmem:[%s174_s3] sm:$0xff] %vm100_vm1, %v86_v7  ;;  %v89_v11 = vadd.f32 %v109_v3, %v88_v10 }
  0xde   :  { %104 = vst.msk [vmem:[%s174_s3 + $0x18] sm:$0xff] %vm100_vm1, %v97_v9 }
  0xdf   :  { %102 = vst.msk [vmem:[%s174_s3 + $0x8] sm:$0xff] %vm100_vm1, %v89_v11 }

// kernel: _lambda_.86
= control target key start
LH: loop header
LB: loop body
LE: loop exit
PB: predicated region body
PF: predicated region fallthrough
CT: control target
= control target key end

     0   :  { %vm72_vm0 = vcmask 588800   ;;  %vm79_vm1 = vcmask 1043456   ;;  %vm136_vm2 = vcmask 64512   ;;  %s240_s1 = inlined_call_operand.vmem [shape: bf16[72,8], index: 1, kind: input, shape index: {}]   ;;  %s241_s0 = inlined_call_operand.vmem [shape: bf16[32,72], index: 0, kind: input, shape index: {}]   ;;  %s242_s2 = inlined_call_operand.vmem [shape: f32[1,8], index: 2, kind: input, shape index: {}]   ;;  %s243_s3 = inlined_call_operand.vmem [shape: f32[32,8], index: 3, kind: output, shape index: {}]  }
   0x1   :  { %v177_v0 = vld [vmem:[%s240_s1] sm:$0xff]   ;;  %v178_v1 = vld [vmem:[%s240_s1 + $0x8] sm:$0xff]   ;;  %v179_v2 = vld [vmem:[%s240_s1 + $0x10] sm:$0xff]  }
   0x2   :  { %162 = vmatprep.subr.bf16.mxu0 %v177_v0  ;;  %v182_v3 = vld [vmem:[%s241_s0] sm:$0xff]   ;;  %v180_v4 = vld [vmem:[%s240_s1 + $0x18] sm:$0xff]   ;;  %v183_v7 = vld [vmem:[%s241_s0 + $0x8] sm:$0xff]  }
   0x3   :  { %163 = vmatpush3.bf16.msra.mxu0 %v177_v0  ;;  %172 = vmatprep.mubr.msk.bf16.mxu0 %vm72_vm0, %v182_v3  ;;  %v181_v5 = vld [vmem:[%s240_s1 + $0x20] ss:$0 sps:$4 sm:$0xff]  }
   0x4   :  { %164 = vmatprep.subr.bf16.mxu0 %v178_v1  ;;  %v81_v6 = vsel %vm79_vm1, %v181_v5, 0  ;;  %v145_v8 = vld [vmem:[%s242_s2] ss:$0 sm:$0xff] }
   0x7   :  { %165 = vmatpush3.bf16.msra.mxu0 %v178_v1 }
   0x8   :  { %166 = vmatprep.subr.bf16.mxu0 %v179_v2 }
   0xb   :  { %167 = vmatpush3.bf16.msra.mxu0 %v179_v2 }
   0xc   :  { %168 = vmatprep.subr.bf16.mxu0 %v180_v4 }
   0xf   :  { %169 = vmatpush3.bf16.msra.mxu0 %v180_v4 }
  0x10   :  { %176 = vmatprep.subr.msk.bf16.mxu0 %vm79_vm1, %v181_v5 }
  0x13   :  { %171 = vmatpush3.bf16.msra.mxu0 %v81_v6 }
  0x16   :  { %173 = vmatmul.mubr.msk.bf16.vlgmr.msra.gmra.mrb[0].mxu0 %vm72_vm0, %v183_v7 }
  0xe9   :  { %v174_v9 = vpop.f32.mrb[0].mxu0 }
  0xea   :  { %v126_v10 = vadd.f32 %v174_v9, %v145_v8  ;;  %v117_v11 = vpop.f32.mrb[1].mxu0 }
  0xeb   :  { %v118_v12 = vadd.f32 %v145_v8, %v117_v11  ;;  %v175_v13 = vpop.f32.mrb[2].mxu0 }
  0xec   :  { %v134_v14 = vmax.f32 %v126_v10, 0.0  ;;  %v129_v15 = vadd.f32 %v175_v13, %v145_v8  ;;  %v120_v16 = vpop.f32.mrb[3].mxu0 }
  0xed   :  { %v132_v17 = vmax.f32 %v118_v12, 0.0  ;;  %v121_v18 = vadd.f32 %v145_v8, %v120_v16 }
  0xee   :  { %139 = vst.msk [vmem:[%s243_s3 + $0x10] sm:$0xff] %vm136_vm2, %v134_v14  ;;  %v135_v19 = vmax.f32 %v129_v15, 0.0 }
  0xef   :  { %137 = vst.msk [vmem:[%s243_s3] sm:$0xff] %vm136_vm2, %v132_v17  ;;  %v133_v20 = vmax.f32 %v121_v18, 0.0 }
  0xf0   :  { %140 = vst.msk [vmem:[%s243_s3 + $0x18] sm:$0xff] %vm136_vm2, %v135_v19 }
  0xf1   :  { %138 = vst.msk [vmem:[%s243_s3 + $0x8] sm:$0xff] %vm136_vm2, %v133_v20 }

// kernel: _lambda_.89
= control target key start
LH: loop header
LB: loop body
LE: loop exit
PB: predicated region body
PF: predicated region fallthrough
CT: control target
= control target key end

     0   :  { %s57_s0 = inlined_call_operand.vmem [shape: f32[8,128], index: 0, kind: input, shape index: {}]   ;;  %s58_s1 = inlined_call_operand.vmem [shape: f32[8,128], index: 1, kind: input, shape index: {}]   ;;  %s59_s2 = inlined_call_operand.vmem [shape: f32[8,128], index: 2, kind: input, shape index: {}]   ;;  %s60_s3 = inlined_call_operand.vmem [shape: f32[8,128], index: 3, kind: output, shape index: {}]  }
   0x1   :  { %v14_v0 = vld [vmem:[%s57_s0] sm:$0xff] }
   0x2   :  { %v15_v1 = vld [vmem:[%s58_s1] sm:$0xff] }
   0x3   :  { %v17_v2 = vld [vmem:[%s59_s2] sm:$0xff]  ;;  %v16_v3 = vadd.f32 %v15_v1, %v14_v0 }
   0x5   :  { %v18_v4 = vadd.f32 %v17_v2, %v16_v3 }
   0x7   :  { %v19_v5 = vmax.f32 %v18_v4, 0.0 }
   0x9   :  { %20 = vst [vmem:[%s60_s3] sm:$0xff] %v19_v5 }

// kernel: _lambda_.87
= control target key start
LH: loop header
LB: loop body
LE: loop exit
PB: predicated region body
PF: predicated region fallthrough
CT: control target
= control target key end

     0   :  { %v147_v0 = vmov 0.0   ;;  %vm148_vm0 = vmmov 0   ;;  %vm63_vm1 = vcmask 1043456   ;;  %vm59_vm2 = vcmask 588800   ;;  %s193_s1 = inlined_call_operand.vmem [shape: bf16[72,32], index: 1, kind: input, shape index: {}]   ;;  %s194_s0 = inlined_call_operand.vmem [shape: bf16[8,72], index: 0, kind: input, shape index: {}]   ;;  %s195_s2 = inlined_call_operand.vmem [shape: f32[1,32], index: 2, kind: input, shape index: {}]   ;;  %s196_s3 = inlined_call_operand.vmem [shape: f32[8,32], index: 3, kind: output, shape index: {}]  }
   0x1   :  { %126 = vmatprep.subr.bf16.mxu0 %v147_v0  ;;  %v142_v1 = vld [vmem:[%s193_s1] sm:$0xff]   ;;  %136 = vmatprep.mubr.msk.bf16.mxu0 %vm148_vm0, %v147_v0  ;;  %v143_v2 = vld [vmem:[%s193_s1 + $0x8] sm:$0xff]   ;;  %v144_v3 = vld [vmem:[%s193_s1 + $0x10] sm:$0xff]   ;;  %vm107_vm3 = vcmask 261120  }
   0x2   :  { %127 = vmatpush3.bf16.msra.mxu0 %v142_v1  ;;  %v145_v4 = vld [vmem:[%s193_s1 + $0x18] sm:$0xff]   ;;  %v146_v5 = vld [vmem:[%s193_s1 + $0x20] ss:$0 sps:$4 sm:$0xff]  }
   0x3   :  { %128 = vmatprep.subr.bf16.mxu0 %v147_v0  ;;  %v65_v6 = vsel %vm63_vm1, %v146_v5, 0  ;;  %v15_v7 = vld [vmem:[%s194_s0] sm:$0xf] }
   0x4   :  { %v113_v8 = vld [vmem:[%s195_s2] ss:$0 sm:$0xff] }
   0x6   :  { %129 = vmatpush3.bf16.msra.mxu0 %v143_v2 }
   0x7   :  { %130 = vmatprep.subr.bf16.mxu0 %v147_v0 }
   0xa   :  { %131 = vmatpush3.bf16.msra.mxu0 %v144_v3 }
   0xb   :  { %132 = vmatprep.subr.bf16.mxu0 %v147_v0 }
   0xe   :  { %133 = vmatpush3.bf16.msra.mxu0 %v145_v4 }
   0xf   :  { %134 = vmatprep.subr.bf16.mxu0 %v147_v0 }
  0x12   :  { %135 = vmatpush3.bf16.msra.mxu0 %v65_v6 }
  0x15   :  { %137 = vmatmul.mubr.msk.bf16.vlgmr.msra.gmra.mrb[0].mxu0 %vm59_vm2, %v15_v7 }
  0xe8   :  { %v101_v9 = vpop.f32.mrb[0].mxu0 }
  0xe9   :  { %v102_v10 = vadd.f32 %v113_v8, %v101_v9  ;;  %v138_v11 = vpop.f32.mrb[1].mxu0 }
  0xea   :  { %v104_v12 = vpop.f32.mrb[2].mxu0 }
  0xeb   :  { %108 = vst.msk [vmem:[%s196_s3] sm:$0xff] %vm107_vm3, %v102_v10  ;;  %v139_v13 = vpop.f32.mrb[3].mxu0 }

// kernel: _lambda_.100
= control target key start
LH: loop header
LB: loop body
LE: loop exit
PB: predicated region body
PF: predicated region fallthrough
CT: control target
= control target key end

     0   :  { %v108_v0 = vmov 0.0   ;;  %vm109_vm0 = vmmov 0   ;;  %vm39_vm1 = vcmask 261120   ;;  %vm83_vm2 = vcmask 195584   ;;  %s145_s1 = inlined_call_operand.vmem [shape: bf16[32,24], index: 1, kind: input, shape index: {}]   ;;  %s146_s0 = inlined_call_operand.vmem [shape: bf16[8,32], index: 0, kind: input, shape index: {}]   ;;  %s147_s2 = inlined_call_operand.vmem [shape: f32[1,24], index: 2, kind: input, shape index: {}]   ;;  %s148_s3 = inlined_call_operand.vmem [shape: f32[8,24], index: 3, kind: output, shape index: {}]  }
   0x1   :  { %96 = vmatprep.subr.bf16.mxu0 %v108_v0  ;;  %v106_v1 = vld [vmem:[%s145_s1] sm:$0xff]   ;;  %100 = vmatprep.mubr.msk.bf16.mxu0 %vm109_vm0, %v108_v0  ;;  %v107_v2 = vld [vmem:[%s145_s1 + $0x8] sm:$0xff]  }
   0x2   :  { %97 = vmatpush3.bf16.msra.mxu0 %v106_v1  ;;  %v15_v3 = vld [vmem:[%s146_s0] sm:$0xf] }
   0x3   :  { %98 = vmatprep.subr.bf16.mxu0 %v108_v0  ;;  %v89_v4 = vld [vmem:[%s147_s2] ss:$0 sm:$0xff] }
   0x6   :  { %99 = vmatpush3.bf16.msra.mxu0 %v107_v2 }
   0x9   :  { %101 = vmatmul.mubr.msk.bf16.vlgmr.msra.gmra.mrb[0].mxu0 %vm39_vm1, %v15_v3 }
  0xdc   :  { %v77_v5 = vpop.f32.mrb[0].mxu0 }
  0xdd   :  { %v78_v6 = vadd.f32 %v89_v4, %v77_v5  ;;  %v102_v7 = vpop.f32.mrb[1].mxu0 }
  0xde   :  { %v80_v8 = vpop.f32.mrb[2].mxu0 }
  0xdf   :  { %84 = vst.msk [vmem:[%s148_s3] sm:$0xff] %vm83_vm2, %v78_v6  ;;  %v103_v9 = vpop.f32.mrb[3].mxu0 }

// kernel: _lambda_.114
= control target key start
LH: loop header
LB: loop body
LE: loop exit
PB: predicated region body
PF: predicated region fallthrough
CT: control target
= control target key end

     0   :  { %v347_v1 = vmov 0.0   ;;  %vm348_vm0 = vmmov 0   ;;  %vm178_vm1 = vcmask 261120   ;;  %vm262_vm2 = vcmask 523264   ;;  %s435_s1 = inlined_call_operand.vmem [shape: bf16[288,64], index: 1, kind: input, shape index: {}]   ;;  %s436_s0 = inlined_call_operand.vmem [shape: bf16[8,288], index: 0, kind: input, shape index: {}]   ;;  %s437_s2 = inlined_call_operand.vmem [shape: f32[1,64], index: 2, kind: input, shape index: {}]   ;;  %s438_s3 = inlined_call_operand.vmem [shape: f32[8,64], index: 3, kind: output, shape index: {}]  }
   0x1   :  { %v326_v0 = vld [vmem:[%s435_s1 + $0x40] sm:$0xff]   ;;  %316 = vmatprep.subr.bf16.mxu1 %v347_v1  ;;  %320 = vmatprep.mubr.msk.bf16.mxu1 %vm348_vm0, %v347_v1  ;;  %v328_v3 = vld [vmem:[%s435_s1 + $0x48] sm:$0xff]   ;;  %v330_v5 = vld [vmem:[%s435_s1 + $0x50] sm:$0xff]  }
   0x2   :  { %v327_v2 = vld [vmem:[%s435_s1] sm:$0xff]   ;;  %291 = vmatprep.subr.bf16.mxu0 %v326_v0  ;;  %v329_v4 = vld [vmem:[%s435_s1 + $0x8] sm:$0xff]   ;;  %v331_v6 = vld [vmem:[%s435_s1 + $0x10] sm:$0xff]  }
   0x3   :  { %292 = vmatpush3.bf16.msra.mxu0 %v327_v2  ;;  %v332_v7 = vld [vmem:[%s435_s1 + $0x58] sm:$0xff]   ;;  %v334_v9 = vld [vmem:[%s435_s1 + $0x60] sm:$0xff]   ;;  %v336_v12 = vld [vmem:[%s435_s1 + $0x68] sm:$0xff]  }
   0x4   :  { %293 = vmatprep.subr.bf16.mxu0 %v328_v3  ;;  %v333_v8 = vld [vmem:[%s435_s1 + $0x18] sm:$0xff]   ;;  %v340_v10 = vld [vmem:[%s435_s1 + $0x80] sm:$0xff]   ;;  %v346_v15 = vld [vmem:[%s435_s1 + $0x88] sm:$0xff]  }
   0x5   :  { %v335_v11 = vld [vmem:[%s435_s1 + $0x20] sm:$0xff]   ;;  %317 = vmatpush3.bf16.msra.mxu1 %v340_v10  ;;  %v337_v16 = vld [vmem:[%s435_s1 + $0x28] sm:$0xff]   ;;  %v338_v17 = vld [vmem:[%s435_s1 + $0x70] sm:$0xff]  }
   0x6   :  { %318 = vmatprep.subr.bf16.mxu1 %v347_v1  ;;  %v15_v13 = vld [vmem:[%s436_s0] sm:$0xff]  ;;  %v345_v18 = vld [vmem:[%s436_s0 + $0x8] ss:$0 sps:$4 sm:$0xff]   ;;  %v339_v19 = vld [vmem:[%s435_s1 + $0x30] sm:$0xff]  }
   0x7   :  { %294 = vmatpush3.bf16.msra.mxu0 %v329_v4  ;;  %v270_v14 = vcombine.high %v15_v13, %v15_v13  ;;  %v341_v20 = vld [vmem:[%s435_s1 + $0x78] sm:$0xff]   ;;  %v269_v22 = vcombine.low %v15_v13, %v15_v13  ;;  %v268_v29 = vld [vmem:[%s437_s2] ss:$0 sm:$0xff] }
   0x8   :  { %295 = vmatprep.subr.bf16.mxu0 %v330_v5  ;;  %v342_v21 = vld [vmem:[%s435_s1 + $0x38] sm:$0xff]  }
   0x9   :  { %214 = vmatprep.mubr.bf16.mxu0 %v270_v14  ;;  %319 = vmatpush3.bf16.msra.mxu1 %v346_v15 }
   0xb   :  { %296 = vmatpush3.bf16.msra.mxu0 %v331_v6 }
   0xc   :  { %297 = vmatprep.subr.bf16.mxu0 %v332_v7  ;;  %321 = vmatmul.mubr.msk.bf16.vlgmr.msra.gmra.mrb[0].mxu1 %vm178_vm1, %v345_v18 }
   0xf   :  { %298 = vmatpush3.bf16.msra.mxu0 %v333_v8 }
  0x10   :  { %299 = vmatprep.subr.bf16.mxu0 %v334_v9 }
  0x13   :  { %300 = vmatpush3.bf16.msra.mxu0 %v335_v11 }
  0x14   :  { %301 = vmatprep.subr.bf16.mxu0 %v336_v12 }
  0x17   :  { %302 = vmatpush3.bf16.msra.mxu0 %v337_v16 }
  0x18   :  { %303 = vmatprep.subr.bf16.mxu0 %v338_v17 }
  0x1b   :  { %304 = vmatpush3.bf16.msra.mxu0 %v339_v19 }
  0x1c   :  { %305 = vmatprep.subr.bf16.mxu0 %v341_v20 }
  0x1f   :  { %306 = vmatpush3.bf16.msra.mxu0 %v342_v21 }
  0x22   :  { %215 = vmatmul.mubr.bf16.vlgmr.msra.gmra.mrb[0].mxu0 %v269_v22 }
  0xdf   :  { %v256_v23 = vpop.f32.mrb[0].mxu1 }
  0xe0   :  { %v322_v24 = vpop.f32.mrb[1].mxu1 }
  0xe1   :  { %v259_v25 = vpop.f32.mrb[2].mxu1 }
  0xe2   :  { %v323_v26 = vpop.f32.mrb[3].mxu1 }
  0xf5   :  { %v307_v27 = vpop.f32.mrb[0].mxu0 }
  0xf6   :  { %v308_v28 = vpop.f32.mrb[1].mxu0 }
  0xf7   :  { %v309_v30 = vadd.f32 %v308_v28, %v307_v27  ;;  %v310_v31 = vpop.f32.mrb[2].mxu0 }
  0xf8   :  { %v311_v32 = vpop.f32.mrb[3].mxu0 }
  0xf9   :  { %v217_v33 = vadd.f32 %v309_v30, %v268_v29 }
  0xfb   :  { %v257_v34 = vadd.f32 %v256_v23, %v217_v33 }
  0xfd   :  { %263 = vst.msk [vmem:[%s438_s3] sm:$0xff] %vm262_vm2, %v257_v34 }

// kernel: _lambda_.112
= control target key start
LH: loop header
LB: loop body
LE: loop exit
PB: predicated region body
PF: predicated region fallthrough
CT: control target
= control target key end

     0   :  { %v176_v0 = vmov 0   ;;  %vm101_vm0 = vcmask 130048   ;;  %s235_s1 = inlined_call_operand.vmem [shape: bf16[144,16], index: 1, kind: input, shape index: {}]   ;;  %s236_s0 = inlined_call_operand.vmem [shape: bf16[8,144], index: 0, kind: input, shape index: {}]   ;;  %s237_s2 = inlined_call_operand.vmem [shape: f32[1,16], index: 2, kind: input, shape index: {}]   ;;  %s238_s3 = inlined_call_operand.vmem [shape: f32[8,16], index: 3, kind: output, shape index: {}]  }
   0x1   :  { %105 = vmatprep.subr.bf16.mxu0 %v176_v0  ;;  %v165_v1 = vld [vmem:[%s235_s1] sm:$0xff]   ;;  %v166_v2 = vld [vmem:[%s235_s1 + $0x8] sm:$0xff]   ;;  %v167_v3 = vld [vmem:[%s235_s1 + $0x10] sm:$0xff]  }
   0x2   :  { %106 = vmatpush1.bf16.msra.mxu0 %v165_v1  ;;  %v15_v4 = vld [vmem:[%s236_s0] sm:$0xff]  ;;  %v168_v5 = vld [vmem:[%s235_s1 + $0x18] sm:$0xff]   ;;  %v170_v8 = vld [vmem:[%s235_s1 + $0x28] sm:$0xff]  }
   0x3   :  { %107 = vmatprep.subr.bf16.mxu0 %v176_v0  ;;  %v153_v6 = vcombine.high %v15_v4, %v15_v4  ;;  %v169_v7 = vld [vmem:[%s235_s1 + $0x20] sm:$0xff]   ;;  %v171_v9 = vld [vmem:[%s235_s1 + $0x30] sm:$0xff]   ;;  %v172_v10 = vld [vmem:[%s235_s1 + $0x38] sm:$0xff]   ;;  %v152_v12 = vcombine.low %v15_v4, %v15_v4 }
   0x4   :  { %v173_v11 = vld [vmem:[%s235_s1 + $0x40] sm:$0xff]  }
   0x5   :  { %163 = vmatprep.mubr.msk.bf16.mxu0 %vm101_vm0, %v153_v6  ;;  %v151_v13 = vld [vmem:[%s237_s2] ss:$0 sm:$0xff] }
   0x6   :  { %108 = vmatpush1.bf16.msra.mxu0 %v166_v2 }
   0x7   :  { %109 = vmatprep.subr.bf16.mxu0 %v176_v0 }
   0xa   :  { %110 = vmatpush1.bf16.msra.mxu0 %v167_v3 }
   0xb   :  { %111 = vmatprep.subr.bf16.mxu0 %v176_v0 }
   0xe   :  { %112 = vmatpush1.bf16.msra.mxu0 %v168_v5 }
   0xf   :  { %113 = vmatprep.subr.bf16.mxu0 %v176_v0 }
  0x12   :  { %114 = vmatpush1.bf16.msra.mxu0 %v169_v7 }
  0x13   :  { %115 = vmatprep.subr.bf16.mxu0 %v176_v0 }
  0x16   :  { %116 = vmatpush1.bf16.msra.mxu0 %v170_v8 }
  0x17   :  { %117 = vmatprep.subr.bf16.mxu0 %v176_v0 }
  0x1a   :  { %118 = vmatpush1.bf16.msra.mxu0 %v171_v9 }
  0x1b   :  { %119 = vmatprep.subr.bf16.mxu0 %v176_v0 }
  0x1e   :  { %120 = vmatpush1.bf16.msra.mxu0 %v172_v10 }
  0x1f   :  { %121 = vmatprep.subr.bf16.mxu0 %v176_v0 }
  0x22   :  { %122 = vmatpush1.bf16.msra.mxu0 %v173_v11 }
  0x25   :  { %138 = vmatmul.mubr.bf16.vlgmr.msra.gmra.mrb[0].mxu0 %v152_v12 }
  0xf8   :  { %v139_v14 = vpop.f32.mrb[0].mxu0 }
  0xf9   :  { %v140_v15 = vadd.f32 %v151_v13, %v139_v14  ;;  %v141_v16 = vpop.f32.mrb[1].mxu0 }
  0xfa   :  { %v142_v17 = vpop.f32.mrb[2].mxu0 }
  0xfb   :  { %v145_v18 = vmax.f32 %v140_v15, 0.0  ;;  %v143_v19 = vpop.f32.mrb[3].mxu0 }
  0xfd   :  { %146 = vst.msk [vmem:[%s238_s3] sm:$0xff] %vm101_vm0, %v145_v18 }

// kernel: _lambda_.113
= control target key start
LH: loop header
LB: loop body
LE: loop exit
PB: predicated region body
PF: predicated region fallthrough
CT: control target
= control target key end

     0   :  { %v176_v0 = vmov 0   ;;  %vm101_vm0 = vcmask 130048   ;;  %vm145_vm1 = vcmask 523264   ;;  %s233_s1 = inlined_call_operand.vmem [shape: bf16[144,64], index: 1, kind: input, shape index: {}]   ;;  %s234_s0 = inlined_call_operand.vmem [shape: bf16[8,144], index: 0, kind: input, shape index: {}]   ;;  %s235_s2 = inlined_call_operand.vmem [shape: f32[1,64], index: 2, kind: input, shape index: {}]   ;;  %s236_s3 = inlined_call_operand.vmem [shape: f32[8,64], index: 3, kind: output, shape index: {}]  }
   0x1   :  { %105 = vmatprep.subr.bf16.mxu0 %v176_v0  ;;  %v165_v1 = vld [vmem:[%s233_s1] sm:$0xff]   ;;  %v166_v2 = vld [vmem:[%s233_s1 + $0x8] sm:$0xff]   ;;  %v167_v3 = vld [vmem:[%s233_s1 + $0x10] sm:$0xff]  }
   0x2   :  { %106 = vmatpush1.bf16.msra.mxu0 %v165_v1  ;;  %v15_v4 = vld [vmem:[%s234_s0] sm:$0xff]  ;;  %v168_v5 = vld [vmem:[%s233_s1 + $0x18] sm:$0xff]   ;;  %v170_v8 = vld [vmem:[%s233_s1 + $0x28] sm:$0xff]  }
   0x3   :  { %107 = vmatprep.subr.bf16.mxu0 %v176_v0  ;;  %v153_v6 = vcombine.high %v15_v4, %v15_v4  ;;  %v169_v7 = vld [vmem:[%s233_s1 + $0x20] sm:$0xff]   ;;  %v171_v9 = vld [vmem:[%s233_s1 + $0x30] sm:$0xff]   ;;  %v172_v10 = vld [vmem:[%s233_s1 + $0x38] sm:$0xff]   ;;  %v152_v12 = vcombine.low %v15_v4, %v15_v4 }
   0x4   :  { %v173_v11 = vld [vmem:[%s233_s1 + $0x40] sm:$0xff]  }
   0x5   :  { %163 = vmatprep.mubr.msk.bf16.mxu0 %vm101_vm0, %v153_v6  ;;  %v151_v13 = vld [vmem:[%s235_s2] ss:$0 sm:$0xff] }
   0x6   :  { %108 = vmatpush1.bf16.msra.mxu0 %v166_v2 }
   0x7   :  { %109 = vmatprep.subr.bf16.mxu0 %v176_v0 }
   0xa   :  { %110 = vmatpush1.bf16.msra.mxu0 %v167_v3 }
   0xb   :  { %111 = vmatprep.subr.bf16.mxu0 %v176_v0 }
   0xe   :  { %112 = vmatpush1.bf16.msra.mxu0 %v168_v5 }
   0xf   :  { %113 = vmatprep.subr.bf16.mxu0 %v176_v0 }
  0x12   :  { %114 = vmatpush1.bf16.msra.mxu0 %v169_v7 }
  0x13   :  { %115 = vmatprep.subr.bf16.mxu0 %v176_v0 }
  0x16   :  { %116 = vmatpush1.bf16.msra.mxu0 %v170_v8 }
  0x17   :  { %117 = vmatprep.subr.bf16.mxu0 %v176_v0 }
  0x1a   :  { %118 = vmatpush1.bf16.msra.mxu0 %v171_v9 }
  0x1b   :  { %119 = vmatprep.subr.bf16.mxu0 %v176_v0 }
  0x1e   :  { %120 = vmatpush1.bf16.msra.mxu0 %v172_v10 }
  0x1f   :  { %121 = vmatprep.subr.bf16.mxu0 %v176_v0 }
  0x22   :  { %122 = vmatpush1.bf16.msra.mxu0 %v173_v11 }
  0x25   :  { %138 = vmatmul.mubr.bf16.vlgmr.msra.gmra.mrb[0].mxu0 %v152_v12 }
  0xf8   :  { %v139_v14 = vpop.f32.mrb[0].mxu0 }
  0xf9   :  { %v140_v15 = vadd.f32 %v151_v13, %v139_v14  ;;  %v141_v16 = vpop.f32.mrb[1].mxu0 }
  0xfa   :  { %v142_v17 = vpop.f32.mrb[2].mxu0 }
  0xfb   :  { %146 = vst.msk [vmem:[%s236_s3] sm:$0xff] %vm145_vm1, %v140_v15  ;;  %v143_v18 = vpop.f32.mrb[3].mxu0 }

// kernel: _lambda_.110
= control target key start
LH: loop header
LB: loop body
LE: loop exit
PB: predicated region body
PF: predicated region fallthrough
CT: control target
= control target key end

     0   :  { %v148_v0 = vmov 0.0   ;;  %vm149_vm0 = vmmov 0   ;;  %vm63_vm1 = vcmask 1043456   ;;  %vm59_vm2 = vcmask 588800   ;;  %s194_s1 = inlined_call_operand.vmem [shape: bf16[72,8], index: 1, kind: input, shape index: {}]   ;;  %s195_s0 = inlined_call_operand.vmem [shape: bf16[8,72], index: 0, kind: input, shape index: {}]   ;;  %s196_s2 = inlined_call_operand.vmem [shape: f32[1,8], index: 2, kind: input, shape index: {}]   ;;  %s197_s3 = inlined_call_operand.vmem [shape: f32[8,8], index: 3, kind: output, shape index: {}]  }
   0x1   :  { %127 = vmatprep.subr.bf16.mxu0 %v148_v0  ;;  %v143_v1 = vld [vmem:[%s194_s1] sm:$0xff]   ;;  %137 = vmatprep.mubr.msk.bf16.mxu0 %vm149_vm0, %v148_v0  ;;  %v144_v2 = vld [vmem:[%s194_s1 + $0x8] sm:$0xff]   ;;  %v145_v3 = vld [vmem:[%s194_s1 + $0x10] sm:$0xff]   ;;  %vm108_vm3 = vcmask 64512  }
   0x2   :  { %128 = vmatpush3.bf16.msra.mxu0 %v143_v1  ;;  %v146_v4 = vld [vmem:[%s194_s1 + $0x18] sm:$0xff]   ;;  %v147_v5 = vld [vmem:[%s194_s1 + $0x20] ss:$0 sps:$4 sm:$0xff]  }
   0x3   :  { %129 = vmatprep.subr.bf16.mxu0 %v148_v0  ;;  %v65_v6 = vsel %vm63_vm1, %v147_v5, 0  ;;  %v15_v7 = vld [vmem:[%s195_s0] sm:$0xf] }
   0x4   :  { %v114_v8 = vld [vmem:[%s196_s2] ss:$0 sm:$0xff] }
   0x6   :  { %130 = vmatpush3.bf16.msra.mxu0 %v144_v2 }
   0x7   :  { %131 = vmatprep.subr.bf16.mxu0 %v148_v0 }
   0xa   :  { %132 = vmatpush3.bf16.msra.mxu0 %v145_v3 }
   0xb   :  { %133 = vmatprep.subr.bf16.mxu0 %v148_v0 }
   0xe   :  { %134 = vmatpush3.bf16.msra.mxu0 %v146_v4 }
   0xf   :  { %135 = vmatprep.subr.bf16.mxu0 %v148_v0 }
  0x12   :  { %136 = vmatpush3.bf16.msra.mxu0 %v65_v6 }
  0x15   :  { %138 = vmatmul.mubr.msk.bf16.vlgmr.msra.gmra.mrb[0].mxu0 %vm59_vm2, %v15_v7 }
  0xe8   :  { %v101_v9 = vpop.f32.mrb[0].mxu0 }
  0xe9   :  { %v102_v10 = vadd.f32 %v114_v8, %v101_v9  ;;  %v139_v11 = vpop.f32.mrb[1].mxu0 }
  0xea   :  { %v104_v12 = vpop.f32.mrb[2].mxu0 }
  0xeb   :  { %v107_v13 = vmax.f32 %v102_v10, 0.0  ;;  %v140_v14 = vpop.f32.mrb[3].mxu0 }
  0xed   :  { %109 = vst.msk [vmem:[%s197_s3] sm:$0xff] %vm108_vm3, %v107_v13 }

// kernel: _lambda_.111
= control target key start
LH: loop header
LB: loop body
LE: loop exit
PB: predicated region body
PF: predicated region fallthrough
CT: control target
= control target key end

     0   :  { %v147_v0 = vmov 0.0   ;;  %vm148_vm0 = vmmov 0   ;;  %vm63_vm1 = vcmask 1043456   ;;  %vm59_vm2 = vcmask 588800   ;;  %s193_s1 = inlined_call_operand.vmem [shape: bf16[72,64], index: 1, kind: input, shape index: {}]   ;;  %s194_s0 = inlined_call_operand.vmem [shape: bf16[8,72], index: 0, kind: input, shape index: {}]   ;;  %s195_s2 = inlined_call_operand.vmem [shape: f32[1,64], index: 2, kind: input, shape index: {}]   ;;  %s196_s3 = inlined_call_operand.vmem [shape: f32[8,64], index: 3, kind: output, shape index: {}]  }
   0x1   :  { %126 = vmatprep.subr.bf16.mxu0 %v147_v0  ;;  %v142_v1 = vld [vmem:[%s193_s1] sm:$0xff]   ;;  %136 = vmatprep.mubr.msk.bf16.mxu0 %vm148_vm0, %v147_v0  ;;  %v143_v2 = vld [vmem:[%s193_s1 + $0x8] sm:$0xff]   ;;  %v144_v3 = vld [vmem:[%s193_s1 + $0x10] sm:$0xff]   ;;  %vm107_vm3 = vcmask 523264  }
   0x2   :  { %127 = vmatpush3.bf16.msra.mxu0 %v142_v1  ;;  %v145_v4 = vld [vmem:[%s193_s1 + $0x18] sm:$0xff]   ;;  %v146_v5 = vld [vmem:[%s193_s1 + $0x20] ss:$0 sps:$4 sm:$0xff]  }
   0x3   :  { %128 = vmatprep.subr.bf16.mxu0 %v147_v0  ;;  %v65_v6 = vsel %vm63_vm1, %v146_v5, 0  ;;  %v15_v7 = vld [vmem:[%s194_s0] sm:$0xf] }
   0x4   :  { %v113_v8 = vld [vmem:[%s195_s2] ss:$0 sm:$0xff] }
   0x6   :  { %129 = vmatpush3.bf16.msra.mxu0 %v143_v2 }
   0x7   :  { %130 = vmatprep.subr.bf16.mxu0 %v147_v0 }
   0xa   :  { %131 = vmatpush3.bf16.msra.mxu0 %v144_v3 }
   0xb   :  { %132 = vmatprep.subr.bf16.mxu0 %v147_v0 }
   0xe   :  { %133 = vmatpush3.bf16.msra.mxu0 %v145_v4 }
   0xf   :  { %134 = vmatprep.subr.bf16.mxu0 %v147_v0 }
  0x12   :  { %135 = vmatpush3.bf16.msra.mxu0 %v65_v6 }
  0x15   :  { %137 = vmatmul.mubr.msk.bf16.vlgmr.msra.gmra.mrb[0].mxu0 %vm59_vm2, %v15_v7 }
  0xe8   :  { %v101_v9 = vpop.f32.mrb[0].mxu0 }
  0xe9   :  { %v102_v10 = vadd.f32 %v113_v8, %v101_v9  ;;  %v138_v11 = vpop.f32.mrb[1].mxu0 }
  0xea   :  { %v104_v12 = vpop.f32.mrb[2].mxu0 }
  0xeb   :  { %108 = vst.msk [vmem:[%s196_s3] sm:$0xff] %vm107_vm3, %v102_v10  ;;  %v139_v13 = vpop.f32.mrb[3].mxu0 }

// kernel: _lambda_.90
= control target key start
LH: loop header
LB: loop body
LE: loop exit
PB: predicated region body
PF: predicated region fallthrough
CT: control target
= control target key end

     0   :  { %v348_v1 = vmov 0.0   ;;  %vm349_vm0 = vmmov 0   ;;  %vm178_vm1 = vcmask 261120   ;;  %vm263_vm2 = vcmask 523264   ;;  %s436_s1 = inlined_call_operand.vmem [shape: bf16[288,64], index: 1, kind: input, shape index: {}]   ;;  %s437_s0 = inlined_call_operand.vmem [shape: bf16[8,288], index: 0, kind: input, shape index: {}]   ;;  %s438_s2 = inlined_call_operand.vmem [shape: f32[1,64], index: 2, kind: input, shape index: {}]   ;;  %s439_s3 = inlined_call_operand.vmem [shape: f32[8,64], index: 3, kind: output, shape index: {}]  }
   0x1   :  { %v327_v0 = vld [vmem:[%s436_s1 + $0x40] sm:$0xff]   ;;  %317 = vmatprep.subr.bf16.mxu1 %v348_v1  ;;  %321 = vmatprep.mubr.msk.bf16.mxu1 %vm349_vm0, %v348_v1  ;;  %v329_v3 = vld [vmem:[%s436_s1 + $0x48] sm:$0xff]   ;;  %v331_v5 = vld [vmem:[%s436_s1 + $0x50] sm:$0xff]  }
   0x2   :  { %v328_v2 = vld [vmem:[%s436_s1] sm:$0xff]   ;;  %292 = vmatprep.subr.bf16.mxu0 %v327_v0  ;;  %v330_v4 = vld [vmem:[%s436_s1 + $0x8] sm:$0xff]   ;;  %v332_v6 = vld [vmem:[%s436_s1 + $0x10] sm:$0xff]  }
   0x3   :  { %293 = vmatpush3.bf16.msra.mxu0 %v328_v2  ;;  %v333_v7 = vld [vmem:[%s436_s1 + $0x58] sm:$0xff]   ;;  %v335_v9 = vld [vmem:[%s436_s1 + $0x60] sm:$0xff]   ;;  %v337_v12 = vld [vmem:[%s436_s1 + $0x68] sm:$0xff]  }
   0x4   :  { %294 = vmatprep.subr.bf16.mxu0 %v329_v3  ;;  %v334_v8 = vld [vmem:[%s436_s1 + $0x18] sm:$0xff]   ;;  %v341_v10 = vld [vmem:[%s436_s1 + $0x80] sm:$0xff]   ;;  %v347_v15 = vld [vmem:[%s436_s1 + $0x88] sm:$0xff]  }
   0x5   :  { %v336_v11 = vld [vmem:[%s436_s1 + $0x20] sm:$0xff]   ;;  %318 = vmatpush3.bf16.msra.mxu1 %v341_v10  ;;  %v338_v16 = vld [vmem:[%s436_s1 + $0x28] sm:$0xff]   ;;  %v339_v17 = vld [vmem:[%s436_s1 + $0x70] sm:$0xff]  }
   0x6   :  { %319 = vmatprep.subr.bf16.mxu1 %v348_v1  ;;  %v15_v13 = vld [vmem:[%s437_s0] sm:$0xff]  ;;  %v346_v18 = vld [vmem:[%s437_s0 + $0x8] ss:$0 sps:$4 sm:$0xff]   ;;  %v340_v19 = vld [vmem:[%s436_s1 + $0x30] sm:$0xff]  }
   0x7   :  { %295 = vmatpush3.bf16.msra.mxu0 %v330_v4  ;;  %v271_v14 = vcombine.high %v15_v13, %v15_v13  ;;  %v342_v20 = vld [vmem:[%s436_s1 + $0x78] sm:$0xff]   ;;  %v270_v22 = vcombine.low %v15_v13, %v15_v13  ;;  %v269_v29 = vld [vmem:[%s438_s2] ss:$0 sm:$0xff] }
   0x8   :  { %296 = vmatprep.subr.bf16.mxu0 %v331_v5  ;;  %v343_v21 = vld [vmem:[%s436_s1 + $0x38] sm:$0xff]  }
   0x9   :  { %214 = vmatprep.mubr.bf16.mxu0 %v271_v14  ;;  %320 = vmatpush3.bf16.msra.mxu1 %v347_v15 }
   0xb   :  { %297 = vmatpush3.bf16.msra.mxu0 %v332_v6 }
   0xc   :  { %298 = vmatprep.subr.bf16.mxu0 %v333_v7  ;;  %322 = vmatmul.mubr.msk.bf16.vlgmr.msra.gmra.mrb[0].mxu1 %vm178_vm1, %v346_v18 }
   0xf   :  { %299 = vmatpush3.bf16.msra.mxu0 %v334_v8 }
  0x10   :  { %300 = vmatprep.subr.bf16.mxu0 %v335_v9 }
  0x13   :  { %301 = vmatpush3.bf16.msra.mxu0 %v336_v11 }
  0x14   :  { %302 = vmatprep.subr.bf16.mxu0 %v337_v12 }
  0x17   :  { %303 = vmatpush3.bf16.msra.mxu0 %v338_v16 }
  0x18   :  { %304 = vmatprep.subr.bf16.mxu0 %v339_v17 }
  0x1b   :  { %305 = vmatpush3.bf16.msra.mxu0 %v340_v19 }
  0x1c   :  { %306 = vmatprep.subr.bf16.mxu0 %v342_v20 }
  0x1f   :  { %307 = vmatpush3.bf16.msra.mxu0 %v343_v21 }
  0x22   :  { %215 = vmatmul.mubr.bf16.vlgmr.msra.gmra.mrb[0].mxu0 %v270_v22 }
  0xdf   :  { %v256_v23 = vpop.f32.mrb[0].mxu1 }
  0xe0   :  { %v323_v24 = vpop.f32.mrb[1].mxu1 }
  0xe1   :  { %v259_v25 = vpop.f32.mrb[2].mxu1 }
  0xe2   :  { %v324_v26 = vpop.f32.mrb[3].mxu1 }
  0xf5   :  { %v308_v27 = vpop.f32.mrb[0].mxu0 }
  0xf6   :  { %v309_v28 = vpop.f32.mrb[1].mxu0 }
  0xf7   :  { %v310_v30 = vadd.f32 %v309_v28, %v308_v27  ;;  %v311_v31 = vpop.f32.mrb[2].mxu0 }
  0xf8   :  { %v312_v32 = vpop.f32.mrb[3].mxu0 }
  0xf9   :  { %v217_v33 = vadd.f32 %v310_v30, %v269_v29 }
  0xfb   :  { %v257_v34 = vadd.f32 %v256_v23, %v217_v33 }
  0xfd   :  { %v262_v35 = vmax.f32 %v257_v34, 0.0 }
  0xff   :  { %264 = vst.msk [vmem:[%s439_s3] sm:$0xff] %vm263_vm2, %v262_v35 }

// kernel: _lambda_.115
= control target key start
LH: loop header
LB: loop body
LE: loop exit
PB: predicated region body
PF: predicated region fallthrough
CT: control target
= control target key end

     0   :  { %s70_s0 = inlined_call_operand.vmem [shape: f32[8,128], index: 0, kind: input, shape index: {}]   ;;  %s71_s1 = inlined_call_operand.vmem [shape: f32[8,128], index: 1, kind: input, shape index: {}]   ;;  %s72_s2 = inlined_call_operand.vmem [shape: f32[8,128], index: 2, kind: input, shape index: {}]   ;;  %s73_s3 = inlined_call_operand.vmem [shape: f32[8,128], index: 3, kind: input, shape index: {}]   ;;  %s74_s4 = inlined_call_operand.vmem [shape: f32[8,128], index: 4, kind: output, shape index: {}]  }
   0x1   :  { %v17_v0 = vld [vmem:[%s70_s0] sm:$0xff] }
   0x2   :  { %v18_v1 = vld [vmem:[%s71_s1] sm:$0xff] }
   0x3   :  { %v20_v2 = vld [vmem:[%s72_s2] sm:$0xff]  ;;  %v19_v3 = vadd.f32 %v18_v1, %v17_v0 }
   0x4   :  { %v22_v4 = vld [vmem:[%s73_s3] sm:$0xff] }
   0x5   :  { %v21_v5 = vadd.f32 %v20_v2, %v19_v3 }
   0x7   :  { %v23_v6 = vadd.f32 %v22_v4, %v21_v5 }
   0x9   :  { %v24_v7 = vmax.f32 %v23_v6, 0.0 }
   0xb   :  { %25 = vst [vmem:[%s74_s4] sm:$0xff] %v24_v7 }

// kernel: _lambda_.97
= control target key start
LH: loop header
LB: loop body
LE: loop exit
PB: predicated region body
PF: predicated region fallthrough
CT: control target
= control target key end

     0   :  { %v607_v35 = vmov 0.0   ;;  %vm608_vm0 = vmmov 0   ;;  %vm330_vm1 = vcmask 523264   ;;  %s754_s1 = inlined_call_operand.vmem [shape: bf16[576,64], index: 1, kind: input, shape index: {}]   ;;  %s755_s0 = inlined_call_operand.vmem [shape: bf16[8,576], index: 0, kind: input, shape index: {}]   ;;  %s756_s2 = inlined_call_operand.vmem [shape: f32[1,64], index: 2, kind: input, shape index: {}]   ;;  %s757_s3 = inlined_call_operand.vmem [shape: f32[8,64], index: 3, kind: output, shape index: {}]  }
   0x1   :  { %v566_v0 = vld [vmem:[%s754_s1 + $0x40] sm:$0xff]   ;;  %v570_v4 = vld [vmem:[%s754_s1 + $0x48] sm:$0xff]   ;;  %v574_v8 = vld [vmem:[%s754_s1 + $0x50] sm:$0xff]  }
   0x2   :  { %v567_v1 = vld [vmem:[%s754_s1] sm:$0xff]   ;;  %503 = vmatprep.subr.bf16.mxu0 %v566_v0  ;;  %v571_v5 = vld [vmem:[%s754_s1 + $0x8] sm:$0xff]   ;;  %v575_v9 = vld [vmem:[%s754_s1 + $0x10] sm:$0xff]  }
   0x3   :  { %v568_v2 = vld [vmem:[%s754_s1 + $0xc0] sm:$0xff]   ;;  %504 = vmatpush3.bf16.msra.mxu0 %v567_v1  ;;  %v572_v6 = vld [vmem:[%s754_s1 + $0xc8] sm:$0xff]   ;;  %v576_v10 = vld [vmem:[%s754_s1 + $0xd0] sm:$0xff]  }
   0x4   :  { %v569_v3 = vld [vmem:[%s754_s1 + $0x80] sm:$0xff]   ;;  %525 = vmatprep.subr.bf16.mxu1 %v568_v2  ;;  %505 = vmatprep.subr.bf16.mxu0 %v570_v4  ;;  %v573_v7 = vld [vmem:[%s754_s1 + $0x88] sm:$0xff]   ;;  %v577_v11 = vld [vmem:[%s754_s1 + $0x90] sm:$0xff]  }
   0x5   :  { %526 = vmatpush3.bf16.msra.mxu1 %v569_v3  ;;  %v578_v12 = vld [vmem:[%s754_s1 + $0x58] sm:$0xff]   ;;  %v582_v16 = vld [vmem:[%s754_s1 + $0x60] sm:$0xff]   ;;  %v586_v20 = vld [vmem:[%s754_s1 + $0x68] sm:$0xff]  }
   0x6   :  { %527 = vmatprep.subr.bf16.mxu1 %v572_v6  ;;  %v579_v13 = vld [vmem:[%s754_s1 + $0x18] sm:$0xff]   ;;  %v583_v17 = vld [vmem:[%s754_s1 + $0x20] sm:$0xff]   ;;  %v587_v21 = vld [vmem:[%s754_s1 + $0x28] sm:$0xff]  }
   0x7   :  { %506 = vmatpush3.bf16.msra.mxu0 %v571_v5  ;;  %v580_v14 = vld [vmem:[%s754_s1 + $0xd8] sm:$0xff]   ;;  %v584_v18 = vld [vmem:[%s754_s1 + $0xe0] sm:$0xff]   ;;  %v588_v22 = vld [vmem:[%s754_s1 + $0xe8] sm:$0xff]  }
   0x8   :  { %507 = vmatprep.subr.bf16.mxu0 %v574_v8  ;;  %v581_v15 = vld [vmem:[%s754_s1 + $0x98] sm:$0xff]   ;;  %v585_v19 = vld [vmem:[%s754_s1 + $0xa0] sm:$0xff]   ;;  %v589_v23 = vld [vmem:[%s754_s1 + $0xa8] sm:$0xff]  }
   0x9   :  { %528 = vmatpush3.bf16.msra.mxu1 %v573_v7  ;;  %v590_v24 = vld [vmem:[%s754_s1 + $0x70] sm:$0xff]   ;;  %v594_v28 = vld [vmem:[%s754_s1 + $0x78] sm:$0xff]   ;;  %v15_v31 = vld [vmem:[%s755_s0] sm:$0xff] }
   0xa   :  { %529 = vmatprep.subr.bf16.mxu1 %v576_v10  ;;  %v591_v25 = vld [vmem:[%s754_s1 + $0x30] sm:$0xff]   ;;  %v595_v29 = vld [vmem:[%s754_s1 + $0x38] sm:$0xff]   ;;  %v461_v32 = vcombine.low %v15_v31, %v15_v31  ;;  %v462_v33 = vcombine.high %v15_v31, %v15_v31  ;;  %v16_v36 = vld [vmem:[%s755_s0 + $0x8] sm:$0xff] }
   0xb   :  { %508 = vmatpush3.bf16.msra.mxu0 %v575_v9  ;;  %v592_v26 = vld [vmem:[%s754_s1 + $0xf0] sm:$0xff]   ;;  %v596_v30 = vld [vmem:[%s754_s1 + $0xf8] sm:$0xff]   ;;  %v463_v37 = vcombine.low %v16_v36, %v16_v36  ;;  %v464_v38 = vcombine.high %v16_v36, %v16_v36  ;;  %v603_v39 = vld [vmem:[%s754_s1 + $0x100] sm:$0xff]  }
   0xc   :  { %509 = vmatprep.subr.bf16.mxu0 %v578_v12  ;;  %v593_v27 = vld [vmem:[%s754_s1 + $0xb0] sm:$0xff]   ;;  %v600_v34 = vld [vmem:[%s754_s1 + $0xb8] sm:$0xff]   ;;  %366 = vmatprep.mubr.bf16.mxu0 %v462_v33  ;;  %v604_v40 = vld [vmem:[%s754_s1 + $0x108] sm:$0xff]  }
   0xd   :  { %530 = vmatpush3.bf16.msra.mxu1 %v577_v11  ;;  %406 = vmatprep.mubr.bf16.mxu1 %v464_v38  ;;  %v605_v41 = vld [vmem:[%s754_s1 + $0x110] sm:$0xff]   ;;  %v606_v42 = vld [vmem:[%s754_s1 + $0x118] sm:$0xff]   ;;  %v460_v45 = vld [vmem:[%s756_s2] ss:$0 sm:$0xff] }
   0xe   :  { %531 = vmatprep.subr.bf16.mxu1 %v580_v14  ;;  %v599_v43 = vld [vmem:[%s755_s0 + $0x10] ss:$0 sps:$4 sm:$0xff]  }
   0xf   :  { %510 = vmatpush3.bf16.msra.mxu0 %v579_v13 }
  0x10   :  { %511 = vmatprep.subr.bf16.mxu0 %v582_v16 }
  0x11   :  { %532 = vmatpush3.bf16.msra.mxu1 %v581_v15 }
  0x12   :  { %533 = vmatprep.subr.bf16.mxu1 %v584_v18 }
  0x13   :  { %512 = vmatpush3.bf16.msra.mxu0 %v583_v17 }
  0x14   :  { %513 = vmatprep.subr.bf16.mxu0 %v586_v20 }
  0x15   :  { %534 = vmatpush3.bf16.msra.mxu1 %v585_v19 }
  0x16   :  { %535 = vmatprep.subr.bf16.mxu1 %v588_v22 }
  0x17   :  { %514 = vmatpush3.bf16.msra.mxu0 %v587_v21 }
  0x18   :  { %515 = vmatprep.subr.bf16.mxu0 %v590_v24 }
  0x19   :  { %536 = vmatpush3.bf16.msra.mxu1 %v589_v23 }
  0x1a   :  { %537 = vmatprep.subr.bf16.mxu1 %v592_v26 }
  0x1b   :  { %516 = vmatpush3.bf16.msra.mxu0 %v591_v25 }
  0x1c   :  { %517 = vmatprep.subr.bf16.mxu0 %v594_v28 }
  0x1d   :  { %538 = vmatpush3.bf16.msra.mxu1 %v593_v27 }
  0x1e   :  { %539 = vmatprep.subr.bf16.mxu1 %v596_v30 }
  0x1f   :  { %518 = vmatpush3.bf16.msra.mxu0 %v595_v29 }
  0x20   :  { %552 = vmatprep.subr.bf16.mxu0 %v607_v35 }
  0x21   :  { %540 = vmatpush3.bf16.msra.mxu1 %v600_v34 }
  0x22   :  { %367 = vmatmul.mubr.bf16.vlgmr.msra.gmra.mrb[0].mxu0 %v461_v32 }
  0x23   :  { %553 = vmatpush3.bf16.msra.mxu0 %v603_v39  ;;  %560 = vmatprep.mubr.msk.bf16.mxu0 %vm608_vm0, %v607_v35 }
  0x24   :  { %407 = vmatmul.mubr.bf16.vlgmr.msra.gmra.mrb[0].mxu1 %v463_v37  ;;  %554 = vmatprep.subr.bf16.mxu0 %v607_v35 }
  0x27   :  { %555 = vmatpush3.bf16.msra.mxu0 %v604_v40 }
  0x28   :  { %556 = vmatprep.subr.bf16.mxu0 %v607_v35 }
  0x2b   :  { %557 = vmatpush3.bf16.msra.mxu0 %v605_v41 }
  0x2c   :  { %558 = vmatprep.subr.bf16.mxu0 %v607_v35 }
  0x2f   :  { %559 = vmatpush3.bf16.msra.mxu0 %v606_v42 }
  0x32   :  { %561 = vmatmul.mubr.msk.bf16.vlgmr.msra.gmra.mrb[4].mxu0 %vm330_vm1, %v599_v43 }
  0xf5   :  { %v519_v44 = vpop.f32.mrb[0].mxu0 }
  0xf6   :  { %v520_v46 = vpop.f32.mrb[1].mxu0 }
  0xf7   :  { %v521_v47 = vadd.f32 %v520_v46, %v519_v44  ;;  %v522_v48 = vpop.f32.mrb[2].mxu0  ;;  %v541_v49 = vpop.f32.mrb[0].mxu1 }
  0xf8   :  { %v523_v50 = vpop.f32.mrb[3].mxu0  ;;  %v542_v51 = vpop.f32.mrb[1].mxu1 }
  0xf9   :  { %v369_v52 = vadd.f32 %v521_v47, %v460_v45  ;;  %v543_v53 = vadd.f32 %v542_v51, %v541_v49  ;;  %v544_v54 = vpop.f32.mrb[2].mxu1 }
  0xfa   :  { %v545_v55 = vpop.f32.mrb[3].mxu1 }
  0xfb   :  { %v409_v56 = vadd.f32 %v543_v53, %v369_v52 }
 0x105   :  { %v448_v57 = vpop.f32.mrb[4].mxu0 }
 0x106   :  { %v449_v58 = vadd.f32 %v448_v57, %v409_v56  ;;  %v562_v59 = vpop.f32.mrb[5].mxu0 }
 0x107   :  { %v451_v60 = vpop.f32.mrb[6].mxu0 }
 0x108   :  { %v454_v61 = vmax.f32 %v449_v58, 0.0  ;;  %v563_v62 = vpop.f32.mrb[7].mxu0 }
 0x10a   :  { %455 = vst.msk [vmem:[%s757_s3] sm:$0xff] %vm330_vm1, %v454_v61 }

// kernel: _lambda_.101
= control target key start
LH: loop header
LB: loop body
LE: loop exit
PB: predicated region body
PF: predicated region fallthrough
CT: control target
= control target key end

     0   :  { %v134_v0 = vmov 0.0   ;;  %vm135_vm0 = vmmov 0   ;;  %vm55_vm1 = vcmask 523264   ;;  %vm99_vm2 = vcmask 457728   ;;  %s177_s1 = inlined_call_operand.vmem [shape: bf16[64,56], index: 1, kind: input, shape index: {}]   ;;  %s178_s0 = inlined_call_operand.vmem [shape: bf16[8,64], index: 0, kind: input, shape index: {}]   ;;  %s179_s2 = inlined_call_operand.vmem [shape: f32[1,56], index: 2, kind: input, shape index: {}]   ;;  %s180_s3 = inlined_call_operand.vmem [shape: f32[8,56], index: 3, kind: output, shape index: {}]  }
   0x1   :  { %116 = vmatprep.subr.bf16.mxu0 %v134_v0  ;;  %v130_v1 = vld [vmem:[%s177_s1] sm:$0xff]   ;;  %124 = vmatprep.mubr.msk.bf16.mxu0 %vm135_vm0, %v134_v0  ;;  %v131_v2 = vld [vmem:[%s177_s1 + $0x8] sm:$0xff]   ;;  %v132_v3 = vld [vmem:[%s177_s1 + $0x10] sm:$0xff]  }
   0x2   :  { %117 = vmatpush3.bf16.msra.mxu0 %v130_v1  ;;  %v133_v4 = vld [vmem:[%s177_s1 + $0x18] sm:$0xff]   ;;  %v15_v5 = vld [vmem:[%s178_s0] sm:$0xf] }
   0x3   :  { %118 = vmatprep.subr.bf16.mxu0 %v134_v0  ;;  %v105_v6 = vld [vmem:[%s179_s2] ss:$0 sm:$0xff] }
   0x6   :  { %119 = vmatpush3.bf16.msra.mxu0 %v131_v2 }
   0x7   :  { %120 = vmatprep.subr.bf16.mxu0 %v134_v0 }
   0xa   :  { %121 = vmatpush3.bf16.msra.mxu0 %v132_v3 }
   0xb   :  { %122 = vmatprep.subr.bf16.mxu0 %v134_v0 }
   0xe   :  { %123 = vmatpush3.bf16.msra.mxu0 %v133_v4 }
  0x11   :  { %125 = vmatmul.mubr.msk.bf16.vlgmr.msra.gmra.mrb[0].mxu0 %vm55_vm1, %v15_v5 }
  0xe4   :  { %v93_v7 = vpop.f32.mrb[0].mxu0 }
  0xe5   :  { %v94_v8 = vadd.f32 %v105_v6, %v93_v7  ;;  %v126_v9 = vpop.f32.mrb[1].mxu0 }
  0xe6   :  { %v96_v10 = vpop.f32.mrb[2].mxu0 }
  0xe7   :  { %100 = vst.msk [vmem:[%s180_s3] sm:$0xff] %vm99_vm2, %v94_v8  ;;  %v127_v11 = vpop.f32.mrb[3].mxu0 }

// kernel: _lambda_.98
= control target key start
LH: loop header
LB: loop body
LE: loop exit
PB: predicated region body
PF: predicated region fallthrough
CT: control target
= control target key end

     0   :  { %v612_v35 = vmov 0.0   ;;  %vm613_vm0 = vmmov 0   ;;  %vm333_vm1 = vcmask 523264   ;;  %s767_s1 = inlined_call_operand.vmem [shape: bf16[576,64], index: 1, kind: input, shape index: {}]   ;;  %s768_s0 = inlined_call_operand.vmem [shape: bf16[8,576], index: 0, kind: input, shape index: {}]   ;;  %s769_s2 = inlined_call_operand.vmem [shape: f32[1,64], index: 2, kind: input, shape index: {}]   ;;  %s770_s3 = inlined_call_operand.vmem [shape: f32[8,64], index: 3, kind: input, shape index: {}]   ;;  %s771_s4 = inlined_call_operand.vmem [shape: f32[8,64], index: 4, kind: output, shape index: {}]  }
   0x1   :  { %v571_v0 = vld [vmem:[%s767_s1 + $0x40] sm:$0xff]   ;;  %v575_v4 = vld [vmem:[%s767_s1 + $0x48] sm:$0xff]   ;;  %v579_v8 = vld [vmem:[%s767_s1 + $0x50] sm:$0xff]  }
   0x2   :  { %v572_v1 = vld [vmem:[%s767_s1] sm:$0xff]   ;;  %508 = vmatprep.subr.bf16.mxu0 %v571_v0  ;;  %v576_v5 = vld [vmem:[%s767_s1 + $0x8] sm:$0xff]   ;;  %v580_v9 = vld [vmem:[%s767_s1 + $0x10] sm:$0xff]  }
   0x3   :  { %v573_v2 = vld [vmem:[%s767_s1 + $0xc0] sm:$0xff]   ;;  %509 = vmatpush3.bf16.msra.mxu0 %v572_v1  ;;  %v577_v6 = vld [vmem:[%s767_s1 + $0xc8] sm:$0xff]   ;;  %v581_v10 = vld [vmem:[%s767_s1 + $0xd0] sm:$0xff]  }
   0x4   :  { %v574_v3 = vld [vmem:[%s767_s1 + $0x80] sm:$0xff]   ;;  %530 = vmatprep.subr.bf16.mxu1 %v573_v2  ;;  %510 = vmatprep.subr.bf16.mxu0 %v575_v4  ;;  %v578_v7 = vld [vmem:[%s767_s1 + $0x88] sm:$0xff]   ;;  %v582_v11 = vld [vmem:[%s767_s1 + $0x90] sm:$0xff]  }
   0x5   :  { %531 = vmatpush3.bf16.msra.mxu1 %v574_v3  ;;  %v583_v12 = vld [vmem:[%s767_s1 + $0x58] sm:$0xff]   ;;  %v587_v16 = vld [vmem:[%s767_s1 + $0x60] sm:$0xff]   ;;  %v591_v20 = vld [vmem:[%s767_s1 + $0x68] sm:$0xff]  }
   0x6   :  { %532 = vmatprep.subr.bf16.mxu1 %v577_v6  ;;  %v584_v13 = vld [vmem:[%s767_s1 + $0x18] sm:$0xff]   ;;  %v588_v17 = vld [vmem:[%s767_s1 + $0x20] sm:$0xff]   ;;  %v592_v21 = vld [vmem:[%s767_s1 + $0x28] sm:$0xff]  }
   0x7   :  { %511 = vmatpush3.bf16.msra.mxu0 %v576_v5  ;;  %v585_v14 = vld [vmem:[%s767_s1 + $0xd8] sm:$0xff]   ;;  %v589_v18 = vld [vmem:[%s767_s1 + $0xe0] sm:$0xff]   ;;  %v593_v22 = vld [vmem:[%s767_s1 + $0xe8] sm:$0xff]  }
   0x8   :  { %512 = vmatprep.subr.bf16.mxu0 %v579_v8  ;;  %v586_v15 = vld [vmem:[%s767_s1 + $0x98] sm:$0xff]   ;;  %v590_v19 = vld [vmem:[%s767_s1 + $0xa0] sm:$0xff]   ;;  %v594_v23 = vld [vmem:[%s767_s1 + $0xa8] sm:$0xff]  }
   0x9   :  { %533 = vmatpush3.bf16.msra.mxu1 %v578_v7  ;;  %v595_v24 = vld [vmem:[%s767_s1 + $0x70] sm:$0xff]   ;;  %v599_v28 = vld [vmem:[%s767_s1 + $0x78] sm:$0xff]   ;;  %v18_v31 = vld [vmem:[%s768_s0] sm:$0xff] }
   0xa   :  { %534 = vmatprep.subr.bf16.mxu1 %v581_v10  ;;  %v596_v25 = vld [vmem:[%s767_s1 + $0x30] sm:$0xff]   ;;  %v600_v29 = vld [vmem:[%s767_s1 + $0x38] sm:$0xff]   ;;  %v466_v32 = vcombine.low %v18_v31, %v18_v31  ;;  %v467_v33 = vcombine.high %v18_v31, %v18_v31  ;;  %v19_v36 = vld [vmem:[%s768_s0 + $0x8] sm:$0xff] }
   0xb   :  { %513 = vmatpush3.bf16.msra.mxu0 %v580_v9  ;;  %v597_v26 = vld [vmem:[%s767_s1 + $0xf0] sm:$0xff]   ;;  %v601_v30 = vld [vmem:[%s767_s1 + $0xf8] sm:$0xff]   ;;  %v468_v37 = vcombine.low %v19_v36, %v19_v36  ;;  %v469_v38 = vcombine.high %v19_v36, %v19_v36  ;;  %v608_v39 = vld [vmem:[%s767_s1 + $0x100] sm:$0xff]  }
   0xc   :  { %514 = vmatprep.subr.bf16.mxu0 %v583_v12  ;;  %v598_v27 = vld [vmem:[%s767_s1 + $0xb0] sm:$0xff]   ;;  %v605_v34 = vld [vmem:[%s767_s1 + $0xb8] sm:$0xff]   ;;  %369 = vmatprep.mubr.bf16.mxu0 %v467_v33  ;;  %v609_v40 = vld [vmem:[%s767_s1 + $0x108] sm:$0xff]  }
   0xd   :  { %535 = vmatpush3.bf16.msra.mxu1 %v582_v11  ;;  %409 = vmatprep.mubr.bf16.mxu1 %v469_v38  ;;  %v610_v41 = vld [vmem:[%s767_s1 + $0x110] sm:$0xff]   ;;  %v611_v42 = vld [vmem:[%s767_s1 + $0x118] sm:$0xff]   ;;  %v465_v45 = vld [vmem:[%s769_s2] ss:$0 sm:$0xff] }
   0xe   :  { %536 = vmatprep.subr.bf16.mxu1 %v585_v14  ;;  %v604_v43 = vld [vmem:[%s768_s0 + $0x10] ss:$0 sps:$4 sm:$0xff]   ;;  %v457_v58 = vld [vmem:[%s770_s3] sm:$0xff] }
   0xf   :  { %515 = vmatpush3.bf16.msra.mxu0 %v584_v13 }
  0x10   :  { %516 = vmatprep.subr.bf16.mxu0 %v587_v16 }
  0x11   :  { %537 = vmatpush3.bf16.msra.mxu1 %v586_v15 }
  0x12   :  { %538 = vmatprep.subr.bf16.mxu1 %v589_v18 }
  0x13   :  { %517 = vmatpush3.bf16.msra.mxu0 %v588_v17 }
  0x14   :  { %518 = vmatprep.subr.bf16.mxu0 %v591_v20 }
  0x15   :  { %539 = vmatpush3.bf16.msra.mxu1 %v590_v19 }
  0x16   :  { %540 = vmatprep.subr.bf16.mxu1 %v593_v22 }
  0x17   :  { %519 = vmatpush3.bf16.msra.mxu0 %v592_v21 }
  0x18   :  { %520 = vmatprep.subr.bf16.mxu0 %v595_v24 }
  0x19   :  { %541 = vmatpush3.bf16.msra.mxu1 %v594_v23 }
  0x1a   :  { %542 = vmatprep.subr.bf16.mxu1 %v597_v26 }
  0x1b   :  { %521 = vmatpush3.bf16.msra.mxu0 %v596_v25 }
  0x1c   :  { %522 = vmatprep.subr.bf16.mxu0 %v599_v28 }
  0x1d   :  { %543 = vmatpush3.bf16.msra.mxu1 %v598_v27 }
  0x1e   :  { %544 = vmatprep.subr.bf16.mxu1 %v601_v30 }
  0x1f   :  { %523 = vmatpush3.bf16.msra.mxu0 %v600_v29 }
  0x20   :  { %557 = vmatprep.subr.bf16.mxu0 %v612_v35 }
  0x21   :  { %545 = vmatpush3.bf16.msra.mxu1 %v605_v34 }
  0x22   :  { %370 = vmatmul.mubr.bf16.vlgmr.msra.gmra.mrb[0].mxu0 %v466_v32 }
  0x23   :  { %558 = vmatpush3.bf16.msra.mxu0 %v608_v39  ;;  %565 = vmatprep.mubr.msk.bf16.mxu0 %vm613_vm0, %v612_v35 }
  0x24   :  { %410 = vmatmul.mubr.bf16.vlgmr.msra.gmra.mrb[0].mxu1 %v468_v37  ;;  %559 = vmatprep.subr.bf16.mxu0 %v612_v35 }
  0x27   :  { %560 = vmatpush3.bf16.msra.mxu0 %v609_v40 }
  0x28   :  { %561 = vmatprep.subr.bf16.mxu0 %v612_v35 }
  0x2b   :  { %562 = vmatpush3.bf16.msra.mxu0 %v610_v41 }
  0x2c   :  { %563 = vmatprep.subr.bf16.mxu0 %v612_v35 }
  0x2f   :  { %564 = vmatpush3.bf16.msra.mxu0 %v611_v42 }
  0x32   :  { %566 = vmatmul.mubr.msk.bf16.vlgmr.msra.gmra.mrb[4].mxu0 %vm333_vm1, %v604_v43 }
  0xf5   :  { %v524_v44 = vpop.f32.mrb[0].mxu0 }
  0xf6   :  { %v525_v46 = vpop.f32.mrb[1].mxu0 }
  0xf7   :  { %v526_v47 = vadd.f32 %v525_v46, %v524_v44  ;;  %v527_v48 = vpop.f32.mrb[2].mxu0  ;;  %v546_v49 = vpop.f32.mrb[0].mxu1 }
  0xf8   :  { %v528_v50 = vpop.f32.mrb[3].mxu0  ;;  %v547_v51 = vpop.f32.mrb[1].mxu1 }
  0xf9   :  { %v372_v52 = vadd.f32 %v526_v47, %v465_v45  ;;  %v548_v53 = vadd.f32 %v547_v51, %v546_v49  ;;  %v549_v54 = vpop.f32.mrb[2].mxu1 }
  0xfa   :  { %v550_v55 = vpop.f32.mrb[3].mxu1 }
  0xfb   :  { %v412_v56 = vadd.f32 %v548_v53, %v372_v52 }
 0x105   :  { %v451_v57 = vpop.f32.mrb[4].mxu0 }
 0x106   :  { %v452_v59 = vadd.f32 %v451_v57, %v412_v56  ;;  %v567_v60 = vpop.f32.mrb[5].mxu0 }
 0x107   :  { %v454_v61 = vpop.f32.mrb[6].mxu0 }
 0x108   :  { %v458_v62 = vadd.f32 %v457_v58, %v452_v59  ;;  %v568_v63 = vpop.f32.mrb[7].mxu0 }
 0x10a   :  { %v459_v0 = vmax.f32 %v458_v62, 0.0 }
 0x10c   :  { %460 = vst.msk [vmem:[%s771_s4] sm:$0xff] %vm333_vm1, %v459_v0 }

</bundles_post_ra>
